<compile_context>
chip_gen: v6e
topology: v6e:2x2x1
jax: 0.10.0
libtpu: 0.0.40
codegen_flags: <defaults>
</compile_context>

<pallas_src>
import jax
import jax.numpy as jnp
from jax import lax
from jax.experimental import pallas as pl
from jax.experimental.pallas import tpu as pltpu

# ---------------- module hyper-parameters (NeRFRenderer.__init__) ------------
BOUND = 1.0          # aabb = [-1,-1,-1, 1,1,1]
MIN_NEAR = 0.2
DENSITY_SCALE = 1.0
BG_COLOR = 1.0       # bg_radius = -1, bg_color=None  ->  bg_color = 1

# synthetic network sizes
HIDDEN = 32
GEO_FEAT = 16

# problem sizes (small demo shapes)
NUM_STEPS = 64       # num_steps (upsample_steps = 0)
TR = 128             # rays per tile (rays live on the lane dimension)
TR_LOG2 = 7
assert TR == (1 << TR_LOG2)
assert NUM_STEPS & (NUM_STEPS - 1) == 0          # power of two (doubling tile)

# packed weight-slab layout (rows are 8-aligned; 128 lanes wide)
SLAB_ROWS = 128
ROW_W1 = 0       # rows 0:32   cols 0:3   w1.T          bias b1  at col 4
ROW_WH = 32      # rows 32:49  cols 0:32  [w_geo;w_sig].T  bias at col 33
ROW_WC1D = 56    # rows 56:88  cols 0:3   wc1d.T        bias bc1 at col 4
ROW_WC1G = 88    # rows 88:120 cols 0:16  wc1g.T
ROW_WC2 = 120    # rows 120:123 cols 0:32 wc2.T         bias bc2 at col 33
BIAS_COL_NARROW = 4
BIAS_COL_WIDE = 33


# ------------------------- small layout helpers ------------------------------
def _tile_lanes(x, reps):
    """Repeat x along the last (lane) axis `reps` (power of two) times.

    Implemented with doubling lane-concats (always lowerable in Mosaic).
    Result value at flat lane f equals x[..., f % x.shape[-1]].
    """
    out = x
    n = 1
    while n < reps:
        out = jnp.concatenate([out, out], axis=-1)
        n *= 2
    return out


def _lanes_to_rows(row_flat):
    """(1, S*TR) -> (S, TR): lane-tile s becomes sublane-row s  (f = s*TR + r)."""
    return jnp.concatenate(
        [row_flat[:, s * TR:(s + 1) * TR] for s in range(NUM_STEPS)], axis=0)


# =========================== fused render kernel =============================
def fused_render_kernel(o_ref, d_ref, slab_ref, out_ref):
    S = NUM_STEPS
    P = S * TR
    f32 = jnp.float32

    o = o_ref[...]                                   # (3, TR)  rays on lanes
    d = d_ref[...]                                   # (3, TR)

    # ---- packed weights (static, 8-aligned sublane slices of one slab) -------
    w1 = slab_ref[ROW_W1:ROW_W1 + HIDDEN, 0:3]                       # (32, 3)
    b1 = slab_ref[ROW_W1:ROW_W1 + HIDDEN,
                  BIAS_COL_NARROW:BIAS_COL_NARROW + 1]               # (32, 1)
    wh = slab_ref[ROW_WH:ROW_WH + GEO_FEAT + 1, 0:HIDDEN]            # (17, 32)
    bh = slab_ref[ROW_WH:ROW_WH + GEO_FEAT + 1,
                  BIAS_COL_WIDE:BIAS_COL_WIDE + 1]                   # (17, 1)
    wc1d = slab_ref[ROW_WC1D:ROW_WC1D + HIDDEN, 0:3]                 # (32, 3)
    bc1 = slab_ref[ROW_WC1D:ROW_WC1D + HIDDEN,
                   BIAS_COL_NARROW:BIAS_COL_NARROW + 1]              # (32, 1)
    wc1g = slab_ref[ROW_WC1G:ROW_WC1G + HIDDEN, 0:GEO_FEAT]          # (32, 16)
    wc2 = slab_ref[ROW_WC2:ROW_WC2 + 3, 0:HIDDEN]                    # (3, 32)
    bc2 = slab_ref[ROW_WC2:ROW_WC2 + 3,
                   BIAS_COL_WIDE:BIAS_COL_WIDE + 1]                  # (3, 1)

    # ---- ray / AABB slab intersection (lane-dense) ---------------------------
    d_safe = jnp.where(jnp.abs(d) < 1e-9,
                       jnp.where(d >= 0.0, 1e-9, -1e-9), d)
    t0 = (-BOUND - o) / d_safe
    t1 = (BOUND - o) / d_safe
    tmin = jnp.minimum(t0, t1)
    tmax = jnp.maximum(t0, t1)
    near = jnp.maximum(jnp.max(tmin, axis=0, keepdims=True), MIN_NEAR)  # (1,TR)
    far = jnp.maximum(jnp.min(tmax, axis=0, keepdims=True), near)       # (1,TR)
    span = far - near                                                   # (1,TR)

    # ---- flattened sample coordinates (3, S*TR); flat index f = s*TR + r -----
    fidx = lax.broadcasted_iota(jnp.int32, (1, P), 1)
    t_flat = (fidx >> TR_LOG2).astype(f32) * (1.0 / (S - 1))            # s/(S-1)
    z_flat = _tile_lanes(near, S) + _tile_lanes(span, S) * t_flat       # (1, P)
    xyz = jnp.clip(_tile_lanes(o, S) + _tile_lanes(d, S) * z_flat,
                   -BOUND, BOUND)                                       # (3, P)

    # ---- density MLP: streaming 2-D matmuls, points on MXU lanes -------------
    h = jnp.maximum(jnp.dot(w1, xyz, preferred_element_type=f32) + b1, 0.0)  # (32,P)
    sg = jnp.dot(wh, h, preferred_element_type=f32) + bh                     # (17,P)
    geo = sg[0:GEO_FEAT, :]                                                  # (16,P)
    sigma = jnp.exp(_lanes_to_rows(sg[GEO_FEAT:GEO_FEAT + 1, :]))            # (S,TR)

    # ---- color MLP: per-ray direction term computed once, lane-tiled ---------
    hdir = jnp.dot(wc1d, d, preferred_element_type=f32) + bc1                # (32,TR)
    hc = jnp.maximum(jnp.dot(wc1g, geo, preferred_element_type=f32)
                     + _tile_lanes(hdir, S), 0.0)                            # (32,P)
    rgb_lin = jnp.dot(wc2, hc, preferred_element_type=f32)                   # (3, P)
    r_pl = jax.nn.sigmoid(_lanes_to_rows(rgb_lin[0:1, :]) + bc2[0:1, 0:1])   # (S,TR)
    g_pl = jax.nn.sigmoid(_lanes_to_rows(rgb_lin[1:2, :]) + bc2[1:2, 0:1])
    b_pl = jax.nn.sigmoid(_lanes_to_rows(rgb_lin[2:3, :]) + bc2[2:3, 0:1])

    # ---- alpha compositing (samples on sublanes, rays on lanes) --------------
    srow = lax.broadcasted_iota(jnp.int32, (S, TR), 0)
    # deltas: first S-1 are span/(S-1), last is sample_dist = span/S
    dvec = jnp.where(srow < S - 1,
                     jnp.float32(1.0 / (S - 1)), jnp.float32(1.0 / S))
    deltas = span * dvec                                                 # (S,TR)

    alphas = 1.0 - jnp.exp(-deltas * DENSITY_SCALE * sigma)
    log1m = jnp.log(1.0 - alphas + 1e-15)
    # exclusive cumsum over samples via strictly-lower-triangular (S,S) matmul;
    # the triangular matrix is pure index arithmetic -> built in-kernel.
    tri = (lax.broadcasted_iota(jnp.int32, (S, S), 1)
           < lax.broadcasted_iota(jnp.int32, (S, S), 0)).astype(f32)
    excl = jnp.dot(tri, log1m, preferred_element_type=f32)
    weights = alphas * jnp.exp(excl)                                     # (S,TR)

    # ori_z = clip((z - near)/(far - near), 0, 1) == linspace(0, 1, S)
    tvals = srow.astype(f32) * (1.0 / (S - 1))

    wsum = jnp.sum(weights, axis=0, keepdims=True)                       # (1,TR)
    depth = jnp.sum(weights * tvals, axis=0, keepdims=True)              # (1,TR)
    bg = (1.0 - wsum) * BG_COLOR
    ir = jnp.sum(weights * r_pl, axis=0, keepdims=True) + bg
    ig = jnp.sum(weights * g_pl, axis=0, keepdims=True) + bg
    ib = jnp.sum(weights * b_pl, axis=0, keepdims=True) + bg

    # packed lane-dense output: rows = [depth, wsum, r, g, b, 0, 0, 0]
    out_ref[...] = jnp.concatenate(
        [depth, wsum, ir, ig, ib, jnp.zeros((3, TR), f32)], axis=0)


# ============================ weight slab packing =============================
def _pack_params(p):
    f32 = jnp.float32
    slab = jnp.zeros((SLAB_ROWS, 128), f32)
    slab = slab.at[ROW_W1:ROW_W1 + HIDDEN, 0:3].set(p["w1"].T.astype(f32))
    slab = slab.at[ROW_W1:ROW_W1 + HIDDEN,
                   BIAS_COL_NARROW:BIAS_COL_NARROW + 1].set(
        p["b1"].reshape(HIDDEN, 1).astype(f32))
    wh = jnp.concatenate([p["w_geo"].T, p["w_sig"].T], axis=0)        # (17, 32)
    bh = jnp.concatenate([p["b_geo"].reshape(GEO_FEAT, 1),
                          p["b_sig"].reshape(1, 1)], axis=0)          # (17, 1)
    slab = slab.at[ROW_WH:ROW_WH + GEO_FEAT + 1, 0:HIDDEN].set(wh.astype(f32))
    slab = slab.at[ROW_WH:ROW_WH + GEO_FEAT + 1,
                   BIAS_COL_WIDE:BIAS_COL_WIDE + 1].set(bh.astype(f32))
    slab = slab.at[ROW_WC1D:ROW_WC1D + HIDDEN, 0:3].set(p["wc1d"].T.astype(f32))
    slab = slab.at[ROW_WC1D:ROW_WC1D + HIDDEN,
                   BIAS_COL_NARROW:BIAS_COL_NARROW + 1].set(
        p["bc1"].reshape(HIDDEN, 1).astype(f32))
    slab = slab.at[ROW_WC1G:ROW_WC1G + HIDDEN, 0:GEO_FEAT].set(
        p["wc1g"].T.astype(f32))
    slab = slab.at[ROW_WC2:ROW_WC2 + 3, 0:HIDDEN].set(p["wc2"].T.astype(f32))
    slab = slab.at[ROW_WC2:ROW_WC2 + 3,
                   BIAS_COL_WIDE:BIAS_COL_WIDE + 1].set(
        p["bc2"].reshape(3, 1).astype(f32))
    return slab


# ================================ wrapper =====================================
@jax.jit
def nerf_render(rays_o, rays_d, params):
    """Pallas implementation of NeRFRenderer.run(rays_o, rays_d, num_steps=64,
    upsample_steps=0, bg_color=None, perturb=False)."""
    prefix = rays_o.shape[:-1]
    o = rays_o.reshape(-1, 3).astype(jnp.float32)
    d = rays_d.reshape(-1, 3).astype(jnp.float32)
    N = o.shape[0]
    S = NUM_STEPS
    assert N % TR == 0
    f32 = jnp.float32

    oT = o.T                                         # (3, N)  rays on lanes
    dT = d.T
    slab = _pack_params(params)                      # (128, 128) weight slab

    mm_flops = 2 * N * S * (3 * HIDDEN + HIDDEN * (GEO_FEAT + 1)
                            + GEO_FEAT * HIDDEN + HIDDEN * 3)
    tri_flops = 2 * N * S * S
    hdir_flops = 2 * N * 3 * HIDDEN
    cost = pl.CostEstimate(
        flops=mm_flops + tri_flops + hdir_flops,
        transcendentals=7 * N * S,
        bytes_accessed=(2 * 3 * N + 8 * N) * 4 + SLAB_ROWS * 128 * 4 * (N // TR))

    packed = pl.pallas_call(
        fused_render_kernel,
        out_shape=jax.ShapeDtypeStruct((8, N), f32),
        grid=(N // TR,),
        in_specs=[
            pl.BlockSpec((3, TR), lambda i: (0, i)),                 # oT
            pl.BlockSpec((3, TR), lambda i: (0, i)),                 # dT
            pl.BlockSpec((SLAB_ROWS, 128), lambda i: (0, 0)),        # weight slab
        ],
        out_specs=pl.BlockSpec((8, TR), lambda i: (0, i)),
        compiler_params=pltpu.CompilerParams(
            dimension_semantics=("parallel",),
            vmem_limit_bytes=32 * 1024 * 1024),
        cost_estimate=cost,
    )(oT, dT, slab)

    depth = packed[0]                                # (N,)
    wsum = packed[1]                                 # (N,)
    image = packed[2:5].T                            # (N, 3)
    return {
        "depth": depth.reshape(*prefix),
        "image": image.reshape(*prefix, 3),
        "weights_sum": wsum,                         # stays flat, as in torch
    }


# ======================= pure-JAX reference (for checking) ====================
def nerf_render_reference(rays_o, rays_d, p):
    o = rays_o.reshape(-1, 3).astype(jnp.float32)
    d = rays_d.reshape(-1, 3).astype(jnp.float32)
    prefix = rays_o.shape[:-1]
    N, S = o.shape[0], NUM_STEPS

    d_safe = jnp.where(jnp.abs(d) < 1e-9, jnp.where(d >= 0.0, 1e-9, -1e-9), d)
    t0 = (-BOUND - o) / d_safe
    t1 = (BOUND - o) / d_safe
    near = jnp.maximum(jnp.max(jnp.minimum(t0, t1), -1, keepdims=True), MIN_NEAR)
    far = jnp.maximum(jnp.min(jnp.maximum(t0, t1), -1, keepdims=True), near)

    t = jnp.linspace(0.0, 1.0, S)[None, :]
    z = near + (far - near) * t
    sample_dist = (far - near) / S
    xyz = jnp.clip(o[:, None, :] + d[:, None, :] * z[..., None], -BOUND, BOUND)
    x = xyz.reshape(-1, 3)

    h = jnp.maximum(x @ p["w1"] + p["b1"], 0.0)
    sigma = jnp.exp(h @ p["w_sig"] + p["b_sig"]).reshape(N, S)
    geo = h @ p["w_geo"] + p["b_geo"]
    dirs = jnp.broadcast_to(d[:, None, :], (N, S, 3)).reshape(-1, 3)
    hc = jnp.maximum(dirs @ p["wc1d"] + geo @ p["wc1g"] + p["bc1"], 0.0)
    rgb = jax.nn.sigmoid(hc @ p["wc2"] + p["bc2"]).reshape(N, S, 3)

    deltas = jnp.concatenate([z[:, 1:] - z[:, :-1],
                              jnp.broadcast_to(sample_dist, (N, 1))], -1)
    alphas = 1.0 - jnp.exp(-deltas * DENSITY_SCALE * sigma)
    a_sh = jnp.concatenate([jnp.ones((N, 1)), 1.0 - alphas + 1e-15], -1)
    weights = alphas * jnp.cumprod(a_sh, axis=-1)[:, :-1]
    wsum = weights.sum(-1)
    ori_z = jnp.clip((z - near) / (far - near), 0.0, 1.0)
    depth = jnp.sum(weights * ori_z, -1)
    image = jnp.sum(weights[..., None] * rgb, -2) + (1.0 - wsum)[:, None] * BG_COLOR
    return {"depth": depth.reshape(*prefix),
            "image": image.reshape(*prefix, 3),
            "weights_sum": wsum}


# ============================== parameter init =================================
def init_params(key):
    ks = jax.random.split(key, 6)
    s = 0.3
    f32 = jnp.float32
    return {
        "w1":    (jax.random.normal(ks[0], (3, HIDDEN)) * s).astype(f32),
        "b1":    jnp.zeros((1, HIDDEN), f32),
        "w_sig": (jax.random.normal(ks[1], (HIDDEN, 1)) * s).astype(f32),
        "b_sig": jnp.full((1, 1), -1.0, f32),
        "w_geo": (jax.random.normal(ks[2], (HIDDEN, GEO_FEAT)) * s).astype(f32),
        "b_geo": jnp.zeros((1, GEO_FEAT), f32),
        "wc1d":  (jax.random.normal(ks[3], (3, HIDDEN)) * s).astype(f32),
        "wc1g":  (jax.random.normal(ks[4], (GEO_FEAT, HIDDEN)) * s).astype(f32),
        "bc1":   jnp.zeros((1, HIDDEN), f32),
        "wc2":   (jax.random.normal(ks[5], (HIDDEN, 3)) * s).astype(f32),
        "bc2":   jnp.zeros((1, 3), f32),
    }


if __name__ == "__main__":
    key = jax.random.PRNGKey(0)
    k_o, k_d, k_w = jax.random.split(key, 3)

    B, R = 2, 128                                  # prefix shape (2, 128) -> N = 256 rays
    rays_o = jax.random.uniform(k_o, (B, R, 3), minval=-0.5, maxval=0.5)
    rays_d = jax.random.normal(k_d, (B, R, 3))
    rays_d = rays_d / jnp.linalg.norm(rays_d, axis=-1, keepdims=True)

    params = init_params(k_w)

    out = nerf_render(rays_o, rays_d, params)
    out = jax.block_until_ready(out)

    ref = nerf_render_reference(rays_o, rays_d, params)
    for name in ("depth", "image", "weights_sum"):
        a, b = out[name], ref[name]
        assert a.shape == b.shape, (name, a.shape, b.shape)
        if not bool(jnp.allclose(a, b, atol=2e-3, rtol=2e-3)):
            raise AssertionError(
                f"mismatch in {name}: max abs err "
                f"{float(jnp.max(jnp.abs(a - b))):.3e}")

    print("KERNEL_OK")
</pallas_src>

<mosaic_0001>
module attributes {stable_mosaic.version = 11 : i64} {
  func.func @fused_render_kernel(%arg0: i32, %arg1: memref<3x128xf32, #tpu.memory_space<vmem>>, %arg2: memref<3x128xf32, #tpu.memory_space<vmem>>, %arg3: memref<128x128xf32, #tpu.memory_space<vmem>>, %arg4: memref<8x128xf32, #tpu.memory_space<vmem>>) attributes {dimension_semantics = [#tpu.dimension_semantics<parallel>], iteration_bounds = array<i64: 2>, scalar_prefetch = 0 : i64, scratch_operands = 0 : i64, tpu.core_type = #tpu.core_type<tc>, window_params = [{transform_indices = @transform_0, window_bounds = array<i64: 3, 128>}, {transform_indices = @transform_1, window_bounds = array<i64: 3, 128>}, {pipeline_mode = #tpu.pipeline_mode<synchronous>, transform_indices = @transform_2, window_bounds = array<i64: 128, 128>}, {transform_indices = @transform_3, window_bounds = array<i64: 8, 128>}]} {
    %c0 = arith.constant 0 : index
    %c0_0 = arith.constant 0 : index
    %0 = vector.load %arg1[%c0, %c0_0] : memref<3x128xf32, #tpu.memory_space<vmem>>, vector<3x128xf32>
    %c0_1 = arith.constant 0 : index
    %c0_2 = arith.constant 0 : index
    %1 = vector.load %arg2[%c0_1, %c0_2] : memref<3x128xf32, #tpu.memory_space<vmem>>, vector<3x128xf32>
    %c0_3 = arith.constant 0 : index
    %c0_4 = arith.constant 0 : index
    %2 = vector.load %arg3[%c0_3, %c0_4] : memref<128x128xf32, #tpu.memory_space<vmem>>, vector<32x3xf32>
    %c0_5 = arith.constant 0 : index
    %c4 = arith.constant 4 : index
    %3 = vector.load %arg3[%c0_5, %c4] : memref<128x128xf32, #tpu.memory_space<vmem>>, vector<32x1xf32>
    %c32 = arith.constant 32 : index
    %c0_6 = arith.constant 0 : index
    %4 = vector.load %arg3[%c32, %c0_6] : memref<128x128xf32, #tpu.memory_space<vmem>>, vector<17x32xf32>
    %c32_7 = arith.constant 32 : index
    %c33 = arith.constant 33 : index
    %5 = vector.load %arg3[%c32_7, %c33] : memref<128x128xf32, #tpu.memory_space<vmem>>, vector<17x1xf32>
    %c56 = arith.constant 56 : index
    %c0_8 = arith.constant 0 : index
    %6 = vector.load %arg3[%c56, %c0_8] : memref<128x128xf32, #tpu.memory_space<vmem>>, vector<32x3xf32>
    %c56_9 = arith.constant 56 : index
    %c4_10 = arith.constant 4 : index
    %7 = vector.load %arg3[%c56_9, %c4_10] : memref<128x128xf32, #tpu.memory_space<vmem>>, vector<32x1xf32>
    %c88 = arith.constant 88 : index
    %c0_11 = arith.constant 0 : index
    %8 = vector.load %arg3[%c88, %c0_11] : memref<128x128xf32, #tpu.memory_space<vmem>>, vector<32x16xf32>
    %c120 = arith.constant 120 : index
    %c0_12 = arith.constant 0 : index
    %9 = vector.load %arg3[%c120, %c0_12] : memref<128x128xf32, #tpu.memory_space<vmem>>, vector<3x32xf32>
    %c120_13 = arith.constant 120 : index
    %c33_14 = arith.constant 33 : index
    %10 = vector.load %arg3[%c120_13, %c33_14] : memref<128x128xf32, #tpu.memory_space<vmem>>, vector<3x1xf32>
    %11 = math.absf %1 : vector<3x128xf32>
    %cst = arith.constant 9.99999971E-10 : f32
    %12 = vector.broadcast %cst : f32 to vector<3x128xf32>
    %13 = arith.cmpf olt, %11, %12 : vector<3x128xf32>
    %cst_15 = arith.constant 0.000000e+00 : f32
    %14 = vector.broadcast %cst_15 : f32 to vector<3x128xf32>
    %15 = arith.cmpf oge, %1, %14 : vector<3x128xf32>
    %cst_16 = arith.constant 9.99999971E-10 : f32
    %cst_17 = arith.constant -9.99999971E-10 : f32
    %16 = vector.broadcast %cst_16 : f32 to vector<3x128xf32>
    %17 = vector.broadcast %cst_17 : f32 to vector<3x128xf32>
    %18 = arith.select %15, %16, %17 : vector<3x128xi1>, vector<3x128xf32>
    %19 = arith.select %13, %18, %1 : vector<3x128xi1>, vector<3x128xf32>
    %cst_18 = arith.constant -1.000000e+00 : f32
    %20 = vector.broadcast %cst_18 : f32 to vector<3x128xf32>
    %21 = arith.subf %20, %0 : vector<3x128xf32>
    %22 = arith.divf %21, %19 : vector<3x128xf32>
    %cst_19 = arith.constant 1.000000e+00 : f32
    %23 = vector.broadcast %cst_19 : f32 to vector<3x128xf32>
    %24 = arith.subf %23, %0 : vector<3x128xf32>
    %25 = arith.divf %24, %19 : vector<3x128xf32>
    %26 = arith.minimumf %22, %25 : vector<3x128xf32>
    %27 = arith.maximumf %22, %25 : vector<3x128xf32>
    %cst_20 = arith.constant dense<0xFF800000> : vector<128xf32>
    %28 = vector.multi_reduction <maximumf>, %26, %cst_20 [0] : vector<3x128xf32> to vector<128xf32>
    %29 = vector.shape_cast %28 : vector<128xf32> to vector<1x128xf32>
    %cst_21 = arith.constant 2.000000e-01 : f32
    %30 = vector.broadcast %cst_21 : f32 to vector<1x128xf32>
    %31 = arith.maximumf %29, %30 : vector<1x128xf32>
    %cst_22 = arith.constant dense<0x7F800000> : vector<128xf32>
    %32 = vector.multi_reduction <minimumf>, %27, %cst_22 [0] : vector<3x128xf32> to vector<128xf32>
    %33 = vector.shape_cast %32 : vector<128xf32> to vector<1x128xf32>
    %34 = arith.maximumf %33, %31 : vector<1x128xf32>
    %35 = arith.subf %34, %31 : vector<1x128xf32>
    %36 = tpu.iota {dimensions = array<i32: 1>} : vector<1x8192xi32>
    %c7_i32 = arith.constant 7 : i32
    %37 = vector.broadcast %c7_i32 : i32 to vector<1x8192xi32>
    %38 = arith.shrsi %36, %37 : vector<1x8192xi32>
    %39 = arith.sitofp %38 : vector<1x8192xi32> to vector<1x8192xf32>
    %cst_23 = arith.constant 0.0158730168 : f32
    %40 = vector.broadcast %cst_23 : f32 to vector<1x8192xf32>
    %41 = arith.mulf %39, %40 : vector<1x8192xf32>
    %42 = tpu.concatenate %31, %31 in 1 : vector<1x128xf32>, vector<1x128xf32> -> vector<1x256xf32>
    %43 = tpu.concatenate %42, %42 in 1 : vector<1x256xf32>, vector<1x256xf32> -> vector<1x512xf32>
    %44 = tpu.concatenate %43, %43 in 1 : vector<1x512xf32>, vector<1x512xf32> -> vector<1x1024xf32>
    %45 = tpu.concatenate %44, %44 in 1 : vector<1x1024xf32>, vector<1x1024xf32> -> vector<1x2048xf32>
    %46 = tpu.concatenate %45, %45 in 1 : vector<1x2048xf32>, vector<1x2048xf32> -> vector<1x4096xf32>
    %47 = tpu.concatenate %46, %46 in 1 : vector<1x4096xf32>, vector<1x4096xf32> -> vector<1x8192xf32>
    %48 = tpu.concatenate %35, %35 in 1 : vector<1x128xf32>, vector<1x128xf32> -> vector<1x256xf32>
    %49 = tpu.concatenate %48, %48 in 1 : vector<1x256xf32>, vector<1x256xf32> -> vector<1x512xf32>
    %50 = tpu.concatenate %49, %49 in 1 : vector<1x512xf32>, vector<1x512xf32> -> vector<1x1024xf32>
    %51 = tpu.concatenate %50, %50 in 1 : vector<1x1024xf32>, vector<1x1024xf32> -> vector<1x2048xf32>
    %52 = tpu.concatenate %51, %51 in 1 : vector<1x2048xf32>, vector<1x2048xf32> -> vector<1x4096xf32>
    %53 = tpu.concatenate %52, %52 in 1 : vector<1x4096xf32>, vector<1x4096xf32> -> vector<1x8192xf32>
    %54 = arith.mulf %53, %41 : vector<1x8192xf32>
    %55 = arith.addf %47, %54 : vector<1x8192xf32>
    %56 = tpu.concatenate %0, %0 in 1 : vector<3x128xf32>, vector<3x128xf32> -> vector<3x256xf32>
    %57 = tpu.concatenate %56, %56 in 1 : vector<3x256xf32>, vector<3x256xf32> -> vector<3x512xf32>
    %58 = tpu.concatenate %57, %57 in 1 : vector<3x512xf32>, vector<3x512xf32> -> vector<3x1024xf32>
    %59 = tpu.concatenate %58, %58 in 1 : vector<3x1024xf32>, vector<3x1024xf32> -> vector<3x2048xf32>
    %60 = tpu.concatenate %59, %59 in 1 : vector<3x2048xf32>, vector<3x2048xf32> -> vector<3x4096xf32>
    %61 = tpu.concatenate %60, %60 in 1 : vector<3x4096xf32>, vector<3x4096xf32> -> vector<3x8192xf32>
    %62 = tpu.concatenate %1, %1 in 1 : vector<3x128xf32>, vector<3x128xf32> -> vector<3x256xf32>
    %63 = tpu.concatenate %62, %62 in 1 : vector<3x256xf32>, vector<3x256xf32> -> vector<3x512xf32>
    %64 = tpu.concatenate %63, %63 in 1 : vector<3x512xf32>, vector<3x512xf32> -> vector<3x1024xf32>
    %65 = tpu.concatenate %64, %64 in 1 : vector<3x1024xf32>, vector<3x1024xf32> -> vector<3x2048xf32>
    %66 = tpu.concatenate %65, %65 in 1 : vector<3x2048xf32>, vector<3x2048xf32> -> vector<3x4096xf32>
    %67 = tpu.concatenate %66, %66 in 1 : vector<3x4096xf32>, vector<3x4096xf32> -> vector<3x8192xf32>
    %68 = vector.broadcast %55 : vector<1x8192xf32> to vector<3x8192xf32>
    %69 = arith.mulf %67, %68 : vector<3x8192xf32>
    %70 = arith.addf %61, %69 : vector<3x8192xf32>
    %cst_24 = arith.constant -1.000000e+00 : f32
    %cst_25 = arith.constant 1.000000e+00 : f32
    %71 = vector.broadcast %cst_24 : f32 to vector<3x8192xf32>
    %72 = arith.maximumf %71, %70 : vector<3x8192xf32>
    %73 = vector.broadcast %cst_25 : f32 to vector<3x8192xf32>
    %74 = arith.minimumf %73, %72 : vector<3x8192xf32>
    %cst_26 = arith.constant dense<0.000000e+00> : vector<32x8192xf32>
    %75 = tpu.matmul %2, %74, %cst_26 {dimension_numbers = #tpu.dot_dimension_numbers<[1], [0], [0], [1], [0, 0, 1, 1], [], []>} : vector<32x3xf32>, vector<3x8192xf32>, vector<32x8192xf32> -> vector<32x8192xf32>
    %76 = vector.broadcast %3 : vector<32x1xf32> to vector<32x8192xf32>
    %77 = arith.addf %75, %76 : vector<32x8192xf32>
    %cst_27 = arith.constant 0.000000e+00 : f32
    %78 = vector.broadcast %cst_27 : f32 to vector<32x8192xf32>
    %79 = arith.maximumf %77, %78 : vector<32x8192xf32>
    %cst_28 = arith.constant dense<0.000000e+00> : vector<17x8192xf32>
    %80 = tpu.matmul %4, %79, %cst_28 {dimension_numbers = #tpu.dot_dimension_numbers<[1], [0], [0], [1], [0, 0, 1, 1], [], []>} : vector<17x32xf32>, vector<32x8192xf32>, vector<17x8192xf32> -> vector<17x8192xf32>
    %81 = vector.broadcast %5 : vector<17x1xf32> to vector<17x8192xf32>
    %82 = arith.addf %80, %81 : vector<17x8192xf32>
    %83 = vector.extract_strided_slice %82 {offsets = [0, 0], sizes = [16, 8192], strides = [1, 1]} : vector<17x8192xf32> to vector<16x8192xf32>
    %84 = vector.extract_strided_slice %82 {offsets = [16, 0], sizes = [1, 8192], strides = [1, 1]} : vector<17x8192xf32> to vector<1x8192xf32>
    %85 = vector.extract_strided_slice %84 {offsets = [0, 0], sizes = [1, 128], strides = [1, 1]} : vector<1x8192xf32> to vector<1x128xf32>
    %86 = vector.extract_strided_slice %84 {offsets = [0, 128], sizes = [1, 128], strides = [1, 1]} : vector<1x8192xf32> to vector<1x128xf32>
    %87 = vector.extract_strided_slice %84 {offsets = [0, 256], sizes = [1, 128], strides = [1, 1]} : vector<1x8192xf32> to vector<1x128xf32>
    %88 = vector.extract_strided_slice %84 {offsets = [0, 384], sizes = [1, 128], strides = [1, 1]} : vector<1x8192xf32> to vector<1x128xf32>
    %89 = vector.extract_strided_slice %84 {offsets = [0, 512], sizes = [1, 128], strides = [1, 1]} : vector<1x8192xf32> to vector<1x128xf32>
    %90 = vector.extract_strided_slice %84 {offsets = [0, 640], sizes = [1, 128], strides = [1, 1]} : vector<1x8192xf32> to vector<1x128xf32>
    %91 = vector.extract_strided_slice %84 {offsets = [0, 768], sizes = [1, 128], strides = [1, 1]} : vector<1x8192xf32> to vector<1x128xf32>
    %92 = vector.extract_strided_slice %84 {offsets = [0, 896], sizes = [1, 128], strides = [1, 1]} : vector<1x8192xf32> to vector<1x128xf32>
    %93 = vector.extract_strided_slice %84 {offsets = [0, 1024], sizes = [1, 128], strides = [1, 1]} : vector<1x8192xf32> to vector<1x128xf32>
    %94 = vector.extract_strided_slice %84 {offsets = [0, 1152], sizes = [1, 128], strides = [1, 1]} : vector<1x8192xf32> to vector<1x128xf32>
    %95 = vector.extract_strided_slice %84 {offsets = [0, 1280], sizes = [1, 128], strides = [1, 1]} : vector<1x8192xf32> to vector<1x128xf32>
    %96 = vector.extract_strided_slice %84 {offsets = [0, 1408], sizes = [1, 128], strides = [1, 1]} : vector<1x8192xf32> to vector<1x128xf32>
    %97 = vector.extract_strided_slice %84 {offsets = [0, 1536], sizes = [1, 128], strides = [1, 1]} : vector<1x8192xf32> to vector<1x128xf32>
    %98 = vector.extract_strided_slice %84 {offsets = [0, 1664], sizes = [1, 128], strides = [1, 1]} : vector<1x8192xf32> to vector<1x128xf32>
    %99 = vector.extract_strided_slice %84 {offsets = [0, 1792], sizes = [1, 128], strides = [1, 1]} : vector<1x8192xf32> to vector<1x128xf32>
    %100 = vector.extract_strided_slice %84 {offsets = [0, 1920], sizes = [1, 128], strides = [1, 1]} : vector<1x8192xf32> to vector<1x128xf32>
    %101 = vector.extract_strided_slice %84 {offsets = [0, 2048], sizes = [1, 128], strides = [1, 1]} : vector<1x8192xf32> to vector<1x128xf32>
    %102 = vector.extract_strided_slice %84 {offsets = [0, 2176], sizes = [1, 128], strides = [1, 1]} : vector<1x8192xf32> to vector<1x128xf32>
    %103 = vector.extract_strided_slice %84 {offsets = [0, 2304], sizes = [1, 128], strides = [1, 1]} : vector<1x8192xf32> to vector<1x128xf32>
    %104 = vector.extract_strided_slice %84 {offsets = [0, 2432], sizes = [1, 128], strides = [1, 1]} : vector<1x8192xf32> to vector<1x128xf32>
    %105 = vector.extract_strided_slice %84 {offsets = [0, 2560], sizes = [1, 128], strides = [1, 1]} : vector<1x8192xf32> to vector<1x128xf32>
    %106 = vector.extract_strided_slice %84 {offsets = [0, 2688], sizes = [1, 128], strides = [1, 1]} : vector<1x8192xf32> to vector<1x128xf32>
    %107 = vector.extract_strided_slice %84 {offsets = [0, 2816], sizes = [1, 128], strides = [1, 1]} : vector<1x8192xf32> to vector<1x128xf32>
    %108 = vector.extract_strided_slice %84 {offsets = [0, 2944], sizes = [1, 128], strides = [1, 1]} : vector<1x8192xf32> to vector<1x128xf32>
    %109 = vector.extract_strided_slice %84 {offsets = [0, 3072], sizes = [1, 128], strides = [1, 1]} : vector<1x8192xf32> to vector<1x128xf32>
    %110 = vector.extract_strided_slice %84 {offsets = [0, 3200], sizes = [1, 128], strides = [1, 1]} : vector<1x8192xf32> to vector<1x128xf32>
    %111 = vector.extract_strided_slice %84 {offsets = [0, 3328], sizes = [1, 128], strides = [1, 1]} : vector<1x8192xf32> to vector<1x128xf32>
    %112 = vector.extract_strided_slice %84 {offsets = [0, 3456], sizes = [1, 128], strides = [1, 1]} : vector<1x8192xf32> to vector<1x128xf32>
    %113 = vector.extract_strided_slice %84 {offsets = [0, 3584], sizes = [1, 128], strides = [1, 1]} : vector<1x8192xf32> to vector<1x128xf32>
    %114 = vector.extract_strided_slice %84 {offsets = [0, 3712], sizes = [1, 128], strides = [1, 1]} : vector<1x8192xf32> to vector<1x128xf32>
    %115 = vector.extract_strided_slice %84 {offsets = [0, 3840], sizes = [1, 128], strides = [1, 1]} : vector<1x8192xf32> to vector<1x128xf32>
    %116 = vector.extract_strided_slice %84 {offsets = [0, 3968], sizes = [1, 128], strides = [1, 1]} : vector<1x8192xf32> to vector<1x128xf32>
    %117 = vector.extract_strided_slice %84 {offsets = [0, 4096], sizes = [1, 128], strides = [1, 1]} : vector<1x8192xf32> to vector<1x128xf32>
    %118 = vector.extract_strided_slice %84 {offsets = [0, 4224], sizes = [1, 128], strides = [1, 1]} : vector<1x8192xf32> to vector<1x128xf32>
    %119 = vector.extract_strided_slice %84 {offsets = [0, 4352], sizes = [1, 128], strides = [1, 1]} : vector<1x8192xf32> to vector<1x128xf32>
    %120 = vector.extract_strided_slice %84 {offsets = [0, 4480], sizes = [1, 128], strides = [1, 1]} : vector<1x8192xf32> to vector<1x128xf32>
    %121 = vector.extract_strided_slice %84 {offsets = [0, 4608], sizes = [1, 128], strides = [1, 1]} : vector<1x8192xf32> to vector<1x128xf32>
    %122 = vector.extract_strided_slice %84 {offsets = [0, 4736], sizes = [1, 128], strides = [1, 1]} : vector<1x8192xf32> to vector<1x128xf32>
    %123 = vector.extract_strided_slice %84 {offsets = [0, 4864], sizes = [1, 128], strides = [1, 1]} : vector<1x8192xf32> to vector<1x128xf32>
    %124 = vector.extract_strided_slice %84 {offsets = [0, 4992], sizes = [1, 128], strides = [1, 1]} : vector<1x8192xf32> to vector<1x128xf32>
    %125 = vector.extract_strided_slice %84 {offsets = [0, 5120], sizes = [1, 128], strides = [1, 1]} : vector<1x8192xf32> to vector<1x128xf32>
    %126 = vector.extract_strided_slice %84 {offsets = [0, 5248], sizes = [1, 128], strides = [1, 1]} : vector<1x8192xf32> to vector<1x128xf32>
    %127 = vector.extract_strided_slice %84 {offsets = [0, 5376], sizes = [1, 128], strides = [1, 1]} : vector<1x8192xf32> to vector<1x128xf32>
    %128 = vector.extract_strided_slice %84 {offsets = [0, 5504], sizes = [1, 128], strides = [1, 1]} : vector<1x8192xf32> to vector<1x128xf32>
    %129 = vector.extract_strided_slice %84 {offsets = [0, 5632], sizes = [1, 128], strides = [1, 1]} : vector<1x8192xf32> to vector<1x128xf32>
    %130 = vector.extract_strided_slice %84 {offsets = [0, 5760], sizes = [1, 128], strides = [1, 1]} : vector<1x8192xf32> to vector<1x128xf32>
    %131 = vector.extract_strided_slice %84 {offsets = [0, 5888], sizes = [1, 128], strides = [1, 1]} : vector<1x8192xf32> to vector<1x128xf32>
    %132 = vector.extract_strided_slice %84 {offsets = [0, 6016], sizes = [1, 128], strides = [1, 1]} : vector<1x8192xf32> to vector<1x128xf32>
    %133 = vector.extract_strided_slice %84 {offsets = [0, 6144], sizes = [1, 128], strides = [1, 1]} : vector<1x8192xf32> to vector<1x128xf32>
    %134 = vector.extract_strided_slice %84 {offsets = [0, 6272], sizes = [1, 128], strides = [1, 1]} : vector<1x8192xf32> to vector<1x128xf32>
    %135 = vector.extract_strided_slice %84 {offsets = [0, 6400], sizes = [1, 128], strides = [1, 1]} : vector<1x8192xf32> to vector<1x128xf32>
    %136 = vector.extract_strided_slice %84 {offsets = [0, 6528], sizes = [1, 128], strides = [1, 1]} : vector<1x8192xf32> to vector<1x128xf32>
    %137 = vector.extract_strided_slice %84 {offsets = [0, 6656], sizes = [1, 128], strides = [1, 1]} : vector<1x8192xf32> to vector<1x128xf32>
    %138 = vector.extract_strided_slice %84 {offsets = [0, 6784], sizes = [1, 128], strides = [1, 1]} : vector<1x8192xf32> to vector<1x128xf32>
    %139 = vector.extract_strided_slice %84 {offsets = [0, 6912], sizes = [1, 128], strides = [1, 1]} : vector<1x8192xf32> to vector<1x128xf32>
    %140 = vector.extract_strided_slice %84 {offsets = [0, 7040], sizes = [1, 128], strides = [1, 1]} : vector<1x8192xf32> to vector<1x128xf32>
    %141 = vector.extract_strided_slice %84 {offsets = [0, 7168], sizes = [1, 128], strides = [1, 1]} : vector<1x8192xf32> to vector<1x128xf32>
    %142 = vector.extract_strided_slice %84 {offsets = [0, 7296], sizes = [1, 128], strides = [1, 1]} : vector<1x8192xf32> to vector<1x128xf32>
    %143 = vector.extract_strided_slice %84 {offsets = [0, 7424], sizes = [1, 128], strides = [1, 1]} : vector<1x8192xf32> to vector<1x128xf32>
    %144 = vector.extract_strided_slice %84 {offsets = [0, 7552], sizes = [1, 128], strides = [1, 1]} : vector<1x8192xf32> to vector<1x128xf32>
    %145 = vector.extract_strided_slice %84 {offsets = [0, 7680], sizes = [1, 128], strides = [1, 1]} : vector<1x8192xf32> to vector<1x128xf32>
    %146 = vector.extract_strided_slice %84 {offsets = [0, 7808], sizes = [1, 128], strides = [1, 1]} : vector<1x8192xf32> to vector<1x128xf32>
    %147 = vector.extract_strided_slice %84 {offsets = [0, 7936], sizes = [1, 128], strides = [1, 1]} : vector<1x8192xf32> to vector<1x128xf32>
    %148 = vector.extract_strided_slice %84 {offsets = [0, 8064], sizes = [1, 128], strides = [1, 1]} : vector<1x8192xf32> to vector<1x128xf32>
    %149 = tpu.concatenate %85, %86, %87, %88, %89, %90, %91, %92, %93, %94, %95, %96, %97, %98, %99, %100 in 0 : vector<1x128xf32>, vector<1x128xf32>, vector<1x128xf32>, vector<1x128xf32>, vector<1x128xf32>, vector<1x128xf32>, vector<1x128xf32>, vector<1x128xf32>, vector<1x128xf32>, vector<1x128xf32>, vector<1x128xf32>, vector<1x128xf32>, vector<1x128xf32>, vector<1x128xf32>, vector<1x128xf32>, vector<1x128xf32> -> vector<16x128xf32>
    %150 = tpu.concatenate %101, %102, %103, %104, %105, %106, %107, %108, %109, %110, %111, %112, %113, %114, %115, %116 in 0 : vector<1x128xf32>, vector<1x128xf32>, vector<1x128xf32>, vector<1x128xf32>, vector<1x128xf32>, vector<1x128xf32>, vector<1x128xf32>, vector<1x128xf32>, vector<1x128xf32>, vector<1x128xf32>, vector<1x128xf32>, vector<1x128xf32>, vector<1x128xf32>, vector<1x128xf32>, vector<1x128xf32>, vector<1x128xf32> -> vector<16x128xf32>
    %151 = tpu.concatenate %117, %118, %119, %120, %121, %122, %123, %124, %125, %126, %127, %128, %129, %130, %131, %132 in 0 : vector<1x128xf32>, vector<1x128xf32>, vector<1x128xf32>, vector<1x128xf32>, vector<1x128xf32>, vector<1x128xf32>, vector<1x128xf32>, vector<1x128xf32>, vector<1x128xf32>, vector<1x128xf32>, vector<1x128xf32>, vector<1x128xf32>, vector<1x128xf32>, vector<1x128xf32>, vector<1x128xf32>, vector<1x128xf32> -> vector<16x128xf32>
    %152 = tpu.concatenate %133, %134, %135, %136, %137, %138, %139, %140, %141, %142, %143, %144, %145, %146, %147, %148 in 0 : vector<1x128xf32>, vector<1x128xf32>, vector<1x128xf32>, vector<1x128xf32>, vector<1x128xf32>, vector<1x128xf32>, vector<1x128xf32>, vector<1x128xf32>, vector<1x128xf32>, vector<1x128xf32>, vector<1x128xf32>, vector<1x128xf32>, vector<1x128xf32>, vector<1x128xf32>, vector<1x128xf32>, vector<1x128xf32> -> vector<16x128xf32>
    %153 = tpu.concatenate %149, %150, %151, %152 in 0 : vector<16x128xf32>, vector<16x128xf32>, vector<16x128xf32>, vector<16x128xf32> -> vector<64x128xf32>
    %154 = math.exp %153 : vector<64x128xf32>
    %cst_29 = arith.constant dense<0.000000e+00> : vector<32x128xf32>
    %155 = tpu.matmul %6, %1, %cst_29 {dimension_numbers = #tpu.dot_dimension_numbers<[1], [0], [0], [1], [0, 0, 1, 1], [], []>} : vector<32x3xf32>, vector<3x128xf32>, vector<32x128xf32> -> vector<32x128xf32>
    %156 = vector.broadcast %7 : vector<32x1xf32> to vector<32x128xf32>
    %157 = arith.addf %155, %156 : vector<32x128xf32>
    %cst_30 = arith.constant dense<0.000000e+00> : vector<32x8192xf32>
    %158 = tpu.matmul %8, %83, %cst_30 {dimension_numbers = #tpu.dot_dimension_numbers<[1], [0], [0], [1], [0, 0, 1, 1], [], []>} : vector<32x16xf32>, vector<16x8192xf32>, vector<32x8192xf32> -> vector<32x8192xf32>
    %159 = tpu.concatenate %157, %157 in 1 : vector<32x128xf32>, vector<32x128xf32> -> vector<32x256xf32>
    %160 = tpu.concatenate %159, %159 in 1 : vector<32x256xf32>, vector<32x256xf32> -> vector<32x512xf32>
    %161 = tpu.concatenate %160, %160 in 1 : vector<32x512xf32>, vector<32x512xf32> -> vector<32x1024xf32>
    %162 = tpu.concatenate %161, %161 in 1 : vector<32x1024xf32>, vector<32x1024xf32> -> vector<32x2048xf32>
    %163 = tpu.concatenate %162, %162 in 1 : vector<32x2048xf32>, vector<32x2048xf32> -> vector<32x4096xf32>
    %164 = tpu.concatenate %163, %163 in 1 : vector<32x4096xf32>, vector<32x4096xf32> -> vector<32x8192xf32>
    %165 = arith.addf %158, %164 : vector<32x8192xf32>
    %cst_31 = arith.constant 0.000000e+00 : f32
    %166 = vector.broadcast %cst_31 : f32 to vector<32x8192xf32>
    %167 = arith.maximumf %165, %166 : vector<32x8192xf32>
    %cst_32 = arith.constant dense<0.000000e+00> : vector<3x8192xf32>
    %168 = tpu.matmul %9, %167, %cst_32 {dimension_numbers = #tpu.dot_dimension_numbers<[1], [0], [0], [1], [0, 0, 1, 1], [], []>} : vector<3x32xf32>, vector<32x8192xf32>, vector<3x8192xf32> -> vector<3x8192xf32>
    %169 = vector.extract_strided_slice %168 {offsets = [0, 0], sizes = [1, 8192], strides = [1, 1]} : vector<3x8192xf32> to vector<1x8192xf32>
    %170 = vector.extract_strided_slice %169 {offsets = [0, 0], sizes = [1, 128], strides = [1, 1]} : vector<1x8192xf32> to vector<1x128xf32>
    %171 = vector.extract_strided_slice %169 {offsets = [0, 128], sizes = [1, 128], strides = [1, 1]} : vector<1x8192xf32> to vector<1x128xf32>
    %172 = vector.extract_strided_slice %169 {offsets = [0, 256], sizes = [1, 128], strides = [1, 1]} : vector<1x8192xf32> to vector<1x128xf32>
    %173 = vector.extract_strided_slice %169 {offsets = [0, 384], sizes = [1, 128], strides = [1, 1]} : vector<1x8192xf32> to vector<1x128xf32>
    %174 = vector.extract_strided_slice %169 {offsets = [0, 512], sizes = [1, 128], strides = [1, 1]} : vector<1x8192xf32> to vector<1x128xf32>
    %175 = vector.extract_strided_slice %169 {offsets = [0, 640], sizes = [1, 128], strides = [1, 1]} : vector<1x8192xf32> to vector<1x128xf32>
    %176 = vector.extract_strided_slice %169 {offsets = [0, 768], sizes = [1, 128], strides = [1, 1]} : vector<1x8192xf32> to vector<1x128xf32>
    %177 = vector.extract_strided_slice %169 {offsets = [0, 896], sizes = [1, 128], strides = [1, 1]} : vector<1x8192xf32> to vector<1x128xf32>
    %178 = vector.extract_strided_slice %169 {offsets = [0, 1024], sizes = [1, 128], strides = [1, 1]} : vector<1x8192xf32> to vector<1x128xf32>
    %179 = vector.extract_strided_slice %169 {offsets = [0, 1152], sizes = [1, 128], strides = [1, 1]} : vector<1x8192xf32> to vector<1x128xf32>
    %180 = vector.extract_strided_slice %169 {offsets = [0, 1280], sizes = [1, 128], strides = [1, 1]} : vector<1x8192xf32> to vector<1x128xf32>
    %181 = vector.extract_strided_slice %169 {offsets = [0, 1408], sizes = [1, 128], strides = [1, 1]} : vector<1x8192xf32> to vector<1x128xf32>
    %182 = vector.extract_strided_slice %169 {offsets = [0, 1536], sizes = [1, 128], strides = [1, 1]} : vector<1x8192xf32> to vector<1x128xf32>
    %183 = vector.extract_strided_slice %169 {offsets = [0, 1664], sizes = [1, 128], strides = [1, 1]} : vector<1x8192xf32> to vector<1x128xf32>
    %184 = vector.extract_strided_slice %169 {offsets = [0, 1792], sizes = [1, 128], strides = [1, 1]} : vector<1x8192xf32> to vector<1x128xf32>
    %185 = vector.extract_strided_slice %169 {offsets = [0, 1920], sizes = [1, 128], strides = [1, 1]} : vector<1x8192xf32> to vector<1x128xf32>
    %186 = vector.extract_strided_slice %169 {offsets = [0, 2048], sizes = [1, 128], strides = [1, 1]} : vector<1x8192xf32> to vector<1x128xf32>
    %187 = vector.extract_strided_slice %169 {offsets = [0, 2176], sizes = [1, 128], strides = [1, 1]} : vector<1x8192xf32> to vector<1x128xf32>
    %188 = vector.extract_strided_slice %169 {offsets = [0, 2304], sizes = [1, 128], strides = [1, 1]} : vector<1x8192xf32> to vector<1x128xf32>
    %189 = vector.extract_strided_slice %169 {offsets = [0, 2432], sizes = [1, 128], strides = [1, 1]} : vector<1x8192xf32> to vector<1x128xf32>
    %190 = vector.extract_strided_slice %169 {offsets = [0, 2560], sizes = [1, 128], strides = [1, 1]} : vector<1x8192xf32> to vector<1x128xf32>
    %191 = vector.extract_strided_slice %169 {offsets = [0, 2688], sizes = [1, 128], strides = [1, 1]} : vector<1x8192xf32> to vector<1x128xf32>
    %192 = vector.extract_strided_slice %169 {offsets = [0, 2816], sizes = [1, 128], strides = [1, 1]} : vector<1x8192xf32> to vector<1x128xf32>
    %193 = vector.extract_strided_slice %169 {offsets = [0, 2944], sizes = [1, 128], strides = [1, 1]} : vector<1x8192xf32> to vector<1x128xf32>
    %194 = vector.extract_strided_slice %169 {offsets = [0, 3072], sizes = [1, 128], strides = [1, 1]} : vector<1x8192xf32> to vector<1x128xf32>
    %195 = vector.extract_strided_slice %169 {offsets = [0, 3200], sizes = [1, 128], strides = [1, 1]} : vector<1x8192xf32> to vector<1x128xf32>
    %196 = vector.extract_strided_slice %169 {offsets = [0, 3328], sizes = [1, 128], strides = [1, 1]} : vector<1x8192xf32> to vector<1x128xf32>
    %197 = vector.extract_strided_slice %169 {offsets = [0, 3456], sizes = [1, 128], strides = [1, 1]} : vector<1x8192xf32> to vector<1x128xf32>
    %198 = vector.extract_strided_slice %169 {offsets = [0, 3584], sizes = [1, 128], strides = [1, 1]} : vector<1x8192xf32> to vector<1x128xf32>
    %199 = vector.extract_strided_slice %169 {offsets = [0, 3712], sizes = [1, 128], strides = [1, 1]} : vector<1x8192xf32> to vector<1x128xf32>
    %200 = vector.extract_strided_slice %169 {offsets = [0, 3840], sizes = [1, 128], strides = [1, 1]} : vector<1x8192xf32> to vector<1x128xf32>
    %201 = vector.extract_strided_slice %169 {offsets = [0, 3968], sizes = [1, 128], strides = [1, 1]} : vector<1x8192xf32> to vector<1x128xf32>
    %202 = vector.extract_strided_slice %169 {offsets = [0, 4096], sizes = [1, 128], strides = [1, 1]} : vector<1x8192xf32> to vector<1x128xf32>
    %203 = vector.extract_strided_slice %169 {offsets = [0, 4224], sizes = [1, 128], strides = [1, 1]} : vector<1x8192xf32> to vector<1x128xf32>
    %204 = vector.extract_strided_slice %169 {offsets = [0, 4352], sizes = [1, 128], strides = [1, 1]} : vector<1x8192xf32> to vector<1x128xf32>
    %205 = vector.extract_strided_slice %169 {offsets = [0, 4480], sizes = [1, 128], strides = [1, 1]} : vector<1x8192xf32> to vector<1x128xf32>
    %206 = vector.extract_strided_slice %169 {offsets = [0, 4608], sizes = [1, 128], strides = [1, 1]} : vector<1x8192xf32> to vector<1x128xf32>
    %207 = vector.extract_strided_slice %169 {offsets = [0, 4736], sizes = [1, 128], strides = [1, 1]} : vector<1x8192xf32> to vector<1x128xf32>
    %208 = vector.extract_strided_slice %169 {offsets = [0, 4864], sizes = [1, 128], strides = [1, 1]} : vector<1x8192xf32> to vector<1x128xf32>
    %209 = vector.extract_strided_slice %169 {offsets = [0, 4992], sizes = [1, 128], strides = [1, 1]} : vector<1x8192xf32> to vector<1x128xf32>
    %210 = vector.extract_strided_slice %169 {offsets = [0, 5120], sizes = [1, 128], strides = [1, 1]} : vector<1x8192xf32> to vector<1x128xf32>
    %211 = vector.extract_strided_slice %169 {offsets = [0, 5248], sizes = [1, 128], strides = [1, 1]} : vector<1x8192xf32> to vector<1x128xf32>
    %212 = vector.extract_strided_slice %169 {offsets = [0, 5376], sizes = [1, 128], strides = [1, 1]} : vector<1x8192xf32> to vector<1x128xf32>
    %213 = vector.extract_strided_slice %169 {offsets = [0, 5504], sizes = [1, 128], strides = [1, 1]} : vector<1x8192xf32> to vector<1x128xf32>
    %214 = vector.extract_strided_slice %169 {offsets = [0, 5632], sizes = [1, 128], strides = [1, 1]} : vector<1x8192xf32> to vector<1x128xf32>
    %215 = vector.extract_strided_slice %169 {offsets = [0, 5760], sizes = [1, 128], strides = [1, 1]} : vector<1x8192xf32> to vector<1x128xf32>
    %216 = vector.extract_strided_slice %169 {offsets = [0, 5888], sizes = [1, 128], strides = [1, 1]} : vector<1x8192xf32> to vector<1x128xf32>
    %217 = vector.extract_strided_slice %169 {offsets = [0, 6016], sizes = [1, 128], strides = [1, 1]} : vector<1x8192xf32> to vector<1x128xf32>
    %218 = vector.extract_strided_slice %169 {offsets = [0, 6144], sizes = [1, 128], strides = [1, 1]} : vector<1x8192xf32> to vector<1x128xf32>
    %219 = vector.extract_strided_slice %169 {offsets = [0, 6272], sizes = [1, 128], strides = [1, 1]} : vector<1x8192xf32> to vector<1x128xf32>
    %220 = vector.extract_strided_slice %169 {offsets = [0, 6400], sizes = [1, 128], strides = [1, 1]} : vector<1x8192xf32> to vector<1x128xf32>
    %221 = vector.extract_strided_slice %169 {offsets = [0, 6528], sizes = [1, 128], strides = [1, 1]} : vector<1x8192xf32> to vector<1x128xf32>
    %222 = vector.extract_strided_slice %169 {offsets = [0, 6656], sizes = [1, 128], strides = [1, 1]} : vector<1x8192xf32> to vector<1x128xf32>
    %223 = vector.extract_strided_slice %169 {offsets = [0, 6784], sizes = [1, 128], strides = [1, 1]} : vector<1x8192xf32> to vector<1x128xf32>
    %224 = vector.extract_strided_slice %169 {offsets = [0, 6912], sizes = [1, 128], strides = [1, 1]} : vector<1x8192xf32> to vector<1x128xf32>
    %225 = vector.extract_strided_slice %169 {offsets = [0, 7040], sizes = [1, 128], strides = [1, 1]} : vector<1x8192xf32> to vector<1x128xf32>
    %226 = vector.extract_strided_slice %169 {offsets = [0, 7168], sizes = [1, 128], strides = [1, 1]} : vector<1x8192xf32> to vector<1x128xf32>
    %227 = vector.extract_strided_slice %169 {offsets = [0, 7296], sizes = [1, 128], strides = [1, 1]} : vector<1x8192xf32> to vector<1x128xf32>
    %228 = vector.extract_strided_slice %169 {offsets = [0, 7424], sizes = [1, 128], strides = [1, 1]} : vector<1x8192xf32> to vector<1x128xf32>
    %229 = vector.extract_strided_slice %169 {offsets = [0, 7552], sizes = [1, 128], strides = [1, 1]} : vector<1x8192xf32> to vector<1x128xf32>
    %230 = vector.extract_strided_slice %169 {offsets = [0, 7680], sizes = [1, 128], strides = [1, 1]} : vector<1x8192xf32> to vector<1x128xf32>
    %231 = vector.extract_strided_slice %169 {offsets = [0, 7808], sizes = [1, 128], strides = [1, 1]} : vector<1x8192xf32> to vector<1x128xf32>
    %232 = vector.extract_strided_slice %169 {offsets = [0, 7936], sizes = [1, 128], strides = [1, 1]} : vector<1x8192xf32> to vector<1x128xf32>
    %233 = vector.extract_strided_slice %169 {offsets = [0, 8064], sizes = [1, 128], strides = [1, 1]} : vector<1x8192xf32> to vector<1x128xf32>
    %234 = tpu.concatenate %170, %171, %172, %173, %174, %175, %176, %177, %178, %179, %180, %181, %182, %183, %184, %185 in 0 : vector<1x128xf32>, vector<1x128xf32>, vector<1x128xf32>, vector<1x128xf32>, vector<1x128xf32>, vector<1x128xf32>, vector<1x128xf32>, vector<1x128xf32>, vector<1x128xf32>, vector<1x128xf32>, vector<1x128xf32>, vector<1x128xf32>, vector<1x128xf32>, vector<1x128xf32>, vector<1x128xf32>, vector<1x128xf32> -> vector<16x128xf32>
    %235 = tpu.concatenate %186, %187, %188, %189, %190, %191, %192, %193, %194, %195, %196, %197, %198, %199, %200, %201 in 0 : vector<1x128xf32>, vector<1x128xf32>, vector<1x128xf32>, vector<1x128xf32>, vector<1x128xf32>, vector<1x128xf32>, vector<1x128xf32>, vector<1x128xf32>, vector<1x128xf32>, vector<1x128xf32>, vector<1x128xf32>, vector<1x128xf32>, vector<1x128xf32>, vector<1x128xf32>, vector<1x128xf32>, vector<1x128xf32> -> vector<16x128xf32>
    %236 = tpu.concatenate %202, %203, %204, %205, %206, %207, %208, %209, %210, %211, %212, %213, %214, %215, %216, %217 in 0 : vector<1x128xf32>, vector<1x128xf32>, vector<1x128xf32>, vector<1x128xf32>, vector<1x128xf32>, vector<1x128xf32>, vector<1x128xf32>, vector<1x128xf32>, vector<1x128xf32>, vector<1x128xf32>, vector<1x128xf32>, vector<1x128xf32>, vector<1x128xf32>, vector<1x128xf32>, vector<1x128xf32>, vector<1x128xf32> -> vector<16x128xf32>
    %237 = tpu.concatenate %218, %219, %220, %221, %222, %223, %224, %225, %226, %227, %228, %229, %230, %231, %232, %233 in 0 : vector<1x128xf32>, vector<1x128xf32>, vector<1x128xf32>, vector<1x128xf32>, vector<1x128xf32>, vector<1x128xf32>, vector<1x128xf32>, vector<1x128xf32>, vector<1x128xf32>, vector<1x128xf32>, vector<1x128xf32>, vector<1x128xf32>, vector<1x128xf32>, vector<1x128xf32>, vector<1x128xf32>, vector<1x128xf32> -> vector<16x128xf32>
    %238 = tpu.concatenate %234, %235, %236, %237 in 0 : vector<16x128xf32>, vector<16x128xf32>, vector<16x128xf32>, vector<16x128xf32> -> vector<64x128xf32>
    %239 = vector.extract_strided_slice %10 {offsets = [0, 0], sizes = [1, 1], strides = [1, 1]} : vector<3x1xf32> to vector<1x1xf32>
    %240 = vector.broadcast %239 : vector<1x1xf32> to vector<64x128xf32>
    %241 = arith.addf %238, %240 : vector<64x128xf32>
    %242 = arith.negf %241 : vector<64x128xf32>
    %243 = math.exp %242 : vector<64x128xf32>
    %cst_33 = arith.constant 1.000000e+00 : f32
    %244 = vector.broadcast %cst_33 : f32 to vector<64x128xf32>
    %245 = arith.addf %244, %243 : vector<64x128xf32>
    %246 = arith.divf %244, %245 : vector<64x128xf32>
    %247 = vector.extract_strided_slice %168 {offsets = [1, 0], sizes = [1, 8192], strides = [1, 1]} : vector<3x8192xf32> to vector<1x8192xf32>
    %248 = vector.extract_strided_slice %247 {offsets = [0, 0], sizes = [1, 128], strides = [1, 1]} : vector<1x8192xf32> to vector<1x128xf32>
    %249 = vector.extract_strided_slice %247 {offsets = [0, 128], sizes = [1, 128], strides = [1, 1]} : vector<1x8192xf32> to vector<1x128xf32>
    %250 = vector.extract_strided_slice %247 {offsets = [0, 256], sizes = [1, 128], strides = [1, 1]} : vector<1x8192xf32> to vector<1x128xf32>
    %251 = vector.extract_strided_slice %247 {offsets = [0, 384], sizes = [1, 128], strides = [1, 1]} : vector<1x8192xf32> to vector<1x128xf32>
    %252 = vector.extract_strided_slice %247 {offsets = [0, 512], sizes = [1, 128], strides = [1, 1]} : vector<1x8192xf32> to vector<1x128xf32>
    %253 = vector.extract_strided_slice %247 {offsets = [0, 640], sizes = [1, 128], strides = [1, 1]} : vector<1x8192xf32> to vector<1x128xf32>
    %254 = vector.extract_strided_slice %247 {offsets = [0, 768], sizes = [1, 128], strides = [1, 1]} : vector<1x8192xf32> to vector<1x128xf32>
    %255 = vector.extract_strided_slice %247 {offsets = [0, 896], sizes = [1, 128], strides = [1, 1]} : vector<1x8192xf32> to vector<1x128xf32>
    %256 = vector.extract_strided_slice %247 {offsets = [0, 1024], sizes = [1, 128], strides = [1, 1]} : vector<1x8192xf32> to vector<1x128xf32>
    %257 = vector.extract_strided_slice %247 {offsets = [0, 1152], sizes = [1, 128], strides = [1, 1]} : vector<1x8192xf32> to vector<1x128xf32>
    %258 = vector.extract_strided_slice %247 {offsets = [0, 1280], sizes = [1, 128], strides = [1, 1]} : vector<1x8192xf32> to vector<1x128xf32>
    %259 = vector.extract_strided_slice %247 {offsets = [0, 1408], sizes = [1, 128], strides = [1, 1]} : vector<1x8192xf32> to vector<1x128xf32>
    %260 = vector.extract_strided_slice %247 {offsets = [0, 1536], sizes = [1, 128], strides = [1, 1]} : vector<1x8192xf32> to vector<1x128xf32>
    %261 = vector.extract_strided_slice %247 {offsets = [0, 1664], sizes = [1, 128], strides = [1, 1]} : vector<1x8192xf32> to vector<1x128xf32>
    %262 = vector.extract_strided_slice %247 {offsets = [0, 1792], sizes = [1, 128], strides = [1, 1]} : vector<1x8192xf32> to vector<1x128xf32>
    %263 = vector.extract_strided_slice %247 {offsets = [0, 1920], sizes = [1, 128], strides = [1, 1]} : vector<1x8192xf32> to vector<1x128xf32>
    %264 = vector.extract_strided_slice %247 {offsets = [0, 2048], sizes = [1, 128], strides = [1, 1]} : vector<1x8192xf32> to vector<1x128xf32>
    %265 = vector.extract_strided_slice %247 {offsets = [0, 2176], sizes = [1, 128], strides = [1, 1]} : vector<1x8192xf32> to vector<1x128xf32>
    %266 = vector.extract_strided_slice %247 {offsets = [0, 2304], sizes = [1, 128], strides = [1, 1]} : vector<1x8192xf32> to vector<1x128xf32>
    %267 = vector.extract_strided_slice %247 {offsets = [0, 2432], sizes = [1, 128], strides = [1, 1]} : vector<1x8192xf32> to vector<1x128xf32>
    %268 = vector.extract_strided_slice %247 {offsets = [0, 2560], sizes = [1, 128], strides = [1, 1]} : vector<1x8192xf32> to vector<1x128xf32>
    %269 = vector.extract_strided_slice %247 {offsets = [0, 2688], sizes = [1, 128], strides = [1, 1]} : vector<1x8192xf32> to vector<1x128xf32>
    %270 = vector.extract_strided_slice %247 {offsets = [0, 2816], sizes = [1, 128], strides = [1, 1]} : vector<1x8192xf32> to vector<1x128xf32>
    %271 = vector.extract_strided_slice %247 {offsets = [0, 2944], sizes = [1, 128], strides = [1, 1]} : vector<1x8192xf32> to vector<1x128xf32>
    %272 = vector.extract_strided_slice %247 {offsets = [0, 3072], sizes = [1, 128], strides = [1, 1]} : vector<1x8192xf32> to vector<1x128xf32>
    %273 = vector.extract_strided_slice %247 {offsets = [0, 3200], sizes = [1, 128], strides = [1, 1]} : vector<1x8192xf32> to vector<1x128xf32>
    %274 = vector.extract_strided_slice %247 {offsets = [0, 3328], sizes = [1, 128], strides = [1, 1]} : vector<1x8192xf32> to vector<1x128xf32>
    %275 = vector.extract_strided_slice %247 {offsets = [0, 3456], sizes = [1, 128], strides = [1, 1]} : vector<1x8192xf32> to vector<1x128xf32>
    %276 = vector.extract_strided_slice %247 {offsets = [0, 3584], sizes = [1, 128], strides = [1, 1]} : vector<1x8192xf32> to vector<1x128xf32>
    %277 = vector.extract_strided_slice %247 {offsets = [0, 3712], sizes = [1, 128], strides = [1, 1]} : vector<1x8192xf32> to vector<1x128xf32>
    %278 = vector.extract_strided_slice %247 {offsets = [0, 3840], sizes = [1, 128], strides = [1, 1]} : vector<1x8192xf32> to vector<1x128xf32>
    %279 = vector.extract_strided_slice %247 {offsets = [0, 3968], sizes = [1, 128], strides = [1, 1]} : vector<1x8192xf32> to vector<1x128xf32>
    %280 = vector.extract_strided_slice %247 {offsets = [0, 4096], sizes = [1, 128], strides = [1, 1]} : vector<1x8192xf32> to vector<1x128xf32>
    %281 = vector.extract_strided_slice %247 {offsets = [0, 4224], sizes = [1, 128], strides = [1, 1]} : vector<1x8192xf32> to vector<1x128xf32>
    %282 = vector.extract_strided_slice %247 {offsets = [0, 4352], sizes = [1, 128], strides = [1, 1]} : vector<1x8192xf32> to vector<1x128xf32>
    %283 = vector.extract_strided_slice %247 {offsets = [0, 4480], sizes = [1, 128], strides = [1, 1]} : vector<1x8192xf32> to vector<1x128xf32>
    %284 = vector.extract_strided_slice %247 {offsets = [0, 4608], sizes = [1, 128], strides = [1, 1]} : vector<1x8192xf32> to vector<1x128xf32>
    %285 = vector.extract_strided_slice %247 {offsets = [0, 4736], sizes = [1, 128], strides = [1, 1]} : vector<1x8192xf32> to vector<1x128xf32>
    %286 = vector.extract_strided_slice %247 {offsets = [0, 4864], sizes = [1, 128], strides = [1, 1]} : vector<1x8192xf32> to vector<1x128xf32>
    %287 = vector.extract_strided_slice %247 {offsets = [0, 4992], sizes = [1, 128], strides = [1, 1]} : vector<1x8192xf32> to vector<1x128xf32>
    %288 = vector.extract_strided_slice %247 {offsets = [0, 5120], sizes = [1, 128], strides = [1, 1]} : vector<1x8192xf32> to vector<1x128xf32>
    %289 = vector.extract_strided_slice %247 {offsets = [0, 5248], sizes = [1, 128], strides = [1, 1]} : vector<1x8192xf32> to vector<1x128xf32>
    %290 = vector.extract_strided_slice %247 {offsets = [0, 5376], sizes = [1, 128], strides = [1, 1]} : vector<1x8192xf32> to vector<1x128xf32>
    %291 = vector.extract_strided_slice %247 {offsets = [0, 5504], sizes = [1, 128], strides = [1, 1]} : vector<1x8192xf32> to vector<1x128xf32>
    %292 = vector.extract_strided_slice %247 {offsets = [0, 5632], sizes = [1, 128], strides = [1, 1]} : vector<1x8192xf32> to vector<1x128xf32>
    %293 = vector.extract_strided_slice %247 {offsets = [0, 5760], sizes = [1, 128], strides = [1, 1]} : vector<1x8192xf32> to vector<1x128xf32>
    %294 = vector.extract_strided_slice %247 {offsets = [0, 5888], sizes = [1, 128], strides = [1, 1]} : vector<1x8192xf32> to vector<1x128xf32>
    %295 = vector.extract_strided_slice %247 {offsets = [0, 6016], sizes = [1, 128], strides = [1, 1]} : vector<1x8192xf32> to vector<1x128xf32>
    %296 = vector.extract_strided_slice %247 {offsets = [0, 6144], sizes = [1, 128], strides = [1, 1]} : vector<1x8192xf32> to vector<1x128xf32>
    %297 = vector.extract_strided_slice %247 {offsets = [0, 6272], sizes = [1, 128], strides = [1, 1]} : vector<1x8192xf32> to vector<1x128xf32>
    %298 = vector.extract_strided_slice %247 {offsets = [0, 6400], sizes = [1, 128], strides = [1, 1]} : vector<1x8192xf32> to vector<1x128xf32>
    %299 = vector.extract_strided_slice %247 {offsets = [0, 6528], sizes = [1, 128], strides = [1, 1]} : vector<1x8192xf32> to vector<1x128xf32>
    %300 = vector.extract_strided_slice %247 {offsets = [0, 6656], sizes = [1, 128], strides = [1, 1]} : vector<1x8192xf32> to vector<1x128xf32>
    %301 = vector.extract_strided_slice %247 {offsets = [0, 6784], sizes = [1, 128], strides = [1, 1]} : vector<1x8192xf32> to vector<1x128xf32>
    %302 = vector.extract_strided_slice %247 {offsets = [0, 6912], sizes = [1, 128], strides = [1, 1]} : vector<1x8192xf32> to vector<1x128xf32>
    %303 = vector.extract_strided_slice %247 {offsets = [0, 7040], sizes = [1, 128], strides = [1, 1]} : vector<1x8192xf32> to vector<1x128xf32>
    %304 = vector.extract_strided_slice %247 {offsets = [0, 7168], sizes = [1, 128], strides = [1, 1]} : vector<1x8192xf32> to vector<1x128xf32>
    %305 = vector.extract_strided_slice %247 {offsets = [0, 7296], sizes = [1, 128], strides = [1, 1]} : vector<1x8192xf32> to vector<1x128xf32>
    %306 = vector.extract_strided_slice %247 {offsets = [0, 7424], sizes = [1, 128], strides = [1, 1]} : vector<1x8192xf32> to vector<1x128xf32>
    %307 = vector.extract_strided_slice %247 {offsets = [0, 7552], sizes = [1, 128], strides = [1, 1]} : vector<1x8192xf32> to vector<1x128xf32>
    %308 = vector.extract_strided_slice %247 {offsets = [0, 7680], sizes = [1, 128], strides = [1, 1]} : vector<1x8192xf32> to vector<1x128xf32>
    %309 = vector.extract_strided_slice %247 {offsets = [0, 7808], sizes = [1, 128], strides = [1, 1]} : vector<1x8192xf32> to vector<1x128xf32>
    %310 = vector.extract_strided_slice %247 {offsets = [0, 7936], sizes = [1, 128], strides = [1, 1]} : vector<1x8192xf32> to vector<1x128xf32>
    %311 = vector.extract_strided_slice %247 {offsets = [0, 8064], sizes = [1, 128], strides = [1, 1]} : vector<1x8192xf32> to vector<1x128xf32>
    %312 = tpu.concatenate %248, %249, %250, %251, %252, %253, %254, %255, %256, %257, %258, %259, %260, %261, %262, %263 in 0 : vector<1x128xf32>, vector<1x128xf32>, vector<1x128xf32>, vector<1x128xf32>, vector<1x128xf32>, vector<1x128xf32>, vector<1x128xf32>, vector<1x128xf32>, vector<1x128xf32>, vector<1x128xf32>, vector<1x128xf32>, vector<1x128xf32>, vector<1x128xf32>, vector<1x128xf32>, vector<1x128xf32>, vector<1x128xf32> -> vector<16x128xf32>
    %313 = tpu.concatenate %264, %265, %266, %267, %268, %269, %270, %271, %272, %273, %274, %275, %276, %277, %278, %279 in 0 : vector<1x128xf32>, vector<1x128xf32>, vector<1x128xf32>, vector<1x128xf32>, vector<1x128xf32>, vector<1x128xf32>, vector<1x128xf32>, vector<1x128xf32>, vector<1x128xf32>, vector<1x128xf32>, vector<1x128xf32>, vector<1x128xf32>, vector<1x128xf32>, vector<1x128xf32>, vector<1x128xf32>, vector<1x128xf32> -> vector<16x128xf32>
    %314 = tpu.concatenate %280, %281, %282, %283, %284, %285, %286, %287, %288, %289, %290, %291, %292, %293, %294, %295 in 0 : vector<1x128xf32>, vector<1x128xf32>, vector<1x128xf32>, vector<1x128xf32>, vector<1x128xf32>, vector<1x128xf32>, vector<1x128xf32>, vector<1x128xf32>, vector<1x128xf32>, vector<1x128xf32>, vector<1x128xf32>, vector<1x128xf32>, vector<1x128xf32>, vector<1x128xf32>, vector<1x128xf32>, vector<1x128xf32> -> vector<16x128xf32>
    %315 = tpu.concatenate %296, %297, %298, %299, %300, %301, %302, %303, %304, %305, %306, %307, %308, %309, %310, %311 in 0 : vector<1x128xf32>, vector<1x128xf32>, vector<1x128xf32>, vector<1x128xf32>, vector<1x128xf32>, vector<1x128xf32>, vector<1x128xf32>, vector<1x128xf32>, vector<1x128xf32>, vector<1x128xf32>, vector<1x128xf32>, vector<1x128xf32>, vector<1x128xf32>, vector<1x128xf32>, vector<1x128xf32>, vector<1x128xf32> -> vector<16x128xf32>
    %316 = tpu.concatenate %312, %313, %314, %315 in 0 : vector<16x128xf32>, vector<16x128xf32>, vector<16x128xf32>, vector<16x128xf32> -> vector<64x128xf32>
    %317 = vector.extract_strided_slice %10 {offsets = [1, 0], sizes = [1, 1], strides = [1, 1]} : vector<3x1xf32> to vector<1x1xf32>
    %318 = vector.broadcast %317 : vector<1x1xf32> to vector<64x128xf32>
    %319 = arith.addf %316, %318 : vector<64x128xf32>
    %320 = arith.negf %319 : vector<64x128xf32>
    %321 = math.exp %320 : vector<64x128xf32>
    %cst_34 = arith.constant 1.000000e+00 : f32
    %322 = vector.broadcast %cst_34 : f32 to vector<64x128xf32>
    %323 = arith.addf %322, %321 : vector<64x128xf32>
    %324 = arith.divf %322, %323 : vector<64x128xf32>
    %325 = vector.extract_strided_slice %168 {offsets = [2, 0], sizes = [1, 8192], strides = [1, 1]} : vector<3x8192xf32> to vector<1x8192xf32>
    %326 = vector.extract_strided_slice %325 {offsets = [0, 0], sizes = [1, 128], strides = [1, 1]} : vector<1x8192xf32> to vector<1x128xf32>
    %327 = vector.extract_strided_slice %325 {offsets = [0, 128], sizes = [1, 128], strides = [1, 1]} : vector<1x8192xf32> to vector<1x128xf32>
    %328 = vector.extract_strided_slice %325 {offsets = [0, 256], sizes = [1, 128], strides = [1, 1]} : vector<1x8192xf32> to vector<1x128xf32>
    %329 = vector.extract_strided_slice %325 {offsets = [0, 384], sizes = [1, 128], strides = [1, 1]} : vector<1x8192xf32> to vector<1x128xf32>
    %330 = vector.extract_strided_slice %325 {offsets = [0, 512], sizes = [1, 128], strides = [1, 1]} : vector<1x8192xf32> to vector<1x128xf32>
    %331 = vector.extract_strided_slice %325 {offsets = [0, 640], sizes = [1, 128], strides = [1, 1]} : vector<1x8192xf32> to vector<1x128xf32>
    %332 = vector.extract_strided_slice %325 {offsets = [0, 768], sizes = [1, 128], strides = [1, 1]} : vector<1x8192xf32> to vector<1x128xf32>
    %333 = vector.extract_strided_slice %325 {offsets = [0, 896], sizes = [1, 128], strides = [1, 1]} : vector<1x8192xf32> to vector<1x128xf32>
    %334 = vector.extract_strided_slice %325 {offsets = [0, 1024], sizes = [1, 128], strides = [1, 1]} : vector<1x8192xf32> to vector<1x128xf32>
    %335 = vector.extract_strided_slice %325 {offsets = [0, 1152], sizes = [1, 128], strides = [1, 1]} : vector<1x8192xf32> to vector<1x128xf32>
    %336 = vector.extract_strided_slice %325 {offsets = [0, 1280], sizes = [1, 128], strides = [1, 1]} : vector<1x8192xf32> to vector<1x128xf32>
    %337 = vector.extract_strided_slice %325 {offsets = [0, 1408], sizes = [1, 128], strides = [1, 1]} : vector<1x8192xf32> to vector<1x128xf32>
    %338 = vector.extract_strided_slice %325 {offsets = [0, 1536], sizes = [1, 128], strides = [1, 1]} : vector<1x8192xf32> to vector<1x128xf32>
    %339 = vector.extract_strided_slice %325 {offsets = [0, 1664], sizes = [1, 128], strides = [1, 1]} : vector<1x8192xf32> to vector<1x128xf32>
    %340 = vector.extract_strided_slice %325 {offsets = [0, 1792], sizes = [1, 128], strides = [1, 1]} : vector<1x8192xf32> to vector<1x128xf32>
    %341 = vector.extract_strided_slice %325 {offsets = [0, 1920], sizes = [1, 128], strides = [1, 1]} : vector<1x8192xf32> to vector<1x128xf32>
    %342 = vector.extract_strided_slice %325 {offsets = [0, 2048], sizes = [1, 128], strides = [1, 1]} : vector<1x8192xf32> to vector<1x128xf32>
    %343 = vector.extract_strided_slice %325 {offsets = [0, 2176], sizes = [1, 128], strides = [1, 1]} : vector<1x8192xf32> to vector<1x128xf32>
    %344 = vector.extract_strided_slice %325 {offsets = [0, 2304], sizes = [1, 128], strides = [1, 1]} : vector<1x8192xf32> to vector<1x128xf32>
    %345 = vector.extract_strided_slice %325 {offsets = [0, 2432], sizes = [1, 128], strides = [1, 1]} : vector<1x8192xf32> to vector<1x128xf32>
    %346 = vector.extract_strided_slice %325 {offsets = [0, 2560], sizes = [1, 128], strides = [1, 1]} : vector<1x8192xf32> to vector<1x128xf32>
    %347 = vector.extract_strided_slice %325 {offsets = [0, 2688], sizes = [1, 128], strides = [1, 1]} : vector<1x8192xf32> to vector<1x128xf32>
    %348 = vector.extract_strided_slice %325 {offsets = [0, 2816], sizes = [1, 128], strides = [1, 1]} : vector<1x8192xf32> to vector<1x128xf32>
    %349 = vector.extract_strided_slice %325 {offsets = [0, 2944], sizes = [1, 128], strides = [1, 1]} : vector<1x8192xf32> to vector<1x128xf32>
    %350 = vector.extract_strided_slice %325 {offsets = [0, 3072], sizes = [1, 128], strides = [1, 1]} : vector<1x8192xf32> to vector<1x128xf32>
    %351 = vector.extract_strided_slice %325 {offsets = [0, 3200], sizes = [1, 128], strides = [1, 1]} : vector<1x8192xf32> to vector<1x128xf32>
    %352 = vector.extract_strided_slice %325 {offsets = [0, 3328], sizes = [1, 128], strides = [1, 1]} : vector<1x8192xf32> to vector<1x128xf32>
    %353 = vector.extract_strided_slice %325 {offsets = [0, 3456], sizes = [1, 128], strides = [1, 1]} : vector<1x8192xf32> to vector<1x128xf32>
    %354 = vector.extract_strided_slice %325 {offsets = [0, 3584], sizes = [1, 128], strides = [1, 1]} : vector<1x8192xf32> to vector<1x128xf32>
    %355 = vector.extract_strided_slice %325 {offsets = [0, 3712], sizes = [1, 128], strides = [1, 1]} : vector<1x8192xf32> to vector<1x128xf32>
    %356 = vector.extract_strided_slice %325 {offsets = [0, 3840], sizes = [1, 128], strides = [1, 1]} : vector<1x8192xf32> to vector<1x128xf32>
    %357 = vector.extract_strided_slice %325 {offsets = [0, 3968], sizes = [1, 128], strides = [1, 1]} : vector<1x8192xf32> to vector<1x128xf32>
    %358 = vector.extract_strided_slice %325 {offsets = [0, 4096], sizes = [1, 128], strides = [1, 1]} : vector<1x8192xf32> to vector<1x128xf32>
    %359 = vector.extract_strided_slice %325 {offsets = [0, 4224], sizes = [1, 128], strides = [1, 1]} : vector<1x8192xf32> to vector<1x128xf32>
    %360 = vector.extract_strided_slice %325 {offsets = [0, 4352], sizes = [1, 128], strides = [1, 1]} : vector<1x8192xf32> to vector<1x128xf32>
    %361 = vector.extract_strided_slice %325 {offsets = [0, 4480], sizes = [1, 128], strides = [1, 1]} : vector<1x8192xf32> to vector<1x128xf32>
    %362 = vector.extract_strided_slice %325 {offsets = [0, 4608], sizes = [1, 128], strides = [1, 1]} : vector<1x8192xf32> to vector<1x128xf32>
    %363 = vector.extract_strided_slice %325 {offsets = [0, 4736], sizes = [1, 128], strides = [1, 1]} : vector<1x8192xf32> to vector<1x128xf32>
    %364 = vector.extract_strided_slice %325 {offsets = [0, 4864], sizes = [1, 128], strides = [1, 1]} : vector<1x8192xf32> to vector<1x128xf32>
    %365 = vector.extract_strided_slice %325 {offsets = [0, 4992], sizes = [1, 128], strides = [1, 1]} : vector<1x8192xf32> to vector<1x128xf32>
    %366 = vector.extract_strided_slice %325 {offsets = [0, 5120], sizes = [1, 128], strides = [1, 1]} : vector<1x8192xf32> to vector<1x128xf32>
    %367 = vector.extract_strided_slice %325 {offsets = [0, 5248], sizes = [1, 128], strides = [1, 1]} : vector<1x8192xf32> to vector<1x128xf32>
    %368 = vector.extract_strided_slice %325 {offsets = [0, 5376], sizes = [1, 128], strides = [1, 1]} : vector<1x8192xf32> to vector<1x128xf32>
    %369 = vector.extract_strided_slice %325 {offsets = [0, 5504], sizes = [1, 128], strides = [1, 1]} : vector<1x8192xf32> to vector<1x128xf32>
    %370 = vector.extract_strided_slice %325 {offsets = [0, 5632], sizes = [1, 128], strides = [1, 1]} : vector<1x8192xf32> to vector<1x128xf32>
    %371 = vector.extract_strided_slice %325 {offsets = [0, 5760], sizes = [1, 128], strides = [1, 1]} : vector<1x8192xf32> to vector<1x128xf32>
    %372 = vector.extract_strided_slice %325 {offsets = [0, 5888], sizes = [1, 128], strides = [1, 1]} : vector<1x8192xf32> to vector<1x128xf32>
    %373 = vector.extract_strided_slice %325 {offsets = [0, 6016], sizes = [1, 128], strides = [1, 1]} : vector<1x8192xf32> to vector<1x128xf32>
    %374 = vector.extract_strided_slice %325 {offsets = [0, 6144], sizes = [1, 128], strides = [1, 1]} : vector<1x8192xf32> to vector<1x128xf32>
    %375 = vector.extract_strided_slice %325 {offsets = [0, 6272], sizes = [1, 128], strides = [1, 1]} : vector<1x8192xf32> to vector<1x128xf32>
    %376 = vector.extract_strided_slice %325 {offsets = [0, 6400], sizes = [1, 128], strides = [1, 1]} : vector<1x8192xf32> to vector<1x128xf32>
    %377 = vector.extract_strided_slice %325 {offsets = [0, 6528], sizes = [1, 128], strides = [1, 1]} : vector<1x8192xf32> to vector<1x128xf32>
    %378 = vector.extract_strided_slice %325 {offsets = [0, 6656], sizes = [1, 128], strides = [1, 1]} : vector<1x8192xf32> to vector<1x128xf32>
    %379 = vector.extract_strided_slice %325 {offsets = [0, 6784], sizes = [1, 128], strides = [1, 1]} : vector<1x8192xf32> to vector<1x128xf32>
    %380 = vector.extract_strided_slice %325 {offsets = [0, 6912], sizes = [1, 128], strides = [1, 1]} : vector<1x8192xf32> to vector<1x128xf32>
    %381 = vector.extract_strided_slice %325 {offsets = [0, 7040], sizes = [1, 128], strides = [1, 1]} : vector<1x8192xf32> to vector<1x128xf32>
    %382 = vector.extract_strided_slice %325 {offsets = [0, 7168], sizes = [1, 128], strides = [1, 1]} : vector<1x8192xf32> to vector<1x128xf32>
    %383 = vector.extract_strided_slice %325 {offsets = [0, 7296], sizes = [1, 128], strides = [1, 1]} : vector<1x8192xf32> to vector<1x128xf32>
    %384 = vector.extract_strided_slice %325 {offsets = [0, 7424], sizes = [1, 128], strides = [1, 1]} : vector<1x8192xf32> to vector<1x128xf32>
    %385 = vector.extract_strided_slice %325 {offsets = [0, 7552], sizes = [1, 128], strides = [1, 1]} : vector<1x8192xf32> to vector<1x128xf32>
    %386 = vector.extract_strided_slice %325 {offsets = [0, 7680], sizes = [1, 128], strides = [1, 1]} : vector<1x8192xf32> to vector<1x128xf32>
    %387 = vector.extract_strided_slice %325 {offsets = [0, 7808], sizes = [1, 128], strides = [1, 1]} : vector<1x8192xf32> to vector<1x128xf32>
    %388 = vector.extract_strided_slice %325 {offsets = [0, 7936], sizes = [1, 128], strides = [1, 1]} : vector<1x8192xf32> to vector<1x128xf32>
    %389 = vector.extract_strided_slice %325 {offsets = [0, 8064], sizes = [1, 128], strides = [1, 1]} : vector<1x8192xf32> to vector<1x128xf32>
    %390 = tpu.concatenate %326, %327, %328, %329, %330, %331, %332, %333, %334, %335, %336, %337, %338, %339, %340, %341 in 0 : vector<1x128xf32>, vector<1x128xf32>, vector<1x128xf32>, vector<1x128xf32>, vector<1x128xf32>, vector<1x128xf32>, vector<1x128xf32>, vector<1x128xf32>, vector<1x128xf32>, vector<1x128xf32>, vector<1x128xf32>, vector<1x128xf32>, vector<1x128xf32>, vector<1x128xf32>, vector<1x128xf32>, vector<1x128xf32> -> vector<16x128xf32>
    %391 = tpu.concatenate %342, %343, %344, %345, %346, %347, %348, %349, %350, %351, %352, %353, %354, %355, %356, %357 in 0 : vector<1x128xf32>, vector<1x128xf32>, vector<1x128xf32>, vector<1x128xf32>, vector<1x128xf32>, vector<1x128xf32>, vector<1x128xf32>, vector<1x128xf32>, vector<1x128xf32>, vector<1x128xf32>, vector<1x128xf32>, vector<1x128xf32>, vector<1x128xf32>, vector<1x128xf32>, vector<1x128xf32>, vector<1x128xf32> -> vector<16x128xf32>
    %392 = tpu.concatenate %358, %359, %360, %361, %362, %363, %364, %365, %366, %367, %368, %369, %370, %371, %372, %373 in 0 : vector<1x128xf32>, vector<1x128xf32>, vector<1x128xf32>, vector<1x128xf32>, vector<1x128xf32>, vector<1x128xf32>, vector<1x128xf32>, vector<1x128xf32>, vector<1x128xf32>, vector<1x128xf32>, vector<1x128xf32>, vector<1x128xf32>, vector<1x128xf32>, vector<1x128xf32>, vector<1x128xf32>, vector<1x128xf32> -> vector<16x128xf32>
    %393 = tpu.concatenate %374, %375, %376, %377, %378, %379, %380, %381, %382, %383, %384, %385, %386, %387, %388, %389 in 0 : vector<1x128xf32>, vector<1x128xf32>, vector<1x128xf32>, vector<1x128xf32>, vector<1x128xf32>, vector<1x128xf32>, vector<1x128xf32>, vector<1x128xf32>, vector<1x128xf32>, vector<1x128xf32>, vector<1x128xf32>, vector<1x128xf32>, vector<1x128xf32>, vector<1x128xf32>, vector<1x128xf32>, vector<1x128xf32> -> vector<16x128xf32>
    %394 = tpu.concatenate %390, %391, %392, %393 in 0 : vector<16x128xf32>, vector<16x128xf32>, vector<16x128xf32>, vector<16x128xf32> -> vector<64x128xf32>
    %395 = vector.extract_strided_slice %10 {offsets = [2, 0], sizes = [1, 1], strides = [1, 1]} : vector<3x1xf32> to vector<1x1xf32>
    %396 = vector.broadcast %395 : vector<1x1xf32> to vector<64x128xf32>
    %397 = arith.addf %394, %396 : vector<64x128xf32>
    %398 = arith.negf %397 : vector<64x128xf32>
    %399 = math.exp %398 : vector<64x128xf32>
    %cst_35 = arith.constant 1.000000e+00 : f32
    %400 = vector.broadcast %cst_35 : f32 to vector<64x128xf32>
    %401 = arith.addf %400, %399 : vector<64x128xf32>
    %402 = arith.divf %400, %401 : vector<64x128xf32>
    %403 = tpu.iota {dimensions = array<i32: 0>} : vector<64x128xi32>
    %c63_i32 = arith.constant 63 : i32
    %404 = vector.broadcast %c63_i32 : i32 to vector<64x128xi32>
    %405 = arith.cmpi slt, %403, %404 : vector<64x128xi32>
    %cst_36 = arith.constant 0.0158730168 : f32
    %cst_37 = arith.constant 1.562500e-02 : f32
    %406 = vector.broadcast %cst_36 : f32 to vector<64x128xf32>
    %407 = vector.broadcast %cst_37 : f32 to vector<64x128xf32>
    %408 = arith.select %405, %406, %407 : vector<64x128xi1>, vector<64x128xf32>
    %409 = vector.broadcast %35 : vector<1x128xf32> to vector<64x128xf32>
    %410 = arith.mulf %409, %408 : vector<64x128xf32>
    %cst_38 = arith.constant 0.000000e+00 : f32
    %411 = vector.broadcast %cst_38 : f32 to vector<64x128xf32>
    %412 = arith.subf %411, %410 : vector<64x128xf32>
    %cst_39 = arith.constant 1.000000e+00 : f32
    %413 = vector.broadcast %cst_39 : f32 to vector<64x128xf32>
    %414 = arith.mulf %412, %413 : vector<64x128xf32>
    %415 = arith.mulf %414, %154 : vector<64x128xf32>
    %416 = math.exp %415 : vector<64x128xf32>
    %cst_40 = arith.constant 1.000000e+00 : f32
    %417 = vector.broadcast %cst_40 : f32 to vector<64x128xf32>
    %418 = arith.subf %417, %416 : vector<64x128xf32>
    %cst_41 = arith.constant 1.000000e+00 : f32
    %419 = vector.broadcast %cst_41 : f32 to vector<64x128xf32>
    %420 = arith.subf %419, %418 : vector<64x128xf32>
    %cst_42 = arith.constant 1.000000e-15 : f32
    %421 = vector.broadcast %cst_42 : f32 to vector<64x128xf32>
    %422 = arith.addf %420, %421 : vector<64x128xf32>
    %423 = math.log %422 : vector<64x128xf32>
    %424 = tpu.iota {dimensions = array<i32: 1>} : vector<64x64xi32>
    %425 = tpu.iota {dimensions = array<i32: 0>} : vector<64x64xi32>
    %426 = arith.cmpi slt, %424, %425 : vector<64x64xi32>
    %427 = arith.extui %426 : vector<64x64xi1> to vector<64x64xi32>
    %428 = arith.sitofp %427 : vector<64x64xi32> to vector<64x64xf32>
    %cst_43 = arith.constant dense<0.000000e+00> : vector<64x128xf32>
    %429 = tpu.matmul %428, %423, %cst_43 {dimension_numbers = #tpu.dot_dimension_numbers<[1], [0], [0], [1], [0, 0, 1, 1], [], []>} : vector<64x64xf32>, vector<64x128xf32>, vector<64x128xf32> -> vector<64x128xf32>
    %430 = math.exp %429 : vector<64x128xf32>
    %431 = arith.mulf %418, %430 : vector<64x128xf32>
    %432 = arith.sitofp %403 : vector<64x128xi32> to vector<64x128xf32>
    %cst_44 = arith.constant 0.0158730168 : f32
    %433 = vector.broadcast %cst_44 : f32 to vector<64x128xf32>
    %434 = arith.mulf %432, %433 : vector<64x128xf32>
    %cst_45 = arith.constant dense<0.000000e+00> : vector<128xf32>
    %435 = vector.multi_reduction <add>, %431, %cst_45 [0] : vector<64x128xf32> to vector<128xf32>
    %436 = vector.shape_cast %435 : vector<128xf32> to vector<1x128xf32>
    %437 = arith.mulf %431, %434 : vector<64x128xf32>
    %cst_46 = arith.constant dense<0.000000e+00> : vector<128xf32>
    %438 = vector.multi_reduction <add>, %437, %cst_46 [0] : vector<64x128xf32> to vector<128xf32>
    %439 = vector.shape_cast %438 : vector<128xf32> to vector<1x128xf32>
    %cst_47 = arith.constant 1.000000e+00 : f32
    %440 = vector.broadcast %cst_47 : f32 to vector<1x128xf32>
    %441 = arith.subf %440, %436 : vector<1x128xf32>
    %cst_48 = arith.constant 1.000000e+00 : f32
    %442 = vector.broadcast %cst_48 : f32 to vector<1x128xf32>
    %443 = arith.mulf %441, %442 : vector<1x128xf32>
    %444 = arith.mulf %431, %246 : vector<64x128xf32>
    %cst_49 = arith.constant dense<0.000000e+00> : vector<128xf32>
    %445 = vector.multi_reduction <add>, %444, %cst_49 [0] : vector<64x128xf32> to vector<128xf32>
    %446 = vector.shape_cast %445 : vector<128xf32> to vector<1x128xf32>
    %447 = arith.addf %446, %443 : vector<1x128xf32>
    %448 = arith.mulf %431, %324 : vector<64x128xf32>
    %cst_50 = arith.constant dense<0.000000e+00> : vector<128xf32>
    %449 = vector.multi_reduction <add>, %448, %cst_50 [0] : vector<64x128xf32> to vector<128xf32>
    %450 = vector.shape_cast %449 : vector<128xf32> to vector<1x128xf32>
    %451 = arith.addf %450, %443 : vector<1x128xf32>
    %452 = arith.mulf %431, %402 : vector<64x128xf32>
    %cst_51 = arith.constant dense<0.000000e+00> : vector<128xf32>
    %453 = vector.multi_reduction <add>, %452, %cst_51 [0] : vector<64x128xf32> to vector<128xf32>
    %454 = vector.shape_cast %453 : vector<128xf32> to vector<1x128xf32>
    %455 = arith.addf %454, %443 : vector<1x128xf32>
    %cst_52 = arith.constant 0.000000e+00 : f32
    %456 = vector.broadcast %cst_52 : f32 to vector<3x128xf32>
    %457 = tpu.concatenate %439, %436, %447, %451, %455, %456 in 0 : vector<1x128xf32>, vector<1x128xf32>, vector<1x128xf32>, vector<1x128xf32>, vector<1x128xf32>, vector<3x128xf32> -> vector<8x128xf32>
    %c0_53 = arith.constant 0 : index
    %c0_54 = arith.constant 0 : index
    %458 = vector.load %arg4[%c0_53, %c0_54] : memref<8x128xf32, #tpu.memory_space<vmem>>, vector<8x128xf32>
    tpu.vector_store %arg4[%c0_53, %c0_54], %457 {strides = array<i32>} : memref<8x128xf32, #tpu.memory_space<vmem>>, vector<8x128xf32>,
    return
  }
  func.func @transform_0(%arg0: i32) -> (i32, i32) {
    %c0_i32 = arith.constant 0 : i32
    %c0_i32_0 = arith.constant 0 : i32
    return %c0_i32, %arg0 : i32, i32
  }
  func.func @transform_1(%arg0: i32) -> (i32, i32) {
    %c0_i32 = arith.constant 0 : i32
    %c0_i32_0 = arith.constant 0 : i32
    return %c0_i32, %arg0 : i32, i32
  }
  func.func @transform_2(%arg0: i32) -> (i32, i32) {
    %c0_i32 = arith.constant 0 : i32
    %c0_i32_0 = arith.constant 0 : i32
    %c0_i32_1 = arith.constant 0 : i32
    return %c0_i32, %c0_i32_0 : i32, i32
  }
  func.func @transform_3(%arg0: i32) -> (i32, i32) {
    %c0_i32 = arith.constant 0 : i32
    %c0_i32_0 = arith.constant 0 : i32
    return %c0_i32, %arg0 : i32, i32
  }
}

</mosaic_0001>

<bundles_post_ra>
// kernel: nerf_render.1
= control target key start
LH: loop header
LB: loop body
LE: loop exit
PB: predicated region body
PF: predicated region fallthrough
CT: control target
= control target key end

     0   :  { %s14983_s12 = smov 0   ;;  %s19826_s0 = inlined_call_operand.vmem [shape: f32[3,256], index: 0, kind: input, shape index: {}]   ;;  %s19827_s1 = inlined_call_operand.vmem [shape: f32[3,256], index: 1, kind: input, shape index: {}]   ;;  %s19828_s2 = inlined_call_operand.vmem [shape: f32[128,128], index: 2, kind: input, shape index: {}]   ;;  %s19829_s3 = inlined_call_operand.vmem [shape: f32[8,256], index: 3, kind: output, shape index: {}]  }
   0x1 LB: > { %s14109_s13 = sadd.s32 4294967295, %s14955_s12   ;;  %p14113_p0 = scmp.ge.s32.totalorder %s14955_s12, 1  ;;  %s14955_s12 = sphi %s14983_s12, %s13_s12  }
   0x2   : > { %p145_p1 = scmp.lt.s32.totalorder %s14955_s12, 3 }
   0x4   : > { %p146_p2 = pnand %p14113_p0, %p145_p1 }
   0x6   : > { %149 = sbr.rel (%p146_p2) target bundleno = 1308 (0x51c), region = 32 }
   0xb   : > { %p171_p3 = scmp.lt.s32.totalorder %s14109_s13, 1  ;;  %v19841_v0 = vmov 0.0   ;;  %v14998_v1 = vld [vmem:[%s19828_s2 + $0x18] sm:$0xff]  ;;  %v15003_v2 = vld [vmem:[%s19828_s2 + $0x8] sm:$0xff]  ;;  %v19835_v3 = vmov 4   ;;  %v15021_v5 = vld [vmem:[%s19828_s2] sm:$0xff]  ;;  %v231_v12 = vlaneseq }
   0xc   : > { %1413 = vmatprep.mubr.f32.mxu0 %v19841_v0  ;;  %1520 = vmatprep.mubr.f32.mxu1 %v19841_v0  ;;  %v15026_v6 = vld [vmem:[%s19828_s2 + $0x10] sm:$0xff]  ;;  %v14959_v8 = vmov -1e-09   ;;  %vm213_vm2 = vcmask 1042432   ;;  %vm1148_vm3 = vcmask 23552   ;;  %vm4468_vm4 = vcmask 261120  }
   0xd   : > { %s19911_s13 = smov (!%p171_p3, %s14109_s13), 1  ;;  %14756 = vset.pattern.permute.xlu1 %v19835_v3  ;;  %14755 = vset.pattern.permute.xlu0 %v19835_v3  ;;  %v15043_v15 = vand.u32 127, %v231_v12  ;;  %v15047_v23 = vshrl.u32 %v231_v12, 7  ;;  %vm7173_vm5 = vcmask 1040384   ;;  %vm7175_vm6 = vcmask 1041408   ;;  %s14961_s17 = smov 95  }
   0xe   : > { %1135 = vperm.xlu1 %14756, %v15003_v2   ;;  %1145 = vperm.xlu0 %14755, %v14998_v1   ;;  %s14114_s18 = sshll.u32 %s19911_s13, 2  ;;  %vm7493_vm7 = vcmask 130048   ;;  %vm7178_vm8 = vcmask 1043456   ;;  %vm7180_vm9 = vcmask 1044480   ;;  %vm7182_vm10 = vcmask 1045504   ;;  %s14116_s25 = sshll.u32 %s19911_s13, 3 }
   0xf   : > { %s15013_s21 = scalar_lea.vmem %s19827_s1, %s14114_s18  ;;  %s15036_s28 = scalar_lea.vmem %s19826_s0, %s14114_s18  ;;  %19849 = vst [vmem:[#allocation2_spill] sm:$0xff] %v15043_v15  ;;  %v233_v19 = vadd.s32 128, %v15043_v15  ;;  %v235_v20 = vadd.s32 384, %v15043_v15  ;;  %19850 = vst [vmem:[#allocation3_spill] sm:$0xff] %v15047_v23  ;;  %v296_v26 = vshra.s32 %v15043_v15, 7  ;;  %v15053_v31 = vsub.s32 0, %v15047_v23 }
  0x10   : > { %v15016_v4 = vld [vmem:[%s15013_s21] sm:$0x7]  ;;  %v234_v32 = vadd.s32 256, %v15043_v15  ;;  %v239_v33 = vadd.s32 896, %v15043_v15  ;;  %v238_v36 = vadd.s32 768, %v15043_v15  ;;  %v243_v37 = vadd.s32 1408, %v15043_v15 }
  0x11   : > { %v201_v7 = vand.u32 2147483647, %v15016_v4  ;;  %vm203_vm0 = vcmp.ge.f32.partialorder %v15016_v4, 0.0  ;;  %v15039_v11 = vld [vmem:[%s15036_s28] sm:$0x7]  ;;  %v297_v29 = vshra.s32 %v233_v19, 7  ;;  %v360_v38 = vcvt.s32.f32 %v296_v26 }
  0x12   : > { %1130 = vperm.xlu1 %14756, %v15021_v5   ;;  %1140 = vperm.xlu0 %14755, %v15026_v6   ;;  %v204_v9 = vsel %vm203_vm0, 1e-09, %v14959_v8  ;;  %v206_v13 = vsub.f32 -1.0, %v15039_v11  ;;  %v209_v14 = vsub.f32 1.0, %v15039_v11  ;;  %v299_v30 = vshra.s32 %v235_v20, 7 }
  0x13   : > { %vm202_vm1 = vcmp.lt.f32.partialorder %v201_v7, 1e-09  ;;  %v242_v39 = vadd.s32 1280, %v15043_v15  ;;  %v237_v40 = vadd.s32 640, %v15043_v15  ;;  %v236_v41 = vadd.s32 512, %v15043_v15 }
  0x14   : > { %v205_v10 = vsel %vm202_vm1, %v204_v9, %v15016_v4  ;;  %v361_v44 = vcvt.s32.f32 %v297_v29  ;;  %v363_v45 = vcvt.s32.f32 %v299_v30  ;;  %v298_v46 = vshra.s32 %v234_v32, 7 }
  0x15   : > { %14763 = vrcp.f32 %v205_v10  ;;  %v303_v47 = vshra.s32 %v239_v33, 7  ;;  %v241_v48 = vadd.s32 1152, %v15043_v15  ;;  %v247_v49 = vadd.s32 1920, %v15043_v15 }
  0x16   : > { %v302_v52 = vshra.s32 %v238_v36, 7  ;;  %v307_v53 = vshra.s32 %v243_v37, 7  ;;  %v424_v54 = vmul.f32 0.015873017, %v360_v38  ;;  %v306_v55 = vshra.s32 %v242_v39, 7 }
  0x17   : > { %v301_v56 = vshra.s32 %v237_v40, 7  ;;  %v300_v57 = vshra.s32 %v236_v41, 7  ;;  %v240_v60 = vadd.s32 1024, %v15043_v15  ;;  %v246_v61 = vadd.s32 1792, %v15043_v15 }
  0x18   : > { %v362_v62 = vcvt.s32.f32 %v298_v46  ;;  %v367_v63 = vcvt.s32.f32 %v303_v47  ;;  %v305_v7 = vshra.s32 %v241_v48, 7  ;;  %v311_v8 = vshra.s32 %v247_v49, 7 }
  0x19   : > { %v366_v12 = vcvt.s32.f32 %v302_v52  ;;  %v304_v20 = vshra.s32 %v240_v60, 7  ;;  %v19853_v23 = vmov 4   ;;  %vm7184_vm11 = vcmask 1046528  }
  0x1a   : > { %v369_v26 = vcvt.s32.f32 %v305_v7  ;;  %v431_v29 = vmul.f32 0.015873017, %v367_v63  ;;  %vm13767_vm14 = vcmask 523264  }
  0x1b   : > { %v430_v30 = vmul.f32 0.015873017, %v366_v12  ;;  %v15075_v37 = vcvt.s32.f32 %v304_v20 }
  0x1c   : > { %v433_v40 = vmul.f32 0.015873017, %v369_v26 }
  0x22   : > { %v14764_v16 = vpop.eup %14763 }
  0x23   : > { %v208_v17 = vmul.f32 %v14764_v16, %v206_v13  ;;  %v210_v18 = vmul.f32 %v14764_v16, %v209_v14  ;;  %v371_v13 = vcvt.s32.f32 %v307_v53  ;;  %v425_v14 = vmul.f32 0.015873017, %v361_v44 }
  0x24   : > { %v370_v16 = vcvt.s32.f32 %v306_v55 }
  0x25   : > { %v211_v21 = vmin.f32 %v208_v17, %v210_v18  ;;  %v212_v22 = vmax.f32 %v208_v17, %v210_v18  ;;  %v365_v17 = vcvt.s32.f32 %v301_v56  ;;  %v364_v18 = vcvt.s32.f32 %v300_v57 }
  0x26   : > { %v435_v32 = vmul.f32 0.015873017, %v371_v13  ;;  %v434_v33 = vmul.f32 0.015873017, %v370_v16 }
  0x27   : > { %v214_v24 = vsel %vm213_vm2, %v211_v21, -inf  ;;  %v222_v25 = vsel %vm213_vm2, %v212_v22, inf  ;;  %v310_v21 = vshra.s32 %v246_v61, 7  ;;  %v15069_v22 = vadd.s32 1664, %v15043_v15 }
  0x28   : > { %v215_v27 = vrot.slane %v214_v24, 4  ;;  %v223_v28 = vrot.slane %v222_v25, 4 }
  0x29   : > { %v374_v38 = vcvt.s32.f32 %v310_v21  ;;  %v309_v39 = vshra.s32 %v15069_v22, 7 }
  0x2a   : > { %v216_v34 = vmax.f32 %v214_v24, %v215_v27  ;;  %v224_v35 = vmin.f32 %v222_v25, %v223_v28  ;;  %v427_v24 = vmul.f32 0.015873017, %v363_v45  ;;  %v426_v25 = vmul.f32 0.015873017, %v362_v62 }
  0x2b   : > { %v375_v27 = vcvt.s32.f32 %v311_v8 }
  0x2c   : > { %v217_v42 = vrot.slane %v216_v34, 2  ;;  %v225_v43 = vrot.slane %v224_v35, 2 }
  0x2d   : > { %v439_v41 = vmul.f32 0.015873017, %v375_v27 }
  0x2e   : > { %v218_v50 = vmax.f32 %v216_v34, %v217_v42  ;;  %v226_v51 = vmin.f32 %v224_v35, %v225_v43  ;;  %v429_v34 = vmul.f32 0.015873017, %v365_v17  ;;  %v428_v35 = vmul.f32 0.015873017, %v364_v18 }
  0x2f   : > { %v15079_v42 = vadd.s32 2432, %v15043_v15  ;;  %v15082_v43 = vadd.s32 2304, %v15043_v15 }
  0x30   : > { %v219_v58 = vrot.slane %v218_v50, 1  ;;  %v227_v59 = vrot.slane %v226_v51, 1 }
  0x32   : > { %v220_v9 = vmax.f32 %v218_v50, %v219_v58  ;;  %v228_v10 = vmin.f32 %v226_v51, %v227_v59 }
  0x34   : > { %v15066_v19 = vmax.f32 %v220_v9, 0.2 }
  0x36   : > { %v229_v28 = vmax.f32 %v228_v10, %v15066_v19 }
  0x38   : > { %v15073_v36 = vsub.f32 %v229_v28, %v15066_v19 }
  0x3a   : > { %19851 = vst [vmem:[#allocation4_spill] sm:$0xff] %v15073_v36  ;;  %v489_v44 = vmul.f32 %v425_v14, %v15073_v36  ;;  %v491_v45 = vmul.f32 %v427_v24, %v15073_v36  ;;  %v488_v46 = vmul.f32 %v424_v54, %v15073_v36  ;;  %v490_v47 = vmul.f32 %v426_v25, %v15073_v36 }
  0x3b   : > { %v495_v48 = vmul.f32 %v431_v29, %v15073_v36  ;;  %v494_v49 = vmul.f32 %v430_v30, %v15073_v36  ;;  %v499_v50 = vmul.f32 %v435_v32, %v15073_v36  ;;  %v498_v51 = vmul.f32 %v434_v33, %v15073_v36 }
  0x3c   : > { %v553_v52 = vadd.f32 %v489_v44, %v15066_v19  ;;  %v555_v53 = vadd.f32 %v491_v45, %v15066_v19  ;;  %v552_v55 = vadd.f32 %v488_v46, %v15066_v19  ;;  %v554_v56 = vadd.f32 %v490_v47, %v15066_v19 }
  0x3d   : > { %v559_v54 = vadd.f32 %v495_v48, %v15066_v19  ;;  %v558_v57 = vadd.f32 %v494_v49, %v15066_v19  ;;  %v563_v58 = vadd.f32 %v499_v50, %v15066_v19  ;;  %v562_v59 = vadd.f32 %v498_v51, %v15066_v19 }
  0x3e   : > { %v623_v60 = vrot.slane %v553_v52, %v15053_v31  ;;  %v631_v61 = vrot.slane %v555_v53, %v15053_v31  ;;  %v619_v62 = vrot.slane %v552_v55, %v15053_v31  ;;  %v627_v63 = vrot.slane %v554_v56, %v15053_v31 }
  0x3f   : > { %v647_v7 = vrot.slane %v559_v54, %v15053_v31  ;;  %v643_v8 = vrot.slane %v558_v57, %v15053_v31  ;;  %v663_v9 = vrot.slane %v563_v58, %v15053_v31  ;;  %v659_v10 = vrot.slane %v562_v59, %v15053_v31 }
  0x40   : > { %v873_v12 = vmul.f32 %v623_v60, %v15016_v4  ;;  %v875_v13 = vmul.f32 %v631_v61, %v15016_v4  ;;  %v872_v14 = vmul.f32 %v619_v62, %v15016_v4  ;;  %v874_v16 = vmul.f32 %v627_v63, %v15016_v4 }
  0x41   : > { %v879_v17 = vmul.f32 %v647_v7, %v15016_v4  ;;  %v878_v18 = vmul.f32 %v643_v8, %v15016_v4  ;;  %v883_v20 = vmul.f32 %v663_v9, %v15016_v4  ;;  %v882_v21 = vmul.f32 %v659_v10, %v15016_v4 }
  0x42   : > { %v937_v22 = vadd.f32 %v873_v12, %v15039_v11  ;;  %v939_v24 = vadd.f32 %v875_v13, %v15039_v11  ;;  %v936_v25 = vadd.f32 %v872_v14, %v15039_v11  ;;  %v938_v26 = vadd.f32 %v874_v16, %v15039_v11 }
  0x43   : > { %v943_v27 = vadd.f32 %v879_v17, %v15039_v11  ;;  %v942_v28 = vadd.f32 %v878_v18, %v15039_v11  ;;  %v947_v29 = vadd.f32 %v883_v20, %v15039_v11  ;;  %v438_v30 = vmul.f32 0.015873017, %v374_v38 }
  0x44   : > { %v14118_v32 = vclamps-f32 %v937_v22, 1.0  ;;  %v14120_v33 = vclamps-f32 %v939_v24, 1.0  ;;  %v14117_v44 = vclamps-f32 %v936_v25, 1.0  ;;  %v14119_v45 = vclamps-f32 %v938_v26, 1.0 }
  0x45   : > { %v14124_v46 = vclamps-f32 %v943_v27, 1.0  ;;  %v946_v47 = vadd.f32 %v882_v21, %v15039_v11  ;;  %v373_v48 = vcvt.s32.f32 %v309_v39  ;;  %v315_v49 = vshra.s32 %v15079_v42, 7 }
  0x46   : > { %14181 = vmatprep.subr.msk.mxu0 %vm213_vm2, %v14118_v32  ;;  %14733 = vmatprep.subr.msk.mxu1 %vm213_vm2, %v14120_v33  ;;  %v14123_v50 = vclamps-f32 %v942_v28, 1.0  ;;  %v493_v51 = vmul.f32 %v429_v34, %v15073_v36  ;;  %v492_v52 = vmul.f32 %v428_v35, %v15073_v36  ;;  %v497_v38 = vmul.f32 %v433_v40, %v15073_v36 }
  0x47   : > { %14182 = vmatpush1.msk.msra.mxu0 %vm213_vm2, %v14117_v44  ;;  %14734 = vmatpush1.msk.msra.mxu1 %vm213_vm2, %v14119_v45  ;;  %v14128_v53 = vclamps-f32 %v947_v29, 1.0  ;;  %v503_v39 = vmul.f32 %v439_v41, %v15073_v36  ;;  %v502_v42 = vmul.f32 %v438_v30, %v15073_v36  ;;  %v255_v55 = vadd.s32 2944, %v15043_v15 }
  0x48   : > { %14183 = vmatmul.mubr.msk.f32.vlgmr.msra.gmra.mxu0 %vm1148_vm3, %v15021_v5  ;;  %14192 = vmatmul.mubr.msk.f32.vlgmr.msra.gmra.mxu1 %vm1148_vm3, %v14998_v1  ;;  %v557_v34 = vadd.f32 %v493_v51, %v15066_v19  ;;  %v556_v35 = vadd.f32 %v492_v52, %v15066_v19  ;;  %v561_v40 = vadd.f32 %v497_v38, %v15066_v19  ;;  %v432_v41 = vmul.f32 0.015873017, %v15075_v37 }
  0x49   : > { %14199 = vmatprep.subr.msk.mxu1 %vm213_vm2, %v14124_v46  ;;  %1419 = vmatprep.mubr.f32.mxu0 %v19841_v0  ;;  %v567_v56 = vadd.f32 %v503_v39, %v15066_v19  ;;  %v379_v54 = vcvt.s32.f32 %v315_v49  ;;  %v314_v57 = vshra.s32 %v15082_v43, 7  ;;  %v14127_v58 = vclamps-f32 %v946_v47, 1.0 }
  0x4a   : > { %14200 = vmatpush1.msk.msra.mxu1 %vm213_vm2, %v14123_v50  ;;  %1680 = vmatprep.mubr.f32.mxu1 %v19841_v0  ;;  %v639_v59 = vrot.slane %v557_v34, %v15053_v31  ;;  %v635_v60 = vrot.slane %v556_v35, %v15053_v31  ;;  %v566_v61 = vadd.f32 %v502_v42, %v15066_v19  ;;  %v437_v43 = vmul.f32 0.015873017, %v373_v48 }
  0x4b   : > { %14187 = vmatprep.subr.msk.mxu0 %vm213_vm2, %v14120_v33  ;;  %14211 = vmatprep.subr.msk.mxu1 %vm213_vm2, %v14128_v53  ;;  %v655_v37 = vrot.slane %v561_v40, %v15053_v31  ;;  %v679_v62 = vrot.slane %v567_v56, %v15053_v31  ;;  %v319_v63 = vshra.s32 %v255_v55, 7  ;;  %v244_v8 = vadd.s32 1536, %v15043_v15 }
  0x4c   : > { %14184 = vmatmul.mubr.msk.f32.gmra.mxu0 %vm1148_vm3, %v15003_v2  ;;  %14201 = vmatmul.mubr.msk.f32.vlgmr.msra.gmra.mxu1 %vm1148_vm3, %v15021_v5  ;;  %v877_v7 = vmul.f32 %v639_v59, %v15016_v4  ;;  %v496_v9 = vmul.f32 %v432_v41, %v15073_v36  ;;  %v378_v12 = vcvt.s32.f32 %v314_v57  ;;  %v249_v13 = vadd.s32 2176, %v15043_v15 }
  0x4d   : > { %14188 = vmatpush1.msk.msra.mxu0 %vm213_vm2, %v14119_v45  ;;  %1425 = vmatprep.mubr.f32.mxu0 %v19841_v0  ;;  %v887_v10 = vmul.f32 %v679_v62, %v15016_v4  ;;  %v876_v16 = vmul.f32 %v635_v60, %v15016_v4  ;;  %v675_v17 = vrot.slane %v566_v61, %v15053_v31  ;;  %v443_v18 = vmul.f32 0.015873017, %v379_v54 }
  0x4e   : > { %1686 = vmatprep.mubr.f32.mxu1 %v19841_v0  ;;  %14212 = vmatpush1.msk.msra.mxu1 %vm213_vm2, %v14127_v58  ;;  %v941_v14 = vadd.f32 %v877_v7, %v15039_v11  ;;  %v881_v20 = vmul.f32 %v655_v37, %v15016_v4  ;;  %v501_v22 = vmul.f32 %v437_v43, %v15073_v36  ;;  %v383_v24 = vcvt.s32.f32 %v319_v63 }
  0x4f   : > { %v951_v21 = vadd.f32 %v887_v10, %v15039_v11  ;;  %v560_v26 = vadd.f32 %v496_v9, %v15066_v19  ;;  %v308_v28 = vshra.s32 %v244_v8, 7  ;;  %v313_v29 = vshra.s32 %v249_v13, 7 }
  0x50   : > { %14185 = vmatmul.mubr.msk.f32.gmra.mxu0 %vm1148_vm3, %v15026_v6  ;;  %14202 = vmatmul.mubr.msk.f32.gmra.mxu1 %vm1148_vm3, %v15003_v2  ;;  %v14122_v25 = vclamps-f32 %v941_v14, 1.0  ;;  %v940_v30 = vadd.f32 %v876_v16, %v15039_v11  ;;  %v886_v32 = vmul.f32 %v675_v17, %v15016_v4  ;;  %v507_v33 = vmul.f32 %v443_v18, %v15073_v36 }
  0x51   : > { %1431 = vmatprep.mubr.f32.mxu0 %v19841_v0  ;;  %1692 = vmatprep.mubr.f32.mxu1 %v19841_v0  ;;  %v14132_v27 = vclamps-f32 %v951_v21, 1.0  ;;  %v442_v44 = vmul.f32 0.015873017, %v378_v12  ;;  %v945_v45 = vadd.f32 %v881_v20, %v15039_v11  ;;  %v565_v46 = vadd.f32 %v501_v22, %v15066_v19 }
  0x52   : > { %14193 = vmatprep.subr.msk.mxu0 %vm213_vm2, %v14122_v25  ;;  %v447_v47 = vmul.f32 0.015873017, %v383_v24  ;;  %v571_v48 = vadd.f32 %v507_v33, %v15066_v19  ;;  %v651_v49 = vrot.slane %v560_v26, %v15053_v31  ;;  %v372_v50 = vcvt.s32.f32 %v308_v28 }
  0x53   : > { %14223 = vmatprep.subr.msk.mxu1 %vm213_vm2, %v14132_v27  ;;  %v377_v51 = vcvt.s32.f32 %v313_v29  ;;  %v254_v52 = vadd.s32 2816, %v15043_v15  ;;  %v14121_v38 = vclamps-f32 %v940_v30, 1.0  ;;  %v950_v53 = vadd.f32 %v886_v32, %v15039_v11 }
  0x54   : > { %14186 = vmatmul.mubr.msk.f32.gmra.mxu0 %vm1148_vm3, %v14998_v1  ;;  %14203 = vmatmul.mubr.msk.f32.gmra.mxu1 %vm1148_vm3, %v15026_v6  ;;  %v695_v39 = vrot.slane %v571_v48, %v15053_v31  ;;  %v506_v42 = vmul.f32 %v442_v44, %v15073_v36  ;;  %v14126_v55 = vclamps-f32 %v945_v45, 1.0  ;;  %v671_v34 = vrot.slane %v565_v46, %v15053_v31 }
  0x55   : > { %1502 = vmatprep.mubr.f32.mxu0 %v19841_v0  ;;  %1698 = vmatprep.mubr.f32.mxu1 %v19841_v0  ;;  %v511_v35 = vmul.f32 %v447_v47, %v15073_v36  ;;  %v259_v40 = vadd.s32 3456, %v15043_v15  ;;  %v436_v56 = vmul.f32 0.015873017, %v372_v50  ;;  %v318_v54 = vshra.s32 %v254_v52, 7 }
  0x56   : > { %v891_v41 = vmul.f32 %v695_v39, %v15016_v4  ;;  %v880_v57 = vmul.f32 %v651_v49, %v15016_v4  ;;  %v14131_v58 = vclamps-f32 %v950_v53, 1.0  ;;  %v570_v60 = vadd.f32 %v506_v42, %v15066_v19 }
  0x57   : > { %v885_v61 = vmul.f32 %v671_v34, %v15016_v4  ;;  %v441_v37 = vmul.f32 0.015873017, %v377_v51  ;;  %v575_v62 = vadd.f32 %v511_v35, %v15066_v19  ;;  %v323_v43 = vshra.s32 %v259_v40, 7 }
  0x58   : > { %14189 = vmatmul.mubr.msk.f32.vlgmr.msra.gmra.mxu0 %vm1148_vm3, %v15021_v5  ;;  %14204 = vmatmul.mubr.msk.f32.gmra.mxu1 %vm1148_vm3, %v14998_v1  ;;  %v955_v59 = vadd.f32 %v891_v41, %v15039_v11  ;;  %v248_v7 = vadd.s32 2048, %v15043_v15  ;;  %v253_v8 = vadd.s32 2688, %v15043_v15  ;;  %v944_v9 = vadd.f32 %v880_v57, %v15039_v11 }
  0x59   : > { %1508 = vmatprep.mubr.f32.mxu0 %v19841_v0  ;;  %1858 = vmatprep.mubr.f32.mxu1 %v19841_v0  ;;  %v500_v10 = vmul.f32 %v436_v56, %v15073_v36  ;;  %v691_v12 = vrot.slane %v570_v60, %v15053_v31  ;;  %v382_v13 = vcvt.s32.f32 %v318_v54  ;;  %v949_v14 = vadd.f32 %v885_v61, %v15039_v11 }
  0x5a   : > { %14194 = vmatpush1.msk.msra.mxu0 %vm213_vm2, %v14121_v38  ;;  %v14136_v63 = vclamps-f32 %v955_v59, 1.0  ;;  %v505_v16 = vmul.f32 %v441_v37, %v15073_v36  ;;  %v711_v17 = vrot.slane %v575_v62, %v15053_v31  ;;  %v387_v18 = vcvt.s32.f32 %v323_v43 }
  0x5b   : > { %14205 = vmatprep.subr.msk.mxu0 %vm213_vm2, %v14126_v55  ;;  %v312_v20 = vshra.s32 %v248_v7, 7  ;;  %v317_v21 = vshra.s32 %v253_v8, 7  ;;  %v14125_v22 = vclamps-f32 %v944_v9, 1.0  ;;  %v564_v24 = vadd.f32 %v500_v10, %v15066_v19 }
  0x5c   : > { %14190 = vmatmul.mubr.msk.f32.gmra.mxu0 %vm1148_vm3, %v15003_v2  ;;  %14213 = vmatmul.mubr.msk.f32.vlgmr.msra.gmra.mxu1 %vm1148_vm3, %v15021_v5  ;;  %v890_v25 = vmul.f32 %v691_v12, %v15016_v4  ;;  %v446_v26 = vmul.f32 0.015873017, %v382_v13  ;;  %v14130_v27 = vclamps-f32 %v949_v14, 1.0  ;;  %v569_v28 = vadd.f32 %v505_v16, %v15066_v19 }
  0x5d   : > { %1514 = vmatprep.mubr.f32.mxu0 %v19841_v0  ;;  %1864 = vmatprep.mubr.f32.mxu1 %v19841_v0  ;;  %v895_v29 = vmul.f32 %v711_v17, %v15016_v4  ;;  %v451_v30 = vmul.f32 0.015873017, %v387_v18  ;;  %v376_v32 = vcvt.s32.f32 %v312_v20  ;;  %v258_v33 = vadd.s32 3328, %v15043_v15 }
  0x5e   : > { %14224 = vmatpush1.msk.msra.mxu1 %vm213_vm2, %v14131_v58  ;;  %v667_v44 = vrot.slane %v564_v24, %v15053_v31  ;;  %v954_v45 = vadd.f32 %v890_v25, %v15039_v11  ;;  %v510_v46 = vmul.f32 %v446_v26, %v15073_v36  ;;  %v381_v47 = vcvt.s32.f32 %v317_v21 }
  0x5f   : > { %14235 = vmatprep.subr.msk.mxu1 %vm213_vm2, %v14136_v63  ;;  %v687_v48 = vrot.slane %v569_v28, %v15053_v31  ;;  %v959_v49 = vadd.f32 %v895_v29, %v15039_v11  ;;  %v515_v50 = vmul.f32 %v451_v30, %v15073_v36  ;;  %v263_v51 = vadd.s32 3968, %v15043_v15 }
  0x60   : > { %14191 = vmatmul.mubr.msk.f32.gmra.mxu0 %vm1148_vm3, %v15026_v6  ;;  %14214 = vmatmul.mubr.msk.f32.gmra.mxu1 %vm1148_vm3, %v15003_v2  ;;  %v440_v52 = vmul.f32 0.015873017, %v376_v32  ;;  %v322_v38 = vshra.s32 %v258_v33, 7  ;;  %v884_v53 = vmul.f32 %v667_v44, %v15016_v4  ;;  %v14135_v39 = vclamps-f32 %v954_v45, 1.0 }
  0x61   : > { %1591 = vmatprep.mubr.f32.mxu0 %v19841_v0  ;;  %1870 = vmatprep.mubr.f32.mxu1 %v19841_v0  ;;  %v574_v42 = vadd.f32 %v510_v46, %v15066_v19  ;;  %v445_v55 = vmul.f32 0.015873017, %v381_v47  ;;  %v889_v34 = vmul.f32 %v687_v48, %v15016_v4  ;;  %v14140_v35 = vclamps-f32 %v959_v49, 1.0 }
  0x62   : > { %v579_v40 = vadd.f32 %v515_v50, %v15066_v19  ;;  %v327_v41 = vshra.s32 %v263_v51, 7  ;;  %v252_v56 = vadd.s32 2560, %v15043_v15  ;;  %v257_v54 = vadd.s32 3200, %v15043_v15 }
  0x63   : > { %v948_v57 = vadd.f32 %v884_v53, %v15039_v11  ;;  %v504_v58 = vmul.f32 %v440_v52, %v15073_v36  ;;  %v707_v59 = vrot.slane %v574_v42, %v15053_v31  ;;  %v386_v60 = vcvt.s32.f32 %v322_v38 }
  0x64   : > { %14195 = vmatmul.mubr.msk.f32.vlgmr.msra.gmra.mxu0 %vm1148_vm3, %v15021_v5  ;;  %14215 = vmatmul.mubr.msk.f32.gmra.mxu1 %vm1148_vm3, %v15026_v6  ;;  %v953_v61 = vadd.f32 %v889_v34, %v15039_v11  ;;  %v509_v37 = vmul.f32 %v445_v55, %v15073_v36  ;;  %v727_v62 = vrot.slane %v579_v40, %v15053_v31  ;;  %v391_v43 = vcvt.s32.f32 %v327_v41 }
  0x65   : > { %1597 = vmatprep.mubr.f32.mxu0 %v19841_v0  ;;  %1876 = vmatprep.mubr.f32.mxu1 %v19841_v0  ;;  %v316_v63 = vshra.s32 %v252_v56, 7  ;;  %v321_v7 = vshra.s32 %v257_v54, 7  ;;  %v14129_v8 = vclamps-f32 %v948_v57, 1.0  ;;  %v568_v9 = vadd.f32 %v504_v58, %v15066_v19 }
  0x66   : > { %14206 = vmatpush1.msk.msra.mxu0 %vm213_vm2, %v14125_v22  ;;  %v894_v10 = vmul.f32 %v707_v59, %v15016_v4  ;;  %v450_v12 = vmul.f32 0.015873017, %v386_v60  ;;  %v14134_v13 = vclamps-f32 %v953_v61, 1.0  ;;  %v573_v14 = vadd.f32 %v509_v37, %v15066_v19 }
  0x67   : > { %14217 = vmatprep.subr.msk.mxu0 %vm213_vm2, %v14130_v27  ;;  %v899_v16 = vmul.f32 %v727_v62, %v15016_v4  ;;  %v455_v17 = vmul.f32 0.015873017, %v391_v43  ;;  %v380_v18 = vcvt.s32.f32 %v316_v63  ;;  %v385_v20 = vcvt.s32.f32 %v321_v7 }
  0x68   : > { %14196 = vmatmul.mubr.msk.f32.gmra.mxu0 %vm1148_vm3, %v15003_v2  ;;  %14216 = vmatmul.mubr.msk.f32.gmra.mxu1 %vm1148_vm3, %v14998_v1  ;;  %v683_v21 = vrot.slane %v568_v9, %v15053_v31  ;;  %v958_v22 = vadd.f32 %v894_v10, %v15039_v11  ;;  %v514_v24 = vmul.f32 %v450_v12, %v15073_v36  ;;  %v262_v25 = vadd.s32 3840, %v15043_v15 }
  0x69   : > { %1603 = vmatprep.mubr.f32.mxu0 %v19841_v0  ;;  %2036 = vmatprep.mubr.f32.mxu1 %v19841_v0  ;;  %v703_v26 = vrot.slane %v573_v14, %v15053_v31  ;;  %v963_v27 = vadd.f32 %v899_v16, %v15039_v11  ;;  %v519_v28 = vmul.f32 %v455_v17, %v15073_v36  ;;  %v267_v29 = vadd.s32 4480, %v15043_v15 }
  0x6a   : > { %v444_v30 = vmul.f32 0.015873017, %v380_v18  ;;  %v449_v32 = vmul.f32 0.015873017, %v385_v20  ;;  %v888_v33 = vmul.f32 %v683_v21, %v15016_v4  ;;  %v14139_v44 = vclamps-f32 %v958_v22, 1.0 }
  0x6b   : > { %v578_v45 = vadd.f32 %v514_v24, %v15066_v19  ;;  %v326_v46 = vshra.s32 %v262_v25, 7  ;;  %v893_v47 = vmul.f32 %v703_v26, %v15016_v4  ;;  %v14144_v48 = vclamps-f32 %v963_v27, 1.0 }
  0x6c   : > { %14197 = vmatmul.mubr.msk.f32.gmra.mxu0 %vm1148_vm3, %v15026_v6  ;;  %14225 = vmatmul.mubr.msk.f32.vlgmr.msra.gmra.mxu1 %vm1148_vm3, %v15021_v5  ;;  %v583_v49 = vadd.f32 %v519_v28, %v15066_v19  ;;  %v331_v50 = vshra.s32 %v267_v29, 7  ;;  %v256_v51 = vadd.s32 3072, %v15043_v15  ;;  %v261_v52 = vadd.s32 3712, %v15043_v15 }
  0x6d   : > { %1609 = vmatprep.mubr.f32.mxu0 %v19841_v0  ;;  %2042 = vmatprep.mubr.f32.mxu1 %v19841_v0  ;;  %v952_v38 = vadd.f32 %v888_v33, %v15039_v11  ;;  %v508_v53 = vmul.f32 %v444_v30, %v15073_v36  ;;  %v390_v42 = vcvt.s32.f32 %v326_v46  ;;  %v957_v55 = vadd.f32 %v893_v47, %v15039_v11 }
  0x6e   : > { %14236 = vmatpush1.msk.msra.mxu1 %vm213_vm2, %v14135_v39  ;;  %v723_v39 = vrot.slane %v578_v45, %v15053_v31  ;;  %v513_v34 = vmul.f32 %v449_v32, %v15073_v36  ;;  %v395_v40 = vcvt.s32.f32 %v331_v50  ;;  %v320_v41 = vshra.s32 %v256_v51, 7 }
  0x6f   : > { %14247 = vmatprep.subr.msk.mxu1 %vm213_vm2, %v14140_v35  ;;  %v743_v35 = vrot.slane %v583_v49, %v15053_v31  ;;  %v325_v56 = vshra.s32 %v261_v52, 7  ;;  %v14133_v54 = vclamps-f32 %v952_v38, 1.0  ;;  %v572_v57 = vadd.f32 %v508_v53, %v15066_v19 }
  0x70   : > { %14198 = vmatmul.mubr.msk.f32.gmra.mxu0 %vm1148_vm3, %v14998_v1  ;;  %14226 = vmatmul.mubr.msk.f32.gmra.mxu1 %vm1148_vm3, %v15003_v2  ;;  %v898_v58 = vmul.f32 %v723_v39, %v15016_v4  ;;  %v454_v59 = vmul.f32 0.015873017, %v390_v42  ;;  %v14138_v60 = vclamps-f32 %v957_v55, 1.0  ;;  %v577_v61 = vadd.f32 %v513_v34, %v15066_v19 }
  0x71   : > { %1769 = vmatprep.mubr.f32.mxu0 %v19841_v0  ;;  %2048 = vmatprep.mubr.f32.mxu1 %v19841_v0  ;;  %v903_v37 = vmul.f32 %v743_v35, %v15016_v4  ;;  %v459_v62 = vmul.f32 0.015873017, %v395_v40  ;;  %v384_v43 = vcvt.s32.f32 %v320_v41  ;;  %v266_v63 = vadd.s32 4352, %v15043_v15 }
  0x72   : > { %v699_v7 = vrot.slane %v572_v57, %v15053_v31  ;;  %v518_v9 = vmul.f32 %v454_v59, %v15073_v36  ;;  %v389_v10 = vcvt.s32.f32 %v325_v56  ;;  %v719_v12 = vrot.slane %v577_v61, %v15053_v31 }
  0x73   : > { %v523_v14 = vmul.f32 %v459_v62, %v15073_v36  ;;  %v271_v16 = vadd.s32 4992, %v15043_v15  ;;  %v448_v17 = vmul.f32 0.015873017, %v384_v43  ;;  %v330_v18 = vshra.s32 %v266_v63, 7 }
  0x74   : > { %14207 = vmatmul.mubr.msk.f32.vlgmr.msra.gmra.mxu0 %vm1148_vm3, %v15021_v5  ;;  %14227 = vmatmul.mubr.msk.f32.gmra.mxu1 %vm1148_vm3, %v15026_v6  ;;  %v892_v20 = vmul.f32 %v699_v7, %v15016_v4  ;;  %v582_v22 = vadd.f32 %v518_v9, %v15066_v19  ;;  %v453_v24 = vmul.f32 0.015873017, %v389_v10  ;;  %v897_v25 = vmul.f32 %v719_v12, %v15016_v4 }
  0x75   : > { %1775 = vmatprep.mubr.f32.mxu0 %v19841_v0  ;;  %2054 = vmatprep.mubr.f32.mxu1 %v19841_v0  ;;  %v587_v27 = vadd.f32 %v523_v14, %v15066_v19  ;;  %v335_v28 = vshra.s32 %v271_v16, 7  ;;  %v260_v29 = vadd.s32 3584, %v15043_v15  ;;  %v394_v30 = vcvt.s32.f32 %v330_v18 }
  0x76   : > { %14218 = vmatpush1.msk.msra.mxu0 %vm213_vm2, %v14129_v8  ;;  %v962_v8 = vadd.f32 %v898_v58, %v15039_v11  ;;  %v956_v32 = vadd.f32 %v892_v20, %v15039_v11  ;;  %v512_v33 = vmul.f32 %v448_v17, %v15073_v36  ;;  %v265_v45 = vadd.s32 4224, %v15043_v15 }
  0x77   : > { %14229 = vmatprep.subr.msk.mxu0 %vm213_vm2, %v14134_v13  ;;  %v967_v13 = vadd.f32 %v903_v37, %v15039_v11  ;;  %v961_v46 = vadd.f32 %v897_v25, %v15039_v11  ;;  %v517_v47 = vmul.f32 %v453_v24, %v15073_v36  ;;  %v399_v49 = vcvt.s32.f32 %v335_v28  ;;  %v15452_v24 = vld [vmem:[%s19828_s2 + $0x8] sm:$0xff] }
  0x78   : > { %14208 = vmatmul.mubr.msk.f32.gmra.mxu0 %vm1148_vm3, %v15003_v2  ;;  %14228 = vmatmul.mubr.msk.f32.gmra.mxu1 %vm1148_vm3, %v14998_v1  ;;  %v14143_v21 = vclamps-f32 %v962_v8, 1.0  ;;  %v324_v50 = vshra.s32 %v260_v29, 7  ;;  %v458_v51 = vmul.f32 0.015873017, %v394_v30  ;;  %v14137_v52 = vclamps-f32 %v956_v32, 1.0 }
  0x79   : > { %1781 = vmatprep.mubr.f32.mxu0 %v19841_v0  ;;  %2214 = vmatprep.mubr.f32.mxu1 %v19841_v0  ;;  %v14148_v26 = vclamps-f32 %v967_v13, 1.0  ;;  %v576_v38 = vadd.f32 %v512_v33, %v15066_v19  ;;  %v329_v39 = vshra.s32 %v265_v45, 7  ;;  %v14142_v42 = vclamps-f32 %v961_v46, 1.0  ;;  %v15468_v46 = vld [vmem:[%s19828_s2] sm:$0xff] }
  0x7a   : > { %v581_v55 = vadd.f32 %v517_v47, %v15066_v19  ;;  %v463_v35 = vmul.f32 0.015873017, %v399_v49  ;;  %v388_v40 = vcvt.s32.f32 %v324_v50  ;;  %v270_v41 = vadd.s32 4864, %v15043_v15  ;;  %v15475_v47 = vld [vmem:[%s19828_s2 + $0x10] sm:$0xff]  ;;  %v15484_v50 = vld [vmem:[%s15036_s28] sm:$0x7]  ;;  %s182_s28 = scalar_lea.vmem %s19829_s3, %s14116_s25 }
  0x7b   : > { %v715_v56 = vrot.slane %v576_v38, %v15053_v31  ;;  %v522_v57 = vmul.f32 %v458_v51, %v15073_v36  ;;  %v393_v58 = vcvt.s32.f32 %v329_v39  ;;  %v275_v37 = vadd.s32 5504, %v15043_v15 }
  0x7c   : > { %14209 = vmatmul.mubr.msk.f32.gmra.mxu0 %vm1148_vm3, %v15026_v6  ;;  %14237 = vmatmul.mubr.msk.f32.vlgmr.msra.gmra.mxu1 %vm1148_vm3, %v15021_v5  ;;  %v735_v59 = vrot.slane %v581_v55, %v15053_v31  ;;  %v527_v61 = vmul.f32 %v463_v35, %v15073_v36  ;;  %v452_v62 = vmul.f32 0.015873017, %v388_v40  ;;  %v334_v43 = vshra.s32 %v270_v41, 7 }
  0x7d   : > { %1787 = vmatprep.mubr.f32.mxu0 %v19841_v0  ;;  %2220 = vmatprep.mubr.f32.mxu1 %v19841_v0  ;;  %v896_v63 = vmul.f32 %v715_v56, %v15016_v4  ;;  %v586_v8 = vadd.f32 %v522_v57, %v15066_v19  ;;  %v457_v9 = vmul.f32 0.015873017, %v393_v58  ;;  %v339_v13 = vshra.s32 %v275_v37, 7 }
  0x7e   : > { %14248 = vmatpush1.msk.msra.mxu1 %vm213_vm2, %v14139_v44  ;;  %v739_v44 = vrot.slane %v582_v22, %v15053_v31  ;;  %v901_v10 = vmul.f32 %v735_v59, %v15016_v4  ;;  %v264_v14 = vadd.s32 4096, %v15043_v15  ;;  %v269_v20 = vadd.s32 4736, %v15043_v15  ;;  %v15445_v22 = vld [vmem:[%s19828_s2 + $0x18] sm:$0xff] }
  0x7f   : > { %14259 = vmatprep.subr.msk.mxu1 %vm213_vm2, %v14144_v48  ;;  %v759_v48 = vrot.slane %v587_v27, %v15053_v31  ;;  %v755_v16 = vrot.slane %v586_v8, %v15053_v31  ;;  %v521_v17 = vmul.f32 %v457_v9, %v15073_v36  ;;  %v15460_v27 = vld [vmem:[%s15013_s21] sm:$0x7]  ;;  %v273_v8 = vadd.s32 5248, %v15043_v15 }
  0x80   : > { %14210 = vmatmul.mubr.msk.f32.gmra.mxu0 %vm1148_vm3, %v14998_v1  ;;  %14238 = vmatmul.mubr.msk.f32.gmra.mxu1 %vm1148_vm3, %v15003_v2  ;;  %v902_v53 = vmul.f32 %v739_v44, %v15016_v4  ;;  %v328_v25 = vshra.s32 %v264_v14, 7  ;;  %v333_v44 = vshra.s32 %v269_v20, 7 }
  0x81   : > { %1947 = vmatprep.mubr.f32.mxu0 %v19841_v0  ;;  %2226 = vmatprep.mubr.f32.mxu1 %v19841_v0  ;;  %v907_v34 = vmul.f32 %v759_v48, %v15016_v4  ;;  %v960_v4 = vadd.f32 %v896_v63, %v15039_v11  ;;  %v906_v28 = vmul.f32 %v15460_v27, %v755_v16 }
  0x82   : > { %v585_v29 = vadd.f32 %v521_v17, %v15066_v19  ;;  %v392_v49 = vcvt.s32.f32 %v328_v25  ;;  %v337_v17 = vshra.s32 %v273_v8, 7 }
  0x83   : > { %v970_v51 = vadd.f32 %v15484_v50, %v906_v28 }
  0x84   : > { %14219 = vmatmul.mubr.msk.f32.vlgmr.msra.gmra.mxu0 %vm1148_vm3, %v15021_v5  ;;  %14239 = vmatmul.mubr.msk.f32.gmra.mxu1 %vm1148_vm3, %v15026_v6  ;;  %v456_v40 = vmul.f32 0.015873017, %v392_v49  ;;  %v401_v28 = vcvt.s32.f32 %v337_v17 }
  0x85   : > { %1953 = vmatprep.mubr.f32.mxu0 %v19841_v0  ;;  %2232 = vmatprep.mubr.f32.mxu1 %v19841_v0  ;;  %v14151_v41 = vclamps-f32 %v970_v51, 1.0 }
  0x86   : > { %14230 = vmatpush1.msk.msra.mxu0 %vm213_vm2, %v14133_v54  ;;  %v966_v54 = vadd.f32 %v902_v53, %v15039_v11  ;;  %v274_v53 = vadd.s32 5376, %v15043_v15  ;;  %v520_v37 = vmul.f32 %v456_v40, %v15073_v36 }
  0x87   : > { %14241 = vmatprep.subr.msk.mxu0 %vm213_vm2, %v14138_v60  ;;  %v971_v60 = vadd.f32 %v907_v34, %v15039_v11  ;;  %v279_v34 = vadd.s32 6016, %v15043_v15 }
  0x88   : > { %14220 = vmatmul.mubr.msk.f32.gmra.mxu0 %vm1148_vm3, %v15003_v2  ;;  %14240 = vmatmul.mubr.msk.f32.gmra.mxu1 %vm1148_vm3, %v14998_v1  ;;  %v14147_v7 = vclamps-f32 %v966_v54, 1.0  ;;  %v338_v57 = vshra.s32 %v274_v53, 7 }
  0x89   : > { %1959 = vmatprep.mubr.f32.mxu0 %v19841_v0  ;;  %2392 = vmatprep.mubr.f32.mxu1 %v19841_v0  ;;  %v14152_v12 = vclamps-f32 %v971_v60, 1.0 }
  0x8c   : > { %14221 = vmatmul.mubr.msk.f32.gmra.mxu0 %vm1148_vm3, %v15026_v6  ;;  %14249 = vmatmul.mubr.msk.f32.vlgmr.msra.gmra.mxu1 %vm1148_vm3, %v15021_v5 }
  0x8d   : > { %1965 = vmatprep.mubr.f32.mxu0 %v19841_v0  ;;  %2398 = vmatprep.mubr.f32.mxu1 %v19841_v0 }
  0x8e   : > { %14260 = vmatpush1.msk.msra.mxu1 %vm213_vm2, %v14143_v21  ;;  %v403_v21 = vcvt.s32.f32 %v339_v13  ;;  %v584_v13 = vadd.f32 %v520_v37, %v15066_v19 }
  0x8f   : > { %14271 = vmatprep.subr.msk.mxu1 %vm213_vm2, %v14148_v26  ;;  %v14141_v26 = vclamps-f32 %v960_v4, 1.0 }
  0x90   : > { %14222 = vmatmul.mubr.msk.f32.gmra.mxu0 %vm1148_vm3, %v14998_v1  ;;  %14250 = vmatmul.mubr.msk.f32.gmra.mxu1 %vm1148_vm3, %v15003_v2  ;;  %v467_v45 = vmul.f32 0.015873017, %v403_v21  ;;  %v747_v21 = vrot.slane %v584_v13, %v15053_v31 }
  0x91   : > { %2125 = vmatprep.mubr.f32.mxu0 %v19841_v0  ;;  %2404 = vmatprep.mubr.f32.mxu1 %v19841_v0 }
  0x92   : > { %v531_v55 = vmul.f32 %v467_v45, %v15073_v36  ;;  %v904_v45 = vmul.f32 %v15460_v27, %v747_v21 }
  0x94   : > { %14231 = vmatmul.mubr.msk.f32.vlgmr.msra.gmra.mxu0 %vm1148_vm3, %v15021_v5  ;;  %14251 = vmatmul.mubr.msk.f32.gmra.mxu1 %vm1148_vm3, %v15026_v6  ;;  %v595_v60 = vadd.f32 %v531_v55, %v15066_v19  ;;  %v968_v40 = vadd.f32 %v15484_v50, %v904_v45  ;;  %v276_v45 = vadd.s32 5632, %v15043_v15 }
  0x95   : > { %2131 = vmatprep.mubr.f32.mxu0 %v19841_v0  ;;  %2410 = vmatprep.mubr.f32.mxu1 %v19841_v0 }
  0x96   : > { %14242 = vmatpush1.msk.msra.mxu0 %vm213_vm2, %v14137_v52  ;;  %v751_v52 = vrot.slane %v585_v29, %v15053_v31  ;;  %v278_v29 = vadd.s32 5888, %v15043_v15 }
  0x97   : > { %14253 = vmatprep.subr.msk.mxu0 %vm213_vm2, %v14142_v42  ;;  %v397_v42 = vcvt.s32.f32 %v333_v44  ;;  %v283_v44 = vadd.s32 6528, %v15043_v15 }
  0x98   : > { %14232 = vmatmul.mubr.msk.f32.gmra.mxu0 %vm1148_vm3, %v15003_v2  ;;  %14252 = vmatmul.mubr.msk.f32.gmra.mxu1 %vm1148_vm3, %v14998_v1  ;;  %v591_v2 = vadd.f32 %v527_v61, %v15066_v19  ;;  %v516_v1 = vmul.f32 %v452_v62, %v15073_v36  ;;  %v905_v56 = vmul.f32 %v15460_v27, %v751_v52  ;;  %v343_v61 = vshra.s32 %v279_v34, 7 }
  0x99   : > { %2137 = vmatprep.mubr.f32.mxu0 %v19841_v0  ;;  %2570 = vmatprep.mubr.f32.mxu1 %v19841_v0  ;;  %v461_v59 = vmul.f32 0.015873017, %v397_v42  ;;  %v268_v62 = vadd.s32 4608, %v15043_v15  ;;  %v465_v52 = vmul.f32 0.015873017, %v401_v28  ;;  %v347_v55 = vshra.s32 %v283_v44, 7 }
  0x9a   : > { %v775_v18 = vrot.slane %v591_v2, %v15053_v31  ;;  %v969_v9 = vadd.f32 %v15484_v50, %v905_v56  ;;  %v407_v2 = vcvt.s32.f32 %v343_v61 }
  0x9b   : > { %v529_v56 = vmul.f32 %v465_v52, %v15073_v36  ;;  %v281_v52 = vadd.s32 6272, %v15043_v15 }
  0x9c   : > { %14233 = vmatmul.mubr.msk.f32.gmra.mxu0 %vm1148_vm3, %v15026_v6  ;;  %14261 = vmatmul.mubr.msk.f32.vlgmr.msra.gmra.mxu1 %vm1148_vm3, %v15021_v5  ;;  %v398_v6 = vcvt.s32.f32 %v334_v43  ;;  %v965_v5 = vadd.f32 %v901_v10, %v15039_v11  ;;  %v580_v11 = vadd.f32 %v516_v1, %v15066_v19  ;;  %v911_v33 = vmul.f32 %v15460_v27, %v775_v18 }
  0x9d   : > { %2143 = vmatprep.mubr.f32.mxu0 %v19841_v0  ;;  %2576 = vmatprep.mubr.f32.mxu1 %v19841_v0  ;;  %v525_v10 = vmul.f32 %v461_v59, %v15073_v36  ;;  %v332_v1 = vshra.s32 %v268_v62, 7  ;;  %v471_v20 = vmul.f32 0.015873017, %v407_v2  ;;  %v277_v59 = vadd.s32 5760, %v15043_v15 }
  0x9e   : > { %14272 = vmatpush1.msk.msra.mxu1 %vm213_vm2, %v14147_v7  ;;  %v462_v30 = vmul.f32 0.015873017, %v398_v6  ;;  %v14146_v32 = vclamps-f32 %v965_v5, 1.0  ;;  %v731_v48 = vrot.slane %v580_v11, %v15053_v31  ;;  %v975_v39 = vadd.f32 %v15484_v50, %v911_v33 }
  0x9f   : > { %14283 = vmatprep.subr.msk.mxu1 %vm213_vm2, %v14152_v12  ;;  %v402_v7 = vcvt.s32.f32 %v338_v57  ;;  %v791_v12 = vrot.slane %v595_v60, %v15053_v31  ;;  %v14150_v6 = vclamps-f32 %v969_v9, 1.0  ;;  %v589_v5 = vadd.f32 %v525_v10, %v15066_v19 }
  0xa0   : > { %14234 = vmatmul.mubr.msk.f32.gmra.mxu0 %vm1148_vm3, %v15445_v22  ;;  %14262 = vmatmul.mubr.msk.f32.gmra.mxu1 %vm1148_vm3, %v15452_v24  ;;  %v526_v38 = vmul.f32 %v462_v30, %v15073_v36  ;;  %v900_v35 = vmul.f32 %v15460_v27, %v731_v48  ;;  %v14156_v58 = vclamps-f32 %v975_v39, 1.0  ;;  %v396_v11 = vcvt.s32.f32 %v332_v1 }
  0xa1   : > { %2303 = vmatprep.mubr.f32.mxu0 %v19841_v0  ;;  %2582 = vmatprep.mubr.f32.mxu1 %v19841_v0  ;;  %v466_v16 = vmul.f32 0.015873017, %v402_v7  ;;  %v915_v18 = vmul.f32 %v15460_v27, %v791_v12  ;;  %v767_v30 = vrot.slane %v589_v5, %v15053_v31  ;;  %v535_v33 = vmul.f32 %v471_v20, %v15073_v36 }
  0xa2   : > { %v590_v54 = vadd.f32 %v526_v38, %v15066_v19  ;;  %v964_v43 = vadd.f32 %v15484_v50, %v900_v35  ;;  %v460_v48 = vmul.f32 0.015873017, %v396_v11  ;;  %v342_v38 = vshra.s32 %v278_v29, 7 }
  0xa3   : > { %v909_v53 = vmul.f32 %v15460_v27, %v767_v30  ;;  %v599_v42 = vadd.f32 %v535_v33, %v15066_v19  ;;  %v272_v35 = vadd.s32 5120, %v15043_v15  ;;  %v411_v60 = vcvt.s32.f32 %v347_v55 }
  0xa4   : > { %14243 = vmatmul.mubr.msk.f32.vlgmr.msra.gmra.mxu0 %vm1148_vm3, %v15468_v46  ;;  %14263 = vmatmul.mubr.msk.f32.gmra.mxu1 %vm1148_vm3, %v15475_v47  ;;  %v771_v63 = vrot.slane %v590_v54, %v15053_v31  ;;  %v14145_v14 = vclamps-f32 %v964_v43, 1.0  ;;  %v524_v34 = vmul.f32 %v460_v48, %v15073_v36  ;;  %v406_v54 = vcvt.s32.f32 %v342_v38 }
  0xa5   : > { %2309 = vmatprep.mubr.f32.mxu0 %v19841_v0  ;;  %2588 = vmatprep.mubr.f32.mxu1 %v19841_v0  ;;  %v973_v57 = vadd.f32 %v15484_v50, %v909_v53  ;;  %v336_v37 = vshra.s32 %v272_v35, 7  ;;  %v14149_v62 = vclamps-f32 %v968_v40, 1.0  ;;  %v341_v10 = vshra.s32 %v277_v59, 7 }
  0xa6   : > { %14254 = vmatpush1.msk.msra.mxu0 %vm213_vm2, %v14141_v26  ;;  %v910_v4 = vmul.f32 %v15460_v27, %v771_v63  ;;  %v530_v26 = vmul.f32 %v466_v16, %v15073_v36  ;;  %v588_v61 = vadd.f32 %v524_v34, %v15066_v19  ;;  %v593_v63 = vadd.f32 %v529_v56, %v15066_v19 }
  0xa7   : > { %14265 = vmatprep.subr.msk.mxu0 %vm213_vm2, %v14146_v32  ;;  %v979_v32 = vadd.f32 %v15484_v50, %v915_v18  ;;  %v470_v7 = vmul.f32 0.015873017, %v406_v54  ;;  %v14154_v8 = vclamps-f32 %v973_v57, 1.0  ;;  %v475_v12 = vmul.f32 0.015873017, %v411_v60 }
  0xa8   : > { %14244 = vmatmul.mubr.msk.f32.gmra.mxu0 %vm1148_vm3, %v15452_v24  ;;  %14264 = vmatmul.mubr.msk.f32.gmra.mxu1 %vm1148_vm3, %v15445_v22  ;;  %v974_v25 = vadd.f32 %v15484_v50, %v910_v4  ;;  %v594_v51 = vadd.f32 %v530_v26, %v15066_v19  ;;  %v763_v2 = vrot.slane %v588_v61, %v15053_v31  ;;  %v400_v13 = vcvt.s32.f32 %v336_v37 }
  0xa9   : > { %2315 = vmatprep.mubr.f32.mxu0 %v19841_v0  ;;  %2748 = vmatprep.mubr.f32.mxu1 %v19841_v0  ;;  %v14160_v39 = vclamps-f32 %v979_v32, 1.0  ;;  %v534_v4 = vmul.f32 %v470_v7, %v15073_v36  ;;  %v282_v16 = vadd.s32 6400, %v15043_v15  ;;  %v539_v5 = vmul.f32 %v475_v12, %v15073_v36 }
  0xaa   : > { %v14155_v49 = vclamps-f32 %v974_v25, 1.0  ;;  %v287_v18 = vadd.s32 7040, %v15043_v15  ;;  %v908_v20 = vmul.f32 %v15460_v27, %v763_v2  ;;  %v464_v21 = vmul.f32 0.015873017, %v400_v13 }
  0xab   : > { %v598_v26 = vadd.f32 %v534_v4, %v15066_v19  ;;  %v346_v28 = vshra.s32 %v282_v16, 7  ;;  %v603_v32 = vadd.f32 %v539_v5, %v15066_v19  ;;  %v340_v34 = vshra.s32 %v276_v45, 7 }
  0xac   : > { %14245 = vmatmul.mubr.msk.f32.gmra.mxu0 %vm1148_vm3, %v15475_v47  ;;  %14273 = vmatmul.mubr.msk.f32.vlgmr.msra.gmra.mxu1 %vm1148_vm3, %v15468_v46  ;;  %v351_v33 = vshra.s32 %v287_v18, 7  ;;  %v528_v44 = vmul.f32 %v464_v21, %v15073_v36  ;;  %v972_v48 = vadd.f32 %v15484_v50, %v908_v20  ;;  %v345_v56 = vshra.s32 %v281_v52, 7 }
  0xad   : > { %2321 = vmatprep.mubr.f32.mxu0 %v19841_v0  ;;  %2754 = vmatprep.mubr.f32.mxu1 %v19841_v0  ;;  %v404_v61 = vcvt.s32.f32 %v340_v34  ;;  %v280_v20 = vadd.s32 6144, %v15043_v15 }
  0xae   : > { %14284 = vmatpush1.msk.msra.mxu1 %vm213_vm2, %v14151_v41  ;;  %v787_v41 = vrot.slane %v594_v51, %v15053_v31  ;;  %v410_v51 = vcvt.s32.f32 %v346_v28  ;;  %v592_v55 = vadd.f32 %v528_v44, %v15066_v19  ;;  %v14153_v35 = vclamps-f32 %v972_v48, 1.0 }
  0xaf   : > { %14295 = vmatprep.subr.msk.mxu1 %vm213_vm2, %v14156_v58  ;;  %v807_v58 = vrot.slane %v599_v42, %v15053_v31  ;;  %v415_v42 = vcvt.s32.f32 %v351_v33  ;;  %v468_v2 = vmul.f32 0.015873017, %v404_v61  ;;  %v344_v44 = vshra.s32 %v280_v20, 7 }
  0xb0   : > { %14246 = vmatmul.mubr.msk.f32.gmra.mxu0 %vm1148_vm3, %v15445_v22  ;;  %14274 = vmatmul.mubr.msk.f32.gmra.mxu1 %vm1148_vm3, %v15452_v24  ;;  %v914_v43 = vmul.f32 %v15460_v27, %v787_v41  ;;  %v474_v41 = vmul.f32 0.015873017, %v410_v51  ;;  %v779_v60 = vrot.slane %v592_v55, %v15053_v31 }
  0xb1   : > { %2481 = vmatprep.mubr.f32.mxu0 %v19841_v0  ;;  %2760 = vmatprep.mubr.f32.mxu1 %v19841_v0  ;;  %v919_v9 = vmul.f32 %v15460_v27, %v807_v58  ;;  %v479_v59 = vmul.f32 0.015873017, %v415_v42  ;;  %v532_v18 = vmul.f32 %v468_v2, %v15073_v36  ;;  %v408_v55 = vcvt.s32.f32 %v344_v44 }
  0xb2   : > { %v978_v1 = vadd.f32 %v15484_v50, %v914_v43  ;;  %v409_v43 = vcvt.s32.f32 %v345_v56  ;;  %v912_v12 = vmul.f32 %v15460_v27, %v779_v60 }
  0xb3   : > { %v983_v17 = vadd.f32 %v15484_v50, %v919_v9  ;;  %v543_v9 = vmul.f32 %v479_v59, %v15073_v36  ;;  %v596_v33 = vadd.f32 %v532_v18, %v15066_v19  ;;  %v472_v60 = vmul.f32 0.015873017, %v408_v55 }
  0xb4   : > { %14255 = vmatmul.mubr.msk.f32.vlgmr.msra.gmra.mxu0 %vm1148_vm3, %v15468_v46  ;;  %14275 = vmatmul.mubr.msk.f32.gmra.mxu1 %vm1148_vm3, %v15475_v47  ;;  %v14159_v11 = vclamps-f32 %v978_v1, 1.0  ;;  %v976_v21 = vadd.f32 %v15484_v50, %v912_v12 }
  0xb5   : > { %2487 = vmatprep.mubr.f32.mxu0 %v19841_v0  ;;  %2766 = vmatprep.mubr.f32.mxu1 %v19841_v0  ;;  %v14164_v29 = vclamps-f32 %v983_v17, 1.0  ;;  %v795_v42 = vrot.slane %v596_v33, %v15053_v31  ;;  %v536_v12 = vmul.f32 %v472_v60, %v15073_v36  ;;  %v288_v60 = vadd.s32 7168, %v15043_v15 }
  0xb6   : > { %14266 = vmatpush1.msk.msra.mxu0 %vm213_vm2, %v14145_v14  ;;  %v783_v14 = vrot.slane %v593_v63, %v15053_v31  ;;  %v286_v63 = vadd.s32 6912, %v15043_v15  ;;  %v14157_v45 = vclamps-f32 %v976_v21, 1.0 }
  0xb7   : > { %14277 = vmatprep.subr.msk.mxu0 %vm213_vm2, %v14150_v6  ;;  %v405_v6 = vcvt.s32.f32 %v341_v10  ;;  %v291_v10 = vadd.s32 7552, %v15043_v15  ;;  %v916_v59 = vmul.f32 %v15460_v27, %v795_v42  ;;  %v600_v18 = vadd.f32 %v536_v12, %v15066_v19 }
  0xb8   : > { %14256 = vmatmul.mubr.msk.f32.gmra.mxu0 %vm1148_vm3, %v15452_v24  ;;  %14276 = vmatmul.mubr.msk.f32.gmra.mxu1 %vm1148_vm3, %v15445_v22  ;;  %v913_v25 = vmul.f32 %v15460_v27, %v783_v14  ;;  %v473_v14 = vmul.f32 0.015873017, %v409_v43  ;;  %v350_v4 = vshra.s32 %v286_v63, 7 }
  0xb9   : > { %2493 = vmatprep.mubr.f32.mxu0 %v19841_v0  ;;  %2926 = vmatprep.mubr.f32.mxu1 %v19841_v0  ;;  %v469_v30 = vmul.f32 0.015873017, %v405_v6  ;;  %v607_v6 = vadd.f32 %v543_v9, %v15066_v19  ;;  %v355_v5 = vshra.s32 %v291_v10, 7  ;;  %v980_v10 = vadd.f32 %v15484_v50, %v916_v59 }
  0xba   : > { %v977_v38 = vadd.f32 %v15484_v50, %v913_v25  ;;  %v537_v25 = vmul.f32 %v473_v14, %v15073_v36 }
  0xbb   : > { %v533_v53 = vmul.f32 %v469_v30, %v15073_v36  ;;  %v285_v30 = vadd.s32 6784, %v15043_v15 }
  0xbc   : > { %14257 = vmatmul.mubr.msk.f32.gmra.mxu0 %vm1148_vm3, %v15475_v47  ;;  %14285 = vmatmul.mubr.msk.f32.vlgmr.msra.gmra.mxu1 %vm1148_vm3, %v15468_v46  ;;  %v14158_v54 = vclamps-f32 %v977_v38, 1.0 }
  0xbd   : > { %2499 = vmatprep.mubr.f32.mxu0 %v19841_v0  ;;  %2932 = vmatprep.mubr.f32.mxu1 %v19841_v0  ;;  %v597_v57 = vadd.f32 %v533_v53, %v15066_v19  ;;  %v349_v53 = vshra.s32 %v285_v30, 7 }
  0xbe   : > { %14296 = vmatpush1.msk.msra.mxu1 %vm213_vm2, %v14155_v49  ;;  %v803_v49 = vrot.slane %v598_v26, %v15053_v31  ;;  %v414_v26 = vcvt.s32.f32 %v350_v4 }
  0xbf   : > { %14307 = vmatprep.subr.msk.mxu1 %vm213_vm2, %v14160_v39  ;;  %v823_v39 = vrot.slane %v603_v32, %v15053_v31  ;;  %v799_v7 = vrot.slane %v597_v57, %v15053_v31  ;;  %v419_v32 = vcvt.s32.f32 %v355_v5  ;;  %v14161_v5 = vclamps-f32 %v980_v10, 1.0 }
  0xc0   : > { %14258 = vmatmul.mubr.msk.f32.gmra.mxu0 %vm1148_vm3, %v15445_v22  ;;  %14286 = vmatmul.mubr.msk.f32.gmra.mxu1 %vm1148_vm3, %v15452_v24  ;;  %v918_v40 = vmul.f32 %v15460_v27, %v803_v49  ;;  %v601_v49 = vadd.f32 %v537_v25, %v15066_v19  ;;  %v478_v51 = vmul.f32 0.015873017, %v414_v26  ;;  %v352_v10 = vshra.s32 %v288_v60, 7 }
  0xc1   : > { %2659 = vmatprep.mubr.f32.mxu0 %v19841_v0  ;;  %2938 = vmatprep.mubr.f32.mxu1 %v19841_v0  ;;  %v923_v58 = vmul.f32 %v15460_v27, %v823_v39  ;;  %v917_v16 = vmul.f32 %v15460_v27, %v799_v7  ;;  %v483_v39 = vmul.f32 0.015873017, %v419_v32  ;;  %v811_v32 = vrot.slane %v600_v18, %v15053_v31 }
  0xc2   : > { %v982_v37 = vadd.f32 %v15484_v50, %v918_v40  ;;  %v542_v40 = vmul.f32 %v478_v51, %v15073_v36 }
  0xc3   : > { %v981_v28 = vadd.f32 %v15484_v50, %v917_v16  ;;  %v547_v57 = vmul.f32 %v483_v39, %v15073_v36 }
  0xc4   : > { %14267 = vmatmul.mubr.msk.f32.vlgmr.msra.gmra.mxu0 %vm1148_vm3, %v15468_v46  ;;  %14287 = vmatmul.mubr.msk.f32.gmra.mxu1 %vm1148_vm3, %v15475_v47  ;;  %v14163_v13 = vclamps-f32 %v982_v37, 1.0 }
  0xc5   : > { %2665 = vmatprep.mubr.f32.mxu0 %v19841_v0  ;;  %2944 = vmatprep.mubr.f32.mxu1 %v19841_v0  ;;  %v14162_v52 = vclamps-f32 %v981_v28, 1.0 }
  0xc6   : > { %14278 = vmatpush1.msk.msra.mxu0 %vm213_vm2, %v14149_v62  ;;  %v538_v62 = vmul.f32 %v474_v41, %v15073_v36  ;;  %v290_v41 = vadd.s32 7424, %v15043_v15 }
  0xc7   : > { %14289 = vmatprep.subr.msk.mxu0 %vm213_vm2, %v14154_v8  ;;  %v987_v8 = vadd.f32 %v15484_v50, %v923_v58  ;;  %v295_v58 = vadd.s32 8064, %v15043_v15 }
  0xc8   : > { %14268 = vmatmul.mubr.msk.f32.gmra.mxu0 %vm1148_vm3, %v15452_v24  ;;  %14288 = vmatmul.mubr.msk.f32.gmra.mxu1 %vm1148_vm3, %v15445_v22  ;;  %v602_v1 = vadd.f32 %v538_v62, %v15066_v19  ;;  %v606_v62 = vadd.f32 %v542_v40, %v15066_v19  ;;  %v354_v43 = vshra.s32 %v290_v41, 7 }
  0xc9   : > { %2671 = vmatprep.mubr.f32.mxu0 %v19841_v0  ;;  %3104 = vmatprep.mubr.f32.mxu1 %v19841_v0  ;;  %v14168_v17 = vclamps-f32 %v987_v8, 1.0  ;;  %v611_v8 = vadd.f32 %v547_v57, %v15066_v19  ;;  %v359_v9 = vshra.s32 %v295_v58, 7 }
  0xca   : > { %v418_v14 = vcvt.s32.f32 %v354_v43  ;;  %v293_v43 = vadd.s32 7808, %v15043_v15 }
  0xcb   : > { %v855_v16 = vrot.slane %v611_v8, %v15053_v31 }
  0xcc   : > { %14269 = vmatmul.mubr.msk.f32.gmra.mxu0 %vm1148_vm3, %v15475_v47  ;;  %14297 = vmatmul.mubr.msk.f32.vlgmr.msra.gmra.mxu1 %vm1148_vm3, %v15468_v46  ;;  %v482_v25 = vmul.f32 0.015873017, %v418_v14 }
  0xcd   : > { %2677 = vmatprep.mubr.f32.mxu0 %v19841_v0  ;;  %3110 = vmatprep.mubr.f32.mxu1 %v19841_v0  ;;  %v931_v28 = vmul.f32 %v15460_v27, %v855_v16 }
  0xce   : > { %14308 = vmatpush1.msk.msra.mxu1 %vm213_vm2, %v14159_v11  ;;  %v819_v11 = vrot.slane %v602_v1, %v15053_v31  ;;  %v284_v1 = vadd.s32 6656, %v15043_v15 }
  0xcf   : > { %14319 = vmatprep.subr.msk.mxu1 %vm213_vm2, %v14164_v29  ;;  %v839_v29 = vrot.slane %v607_v6, %v15053_v31  ;;  %v289_v6 = vadd.s32 7296, %v15043_v15  ;;  %v995_v51 = vadd.f32 %v15484_v50, %v931_v28 }
  0xd0   : > { %14270 = vmatmul.mubr.msk.f32.gmra.mxu0 %vm1148_vm3, %v15445_v22  ;;  %14298 = vmatmul.mubr.msk.f32.gmra.mxu1 %vm1148_vm3, %v15452_v24  ;;  %v922_v48 = vmul.f32 %v15460_v27, %v819_v11  ;;  %v348_v11 = vshra.s32 %v284_v1, 7  ;;  %v357_v1 = vshra.s32 %v293_v43, 7 }
  0xd1   : > { %2837 = vmatprep.mubr.f32.mxu0 %v19841_v0  ;;  %3116 = vmatprep.mubr.f32.mxu1 %v19841_v0  ;;  %v927_v38 = vmul.f32 %v15460_v27, %v839_v29  ;;  %v353_v30 = vshra.s32 %v289_v6, 7  ;;  %v14176_v40 = vclamps-f32 %v995_v51, 1.0 }
  0xd2   : > { %v986_v34 = vadd.f32 %v15484_v50, %v922_v48  ;;  %v412_v44 = vcvt.s32.f32 %v348_v11  ;;  %v294_v48 = vadd.s32 7936, %v15043_v15  ;;  %v421_v18 = vcvt.s32.f32 %v357_v1 }
  0xd3   : > { %v991_v56 = vadd.f32 %v15484_v50, %v927_v38  ;;  %v417_v38 = vcvt.s32.f32 %v353_v30 }
  0xd4   : > { %14279 = vmatmul.mubr.msk.f32.vlgmr.msra.gmra.mxu0 %vm1148_vm3, %v15468_v46  ;;  %14299 = vmatmul.mubr.msk.f32.gmra.mxu1 %vm1148_vm3, %v15475_v47  ;;  %v14167_v61 = vclamps-f32 %v986_v34, 1.0  ;;  %v476_v42 = vmul.f32 0.015873017, %v412_v44  ;;  %v358_v34 = vshra.s32 %v294_v48, 7  ;;  %v485_v44 = vmul.f32 0.015873017, %v421_v18 }
  0xd5   : > { %2843 = vmatprep.mubr.f32.mxu0 %v19841_v0  ;;  %3122 = vmatprep.mubr.f32.mxu1 %v19841_v0  ;;  %v14172_v63 = vclamps-f32 %v991_v56, 1.0  ;;  %v481_v56 = vmul.f32 0.015873017, %v417_v38 }
  0xd6   : > { %14290 = vmatpush1.msk.msra.mxu0 %vm213_vm2, %v14153_v35  ;;  %v815_v35 = vrot.slane %v601_v49, %v15053_v31  ;;  %v540_v57 = vmul.f32 %v476_v42, %v15073_v36  ;;  %v422_v59 = vcvt.s32.f32 %v358_v34 }
  0xd7   : > { %14301 = vmatprep.subr.msk.mxu0 %vm213_vm2, %v14158_v54  ;;  %v413_v54 = vcvt.s32.f32 %v349_v53  ;;  %v920_v53 = vmul.f32 %v15460_v27, %v811_v32 }
  0xd8   : > { %14280 = vmatmul.mubr.msk.f32.gmra.mxu0 %vm1148_vm3, %v15452_v24  ;;  %14300 = vmatmul.mubr.msk.f32.gmra.mxu1 %vm1148_vm3, %v15445_v22  ;;  %v921_v37 = vmul.f32 %v15460_v27, %v815_v35 }
  0xd9   : > { %2849 = vmatprep.mubr.f32.mxu0 %v19841_v0  ;;  %3282 = vmatprep.mubr.f32.mxu1 %v19841_v0  ;;  %v477_v7 = vmul.f32 0.015873017, %v413_v54  ;;  %v984_v54 = vadd.f32 %v15484_v50, %v920_v53 }
  0xda   : > { %v985_v2 = vadd.f32 %v15484_v50, %v921_v37 }
  0xdb   : > { %v541_v4 = vmul.f32 %v477_v7, %v15073_v36  ;;  %v604_v7 = vadd.f32 %v540_v57, %v15066_v19 }
  0xdc   : > { %14281 = vmatmul.mubr.msk.f32.gmra.mxu0 %vm1148_vm3, %v15475_v47  ;;  %14309 = vmatmul.mubr.msk.f32.vlgmr.msra.gmra.mxu1 %vm1148_vm3, %v15468_v46  ;;  %v14166_v20 = vclamps-f32 %v985_v2, 1.0 }
  0xdd   : > { %2855 = vmatprep.mubr.f32.mxu0 %v19841_v0  ;;  %3288 = vmatprep.mubr.f32.mxu1 %v19841_v0  ;;  %v605_v26 = vadd.f32 %v541_v4, %v15066_v19  ;;  %v827_v14 = vrot.slane %v604_v7, %v15053_v31 }
  0xde   : > { %14320 = vmatpush1.msk.msra.mxu1 %vm213_vm2, %v14163_v13  ;;  %v835_v13 = vrot.slane %v606_v62, %v15053_v31  ;;  %v545_v62 = vmul.f32 %v481_v56, %v15073_v36 }
  0xdf   : > { %14331 = vmatprep.subr.msk.mxu1 %vm213_vm2, %v14168_v17  ;;  %v423_v17 = vcvt.s32.f32 %v359_v9  ;;  %v831_v49 = vrot.slane %v605_v26, %v15053_v31  ;;  %v486_v9 = vmul.f32 0.015873017, %v422_v59  ;;  %v924_v26 = vmul.f32 %v15460_v27, %v827_v14 }
  0xe0   : > { %14282 = vmatmul.mubr.msk.f32.gmra.mxu0 %vm1148_vm3, %v15445_v22  ;;  %14310 = vmatmul.mubr.msk.f32.gmra.mxu1 %vm1148_vm3, %v15452_v24  ;;  %v926_v21 = vmul.f32 %v15460_v27, %v835_v13  ;;  %v609_v13 = vadd.f32 %v545_v62, %v15066_v19  ;;  %v15864_v62 = vpop.permute.xlu0 %1145 }
  0xe1   : > { %3015 = vmatprep.mubr.f32.mxu0 %v19841_v0  ;;  %3294 = vmatprep.mubr.f32.mxu1 %v19841_v0  ;;  %v487_v29 = vmul.f32 0.015873017, %v423_v17  ;;  %v925_v35 = vmul.f32 %v15460_v27, %v831_v49  ;;  %v550_v16 = vmul.f32 %v486_v9, %v15073_v36  ;;  %v416_v17 = vcvt.s32.f32 %v352_v10 }
  0xe2   : > { %v990_v33 = vadd.f32 %v15484_v50, %v926_v21  ;;  %v292_v49 = vadd.s32 7680, %v15043_v15  ;;  %v988_v38 = vadd.f32 %v15484_v50, %v924_v26 }
  0xe3   : > { %v480_v30 = vmul.f32 0.015873017, %v416_v17 }
  0xe4   : > { %14291 = vmatmul.mubr.msk.f32.vlgmr.msra.gmra.mxu0 %vm1148_vm3, %v15468_v46  ;;  %14311 = vmatmul.mubr.msk.f32.gmra.mxu1 %vm1148_vm3, %v15475_v47  ;;  %v14171_v39 = vclamps-f32 %v990_v33, 1.0 }
  0xe5   : > { %3021 = vmatprep.mubr.f32.mxu0 %v19841_v0  ;;  %3300 = vmatprep.mubr.f32.mxu1 %v19841_v0 }
  0xe6   : > { %14302 = vmatpush1.msk.msra.mxu0 %vm213_vm2, %v14157_v45  ;;  %v546_v45 = vmul.f32 %v482_v25, %v15073_v36 }
  0xe7   : > { %14313 = vmatprep.subr.msk.mxu0 %vm213_vm2, %v14162_v52  ;;  %v551_v52 = vmul.f32 %v487_v29, %v15073_v36  ;;  %v614_v29 = vadd.f32 %v550_v16, %v15066_v19 }
  0xe8   : > { %14292 = vmatmul.mubr.msk.f32.gmra.mxu0 %vm1148_vm3, %v15452_v24  ;;  %14312 = vmatmul.mubr.msk.f32.gmra.mxu1 %vm1148_vm3, %v15445_v22  ;;  %v610_v55 = vadd.f32 %v546_v45, %v15066_v19 }
  0xe9   : > { %3027 = vmatprep.mubr.f32.mxu0 %v19841_v0  ;;  %3460 = vmatprep.mubr.f32.mxu1 %v19841_v0  ;;  %v615_v41 = vadd.f32 %v551_v52, %v15066_v19  ;;  %v867_v53 = vrot.slane %v614_v29, %v15053_v31 }
  0xea   : > { %v851_v58 = vrot.slane %v610_v55, %v15053_v31  ;;  %v549_v55 = vmul.f32 %v485_v44, %v15073_v36 }
  0xeb   : > { %v871_v37 = vrot.slane %v615_v41, %v15053_v31  ;;  %v934_v57 = vmul.f32 %v15460_v27, %v867_v53 }
  0xec   : > { %14293 = vmatmul.mubr.msk.f32.gmra.mxu0 %vm1148_vm3, %v15475_v47  ;;  %14321 = vmatmul.mubr.msk.f32.vlgmr.msra.gmra.mxu1 %vm1148_vm3, %v15468_v46  ;;  %v930_v8 = vmul.f32 %v15460_v27, %v851_v58  ;;  %v613_v60 = vadd.f32 %v549_v55, %v15066_v19 }
  0xed   : > { %3033 = vmatprep.mubr.f32.mxu0 %v19841_v0  ;;  %3466 = vmatprep.mubr.f32.mxu1 %v19841_v0  ;;  %v935_v2 = vmul.f32 %v15460_v27, %v871_v37 }
  0xee   : > { %14332 = vmatpush1.msk.msra.mxu1 %vm213_vm2, %v14167_v61  ;;  %v989_v61 = vadd.f32 %v15484_v50, %v925_v35  ;;  %v994_v4 = vadd.f32 %v15484_v50, %v930_v8  ;;  %v998_v8 = vadd.f32 %v15484_v50, %v934_v57 }
  0xef   : > { %14343 = vmatprep.subr.msk.mxu1 %vm213_vm2, %v14172_v63  ;;  %v14165_v63 = vclamps-f32 %v984_v54, 1.0  ;;  %v999_v6 = vadd.f32 %v15484_v50, %v935_v2  ;;  %v14169_v54 = vclamps-f32 %v988_v38, 1.0 }
  0xf0   : > { %14294 = vmatmul.mubr.msk.f32.gmra.mxu0 %vm1148_vm3, %v15445_v22  ;;  %14322 = vmatmul.mubr.msk.f32.gmra.mxu1 %vm1148_vm3, %v15452_v24  ;;  %v14170_v12 = vclamps-f32 %v989_v61, 1.0  ;;  %v14175_v28 = vclamps-f32 %v994_v4, 1.0  ;;  %v14179_v16 = vclamps-f32 %v998_v8, 1.0 }
  0xf1   : > { %3193 = vmatprep.mubr.f32.mxu0 %v19841_v0  ;;  %3472 = vmatprep.mubr.f32.mxu1 %v19841_v0  ;;  %v14180_v32 = vclamps-f32 %v999_v6, 1.0 }
  0xf4   : > { %14303 = vmatmul.mubr.msk.f32.vlgmr.msra.gmra.mxu0 %vm1148_vm3, %v15468_v46  ;;  %14323 = vmatmul.mubr.msk.f32.gmra.mxu1 %vm1148_vm3, %v15475_v47 }
  0xf5   : > { %3199 = vmatprep.mubr.f32.mxu0 %v19841_v0  ;;  %3478 = vmatprep.mubr.f32.mxu1 %v19841_v0 }
  0xf6   : > { %14314 = vmatpush1.msk.msra.mxu0 %vm213_vm2, %v14161_v5  ;;  %v847_v5 = vrot.slane %v609_v13, %v15053_v31 }
  0xf7   : > { %14325 = vmatprep.subr.msk.mxu0 %vm213_vm2, %v14166_v20 }
  0xf8   : > { %14304 = vmatmul.mubr.msk.f32.gmra.mxu0 %vm1148_vm3, %v15452_v24  ;;  %14324 = vmatmul.mubr.msk.f32.gmra.mxu1 %vm1148_vm3, %v15445_v22  ;;  %v929_v33 = vmul.f32 %v15460_v27, %v847_v5 }
  0xf9   : > { %3205 = vmatprep.mubr.f32.mxu0 %v19841_v0  ;;  %3638 = vmatprep.mubr.f32.mxu1 %v19841_v0 }
  0xfa   : > { %v993_v42 = vadd.f32 %v15484_v50, %v929_v33 }
  0xfc   : > { %14305 = vmatmul.mubr.msk.f32.gmra.mxu0 %vm1148_vm3, %v15475_v47  ;;  %14333 = vmatmul.mubr.msk.f32.vlgmr.msra.gmra.mxu1 %vm1148_vm3, %v15468_v46  ;;  %v14174_v59 = vclamps-f32 %v993_v42, 1.0 }
  0xfd   : > { %3211 = vmatprep.mubr.f32.mxu0 %v19841_v0  ;;  %3644 = vmatprep.mubr.f32.mxu1 %v19841_v0 }
  0xfe   : > { %14344 = vmatpush1.msk.msra.mxu1 %vm213_vm2, %v14171_v39  ;;  %v544_v39 = vmul.f32 %v480_v30, %v15073_v36 }
  0xff   : > { %14355 = vmatprep.subr.msk.mxu1 %vm213_vm2, %v14176_v40  ;;  %v356_v40 = vshra.s32 %v292_v49, 7 }
 0x100   : > { %14306 = vmatmul.mubr.msk.f32.gmra.mxu0 %vm1148_vm3, %v15445_v22  ;;  %14334 = vmatmul.mubr.msk.f32.gmra.mxu1 %vm1148_vm3, %v15452_v24  ;;  %v608_v58 = vadd.f32 %v544_v39, %v15066_v19 }
 0x101   : > { %3371 = vmatprep.mubr.f32.mxu0 %v19841_v0  ;;  %3650 = vmatprep.mubr.f32.mxu1 %v19841_v0  ;;  %v420_v43 = vcvt.s32.f32 %v356_v40 }
 0x102   : > { %v843_v9 = vrot.slane %v608_v58, %v15053_v31 }
 0x103   : > { %v484_v1 = vmul.f32 0.015873017, %v420_v43 }
 0x104   : > { %14315 = vmatmul.mubr.msk.f32.vlgmr.msra.gmra.mxu0 %vm1148_vm3, %v15468_v46  ;;  %14335 = vmatmul.mubr.msk.f32.gmra.mxu1 %vm1148_vm3, %v15475_v47  ;;  %v928_v17 = vmul.f32 %v15460_v27, %v843_v9 }
 0x105   : > { %3377 = vmatprep.mubr.f32.mxu0 %v19841_v0  ;;  %3656 = vmatprep.mubr.f32.mxu1 %v19841_v0  ;;  %v548_v26 = vmul.f32 %v484_v1, %v15073_v36 }
 0x106   : > { %14326 = vmatpush1.msk.msra.mxu0 %vm213_vm2, %v14165_v63  ;;  %v992_v30 = vadd.f32 %v15484_v50, %v928_v17 }
 0x107   : > { %14337 = vmatprep.subr.msk.mxu0 %vm213_vm2, %v14170_v12  ;;  %v863_v12 = vrot.slane %v613_v60, %v15053_v31  ;;  %v612_v49 = vadd.f32 %v548_v26, %v15066_v19 }
 0x108   : > { %v15802_v20 = vpop.f32.mrf.mxu0  ;;  %v15804_v21 = vpop.f32.mrf.mxu1  ;;  %14316 = vmatmul.mubr.msk.f32.gmra.mxu0 %vm1148_vm3, %v15452_v24  ;;  %14336 = vmatmul.mubr.msk.f32.gmra.mxu1 %vm1148_vm3, %v15445_v22  ;;  %v14173_v39 = vclamps-f32 %v992_v30, 1.0 }
 0x109   : > { %3383 = vmatprep.mubr.f32.mxu0 %v19841_v0  ;;  %3816 = vmatprep.mubr.f32.mxu1 %v19841_v0  ;;  %v933_v5 = vmul.f32 %v15460_v27, %v863_v12  ;;  %v859_v19 = vrot.slane %v612_v49, %v15053_v31  ;;  %v1523_v60 = vadd.f32 %v15804_v21, %v15864_v62 }
 0x10a   : > { %v15812_v11 = vpop.f32.mrf.mxu0  ;;  %v1524_v25 = vpop.f32.mrf.mxu1 }
 0x10b   : > { %v1525_v10 = vadd.f32 %v1524_v25, %v15864_v62  ;;  %v932_v21 = vmul.f32 %v15460_v27, %v859_v19 }
 0x10c   : > { %v15817_v45 = vpop.f32.mrf.mxu0  ;;  %v15819_v48 = vpop.f32.mrf.mxu1  ;;  %14317 = vmatmul.mubr.msk.f32.gmra.mxu0 %vm1148_vm3, %v15475_v47  ;;  %14345 = vmatmul.mubr.msk.f32.vlgmr.msra.gmra.mxu1 %vm1148_vm3, %v15468_v46 }
 0x10d   : > { %3389 = vmatprep.mubr.f32.mxu0 %v19841_v0  ;;  %3822 = vmatprep.mubr.f32.mxu1 %v19841_v0  ;;  %v4392_v6 = vmax.f32 %v1525_v10, 0.0 }
 0x10e   : > { %v15828_v51 = vpop.f32.mrf.mxu0  ;;  %v15830_v52 = vpop.f32.mrf.mxu1  ;;  %14356 = vmatpush1.msk.msra.mxu1 %vm213_vm2, %v14175_v28 }
 0x10f   : > { %14367 = vmatprep.subr.msk.mxu1 %vm213_vm2, %v14180_v32  ;;  %v997_v32 = vadd.f32 %v15484_v50, %v933_v5 }
 0x110   : > { %v15839_v34 = vpop.f32.mrf.mxu0  ;;  %v15841_v35 = vpop.f32.mrf.mxu1  ;;  %14318 = vmatmul.mubr.msk.f32.gmra.mxu0 %vm1148_vm3, %v15445_v22  ;;  %14346 = vmatmul.mubr.msk.f32.gmra.mxu1 %vm1148_vm3, %v15452_v24 }
 0x111   : > { %3549 = vmatprep.mubr.f32.mxu0 %v19841_v0  ;;  %3828 = vmatprep.mubr.f32.mxu1 %v19841_v0  ;;  %v14178_v42 = vclamps-f32 %v997_v32, 1.0 }
 0x112   : > { %v15849_v41 = vpop.f32.mrf.mxu0  ;;  %v15851_v56 = vpop.f32.mrf.mxu1 }
 0x114   : > { %v15856_v61 = vpop.f32.mrf.mxu0  ;;  %v15858_v37 = vpop.f32.mrf.mxu1  ;;  %14327 = vmatmul.mubr.msk.f32.vlgmr.msra.gmra.mxu0 %vm1148_vm3, %v15468_v46  ;;  %14347 = vmatmul.mubr.msk.f32.gmra.mxu1 %vm1148_vm3, %v15475_v47 }
 0x115   : > { %3555 = vmatprep.mubr.f32.mxu0 %v19841_v0  ;;  %3834 = vmatprep.mubr.f32.mxu1 %v19841_v0 }
 0x116   : > { %v15868_v63 = vpop.f32.mrf.mxu0  ;;  %v15870_v7 = vpop.f32.mrf.mxu1  ;;  %14338 = vmatpush1.msk.msra.mxu0 %vm213_vm2, %v14169_v54 }
 0x117   : > { %14349 = vmatprep.subr.msk.mxu0 %vm213_vm2, %v14174_v59  ;;  %v15927_v54 = vpop.permute.xlu1 %1135  ;;  %v15937_v59 = vpop.permute.xlu0 %1140 }
 0x118   : > { %v15878_v2 = vpop.f32.mrf.mxu0  ;;  %v15880_v13 = vpop.f32.mrf.mxu1  ;;  %14328 = vmatmul.mubr.msk.f32.gmra.mxu0 %vm1148_vm3, %v15452_v24  ;;  %14348 = vmatmul.mubr.msk.f32.gmra.mxu1 %vm1148_vm3, %v15445_v22 }
 0x119   : > { %3561 = vmatprep.mubr.f32.mxu0 %v19841_v0  ;;  %3994 = vmatprep.mubr.f32.mxu1 %v19841_v0 }
 0x11a   : > { %v15888_v14 = vpop.f32.mrf.mxu0  ;;  %v15890_v4 = vpop.f32.mrf.mxu1 }
 0x11b   : > { %v1703_v26 = vadd.f32 %v15890_v4, %v15864_v62 }
 0x11c   : > { %v1510_v18 = vpop.f32.mrf.mxu0  ;;  %v15894_v25 = vpop.f32.mrf.mxu1  ;;  %14329 = vmatmul.mubr.msk.f32.gmra.mxu0 %vm1148_vm3, %v15475_v47  ;;  %14357 = vmatmul.mubr.msk.f32.vlgmr.msra.gmra.mxu1 %vm1148_vm3, %v15468_v46 }
 0x11d   : > { %3567 = vmatprep.mubr.f32.mxu0 %v19841_v0  ;;  %4000 = vmatprep.mubr.f32.mxu1 %v19841_v0  ;;  %v1511_v17 = vadd.f32 %v1510_v18, %v15927_v54  ;;  %v996_v18 = vadd.f32 %v15484_v50, %v932_v21 }
 0x11e   : > { %v1512_v28 = vpop.f32.mrf.mxu0  ;;  %v15903_v29 = vpop.f32.mrf.mxu1  ;;  %14368 = vmatpush1.msk.msra.mxu1 %vm213_vm2, %v14179_v16 }
 0x11f   : > { %4582 = vmatprep.subr.mxu1 %v4392_v6  ;;  %v1513_v10 = vadd.f32 %v1512_v28, %v15927_v54  ;;  %v15960_v16 = vpop.permute.xlu1 %1130  ;;  %v4263_v4 = vmax.f32 %v1511_v17, 0.0  ;;  %v16026_v17 = vld [vmem:[%s19828_s2 + $0x10] sm:$0xff] }
 0x120   : > { %v1516_v33 = vpop.f32.mrf.mxu0  ;;  %v15908_v44 = vpop.f32.mrf.mxu1  ;;  %14330 = vmatmul.mubr.msk.f32.gmra.mxu0 %vm1148_vm3, %v15445_v22  ;;  %14358 = vmatmul.mubr.msk.f32.gmra.mxu1 %vm1148_vm3, %v15452_v24  ;;  %v1507_v27 = vadd.f32 %v15888_v14, %v15960_v16  ;;  %v1505_v30 = vadd.f32 %v15878_v2, %v15960_v16  ;;  %v1436_v14 = vadd.f32 %v15868_v63, %v15864_v62  ;;  %v15993_v2 = vld [vmem:[%s19828_s2 + $0x18] sm:$0xff]  ;;  %v16000_v63 = vld [vmem:[%s19828_s2 + $0x8] sm:$0xff] }
 0x121   : > { %3727 = vmatprep.mubr.f32.mxu0 %v19841_v0  ;;  %4006 = vmatprep.mubr.f32.mxu1 %v19841_v0  ;;  %v1517_v31 = vadd.f32 %v1516_v33, %v15937_v59  ;;  %v4264_v32 = vmax.f32 %v1513_v10, 0.0 }
 0x122   : > { %v1518_v38 = vpop.f32.mrf.mxu0  ;;  %v15917_v53 = vpop.f32.mrf.mxu1  ;;  %v4200_v49 = vmax.f32 %v1507_v27, 0.0 }
 0x123   : > { %v1519_v43 = vadd.f32 %v1518_v38, %v15937_v59  ;;  %v4327_v28 = vmax.f32 %v1517_v31, 0.0  ;;  %v4396_v38 = vmax.f32 %v1703_v26, 0.0  ;;  %v4390_v31 = vmax.f32 %v1436_v14, 0.0  ;;  %v16039_v26 = vld [vmem:[%s19828_s2 + $0x28] sm:$0xff] }
 0x124   : > { %v15919_v55 = vpop.f32.mrf.mxu0  ;;  %v15921_v40 = vpop.f32.mrf.mxu1  ;;  %14339 = vmatmul.mubr.msk.f32.vlgmr.msra.gmra.mxu0 %vm1148_vm3, %v15468_v46  ;;  %14359 = vmatmul.mubr.msk.f32.gmra.mxu1 %vm1148_vm3, %v15475_v47  ;;  %v1697_v14 = vadd.f32 %v15870_v7, %v15937_v59  ;;  %v1691_v7 = vadd.f32 %v15851_v56, %v15927_v54 }
 0x125   : > { %3733 = vmatprep.mubr.f32.mxu0 %v19841_v0  ;;  %4012 = vmatprep.mubr.f32.mxu1 %v19841_v0 }
 0x126   : > { %v15932_v57 = vpop.f32.mrf.mxu0  ;;  %v15934_v58 = vpop.f32.mrf.mxu1  ;;  %14350 = vmatpush1.msk.msra.mxu0 %vm213_vm2, %v14173_v39  ;;  %v14177_v39 = vclamps-f32 %v996_v18, 1.0  ;;  %v4332_v56 = vmax.f32 %v1697_v14, 0.0 }
 0x127   : > { %14361 = vmatprep.subr.msk.mxu0 %vm213_vm2, %v14178_v42  ;;  %v4199_v42 = vmax.f32 %v1505_v30, 0.0  ;;  %v1701_v30 = vadd.f32 %v15880_v13, %v15864_v62  ;;  %v194_v13 = vld [vmem:[%s19828_s2 + $0x48] sm:$0xff] }
 0x128   : > { %v15943_v8 = vpop.f32.mrf.mxu0  ;;  %v15945_v9 = vpop.f32.mrf.mxu1  ;;  %14340 = vmatmul.mubr.msk.f32.gmra.mxu0 %vm1148_vm3, %v15452_v24  ;;  %14360 = vmatmul.mubr.msk.f32.gmra.mxu1 %vm1148_vm3, %v15445_v22  ;;  %v4391_v24 = vmax.f32 %v1523_v60, 0.0  ;;  %v4328_v22 = vmax.f32 %v1519_v43, 0.0  ;;  %v19830_v43 = vmov 33  }
 0x129   : > { %3739 = vmatprep.mubr.f32.mxu0 %v19841_v0  ;;  %4172 = vmatprep.mubr.f32.mxu1 %v19841_v0 }
 0x12a   : > { %v15956_v12 = vpop.f32.mrf.mxu0  ;;  %v15958_v1 = vpop.f32.mrf.mxu1  ;;  %14757 = vset.pattern.permute.xlu0 %v19830_v43  ;;  %14758 = vset.pattern.permute.xlu1 %v19830_v43  ;;  %v4395_v43 = vmax.f32 %v1701_v30, 0.0  ;;  %v1434_v30 = vadd.f32 %v15856_v61, %v15864_v62 }
 0x12b   : > { %4460 = vperm.xlu0 %14757, %v16039_v26   ;;  %v1881_v15 = vadd.f32 %v15958_v1, %v15864_v62  ;;  %v4268_v1 = vmax.f32 %v1691_v7, 0.0 }
 0x12c   : > { %v15963_v6 = vpop.f32.mrf.mxu0  ;;  %v15965_v5 = vpop.f32.mrf.mxu1  ;;  %14341 = vmatmul.mubr.msk.f32.gmra.mxu0 %vm1148_vm3, %v15475_v47  ;;  %14369 = vmatmul.mubr.msk.f32.vlgmr.msra.gmra.mxu1 %vm1148_vm3, %v15468_v46 }
 0x12d   : > { %4583 = vmatpush1.msra.mxu1 %v4391_v24  ;;  %3745 = vmatprep.mubr.f32.mxu0 %v19841_v0  ;;  %v16018_v24 = vld [vmem:[%s19828_s2] sm:$0xff] }
 0x12e   : > { %4584 = vmatprep.subr.mxu1 %v4328_v22  ;;  %v15979_v47 = vpop.f32.mrf.mxu0  ;;  %v15981_v46 = vpop.f32.mrf.mxu1  ;;  %4178 = vmatprep.mubr.f32.mxu1 %v19841_v0 }
 0x12f   : > { %4585 = vmatpush1.msra.mxu1 %v4327_v28  ;;  %14760 = vset.pattern.permute.xlu0 %v19835_v3 }
 0x130   : > { %4586 = vmatprep.subr.mxu1 %v4264_v32  ;;  %v15986_v33 = vpop.f32.mrf.mxu0  ;;  %v15988_v50 = vpop.f32.mrf.mxu1  ;;  %14342 = vmatmul.mubr.msk.f32.gmra.mxu0 %vm1148_vm3, %v15993_v2  ;;  %v16054_v32 = vld [vmem:[%s19828_s2 + $0x20] sm:$0xff] }
 0x131   : > { %14370 = vmatmul.mubr.msk.f32.gmra.mxu1 %vm1148_vm3, %v16000_v63  ;;  %3905 = vmatprep.mubr.f32.mxu0 %v19841_v0 }
 0x132   : > { %4587 = vmatpush1.msra.mxu1 %v4263_v4  ;;  %v16005_v19 = vpop.f32.mrf.mxu0  ;;  %v16007_v60 = vpop.f32.mrf.mxu1  ;;  %4184 = vmatprep.mubr.f32.mxu1 %v19841_v0 }
 0x133   : > { %4588 = vmatprep.subr.mxu1 %v4200_v49  ;;  %4455 = vperm.xlu1 %14758, %v16054_v32  }
 0x134   : > { %4589 = vmatpush1.msra.mxu1 %v4199_v42  ;;  %v16011_v21 = vpop.f32.mrf.mxu0  ;;  %v16013_v10 = vpop.f32.mrf.mxu1  ;;  %14351 = vmatmul.mubr.msk.f32.vlgmr.msra.gmra.mxu0 %vm1148_vm3, %v16018_v24 }
 0x135   : > { %4748 = vmatprep.subr.mxu1 %v4396_v38  ;;  %14362 = vmatpush1.msk.msra.mxu0 %vm213_vm2, %v14177_v39  ;;  %v1695_v38 = vadd.f32 %v15858_v37, %v15937_v59  ;;  %v1685_v37 = vadd.f32 %v15830_v52, %v15960_v16 }
 0x136   : > { %14371 = vmatmul.mubr.msk.f32.gmra.mxu1 %vm1148_vm3, %v16026_v17  ;;  %4499 = vmatprep.subr.mxu0 %v4390_v31  ;;  %v16030_v22 = vpop.f32.mrf.mxu0  ;;  %v16032_v27 = vpop.f32.mrf.mxu1  ;;  %v1689_v31 = vadd.f32 %v15841_v35, %v15927_v54  ;;  %v1683_v35 = vadd.f32 %v15819_v48, %v15960_v16  ;;  %v1430_v48 = vadd.f32 %v15849_v41, %v15937_v59 }
 0x137   : > { %3911 = vmatprep.mubr.f32.mxu0 %v19841_v0  ;;  %4190 = vmatprep.mubr.f32.mxu1 %v19841_v0  ;;  %v4331_v52 = vmax.f32 %v1695_v38, 0.0  ;;  %v4204_v61 = vmax.f32 %v1685_v37, 0.0  ;;  %v4400_v38 = vmax.f32 %v1881_v15, 0.0  ;;  %v1424_v41 = vadd.f32 %v15828_v51, %v15927_v54  ;;  %v16123_v15 = vld [vmem:[%s19828_s2 + $0x30] sm:$0x1] }
 0x138   : > { %v16041_v28 = vpop.f32.mrf.mxu0  ;;  %v16043_v18 = vpop.f32.mrf.mxu1  ;;  %14352 = vmatmul.mubr.msk.f32.gmra.mxu0 %vm1148_vm3, %v16000_v63  ;;  %7389 = vperm.xlu0 %14760, %v194_v13   ;;  %v1418_v51 = vadd.f32 %v15812_v11, %v15960_v16 }
 0x139   : > { %3917 = vmatprep.mubr.f32.mxu0 %v19841_v0  ;;  %14759 = vset.pattern.permute.xlu1 %v19853_v23 }
 0x13a   : > { %14372 = vmatmul.mubr.msk.f32.gmra.mxu1 %vm1148_vm3, %v15993_v2  ;;  %v16061_v4 = vpop.f32.mrf.mxu0  ;;  %v16063_v49 = vpop.f32.mrf.mxu1 }
 0x13b   : > { %4622 = vmatprep.mubr.f32.mxu1 %v19841_v0 }
 0x13c   : > { %v16074_v39 = vpop.f32.mrf.mxu0  ;;  %v16076_v42 = vpop.f32.mrf.mxu1  ;;  %14353 = vmatmul.mubr.msk.f32.gmra.mxu0 %vm1148_vm3, %v16026_v17 }
 0x13d   : > { %19852 = vst [vmem:[#allocation5_spill] sm:$0xff] %v16076_v42  ;;  %3923 = vmatprep.mubr.f32.mxu0 %v19841_v0  ;;  %v4267_v42 = vmax.f32 %v1689_v31, 0.0  ;;  %v4203_v31 = vmax.f32 %v1683_v35, 0.0  ;;  %v1879_v35 = vadd.f32 %v15945_v9, %v15864_v62  ;;  %v1873_v9 = vadd.f32 %v15921_v40, %v15937_v59 }
 0x13e   : > { %14376 = vmatmul.mubr.msk.f32.vlgmr.msra.gmra.mxu1 %vm4468_vm4, %v16054_v32  ;;  %v16090_v36 = vpop.f32.mrf.mxu0  ;;  %v16092_v3 = vpop.f32.mrf.mxu1 }
 0x13f   : > { %4749 = vmatpush1.msra.mxu1 %v4395_v43  ;;  %4628 = vmatprep.mubr.f32.mxu1 %v19841_v0  ;;  %v1428_v43 = vadd.f32 %v15839_v34, %v15937_v59  ;;  %v1422_v34 = vadd.f32 %v15817_v45, %v15927_v54  ;;  %v1416_v45 = vadd.f32 %v15802_v20, %v15960_v16 }
 0x140   : > { %4750 = vmatprep.subr.mxu1 %v4332_v56  ;;  %v16100_v14 = vpop.f32.mrf.mxu0  ;;  %v16102_v13 = vpop.f32.mrf.mxu1  ;;  %14354 = vmatmul.mubr.msk.f32.gmra.mxu0 %vm1148_vm3, %v15993_v2 }
 0x141   : > { %4751 = vmatpush1.msra.mxu1 %v4331_v52  ;;  %4083 = vmatprep.mubr.f32.mxu0 %v19841_v0  ;;  %v4389_v52 = vmax.f32 %v1434_v30, 0.0  ;;  %v4325_v30 = vmax.f32 %v1428_v43, 0.0  ;;  %v4261_v20 = vmax.f32 %v1422_v34, 0.0  ;;  %v1614_v43 = vadd.f32 %v16005_v19, %v15864_v62 }
 0x142   : > { %4752 = vmatprep.subr.mxu1 %v4268_v1  ;;  %14377 = vmatmul.mubr.msk.f32.gmra.mxu1 %vm4468_vm4, %v16039_v26  ;;  %v16113_v7 = vpop.f32.mrf.mxu0  ;;  %v16115_v56 = vpop.f32.mrf.mxu1  ;;  %v4197_v40 = vmax.f32 %v1416_v45, 0.0 }
 0x143   : > { %4753 = vmatpush1.msra.mxu1 %v4267_v42  ;;  %4634 = vmatprep.mubr.f32.mxu1 %v19841_v0  ;;  %v4326_v42 = vmax.f32 %v1430_v48, 0.0  ;;  %v4262_v48 = vmax.f32 %v1424_v41, 0.0  ;;  %v1869_v41 = vadd.f32 %v15917_v53, %v15927_v54  ;;  %v1863_v53 = vadd.f32 %v15903_v29, %v15960_v16 }
 0x144   : > { %4754 = vmatprep.subr.mxu1 %v4204_v61  ;;  %v16127_v37 = vpop.f32.mrf.mxu0  ;;  %v16129_v1 = vpop.f32.mrf.mxu1  ;;  %14363 = vmatmul.mubr.msk.f32.vlgmr.msra.gmra.mxu0 %vm1148_vm3, %v16018_v24  ;;  %v1875_v61 = vadd.f32 %v15934_v58, %v15937_v59 }
 0x145   : > { %4755 = vmatpush1.msra.mxu1 %v4203_v31  ;;  %4500 = vmatpush1.msra.mxu0 %v4389_v52  ;;  %v4198_v31 = vmax.f32 %v1418_v51, 0.0  ;;  %v4399_v52 = vmax.f32 %v1879_v35, 0.0  ;;  %v1867_v51 = vadd.f32 %v15908_v44, %v15927_v54  ;;  %v2059_v35 = vadd.f32 %v16063_v49, %v15864_v62 }
 0x146   : > { %4914 = vmatprep.subr.mxu1 %v4400_v38  ;;  %14378 = vmatmul.mubr.msk.f32.gmra.mxu1 %vm4468_vm4, %v16123_v15  ;;  %v16143_v24 = vpop.f32.mrf.mxu0  ;;  %v16145_v11 = vpop.f32.mrf.mxu1  ;;  %v4336_v34 = vmax.f32 %v1875_v61, 0.0  ;;  %v4272_v44 = vmax.f32 %v1869_v41, 0.0 }
 0x147   : > { %4501 = vmatprep.subr.mxu0 %v4326_v42  ;;  %4089 = vmatprep.mubr.f32.mxu0 %v19841_v0  ;;  %v4271_v49 = vmax.f32 %v1867_v51, 0.0  ;;  %v1608_v51 = vadd.f32 %v15979_v47, %v15937_v59 }
 0x148   : > { %4502 = vmatpush1.msra.mxu0 %v4325_v30  ;;  %4788 = vmatprep.mubr.f32.mxu1 %v19841_v0  ;;  %v16153_v58 = vpop.f32.mrf.mxu0  ;;  %v16155_v38 = vpop.f32.mrf.mxu1  ;;  %v4335_v30 = vmax.f32 %v1873_v9, 0.0 }
 0x149   : > { %4503 = vmatprep.subr.mxu0 %v4262_v48  ;;  %14364 = vmatmul.mubr.msk.f32.gmra.mxu0 %vm1148_vm3, %v16000_v63  ;;  %v4394_v63 = vmax.f32 %v1614_v43, 0.0  ;;  %v1861_v48 = vadd.f32 %v15894_v25, %v15960_v16  ;;  %v4404_v43 = vmax.f32 %v2059_v35, 0.0 }
 0x14a   : > { %4504 = vmatpush1.msra.mxu0 %v4261_v20  ;;  %14382 = vmatmul.mubr.msk.f32.vlgmr.msra.gmra.mxu1 %vm4468_vm4, %v16054_v32  ;;  %v16163_v19 = vpop.f32.mrf.mxu0  ;;  %v16165_v42 = vpop.f32.mrf.mxu1  ;;  %v4208_v20 = vmax.f32 %v1863_v53, 0.0  ;;  %v2053_v53 = vadd.f32 %v16032_v27, %v15937_v59 }
 0x14b   : > { %4915 = vmatpush1.msra.mxu1 %v4399_v52  ;;  %4505 = vmatprep.subr.mxu0 %v4198_v31  ;;  %v4207_v41 = vmax.f32 %v1861_v48, 0.0  ;;  %v1612_v52 = vadd.f32 %v15986_v33, %v15864_v62  ;;  %v1606_v33 = vadd.f32 %v15963_v6, %v15937_v59  ;;  %v1602_v6 = vadd.f32 %v15956_v12, %v15927_v54 }
 0x14c   : > { %4916 = vmatprep.subr.mxu1 %v4336_v34  ;;  %4506 = vmatpush1.msra.mxu0 %v4197_v40  ;;  %v16173_v45 = vpop.f32.mrf.mxu0  ;;  %v16175_v61 = vpop.f32.mrf.mxu1  ;;  %v19854_v34 = vmov 33   ;;  %v4330_v48 = vmax.f32 %v1608_v51, 0.0  ;;  %v4340_v12 = vmax.f32 %v2053_v53, 0.0 }
 0x14d   : > { %4917 = vmatpush1.msra.mxu1 %v4335_v30  ;;  %4095 = vmatprep.mubr.f32.mxu0 %v19841_v0  ;;  %v2057_v30 = vadd.f32 %v16043_v18, %v15864_v62  ;;  %v2051_v18 = vadd.f32 %v16013_v10, %v15937_v59  ;;  %v1600_v10 = vadd.f32 %v15943_v8, %v15927_v54  ;;  %v4266_v51 = vmax.f32 %v1602_v6, 0.0 }
 0x14e   : > { %4665 = vmatprep.subr.mxu0 %v4394_v63  ;;  %4794 = vmatprep.mubr.f32.mxu1 %v19841_v0  ;;  %v16181_v29 = vpop.f32.mrf.mxu0  ;;  %v16183_v9 = vpop.f32.mrf.mxu1  ;;  %v1594_v8 = vadd.f32 %v15919_v55, %v15960_v16  ;;  %v1792_v55 = vadd.f32 %v16113_v7, %v15864_v62 }
 0x14f   : > { %4918 = vmatprep.subr.mxu1 %v4272_v44  ;;  %14365 = vmatmul.mubr.msk.f32.gmra.mxu0 %vm1148_vm3, %v16026_v17  ;;  %v2047_v44 = vadd.f32 %v16007_v60, %v15927_v54  ;;  %v1596_v60 = vadd.f32 %v15932_v57, %v15960_v16  ;;  %v2039_v57 = vadd.f32 %v15965_v5, %v15960_v16 }
 0x150   : > { %14383 = vmatmul.mubr.msk.f32.gmra.mxu1 %vm4468_vm4, %v16039_v26  ;;  %4101 = vmatprep.mubr.f32.mxu0 %v19841_v0  ;;  %v16190_v25 = vpop.f32.mrf.mxu0  ;;  %v16192_v31 = vpop.f32.mrf.mxu1  ;;  %v2237_v5 = vadd.f32 %v16165_v42, %v15864_v62 }
 0x151   : > { %4919 = vmatpush1.msra.mxu1 %v4271_v49  ;;  %4800 = vmatprep.mubr.f32.mxu1 %v19841_v0  ;;  %v4403_v49 = vmax.f32 %v2057_v30, 0.0  ;;  %v2041_v30 = vadd.f32 %v15981_v46, %v15960_v16 }
 0x152   : > { %4920 = vmatprep.subr.mxu1 %v4208_v20  ;;  %v16197_v17 = vpop.f32.mrf.mxu0  ;;  %v16199_v40 = vpop.f32.mrf.mxu1  ;;  %14761 = vset.pattern.permute.xlu0 %v19854_v34  ;;  %v4329_v20 = vmax.f32 %v1606_v33, 0.0  ;;  %v4339_v34 = vmax.f32 %v2051_v18, 0.0  ;;  %v4265_v18 = vmax.f32 %v1600_v10, 0.0 }
 0x153   : > { %4921 = vmatpush1.msra.mxu1 %v4207_v41  ;;  %14366 = vmatmul.mubr.msk.f32.gmra.mxu0 %vm1148_vm3, %v15993_v2  ;;  %v4393_v2 = vmax.f32 %v1612_v52, 0.0  ;;  %v2045_v52 = vadd.f32 %v15988_v50, %v15927_v54  ;;  %v4276_v50 = vmax.f32 %v2047_v44, 0.0  ;;  %v4201_v44 = vmax.f32 %v1594_v8, 0.0 }
 0x154   : > { %5080 = vmatprep.subr.mxu1 %v4404_v43  ;;  %14384 = vmatmul.mubr.msk.f32.gmra.mxu1 %vm4468_vm4, %v16123_v15  ;;  %v16214_v63 = vpop.f32.mrf.mxu0  ;;  %v16216_v47 = vpop.f32.mrf.mxu1 }
 0x155   : > { %4539 = vmatprep.mubr.f32.mxu0 %v19841_v0  ;;  %4954 = vmatprep.mubr.f32.mxu1 %v19841_v0 }
 0x156   : > { %v16224_v27 = vpop.f32.mrf.mxu0  ;;  %v16226_v35 = vpop.f32.mrf.mxu1  ;;  %4465 = vperm.xlu0 %14761, %v16123_v15  }
 0x157   : > { %14373 = vmatmul.mubr.msk.f32.vlgmr.msra.gmra.mxu0 %vm4468_vm4, %v16054_v32 }
 0x158   : > { %4666 = vmatpush1.msra.mxu0 %v4393_v2  ;;  %14388 = vmatmul.mubr.msk.f32.vlgmr.msra.gmra.mxu1 %vm4468_vm4, %v16054_v32  ;;  %v16237_v43 = vpop.f32.mrf.mxu0  ;;  %v16239_v41 = vpop.f32.mrf.mxu1  ;;  %v4202_v2 = vmax.f32 %v1596_v60, 0.0 }
 0x159   : > { %5081 = vmatpush1.msra.mxu1 %v4403_v49  ;;  %4667 = vmatprep.subr.mxu0 %v4330_v48  ;;  %v4275_v48 = vmax.f32 %v2045_v52, 0.0  ;;  %v4212_v49 = vmax.f32 %v2041_v30, 0.0  ;;  %v4408_v52 = vmax.f32 %v2237_v5, 0.0  ;;  %v1786_v30 = vadd.f32 %v16090_v36, %v15937_v59 }
 0x15a   : > { %5082 = vmatprep.subr.mxu1 %v4340_v12  ;;  %4668 = vmatpush1.msra.mxu0 %v4329_v20  ;;  %v16249_v33 = vpop.f32.mrf.mxu0  ;;  %v16251_v53 = vpop.f32.mrf.mxu1  ;;  %v4211_v20 = vmax.f32 %v2039_v57, 0.0  ;;  %v4398_v12 = vmax.f32 %v1792_v55, 0.0  ;;  %v2235_v57 = vadd.f32 %v16155_v38, %v15864_v62  ;;  %v2229_v38 = vadd.f32 %v16129_v1, %v15937_v59 }
 0x15b   : > { %5083 = vmatpush1.msra.mxu1 %v4339_v34  ;;  %4545 = vmatprep.mubr.f32.mxu0 %v19841_v0  ;;  %v1790_v34 = vadd.f32 %v16100_v14, %v15864_v62  ;;  %v1784_v14 = vadd.f32 %v16074_v39, %v15937_v59  ;;  %v1780_v39 = vadd.f32 %v16061_v4, %v15927_v54 }
 0x15c   : > { %4669 = vmatprep.subr.mxu0 %v4266_v51  ;;  %4960 = vmatprep.mubr.f32.mxu1 %v19841_v0  ;;  %v16259_v46 = vpop.f32.mrf.mxu0  ;;  %v16261_v6 = vpop.f32.mrf.mxu1  ;;  %v2225_v5 = vadd.f32 %v16115_v56, %v15927_v54  ;;  %v1778_v1 = vadd.f32 %v16041_v28, %v15927_v54  ;;  %v1774_v56 = vadd.f32 %v16030_v22, %v15960_v16  ;;  %v19855_v22 = vld [vmem:[#allocation5_spill] sm:$0xff] }
 0x15d   : > { %5084 = vmatprep.subr.mxu1 %v4276_v50  ;;  %14374 = vmatmul.mubr.msk.f32.gmra.mxu0 %vm4468_vm4, %v16039_v26  ;;  %v2231_v50 = vadd.f32 %v16145_v11, %v15937_v59  ;;  %v4397_v11 = vmax.f32 %v1790_v34, 0.0  ;;  %v1772_v28 = vadd.f32 %v16011_v21, %v15960_v16  ;;  %v4270_v34 = vmax.f32 %v1780_v39, 0.0 }
 0x15e   : > { %4670 = vmatpush1.msra.mxu0 %v4265_v18  ;;  %14389 = vmatmul.mubr.msk.f32.gmra.mxu1 %vm4468_vm4, %v16039_v26  ;;  %v16269_v7 = vpop.f32.mrf.mxu0  ;;  %v16271_v10 = vpop.f32.mrf.mxu1  ;;  %v1970_v21 = vadd.f32 %v16197_v17, %v15864_v62 }
 0x15f   : > { %5085 = vmatpush1.msra.mxu1 %v4275_v48  ;;  %4671 = vmatprep.subr.mxu0 %v4202_v2  ;;  %v4334_v48 = vmax.f32 %v1786_v30, 0.0  ;;  %v2219_v30 = vadd.f32 %v16092_v3, %v15960_v16 }
 0x160   : > { %5086 = vmatprep.subr.mxu1 %v4212_v49  ;;  %4672 = vmatpush1.msra.mxu0 %v4201_v44  ;;  %v16273_v42 = vpop.f32.mrf.mxu0  ;;  %v16275_v60 = vpop.f32.mrf.mxu1  ;;  %v4407_v44 = vmax.f32 %v2235_v57, 0.0  ;;  %v4344_v49 = vmax.f32 %v2231_v50, 0.0  ;;  %v2217_v50 = vadd.f32 %v19855_v22, %v15960_v16  ;;  %v1964_v22 = vadd.f32 %v16181_v29, %v15937_v59 }
 0x161   : > { %5087 = vmatpush1.msra.mxu1 %v4211_v20  ;;  %4551 = vmatprep.mubr.f32.mxu0 %v19841_v0 }
 0x162   : > { %4831 = vmatprep.subr.mxu0 %v4398_v12  ;;  %4966 = vmatprep.mubr.f32.mxu1 %v19841_v0  ;;  %v16281_v8 = vpop.f32.mrf.mxu0  ;;  %v16283_v51 = vpop.f32.mrf.mxu1  ;;  %v2223_v12 = vadd.f32 %v16102_v13, %v15927_v54  ;;  %v4280_v13 = vmax.f32 %v2225_v5, 0.0  ;;  %v4205_v5 = vmax.f32 %v1772_v28, 0.0  ;;  %v1968_v28 = vadd.f32 %v16190_v25, %v15864_v62 }
 0x163   : > { %5246 = vmatprep.subr.mxu1 %v4408_v52  ;;  %14375 = vmatmul.mubr.msk.f32.gmra.mxu0 %vm4468_vm4, %v16123_v15  ;;  %v4343_v52 = vmax.f32 %v2229_v38, 0.0  ;;  %v4269_v38 = vmax.f32 %v1778_v1, 0.0  ;;  %v4216_v1 = vmax.f32 %v2219_v30, 0.0  ;;  %v1962_v25 = vadd.f32 %v16173_v45, %v15937_v59 }
 0x164   : > { %14390 = vmatmul.mubr.msk.f32.gmra.mxu1 %vm4468_vm4, %v16123_v15  ;;  %4705 = vmatprep.mubr.f32.mxu0 %v19841_v0  ;;  %v16298_v18 = vpop.f32.mrf.mxu0  ;;  %v16300_v36 = vpop.f32.mrf.mxu1  ;;  %v1958_v45 = vadd.f32 %v16163_v19, %v15927_v54 }
 0x165   : > { %5120 = vmatprep.mubr.f32.mxu1 %v19841_v0  ;;  %14762 = vset.pattern.permute.xlu0 %v19853_v23  ;;  %v4333_v23 = vmax.f32 %v1784_v14, 0.0 }
 0x166   : > { %v16308_v55 = vpop.f32.mrf.mxu0  ;;  %v16310_v2 = vpop.f32.mrf.mxu1 }
 0x167   : > { %14379 = vmatmul.mubr.msk.f32.vlgmr.msra.gmra.mxu0 %vm4468_vm4, %v16054_v32 }
 0x168   : > { %4832 = vmatpush1.msra.mxu0 %v4397_v11  ;;  %14394 = vmatmul.mubr.msk.f32.vlgmr.msra.gmra.mxu1 %vm4468_vm4, %v16054_v32  ;;  %v16320_v4 = vpop.f32.mrf.mxu0  ;;  %v16322_v20 = vpop.f32.mrf.mxu1  ;;  %v4206_v11 = vmax.f32 %v1774_v56, 0.0  ;;  %v4402_v56 = vmax.f32 %v1970_v21, 0.0  ;;  %v4401_v21 = vmax.f32 %v1968_v28, 0.0 }
 0x169   : > { %5247 = vmatpush1.msra.mxu1 %v4407_v44  ;;  %4833 = vmatprep.subr.mxu0 %v4334_v48  ;;  %v4279_v48 = vmax.f32 %v2223_v12, 0.0  ;;  %v2415_v44 = vadd.f32 %v16251_v53, %v15864_v62 }
 0x16a   : > { %5248 = vmatprep.subr.mxu1 %v4344_v49  ;;  %4834 = vmatpush1.msra.mxu0 %v4333_v23  ;;  %v16332_v57 = vpop.f32.mrf.mxu0  ;;  %v16334_v14 = vpop.f32.mrf.mxu1  ;;  %v4215_v49 = vmax.f32 %v2217_v50, 0.0  ;;  %v2413_v50 = vadd.f32 %v16239_v41, %v15864_v62  ;;  %v2407_v41 = vadd.f32 %v16216_v47, %v15937_v59  ;;  %v1956_v47 = vadd.f32 %v16153_v58, %v15927_v54 }
 0x16b   : > { %5249 = vmatpush1.msra.mxu1 %v4343_v52  ;;  %4711 = vmatprep.mubr.f32.mxu0 %v19841_v0  ;;  %v4412_v52 = vmax.f32 %v2415_v44, 0.0  ;;  %v2403_v44 = vadd.f32 %v16199_v40, %v15927_v54  ;;  %v1952_v40 = vadd.f32 %v16143_v24, %v15960_v16  ;;  %v1950_v58 = vadd.f32 %v16127_v37, %v15960_v16 }
 0x16c   : > { %4835 = vmatprep.subr.mxu0 %v4270_v34  ;;  %5126 = vmatprep.mubr.f32.mxu1 %v19841_v0  ;;  %v16342_v3 = vpop.f32.mrf.mxu0  ;;  %v16344_v39 = vpop.f32.mrf.mxu1  ;;  %v4347_v28 = vmax.f32 %v2407_v41, 0.0  ;;  %v2395_v24 = vadd.f32 %v16175_v61, %v15960_v16  ;;  %v4273_v41 = vmax.f32 %v1956_v47, 0.0  ;;  %v2148_v37 = vadd.f32 %v16281_v8, %v15864_v62 }
 0x16d   : > { %5250 = vmatprep.subr.mxu1 %v4280_v13  ;;  %14380 = vmatmul.mubr.msk.f32.gmra.mxu0 %vm4468_vm4, %v16039_v26  ;;  %v2409_v13 = vadd.f32 %v16226_v35, %v15937_v59  ;;  %v2593_v61 = vadd.f32 %v16334_v14, %v15864_v62 }
 0x16e   : > { %4836 = vmatpush1.msra.mxu0 %v4269_v38  ;;  %14395 = vmatmul.mubr.msk.f32.gmra.mxu1 %vm4468_vm4, %v16039_v26  ;;  %v16352_v17 = vpop.f32.mrf.mxu0  ;;  %v16354_v23 = vpop.f32.mrf.mxu1 }
 0x16f   : > { %5251 = vmatpush1.msra.mxu1 %v4279_v48  ;;  %4837 = vmatprep.subr.mxu0 %v4206_v11  ;;  %v4338_v48 = vmax.f32 %v1964_v22, 0.0  ;;  %v4274_v22 = vmax.f32 %v1958_v45, 0.0 }
 0x170   : > { %5252 = vmatprep.subr.mxu1 %v4216_v1  ;;  %4838 = vmatpush1.msra.mxu0 %v4205_v5  ;;  %v16356_v53 = vpop.f32.mrf.mxu0  ;;  %v16358_v12 = vpop.f32.mrf.mxu1  ;;  %v4411_v5 = vmax.f32 %v2413_v50, 0.0  ;;  %v4337_v1 = vmax.f32 %v1962_v25, 0.0  ;;  %v2397_v50 = vadd.f32 %v16183_v9, %v15960_v16 }
 0x171   : > { %5253 = vmatpush1.msra.mxu1 %v4215_v49  ;;  %4717 = vmatprep.mubr.f32.mxu0 %v19841_v0  ;;  %v4348_v49 = vmax.f32 %v2409_v13, 0.0 }
 0x172   : > { %4997 = vmatprep.subr.mxu0 %v4402_v56  ;;  %5132 = vmatprep.mubr.f32.mxu1 %v19841_v0  ;;  %v16364_v34 = vpop.f32.mrf.mxu0  ;;  %v16366_v30 = vpop.f32.mrf.mxu1 }
 0x173   : > { %5412 = vmatprep.subr.mxu1 %v4412_v52  ;;  %14381 = vmatmul.mubr.msk.f32.gmra.mxu0 %vm4468_vm4, %v16123_v15  ;;  %v2401_v52 = vadd.f32 %v16192_v31, %v15927_v54  ;;  %v4284_v31 = vmax.f32 %v2403_v44, 0.0  ;;  %v4209_v44 = vmax.f32 %v1950_v58, 0.0 }
 0x174   : > { %14396 = vmatmul.mubr.msk.f32.gmra.mxu1 %vm4468_vm4, %v16123_v15  ;;  %4871 = vmatprep.mubr.f32.mxu0 %v19841_v0  ;;  %v16381_v38 = vpop.f32.mrf.mxu0  ;;  %v16383_v29 = vpop.f32.mrf.mxu1 }
 0x175   : > { %5286 = vmatprep.mubr.f32.mxu1 %v19841_v0 }
 0x176   : > { %v16390_v11 = vpop.f32.mrf.mxu0  ;;  %v16392_v35 = vpop.f32.mrf.mxu1 }
 0x177   : > { %14385 = vmatmul.mubr.msk.f32.vlgmr.msra.gmra.mxu0 %vm4468_vm4, %v16054_v32 }
 0x178   : > { %4998 = vmatpush1.msra.mxu0 %v4401_v21  ;;  %14400 = vmatmul.mubr.msk.f32.vlgmr.msra.gmra.mxu1 %vm4468_vm4, %v16054_v32  ;;  %v16402_v19 = vpop.f32.mrf.mxu0  ;;  %v16404_v56 = vpop.f32.mrf.mxu1  ;;  %v4210_v21 = vmax.f32 %v1952_v40, 0.0 }
 0x179   : > { %5413 = vmatpush1.msra.mxu1 %v4411_v5  ;;  %4999 = vmatprep.subr.mxu0 %v4338_v48  ;;  %v4283_v48 = vmax.f32 %v2401_v52, 0.0  ;;  %v4220_v5 = vmax.f32 %v2397_v50, 0.0  ;;  %v4416_v52 = vmax.f32 %v2593_v61, 0.0  ;;  %v2142_v50 = vadd.f32 %v16269_v7, %v15937_v59 }
 0x17a   : > { %5414 = vmatprep.subr.mxu1 %v4348_v49  ;;  %5000 = vmatpush1.msra.mxu0 %v4337_v1  ;;  %v16414_v25 = vpop.f32.mrf.mxu0  ;;  %v16416_v13 = vpop.f32.mrf.mxu1  ;;  %v4219_v1 = vmax.f32 %v2395_v24, 0.0  ;;  %v4406_v49 = vmax.f32 %v2148_v37, 0.0  ;;  %v2591_v24 = vadd.f32 %v16322_v20, %v15864_v62  ;;  %v2585_v20 = vadd.f32 %v16300_v36, %v15937_v59 }
 0x17b   : > { %5415 = vmatpush1.msra.mxu1 %v4347_v28  ;;  %4877 = vmatprep.mubr.f32.mxu0 %v19841_v0  ;;  %v2146_v28 = vadd.f32 %v16273_v42, %v15864_v62  ;;  %v2140_v42 = vadd.f32 %v16259_v46, %v15937_v59  ;;  %v2136_v46 = vadd.f32 %v16249_v33, %v15927_v54 }
 0x17c   : > { %5001 = vmatprep.subr.mxu0 %v4274_v22  ;;  %5292 = vmatprep.mubr.f32.mxu1 %v19841_v0  ;;  %v16424_v9 = vpop.f32.mrf.mxu0  ;;  %v16426_v45 = vpop.f32.mrf.mxu1  ;;  %v2581_v61 = vadd.f32 %v16283_v51, %v15927_v54  ;;  %v2134_v36 = vadd.f32 %v16237_v43, %v15927_v54  ;;  %v2130_v51 = vadd.f32 %v16224_v27, %v15960_v16 }
 0x17d   : > { %5416 = vmatprep.subr.mxu1 %v4284_v31  ;;  %14386 = vmatmul.mubr.msk.f32.gmra.mxu0 %vm4468_vm4, %v16039_v26  ;;  %v2587_v31 = vadd.f32 %v16310_v2, %v15937_v59  ;;  %v4405_v37 = vmax.f32 %v2146_v28, 0.0  ;;  %v4351_v28 = vmax.f32 %v2585_v20, 0.0  ;;  %v2128_v43 = vadd.f32 %v16214_v63, %v15960_v16 }
 0x17e   : > { %5002 = vmatpush1.msra.mxu0 %v4273_v41  ;;  %14401 = vmatmul.mubr.msk.f32.gmra.mxu1 %vm4468_vm4, %v16039_v26  ;;  %v16434_v8 = vpop.f32.mrf.mxu0  ;;  %v16436_v47 = vpop.f32.mrf.mxu1  ;;  %v2573_v27 = vadd.f32 %v16261_v6, %v15960_v16  ;;  %v2771_v20 = vadd.f32 %v16416_v13, %v15864_v62  ;;  %v4277_v63 = vmax.f32 %v2134_v36, 0.0 }
 0x17f   : > { %5417 = vmatpush1.msra.mxu1 %v4283_v48  ;;  %5003 = vmatprep.subr.mxu0 %v4210_v21  ;;  %v4342_v48 = vmax.f32 %v2142_v50, 0.0  ;;  %v4278_v50 = vmax.f32 %v2136_v46, 0.0  ;;  %v4213_v13 = vmax.f32 %v2128_v43, 0.0 }
 0x180   : > { %5418 = vmatprep.subr.mxu1 %v4220_v5  ;;  %5004 = vmatpush1.msra.mxu0 %v4209_v44  ;;  %v16438_v14 = vpop.f32.mrf.mxu0  ;;  %v16440_v40 = vpop.f32.mrf.mxu1  ;;  %v4415_v44 = vmax.f32 %v2591_v24, 0.0  ;;  %v4341_v5 = vmax.f32 %v2140_v42, 0.0  ;;  %v2575_v24 = vadd.f32 %v16271_v10, %v15960_v16  ;;  %v2326_v10 = vadd.f32 %v16364_v34, %v15864_v62 }
 0x181   : > { %5419 = vmatpush1.msra.mxu1 %v4219_v1  ;;  %4883 = vmatprep.mubr.f32.mxu0 %v19841_v0  ;;  %v4352_v1 = vmax.f32 %v2587_v31, 0.0  ;;  %v4223_v36 = vmax.f32 %v2573_v27, 0.0  ;;  %v2769_v27 = vadd.f32 %v16404_v56, %v15864_v62  ;;  %v2763_v56 = vadd.f32 %v16383_v29, %v15937_v59 }
 0x182   : > { %5163 = vmatprep.subr.mxu0 %v4406_v49  ;;  %5298 = vmatprep.mubr.f32.mxu1 %v19841_v0  ;;  %v16446_v58 = vpop.f32.mrf.mxu0  ;;  %v16448_v22 = vpop.f32.mrf.mxu1  ;;  %v2312_v29 = vadd.f32 %v16320_v4, %v15927_v54  ;;  %v2306_v4 = vadd.f32 %v16298_v18, %v15960_v16 }
 0x183   : > { %5578 = vmatprep.subr.mxu1 %v4416_v52  ;;  %14387 = vmatmul.mubr.msk.f32.gmra.mxu0 %vm4468_vm4, %v16123_v15  ;;  %v2579_v52 = vadd.f32 %v16275_v60, %v15927_v54  ;;  %v4288_v60 = vmax.f32 %v2581_v61, 0.0  ;;  %v4224_v61 = vmax.f32 %v2575_v24, 0.0  ;;  %v2320_v24 = vadd.f32 %v16352_v17, %v15937_v59 }
 0x184   : > { %14402 = vmatmul.mubr.msk.f32.gmra.mxu1 %vm4468_vm4, %v16123_v15  ;;  %5037 = vmatprep.mubr.f32.mxu0 %v19841_v0  ;;  %v16463_v41 = vpop.f32.mrf.mxu0  ;;  %v16465_v7 = vpop.f32.mrf.mxu1  ;;  %v2504_v18 = vadd.f32 %v16446_v58, %v15864_v62 }
 0x185   : > { %5452 = vmatprep.mubr.f32.mxu1 %v19841_v0  ;;  %v4287_v6 = vmax.f32 %v2579_v52, 0.0 }
 0x186   : > { %v16472_v21 = vpop.f32.mrf.mxu0  ;;  %v16474_v2 = vpop.f32.mrf.mxu1 }
 0x187   : > { %14391 = vmatmul.mubr.msk.f32.vlgmr.msra.gmra.mxu0 %vm4468_vm4, %v16054_v32 }
 0x188   : > { %5164 = vmatpush1.msra.mxu0 %v4405_v37  ;;  %14406 = vmatmul.mubr.msk.f32.vlgmr.msra.gmra.mxu1 %vm4468_vm4, %v16054_v32  ;;  %v16484_v33 = vpop.f32.mrf.mxu0  ;;  %v16486_v49 = vpop.f32.mrf.mxu1 }
 0x189   : > { %5579 = vmatpush1.msra.mxu1 %v4415_v44  ;;  %5165 = vmatprep.subr.mxu0 %v4342_v48  ;;  %v4214_v48 = vmax.f32 %v2130_v51, 0.0 }
 0x18a   : > { %5580 = vmatprep.subr.mxu1 %v4352_v1  ;;  %5166 = vmatpush1.msra.mxu0 %v4341_v5  ;;  %v16496_v42 = vpop.f32.mrf.mxu0  ;;  %v16498_v31 = vpop.f32.mrf.mxu1  ;;  %v4420_v5 = vmax.f32 %v2771_v20, 0.0  ;;  %v4410_v1 = vmax.f32 %v2326_v10, 0.0 }
 0x18b   : > { %5581 = vmatpush1.msra.mxu1 %v4351_v28  ;;  %5043 = vmatprep.mubr.f32.mxu0 %v19841_v0  ;;  %v2324_v28 = vadd.f32 %v16356_v53, %v15864_v62  ;;  %v2318_v53 = vadd.f32 %v16342_v3, %v15937_v59  ;;  %v2314_v3 = vadd.f32 %v16332_v57, %v15927_v54 }
 0x18c   : > { %5167 = vmatprep.subr.mxu0 %v4278_v50  ;;  %5458 = vmatprep.mubr.f32.mxu1 %v19841_v0  ;;  %v16508_v46 = vpop.f32.mrf.mxu0  ;;  %v16510_v37 = vpop.f32.mrf.mxu1 }
 0x18d   : > { %5582 = vmatprep.subr.mxu1 %v4288_v60  ;;  %14392 = vmatmul.mubr.msk.f32.gmra.mxu0 %vm4468_vm4, %v16039_v26  ;;  %v2765_v60 = vadd.f32 %v16392_v35, %v15937_v59 }
 0x18e   : > { %5168 = vmatpush1.msra.mxu0 %v4277_v63  ;;  %14407 = vmatmul.mubr.msk.f32.gmra.mxu1 %vm4468_vm4, %v16039_v26  ;;  %v16516_v34 = vpop.f32.mrf.mxu0  ;;  %v16518_v44 = vpop.f32.mrf.mxu1  ;;  %v4409_v63 = vmax.f32 %v2324_v28, 0.0  ;;  %v4355_v28 = vmax.f32 %v2763_v56, 0.0 }
 0x18f   : > { %5583 = vmatpush1.msra.mxu1 %v4287_v6  ;;  %5169 = vmatprep.subr.mxu0 %v4214_v48  ;;  %v4346_v48 = vmax.f32 %v2320_v24, 0.0  ;;  %v2759_v6 = vadd.f32 %v16366_v30, %v15927_v54  ;;  %v2308_v30 = vadd.f32 %v16308_v55, %v15960_v16  ;;  %v4282_v24 = vmax.f32 %v2314_v3, 0.0 }
 0x190   : > { %5584 = vmatprep.subr.mxu1 %v4224_v61  ;;  %5170 = vmatpush1.msra.mxu0 %v4213_v13  ;;  %v16520_v51 = vpop.f32.mrf.mxu0  ;;  %v16522_v52 = vpop.f32.mrf.mxu1  ;;  %v4419_v13 = vmax.f32 %v2769_v27, 0.0  ;;  %v4345_v61 = vmax.f32 %v2318_v53, 0.0  ;;  %v2751_v55 = vadd.f32 %v16344_v39, %v15960_v16  ;;  %v2949_v39 = vadd.f32 %v16498_v31, %v15864_v62 }
 0x191   : > { %5585 = vmatpush1.msra.mxu1 %v4223_v36  ;;  %5049 = vmatprep.mubr.f32.mxu0 %v19841_v0  ;;  %v4356_v36 = vmax.f32 %v2765_v60, 0.0  ;;  %v4281_v60 = vmax.f32 %v2312_v29, 0.0  ;;  %v4218_v3 = vmax.f32 %v2308_v30, 0.0 }
 0x192   : > { %5329 = vmatprep.subr.mxu0 %v4410_v1  ;;  %5464 = vmatprep.mubr.f32.mxu1 %v19841_v0  ;;  %v16528_v43 = vpop.f32.mrf.mxu0  ;;  %v16530_v50 = vpop.f32.mrf.mxu1  ;;  %v2757_v1 = vadd.f32 %v16358_v12, %v15927_v54  ;;  %v4292_v12 = vmax.f32 %v2759_v6, 0.0  ;;  %v4227_v29 = vmax.f32 %v2751_v55, 0.0  ;;  %v4424_v31 = vmax.f32 %v2949_v39, 0.0 }
 0x193   : > { %5744 = vmatprep.subr.mxu1 %v4420_v5  ;;  %14393 = vmatmul.mubr.msk.f32.gmra.mxu0 %vm4468_vm4, %v16123_v15  ;;  %v2935_v39 = vadd.f32 %v16440_v40, %v15927_v54  ;;  %v2484_v40 = vadd.f32 %v16381_v38, %v15960_v16 }
 0x194   : > { %14408 = vmatmul.mubr.msk.f32.gmra.mxu1 %vm4468_vm4, %v16123_v15  ;;  %5203 = vmatprep.mubr.f32.mxu0 %v19841_v0  ;;  %v16545_v20 = vpop.f32.mrf.mxu0  ;;  %v16547_v17 = vpop.f32.mrf.mxu1 }
 0x195   : > { %5618 = vmatprep.mubr.f32.mxu1 %v19841_v0 }
 0x196   : > { %v16554_v10 = vpop.f32.mrf.mxu0  ;;  %v16556_v35 = vpop.f32.mrf.mxu1 }
 0x197   : > { %14397 = vmatmul.mubr.msk.f32.vlgmr.msra.gmra.mxu0 %vm4468_vm4, %v16054_v32 }
 0x198   : > { %5330 = vmatpush1.msra.mxu0 %v4409_v63  ;;  %14412 = vmatmul.mubr.msk.f32.vlgmr.msra.gmra.mxu1 %vm4468_vm4, %v16054_v32  ;;  %v16566_v57 = vpop.f32.mrf.mxu0  ;;  %v16568_v5 = vpop.f32.mrf.mxu1  ;;  %v2753_v32 = vadd.f32 %v16354_v23, %v15960_v16  ;;  %v4291_v63 = vmax.f32 %v2757_v1, 0.0  ;;  %v2947_v1 = vadd.f32 %v16486_v49, %v15864_v62  ;;  %v2941_v49 = vadd.f32 %v16465_v7, %v15937_v59 }
 0x199   : > { %5745 = vmatpush1.msra.mxu1 %v4419_v13  ;;  %5331 = vmatprep.subr.mxu0 %v4346_v48  ;;  %v4217_v48 = vmax.f32 %v2306_v4, 0.0 }
 0x19a   : > { %5746 = vmatprep.subr.mxu1 %v4356_v36  ;;  %5332 = vmatpush1.msra.mxu0 %v4345_v61  ;;  %v16578_v27 = vpop.f32.mrf.mxu0  ;;  %v16580_v53 = vpop.f32.mrf.mxu1  ;;  %v4228_v6 = vmax.f32 %v2753_v32, 0.0  ;;  %v4414_v61 = vmax.f32 %v2504_v18, 0.0  ;;  %v2943_v32 = vadd.f32 %v16474_v2, %v15937_v59  ;;  %v2492_v2 = vadd.f32 %v16414_v25, %v15927_v54 }
 0x19b   : > { %5747 = vmatpush1.msra.mxu1 %v4355_v28  ;;  %5209 = vmatprep.mubr.f32.mxu0 %v19841_v0  ;;  %v2490_v25 = vadd.f32 %v16402_v19, %v15927_v54  ;;  %v2682_v19 = vadd.f32 %v16528_v43, %v15864_v62  ;;  %v3127_v38 = vadd.f32 %v16580_v53, %v15864_v62 }
 0x19c   : > { %5333 = vmatprep.subr.mxu0 %v4282_v24  ;;  %5624 = vmatprep.mubr.f32.mxu1 %v19841_v0  ;;  %v16588_v23 = vpop.f32.mrf.mxu0  ;;  %v16590_v56 = vpop.f32.mrf.mxu1  ;;  %v2498_v24 = vadd.f32 %v16434_v8, %v15937_v59 }
 0x19d   : > { %5748 = vmatprep.subr.mxu1 %v4292_v12  ;;  %14398 = vmatmul.mubr.msk.f32.gmra.mxu0 %vm4468_vm4, %v16039_v26 }
 0x19e   : > { %5334 = vmatpush1.msra.mxu0 %v4281_v60  ;;  %14413 = vmatmul.mubr.msk.f32.gmra.mxu1 %vm4468_vm4, %v16039_v26  ;;  %v16598_v58 = vpop.f32.mrf.mxu0  ;;  %v16600_v13 = vpop.f32.mrf.mxu1  ;;  %v2502_v26 = vadd.f32 %v16438_v14, %v15864_v62  ;;  %v2496_v14 = vadd.f32 %v16424_v9, %v15937_v59  ;;  %v4423_v9 = vmax.f32 %v2947_v1, 0.0  ;;  %v4350_v18 = vmax.f32 %v2498_v24, 0.0 }
 0x19f   : > { %5749 = vmatpush1.msra.mxu1 %v4291_v63  ;;  %5335 = vmatprep.subr.mxu0 %v4218_v3  ;;  %v4360_v3 = vmax.f32 %v2943_v32, 0.0  ;;  %v16645_v63 = vld [vmem:[%s19828_s2 + $0x20] sm:$0xff]  ;;  %v2929_v1 = vadd.f32 %v16426_v45, %v15960_v16 }
 0x1a0   : > { %5750 = vmatprep.subr.mxu1 %v4228_v6  ;;  %5336 = vmatpush1.msra.mxu0 %v4217_v48  ;;  %v16602_v36 = vpop.f32.mrf.mxu0  ;;  %v16604_v30 = vpop.f32.mrf.mxu1  ;;  %v4413_v12 = vmax.f32 %v2502_v26, 0.0  ;;  %v4359_v48 = vmax.f32 %v2941_v49, 0.0  ;;  %v2931_v26 = vadd.f32 %v16436_v47, %v15960_v16  ;;  %v4285_v47 = vmax.f32 %v2490_v25, 0.0 }
 0x1a1   : > { %5751 = vmatpush1.msra.mxu1 %v4227_v29  ;;  %5215 = vmatprep.mubr.f32.mxu0 %v19841_v0  ;;  %v4231_v53 = vmax.f32 %v2929_v1, 0.0  ;;  %v4428_v25 = vmax.f32 %v3127_v38, 0.0  ;;  %v3125_v38 = vadd.f32 %v16568_v5, %v15864_v62  ;;  %v3119_v5 = vadd.f32 %v16547_v17, %v15937_v59 }
 0x1a2   : > { %5495 = vmatprep.subr.mxu0 %v4414_v61  ;;  %5630 = vmatprep.mubr.f32.mxu1 %v19841_v0  ;;  %v16612_v28 = vpop.f32.mrf.mxu0  ;;  %v16614_v4 = vpop.f32.mrf.mxu1  ;;  %v2486_v61 = vadd.f32 %v16390_v11, %v15960_v16 }
 0x1a3   : > { %14399 = vmatmul.mubr.msk.f32.gmra.mxu0 %vm4468_vm4, %v16123_v15  ;;  %14414 = vmatmul.mubr.msk.f32.gmra.mxu1 %vm4468_vm4, %v16123_v15  ;;  %v2937_v15 = vadd.f32 %v16448_v22, %v15927_v54  ;;  %v4349_v22 = vmax.f32 %v2496_v14, 0.0  ;;  %v4295_v14 = vmax.f32 %v2935_v39, 0.0  ;;  %v2860_v17 = vadd.f32 %v16612_v28, %v15864_v62 }
 0x1a4   : > { %5369 = vmatprep.mubr.f32.mxu0 %v19841_v0  ;;  %5784 = vmatprep.mubr.f32.mxu1 %v19841_v0  ;;  %v16630_v8 = vpop.f32.mrf.mxu0  ;;  %v16632_v55 = vpop.f32.mrf.mxu1  ;;  %v4222_v49 = vmax.f32 %v2486_v61, 0.0  ;;  %v2676_v61 = vadd.f32 %v16516_v34, %v15937_v59  ;;  %v2670_v34 = vadd.f32 %v16496_v42, %v15927_v54 }
 0x1a5   : > { %5910 = vmatprep.subr.mxu1 %v4424_v31  ;;  %v4286_v31 = vmax.f32 %v2492_v2, 0.0  ;;  %v4296_v24 = vmax.f32 %v2937_v15, 0.0  ;;  %v4232_v2 = vmax.f32 %v2931_v26, 0.0  ;;  %v16684_v15 = vld [vmem:[%s19828_s2 + $0x28] sm:$0xff] }
 0x1a6   : > { %v16638_v60 = vpop.f32.mrf.mxu0  ;;  %v16640_v7 = vpop.f32.mrf.mxu1 }
 0x1a7   : > { %14403 = vmatmul.mubr.msk.f32.vlgmr.msra.gmra.mxu0 %vm4468_vm4, %v16645_v63  ;;  %14418 = vmatmul.mubr.msk.f32.vlgmr.msra.gmra.mxu1 %vm4468_vm4, %v16645_v63 }
 0x1a8   : > { %5496 = vmatpush1.msra.mxu0 %v4413_v12  ;;  %5911 = vmatpush1.msra.mxu1 %v4423_v9  ;;  %v16655_v6 = vpop.f32.mrf.mxu0  ;;  %v16657_v29 = vpop.f32.mrf.mxu1  ;;  %v4418_v12 = vmax.f32 %v2682_v19, 0.0  ;;  %v4221_v9 = vmax.f32 %v2484_v40, 0.0 }
 0x1a9   : > { %5497 = vmatprep.subr.mxu0 %v4350_v18  ;;  %5912 = vmatprep.subr.mxu1 %v4360_v3 }
 0x1aa   : > { %5498 = vmatpush1.msra.mxu0 %v4349_v22  ;;  %5913 = vmatpush1.msra.mxu1 %v4359_v48  ;;  %v16669_v32 = vpop.f32.mrf.mxu0  ;;  %v16671_v11 = vpop.f32.mrf.mxu1  ;;  %v2680_v48 = vadd.f32 %v16520_v51, %v15864_v62  ;;  %v2674_v51 = vadd.f32 %v16508_v46, %v15937_v59  ;;  %v2664_v46 = vadd.f32 %v16472_v21, %v15960_v16  ;;  %v4290_v21 = vmax.f32 %v2670_v34, 0.0 }
 0x1ab   : > { %5375 = vmatprep.mubr.f32.mxu0 %v19841_v0  ;;  %5499 = vmatprep.subr.mxu0 %v4286_v31  ;;  %v16707_v31 = vld [vmem:[%s19828_s2 + $0x30] sm:$0x1] }
 0x1ac   : > { %5790 = vmatprep.mubr.f32.mxu1 %v19841_v0  ;;  %5914 = vmatprep.subr.mxu1 %v4296_v24  ;;  %v16677_v43 = vpop.f32.mrf.mxu0  ;;  %v16679_v45 = vpop.f32.mrf.mxu1  ;;  %v2668_v24 = vadd.f32 %v16484_v33, %v15927_v54  ;;  %v3121_v33 = vadd.f32 %v16556_v35, %v15937_v59  ;;  %v4226_v35 = vmax.f32 %v2664_v46, 0.0  ;;  %v4363_v46 = vmax.f32 %v3119_v5, 0.0 }
 0x1ad   : > { %14404 = vmatmul.mubr.msk.f32.gmra.mxu0 %vm4468_vm4, %v16684_v15  ;;  %14419 = vmatmul.mubr.msk.f32.gmra.mxu1 %vm4468_vm4, %v16684_v15 }
 0x1ae   : > { %5500 = vmatpush1.msra.mxu0 %v4285_v47  ;;  %5915 = vmatpush1.msra.mxu1 %v4295_v14  ;;  %v16690_v18 = vpop.f32.mrf.mxu0  ;;  %v16692_v3 = vpop.f32.mrf.mxu1  ;;  %v4417_v47 = vmax.f32 %v2680_v48, 0.0  ;;  %v4354_v14 = vmax.f32 %v2676_v61, 0.0  ;;  %v4427_v48 = vmax.f32 %v3125_v38, 0.0  ;;  %v3107_v38 = vadd.f32 %v16510_v37, %v15960_v16 }
 0x1af   : > { %5501 = vmatprep.subr.mxu0 %v4222_v49  ;;  %5916 = vmatprep.subr.mxu1 %v4232_v2  ;;  %v2662_v2 = vadd.f32 %v16463_v41, %v15960_v16  ;;  %v4289_v41 = vmax.f32 %v2668_v24, 0.0  ;;  %v4364_v24 = vmax.f32 %v3121_v33, 0.0  ;;  %v3305_v37 = vadd.f32 %v16671_v11, %v15864_v62 }
 0x1b0   : > { %5502 = vmatpush1.msra.mxu0 %v4221_v9  ;;  %5917 = vmatpush1.msra.mxu1 %v4231_v53  ;;  %v16694_v22 = vpop.f32.mrf.mxu0  ;;  %v16696_v39 = vpop.f32.mrf.mxu1 }
 0x1b1   : > { %5381 = vmatprep.mubr.f32.mxu0 %v19841_v0  ;;  %5661 = vmatprep.subr.mxu0 %v4418_v12  ;;  %v4353_v12 = vmax.f32 %v2674_v51, 0.0  ;;  %v4225_v34 = vmax.f32 %v2662_v2, 0.0 }
 0x1b2   : > { %5796 = vmatprep.mubr.f32.mxu1 %v19841_v0  ;;  %14405 = vmatmul.mubr.msk.f32.gmra.mxu0 %vm4468_vm4, %v16707_v31  ;;  %v16711_v26 = vpop.f32.mrf.mxu0  ;;  %v16713_v19 = vpop.f32.mrf.mxu1 }
 0x1b3   : > { %14420 = vmatmul.mubr.msk.f32.gmra.mxu1 %vm4468_vm4, %v16707_v31  ;;  %5535 = vmatprep.mubr.f32.mxu0 %v19841_v0 }
 0x1b4   : > { %5950 = vmatprep.mubr.f32.mxu1 %v19841_v0  ;;  %6076 = vmatprep.subr.mxu1 %v4428_v25  ;;  %v16723_v40 = vpop.f32.mrf.mxu0  ;;  %v16725_v1 = vpop.f32.mrf.mxu1  ;;  %v3115_v25 = vadd.f32 %v16530_v50, %v15927_v54  ;;  %v3113_v50 = vadd.f32 %v16522_v52, %v15927_v54  ;;  %v4422_v52 = vmax.f32 %v2860_v17, 0.0 }
 0x1b6   : > { %14409 = vmatmul.mubr.msk.f32.vlgmr.msra.gmra.mxu0 %vm4468_vm4, %v16645_v63  ;;  %v16735_v42 = vpop.f32.mrf.mxu0  ;;  %v16737_v49 = vpop.f32.mrf.mxu1  ;;  %v4300_v2 = vmax.f32 %v3115_v25, 0.0  ;;  %v4299_v33 = vmax.f32 %v3113_v50, 0.0 }
 0x1b7   : > { %5662 = vmatpush1.msra.mxu0 %v4417_v47  ;;  %14424 = vmatmul.mubr.msk.f32.vlgmr.msra.gmra.mxu1 %vm4468_vm4, %v16645_v63  ;;  %v3109_v47 = vadd.f32 %v16518_v44, %v15960_v16 }
 0x1b8   : > { %5663 = vmatprep.subr.mxu0 %v4354_v14  ;;  %5541 = vmatprep.mubr.f32.mxu0 %v19841_v0  ;;  %v16748_v9 = vpop.f32.mrf.mxu0  ;;  %v16750_v53 = vpop.f32.mrf.mxu1 }
 0x1b9   : > { %5664 = vmatpush1.msra.mxu0 %v4353_v12  ;;  %5956 = vmatprep.mubr.f32.mxu1 %v19841_v0  ;;  %v4236_v5 = vmax.f32 %v3109_v47, 0.0 }
 0x1ba   : > { %5665 = vmatprep.subr.mxu0 %v4290_v21  ;;  %14410 = vmatmul.mubr.msk.f32.gmra.mxu0 %vm4468_vm4, %v16684_v15  ;;  %v16759_v61 = vpop.f32.mrf.mxu0  ;;  %v16761_v51 = vpop.f32.mrf.mxu1  ;;  %v2858_v21 = vadd.f32 %v16602_v36, %v15864_v62  ;;  %v4235_v36 = vmax.f32 %v3107_v38, 0.0 }
 0x1bb   : > { %5666 = vmatpush1.msra.mxu0 %v4289_v41  ;;  %14425 = vmatmul.mubr.msk.f32.gmra.mxu1 %vm4468_vm4, %v16684_v15  ;;  %v2854_v41 = vadd.f32 %v16598_v58, %v15937_v59  ;;  %v2848_v58 = vadd.f32 %v16578_v27, %v15927_v54 }
 0x1bc   : > { %6077 = vmatpush1.msra.mxu1 %v4427_v48  ;;  %5667 = vmatprep.subr.mxu0 %v4226_v35  ;;  %v16769_v28 = vpop.f32.mrf.mxu0  ;;  %v16771_v14 = vpop.f32.mrf.mxu1  ;;  %v2852_v48 = vadd.f32 %v16588_v23, %v15937_v59  ;;  %v4421_v50 = vmax.f32 %v2858_v21, 0.0  ;;  %v4432_v23 = vmax.f32 %v3305_v37, 0.0 }
 0x1bd   : > { %6078 = vmatprep.subr.mxu1 %v4364_v24  ;;  %5668 = vmatpush1.msra.mxu0 %v4225_v34  ;;  %v2846_v34 = vadd.f32 %v16566_v57, %v15927_v54  ;;  %v2842_v24 = vadd.f32 %v16554_v10, %v15960_v16  ;;  %v4358_v47 = vmax.f32 %v2854_v41, 0.0  ;;  %v2840_v57 = vadd.f32 %v16545_v20, %v15960_v16 }
 0x1be   : > { %6079 = vmatpush1.msra.mxu1 %v4363_v46  ;;  %5547 = vmatprep.mubr.f32.mxu0 %v19841_v0  ;;  %v16776_v12 = vpop.f32.mrf.mxu0  ;;  %v16778_v44 = vpop.f32.mrf.mxu1  ;;  %v4357_v38 = vmax.f32 %v2852_v48, 0.0  ;;  %v4294_v10 = vmax.f32 %v2848_v58, 0.0  ;;  %v3297_v20 = vadd.f32 %v16632_v55, %v15937_v59  ;;  %v3291_v55 = vadd.f32 %v16604_v30, %v15927_v54 }
 0x1bf   : > { %5962 = vmatprep.mubr.f32.mxu1 %v19841_v0  ;;  %6080 = vmatprep.subr.mxu1 %v4300_v2  ;;  %v3303_v2 = vadd.f32 %v16657_v29, %v15864_v62  ;;  %v4293_v37 = vmax.f32 %v2846_v34, 0.0  ;;  %v4230_v29 = vmax.f32 %v2842_v24, 0.0  ;;  %v4229_v41 = vmax.f32 %v2840_v57, 0.0 }
 0x1c0   : > { %14411 = vmatmul.mubr.msk.f32.gmra.mxu0 %vm4468_vm4, %v16707_v31  ;;  %14426 = vmatmul.mubr.msk.f32.gmra.mxu1 %vm4468_vm4, %v16707_v31  ;;  %v16791_v25 = vpop.f32.mrf.mxu0  ;;  %v16793_v35 = vpop.f32.mrf.mxu1  ;;  %v3038_v34 = vadd.f32 %v16711_v26, %v15864_v62  ;;  %v4367_v24 = vmax.f32 %v3297_v20, 0.0  ;;  %v3285_v30 = vadd.f32 %v16590_v56, %v15960_v16 }
 0x1c1   : > { %6081 = vmatpush1.msra.mxu1 %v4299_v33  ;;  %5701 = vmatprep.mubr.f32.mxu0 %v19841_v0  ;;  %v4431_v48 = vmax.f32 %v3303_v2, 0.0  ;;  %v3032_v2 = vadd.f32 %v16690_v18, %v15937_v59  ;;  %v3026_v18 = vadd.f32 %v16669_v32, %v15927_v54  ;;  %v3483_v32 = vadd.f32 %v16761_v51, %v15864_v62 }
 0x1c2   : > { %6082 = vmatprep.subr.mxu1 %v4236_v5  ;;  %5827 = vmatprep.subr.mxu0 %v4422_v52  ;;  %v16800_v11 = vpop.f32.mrf.mxu0  ;;  %v16802_v17 = vpop.f32.mrf.mxu1  ;;  %v3299_v52 = vadd.f32 %v16640_v7, %v15937_v59  ;;  %v4426_v56 = vmax.f32 %v3038_v34, 0.0  ;;  %v4239_v20 = vmax.f32 %v3285_v30, 0.0 }
 0x1c3   : > { %6083 = vmatpush1.msra.mxu1 %v4235_v36  ;;  %6116 = vmatprep.mubr.f32.mxu1 %v19841_v0  ;;  %v3293_v36 = vadd.f32 %v16614_v4, %v15927_v54  ;;  %v3287_v4 = vadd.f32 %v16600_v13, %v15960_v16  ;;  %v4303_v13 = vmax.f32 %v3291_v55, 0.0  ;;  %v4362_v55 = vmax.f32 %v3032_v2, 0.0 }
 0x1c4   : > { %14415 = vmatmul.mubr.msk.f32.vlgmr.msra.gmra.mxu0 %vm4468_vm4, %v16645_v63  ;;  %14430 = vmatmul.mubr.msk.f32.vlgmr.msra.gmra.mxu1 %vm4468_vm4, %v16645_v63  ;;  %v16813_v27 = vpop.f32.mrf.mxu0  ;;  %v16815_v46 = vpop.f32.mrf.mxu1  ;;  %v4368_v58 = vmax.f32 %v3299_v52, 0.0 }
 0x1c5   : > { %5828 = vmatpush1.msra.mxu0 %v4421_v50  ;;  %5707 = vmatprep.mubr.f32.mxu0 %v19841_v0  ;;  %v4304_v57 = vmax.f32 %v3293_v36, 0.0  ;;  %v3024_v36 = vadd.f32 %v16655_v6, %v15927_v54  ;;  %v3018_v6 = vadd.f32 %v16630_v8, %v15960_v16  ;;  %v3481_v8 = vadd.f32 %v16750_v53, %v15864_v62 }
 0x1c6   : > { %5829 = vmatprep.subr.mxu0 %v4358_v47  ;;  %6122 = vmatprep.mubr.f32.mxu1 %v19841_v0  ;;  %v16825_v33 = vpop.f32.mrf.mxu0  ;;  %v16827_v21 = vpop.f32.mrf.mxu1 }
 0x1c7   : > { %5830 = vmatpush1.msra.mxu0 %v4357_v38  ;;  %6242 = vmatprep.subr.mxu1 %v4432_v23  ;;  %v3036_v38 = vadd.f32 %v16694_v22, %v15864_v62  ;;  %v3030_v22 = vadd.f32 %v16677_v43, %v15937_v59  ;;  %v3020_v43 = vadd.f32 %v16638_v60, %v15960_v16 }
 0x1c8   : > { %5831 = vmatprep.subr.mxu0 %v4294_v10  ;;  %14416 = vmatmul.mubr.msk.f32.gmra.mxu0 %vm4468_vm4, %v16684_v15  ;;  %v16833_v5 = vpop.f32.mrf.mxu0  ;;  %v16835_v7 = vpop.f32.mrf.mxu1  ;;  %v3216_v60 = vadd.f32 %v16800_v11, %v15864_v62  ;;  %v3477_v11 = vadd.f32 %v16737_v49, %v15937_v59  ;;  %v3471_v49 = vadd.f32 %v16713_v19, %v15927_v54 }
 0x1c9   : > { %5832 = vmatpush1.msra.mxu0 %v4293_v37  ;;  %14431 = vmatmul.mubr.msk.f32.gmra.mxu1 %vm4468_vm4, %v16684_v15  ;;  %v4240_v37 = vmax.f32 %v3287_v4, 0.0  ;;  %v4361_v4 = vmax.f32 %v3030_v22, 0.0  ;;  %v3475_v22 = vadd.f32 %v16725_v1, %v15937_v59  ;;  %v4435_v1 = vmax.f32 %v3481_v8, 0.0 }
 0x1ca   : > { %5833 = vmatprep.subr.mxu0 %v4230_v29  ;;  %5713 = vmatprep.mubr.f32.mxu0 %v19841_v0  ;;  %v16846_v50 = vpop.f32.mrf.mxu0  ;;  %v16848_v23 = vpop.f32.mrf.mxu1  ;;  %v4430_v53 = vmax.f32 %v3216_v60, 0.0 }
 0x1cb   : > { %5834 = vmatpush1.msra.mxu0 %v4229_v41  ;;  %6243 = vmatpush1.msra.mxu1 %v4431_v48  ;;  %v4425_v48 = vmax.f32 %v3036_v38, 0.0  ;;  %v4234_v38 = vmax.f32 %v3020_v43, 0.0  ;;  %v4372_v43 = vmax.f32 %v3477_v11, 0.0  ;;  %v3204_v11 = vadd.f32 %v16759_v61, %v15927_v54 }
 0x1cc   : > { %14417 = vmatmul.mubr.msk.f32.gmra.mxu0 %vm4468_vm4, %v16707_v31  ;;  %6244 = vmatprep.subr.mxu1 %v4368_v58  ;;  %v16856_v47 = vpop.f32.mrf.mxu0  ;;  %v16858_v26 = vpop.f32.mrf.mxu1  ;;  %v3198_v61 = vadd.f32 %v16735_v42, %v15960_v16  ;;  %v3655_v42 = vadd.f32 %v16827_v21, %v15937_v59  ;;  %v3653_v21 = vadd.f32 %v16815_v46, %v15937_v59 }
 0x1cd   : > { %6128 = vmatprep.mubr.f32.mxu1 %v19841_v0  ;;  %6245 = vmatpush1.msra.mxu1 %v4367_v24  ;;  %v4298_v24 = vmax.f32 %v3026_v18, 0.0 }
 0x1ce   : > { %5867 = vmatprep.mubr.f32.mxu0 %v19841_v0  ;;  %14432 = vmatmul.mubr.msk.f32.gmra.mxu1 %vm4468_vm4, %v16707_v31  ;;  %v16868_v10 = vpop.f32.mrf.mxu0  ;;  %v16870_v52 = vpop.f32.mrf.mxu1  ;;  %v4376_v46 = vmax.f32 %v3655_v42, 0.0 }
 0x1cf   : > { %6246 = vmatprep.subr.mxu1 %v4304_v57  ;;  %6282 = vmatprep.mubr.f32.mxu1 %v19841_v0  ;;  %v4297_v57 = vmax.f32 %v3024_v36, 0.0  ;;  %v3469_v36 = vadd.f32 %v16696_v39, %v15927_v54  ;;  %v3214_v39 = vadd.f32 %v16791_v25, %v15864_v62 }
 0x1d0   : > { %14421 = vmatmul.mubr.msk.f32.vlgmr.msra.gmra.mxu0 %vm4468_vm4, %v16645_v63  ;;  %6247 = vmatpush1.msra.mxu1 %v4303_v13  ;;  %v16879_v29 = vpop.f32.mrf.mxu0  ;;  %v16881_v41 = vpop.f32.mrf.mxu1  ;;  %v4436_v13 = vmax.f32 %v3483_v32, 0.0  ;;  %v3463_v32 = vadd.f32 %v16679_v45, %v15960_v16  ;;  %v3208_v45 = vadd.f32 %v16769_v28, %v15937_v59  ;;  %v3661_v28 = vadd.f32 %v16848_v23, %v15864_v62 }
 0x1d1   : > { %6248 = vmatprep.subr.mxu1 %v4240_v37  ;;  %5873 = vmatprep.mubr.f32.mxu0 %v19841_v0  ;;  %v4233_v37 = vmax.f32 %v3018_v6, 0.0  ;;  %v4371_v6 = vmax.f32 %v3475_v22, 0.0  ;;  %v3196_v23 = vadd.f32 %v16723_v40, %v15960_v16 }
 0x1d2   : > { %6249 = vmatpush1.msra.mxu1 %v4239_v20  ;;  %5993 = vmatprep.subr.mxu0 %v4426_v56  ;;  %v16890_v58 = vpop.f32.mrf.mxu0  ;;  %v16892_v34 = vpop.f32.mrf.mxu1 }
 0x1d3   : > { %14436 = vmatmul.mubr.msk.f32.vlgmr.msra.gmra.mxu1 %vm4468_vm4, %v16645_v63  ;;  %5994 = vmatpush1.msra.mxu0 %v4425_v48  ;;  %v3465_v48 = vadd.f32 %v16692_v3, %v15960_v16  ;;  %v3210_v3 = vadd.f32 %v16776_v12, %v15937_v59  ;;  %v3394_v40 = vadd.f32 %v16890_v58, %v15864_v62 }
 0x1d4   : > { %14422 = vmatmul.mubr.msk.f32.gmra.mxu0 %vm4468_vm4, %v16684_v15  ;;  %5995 = vmatprep.subr.mxu0 %v4362_v55  ;;  %v16902_v51 = vpop.f32.mrf.mxu0  ;;  %v16904_v30 = vpop.f32.mrf.mxu1  ;;  %v3649_v58 = vadd.f32 %v16802_v17, %v15927_v54 }
 0x1d5   : > { %5996 = vmatpush1.msra.mxu0 %v4361_v4  ;;  %6288 = vmatprep.mubr.f32.mxu1 %v19841_v0  ;;  %v4308_v4 = vmax.f32 %v3471_v49, 0.0  ;;  %v4244_v25 = vmax.f32 %v3465_v48, 0.0  ;;  %v4366_v22 = vmax.f32 %v3210_v3, 0.0  ;;  %v4237_v3 = vmax.f32 %v3196_v23, 0.0 }
 0x1d6   : > { %5879 = vmatprep.mubr.f32.mxu0 %v19841_v0  ;;  %5997 = vmatprep.subr.mxu0 %v4298_v24  ;;  %v16912_v2 = vpop.f32.mrf.mxu0  ;;  %v16914_v56 = vpop.f32.mrf.mxu1 }
 0x1d7   : > { %14437 = vmatmul.mubr.msk.f32.gmra.mxu1 %vm4468_vm4, %v16684_v15  ;;  %5998 = vmatpush1.msra.mxu0 %v4297_v57  ;;  %v4307_v57 = vmax.f32 %v3469_v36, 0.0  ;;  %v4365_v36 = vmax.f32 %v3208_v45, 0.0 }
 0x1d8   : > { %14423 = vmatmul.mubr.msk.f32.gmra.mxu0 %vm4468_vm4, %v16707_v31  ;;  %5999 = vmatprep.subr.mxu0 %v4234_v38  ;;  %v16924_v20 = vpop.f32.mrf.mxu0  ;;  %v16926_v18 = vpop.f32.mrf.mxu1  ;;  %v4243_v38 = vmax.f32 %v3463_v32, 0.0  ;;  %v4440_v32 = vmax.f32 %v3661_v28, 0.0 }
 0x1d9   : > { %6000 = vmatpush1.msra.mxu0 %v4233_v37  ;;  %6033 = vmatprep.mubr.f32.mxu0 %v19841_v0  ;;  %v3202_v37 = vadd.f32 %v16748_v9, %v15927_v54  ;;  %v3659_v9 = vadd.f32 %v16835_v7, %v15864_v62 }
 0x1da   : > { %6408 = vmatprep.subr.mxu1 %v4436_v13  ;;  %6294 = vmatprep.mubr.f32.mxu1 %v19841_v0  ;;  %v16934_v19 = vpop.f32.mrf.mxu0  ;;  %v16936_v55 = vpop.f32.mrf.mxu1  ;;  %v4429_v13 = vmax.f32 %v3214_v39, 0.0 }
 0x1db   : > { %6409 = vmatpush1.msra.mxu1 %v4435_v1  ;;  %6159 = vmatprep.subr.mxu0 %v4430_v53 }
 0x1dc   : > { %14427 = vmatmul.mubr.msk.f32.vlgmr.msra.gmra.mxu0 %vm4468_vm4, %v16645_v63  ;;  %6410 = vmatprep.subr.mxu1 %v4372_v43  ;;  %v16946_v60 = vpop.f32.mrf.mxu0  ;;  %v16948_v24 = vpop.f32.mrf.mxu1  ;;  %v4302_v43 = vmax.f32 %v3204_v11, 0.0  ;;  %v4434_v11 = vmax.f32 %v3394_v40, 0.0 }
 0x1dd   : > { %6411 = vmatpush1.msra.mxu1 %v4371_v6  ;;  %6039 = vmatprep.mubr.f32.mxu0 %v19841_v0  ;;  %v4301_v6 = vmax.f32 %v3202_v37, 0.0  ;;  %v3641_v37 = vadd.f32 %v16771_v14, %v15960_v16 }
 0x1de   : > { %14438 = vmatmul.mubr.msk.f32.gmra.mxu1 %vm4468_vm4, %v16707_v31  ;;  %6412 = vmatprep.subr.mxu1 %v4308_v4  ;;  %v16955_v12 = vpop.f32.mrf.mxu0  ;;  %v16957_v8 = vpop.f32.mrf.mxu1  ;;  %v4238_v4 = vmax.f32 %v3198_v61, 0.0  ;;  %v4312_v61 = vmax.f32 %v3649_v58, 0.0 }
 0x1df   : > { %6413 = vmatpush1.msra.mxu1 %v4307_v57  ;;  %6448 = vmatprep.mubr.f32.mxu1 %v19841_v0  ;;  %v4439_v57 = vmax.f32 %v3659_v9, 0.0  ;;  %v3386_v9 = vadd.f32 %v16856_v47, %v15937_v59  ;;  %v4247_v42 = vmax.f32 %v3641_v37, 0.0  ;;  %v3839_v47 = vadd.f32 %v16936_v55, %v15864_v62 }
 0x1e0   : > { %14428 = vmatmul.mubr.msk.f32.gmra.mxu0 %vm4468_vm4, %v16684_v15  ;;  %6414 = vmatprep.subr.mxu1 %v4244_v25  ;;  %v16968_v53 = vpop.f32.mrf.mxu0  ;;  %v16970_v49 = vpop.f32.mrf.mxu1  ;;  %v3374_v55 = vadd.f32 %v16813_v27, %v15960_v16 }
 0x1e1   : > { %6415 = vmatpush1.msra.mxu1 %v4243_v38  ;;  %6160 = vmatpush1.msra.mxu0 %v4429_v13  ;;  %v3647_v38 = vadd.f32 %v16793_v35, %v15927_v54  ;;  %v3643_v13 = vadd.f32 %v16778_v44, %v15960_v16  ;;  %v3392_v35 = vadd.f32 %v16879_v29, %v15864_v62  ;;  %v4369_v58 = vmax.f32 %v3386_v9, 0.0 }
 0x1e2   : > { %14442 = vmatmul.mubr.msk.f32.vlgmr.msra.gmra.mxu1 %vm4468_vm4, %v16645_v63  ;;  %6161 = vmatprep.subr.mxu0 %v4366_v22  ;;  %v16980_v1 = vpop.f32.mrf.mxu0  ;;  %v16982_v48 = vpop.f32.mrf.mxu1  ;;  %v4375_v22 = vmax.f32 %v3653_v21, 0.0  ;;  %v3388_v44 = vadd.f32 %v16868_v10, %v15937_v59 }
 0x1e3   : > { %6045 = vmatprep.mubr.f32.mxu0 %v19841_v0  ;;  %6162 = vmatpush1.msra.mxu0 %v4365_v36  ;;  %v4311_v14 = vmax.f32 %v3647_v38, 0.0  ;;  %v4248_v29 = vmax.f32 %v3643_v13, 0.0  ;;  %v4433_v40 = vmax.f32 %v3392_v35, 0.0  ;;  %v3572_v27 = vadd.f32 %v16980_v1, %v15864_v62 }
 0x1e4   : > { %6454 = vmatprep.mubr.f32.mxu1 %v19841_v0  ;;  %14429 = vmatmul.mubr.msk.f32.gmra.mxu0 %vm4468_vm4, %v16707_v31  ;;  %v16992_v7 = vpop.f32.mrf.mxu0  ;;  %v16994_v39 = vpop.f32.mrf.mxu1  ;;  %v4241_v1 = vmax.f32 %v3374_v55, 0.0  ;;  %v3827_v35 = vadd.f32 %v16892_v34, %v15927_v54 }
 0x1e5   : > { %6163 = vmatprep.subr.mxu0 %v4302_v43  ;;  %6199 = vmatprep.mubr.f32.mxu0 %v19841_v0  ;;  %v4438_v9 = vmax.f32 %v3572_v27, 0.0 }
 0x1e6   : > { %14443 = vmatmul.mubr.msk.f32.gmra.mxu1 %vm4468_vm4, %v16684_v15  ;;  %6164 = vmatpush1.msra.mxu0 %v4301_v6  ;;  %v17003_v45 = vpop.f32.mrf.mxu0  ;;  %v17005_v25 = vpop.f32.mrf.mxu1  ;;  %v3380_v6 = vadd.f32 %v16833_v5, %v15927_v54  ;;  %v3837_v5 = vadd.f32 %v16926_v18, %v15864_v62 }
 0x1e7   : > { %6165 = vmatprep.subr.mxu0 %v4238_v4  ;;  %6574 = vmatprep.subr.mxu1 %v4440_v32  ;;  %v3382_v32 = vadd.f32 %v16846_v50, %v15927_v54  ;;  %v4370_v4 = vmax.f32 %v3388_v44, 0.0  ;;  %v3376_v50 = vadd.f32 %v16825_v33, %v15960_v16  ;;  %v4444_v33 = vmax.f32 %v3839_v47, 0.0 }
 0x1e8   : > { %6166 = vmatpush1.msra.mxu0 %v4237_v3  ;;  %6575 = vmatpush1.msra.mxu1 %v4439_v57  ;;  %v17011_v17 = vpop.f32.mrf.mxu0  ;;  %v17013_v28 = vpop.f32.mrf.mxu1  ;;  %v4305_v13 = vmax.f32 %v3380_v6, 0.0  ;;  %v4316_v47 = vmax.f32 %v3827_v35, 0.0 }
 0x1e9   : > { %14433 = vmatmul.mubr.msk.f32.vlgmr.msra.gmra.mxu0 %vm4468_vm4, %v16645_v63  ;;  %6576 = vmatprep.subr.mxu1 %v4376_v46  ;;  %v4306_v38 = vmax.f32 %v3382_v32, 0.0  ;;  %v3833_v46 = vadd.f32 %v16914_v56, %v15937_v59  ;;  %v4242_v37 = vmax.f32 %v3376_v50, 0.0  ;;  %v3831_v56 = vadd.f32 %v16904_v30, %v15937_v59 }
 0x1ea   : > { %6205 = vmatprep.mubr.f32.mxu0 %v19841_v0  ;;  %6460 = vmatprep.mubr.f32.mxu1 %v19841_v0  ;;  %v17025_v36 = vpop.f32.mrf.mxu0  ;;  %v17027_v23 = vpop.f32.mrf.mxu1  ;;  %v3819_v32 = vadd.f32 %v16858_v26, %v15960_v16  ;;  %v3564_v50 = vadd.f32 %v16946_v60, %v15937_v59 }
 0x1eb   : > { %6577 = vmatpush1.msra.mxu1 %v4375_v22  ;;  %6325 = vmatprep.subr.mxu0 %v4434_v11  ;;  %v4380_v30 = vmax.f32 %v3833_v46, 0.0  ;;  %v4017_v60 = vadd.f32 %v17027_v23, %v15864_v62  ;;  %v3558_v46 = vadd.f32 %v16924_v20, %v15927_v54  ;;  %v3552_v23 = vadd.f32 %v16902_v51, %v15960_v16 }
 0x1ec   : > { %14444 = vmatmul.mubr.msk.f32.gmra.mxu1 %vm4468_vm4, %v16707_v31  ;;  %6578 = vmatprep.subr.mxu1 %v4312_v61  ;;  %v17033_v10 = vpop.f32.mrf.mxu0  ;;  %v17035_v43 = vpop.f32.mrf.mxu1  ;;  %v4443_v61 = vmax.f32 %v3837_v5, 0.0  ;;  %v4251_v55 = vmax.f32 %v3819_v32, 0.0  ;;  %v3560_v5 = vadd.f32 %v16934_v19, %v15927_v54  ;;  %v3554_v19 = vadd.f32 %v16912_v2, %v15960_v16 }
 0x1ed   : > { %14434 = vmatmul.mubr.msk.f32.gmra.mxu0 %vm4468_vm4, %v16684_v15  ;;  %6579 = vmatpush1.msra.mxu1 %v4311_v14  ;;  %v3825_v14 = vadd.f32 %v16881_v41, %v15927_v54  ;;  %v3570_v41 = vadd.f32 %v16968_v53, %v15864_v62  ;;  %v4015_v20 = vadd.f32 %v17013_v28, %v15864_v62 }
 0x1ee   : > { %6580 = vmatprep.subr.mxu1 %v4248_v29  ;;  %6614 = vmatprep.mubr.f32.mxu1 %v19841_v0  ;;  %v17046_v21 = vpop.f32.mrf.mxu0  ;;  %v17048_v3 = vpop.f32.mrf.mxu1  ;;  %v3821_v29 = vadd.f32 %v16870_v52, %v15960_v16  ;;  %v3566_v52 = vadd.f32 %v16955_v12, %v15937_v59  ;;  %v4310_v35 = vmax.f32 %v3560_v5, 0.0  ;;  %v4011_v2 = vadd.f32 %v17005_v25, %v15937_v59 }
 0x1ef   : > { %6581 = vmatpush1.msra.mxu1 %v4247_v42  ;;  %6326 = vmatpush1.msra.mxu0 %v4433_v40  ;;  %v4379_v40 = vmax.f32 %v3831_v56, 0.0  ;;  %v4315_v26 = vmax.f32 %v3825_v14, 0.0  ;;  %v4309_v14 = vmax.f32 %v3558_v46, 0.0  ;;  %v4009_v25 = vadd.f32 %v16994_v39, %v15937_v59 }
 0x1f0   : > { %14448 = vmatmul.mubr.msk.f32.vlgmr.msra.gmra.mxu1 %vm4468_vm4, %v16645_v63  ;;  %6327 = vmatprep.subr.mxu0 %v4370_v4  ;;  %v17058_v57 = vpop.f32.mrf.mxu0  ;;  %v4252_v53 = vmax.f32 %v3821_v29, 0.0  ;;  %v4245_v29 = vmax.f32 %v3552_v23, 0.0  ;;  %v4447_v32 = vmax.f32 %v4015_v20, 0.0  ;;  %v3736_v23 = vadd.f32 %v17011_v17, %v15927_v54  ;;  %v17209_v17 = vld [vmem:[%s19828_s2 + $0x20] sm:$0xff] }
 0x1f1   : > { %6211 = vmatprep.mubr.f32.mxu0 %v19841_v0  ;;  %6328 = vmatpush1.msra.mxu0 %v4369_v58  ;;  %v17065_v11 = vpop.f32.mrf.mxu1 }
 0x1f2   : > { %6620 = vmatprep.mubr.f32.mxu1 %v19841_v0  ;;  %14435 = vmatmul.mubr.msk.f32.gmra.mxu0 %vm4468_vm4, %v16707_v31  ;;  %v17070_v18 = vpop.f32.mrf.mxu0 }
 0x1f3   : > { %6329 = vmatprep.subr.mxu0 %v4306_v38  ;;  %6365 = vmatprep.mubr.f32.mxu0 %v19841_v0  ;;  %v17075_v22 = vpop.f32.mrf.mxu1  ;;  %v4437_v38 = vmax.f32 %v3570_v41, 0.0  ;;  %v3750_v51 = vadd.f32 %v17070_v18, %v15864_v62  ;;  %v4005_v18 = vadd.f32 %v16982_v48, %v15927_v54 }
 0x1f4   : > { %14449 = vmatmul.mubr.msk.f32.gmra.mxu1 %vm4468_vm4, %v16684_v15  ;;  %6330 = vmatpush1.msra.mxu0 %v4305_v13  ;;  %v17081_v44 = vpop.f32.mrf.mxu0 }
 0x1f5   : > { %6331 = vmatprep.subr.mxu0 %v4242_v37  ;;  %6740 = vmatprep.subr.mxu1 %v4444_v33  ;;  %v4374_v33 = vmax.f32 %v3566_v52, 0.0  ;;  %v4373_v37 = vmax.f32 %v3564_v50, 0.0  ;;  %v4384_v52 = vmax.f32 %v4011_v2, 0.0  ;;  %v4442_v39 = vmax.f32 %v3750_v51, 0.0 }
 0x1f6   : > { %6332 = vmatpush1.msra.mxu0 %v4241_v1  ;;  %6741 = vmatpush1.msra.mxu1 %v4443_v61  ;;  %v17087_v34 = vpop.f32.mrf.mxu1  ;;  %v17089_v42 = vpop.f32.mrf.mxu0  ;;  %v4448_v61 = vmax.f32 %v4017_v60, 0.0  ;;  %v4320_v5 = vmax.f32 %v4005_v18, 0.0 }
 0x1f7   : > { %14439 = vmatmul.mubr.msk.f32.vlgmr.msra.gmra.mxu0 %vm4468_vm4, %v16645_v63  ;;  %6742 = vmatprep.subr.mxu1 %v4380_v30  ;;  %v4187_v18 = vadd.f32 %v17087_v34, %v15937_v59 }
 0x1f8   : > { %6371 = vmatprep.mubr.f32.mxu0 %v19841_v0  ;;  %6626 = vmatprep.mubr.f32.mxu1 %v19841_v0  ;;  %v17101_v6 = vpop.f32.mrf.mxu1  ;;  %v17103_v4 = vpop.f32.mrf.mxu0 }
 0x1f9   : > { %6743 = vmatpush1.msra.mxu1 %v4379_v40  ;;  %6491 = vmatprep.subr.mxu0 %v4438_v9  ;;  %v4246_v9 = vmax.f32 %v3554_v19, 0.0 }
 0x1fa   : > { %14450 = vmatmul.mubr.msk.f32.gmra.mxu1 %vm4468_vm4, %v16707_v31  ;;  %6744 = vmatprep.subr.mxu1 %v4316_v47  ;;  %v17109_v12 = vpop.f32.mrf.mxu1  ;;  %v17111_v58 = vpop.f32.mrf.mxu0  ;;  %v4003_v47 = vadd.f32 %v16970_v49, %v15927_v54  ;;  %v3748_v49 = vadd.f32 %v17058_v57, %v15864_v62 }
 0x1fb   : > { %14440 = vmatmul.mubr.msk.f32.gmra.mxu0 %vm4468_vm4, %v16684_v15  ;;  %6745 = vmatpush1.msra.mxu1 %v4315_v26  ;;  %v3999_v26 = vadd.f32 %v16957_v8, %v15960_v16  ;;  %v3744_v8 = vadd.f32 %v17046_v21, %v15937_v59  ;;  %v4193_v51 = vadd.f32 %v17109_v12, %v15864_v62 }
 0x1fc   : > { %6746 = vmatprep.subr.mxu1 %v4252_v53  ;;  %6780 = vmatprep.mubr.f32.mxu1 %v19841_v0  ;;  %v17122_v27 = vpop.f32.mrf.mxu1  ;;  %v17124_v13 = vpop.f32.mrf.mxu0  ;;  %v3997_v53 = vadd.f32 %v16948_v24, %v15960_v16  ;;  %v4319_v24 = vmax.f32 %v4003_v47, 0.0  ;;  %v4441_v19 = vmax.f32 %v3748_v49, 0.0  ;;  %v4183_v47 = vadd.f32 %v17075_v22, %v15927_v54 }
 0x1fd   : > { %6747 = vmatpush1.msra.mxu1 %v4251_v55  ;;  %6492 = vmatpush1.msra.mxu0 %v4437_v38  ;;  %v4383_v55 = vmax.f32 %v4009_v25, 0.0  ;;  %v4256_v57 = vmax.f32 %v3999_v26, 0.0  ;;  %v4378_v20 = vmax.f32 %v3744_v8, 0.0 }
 0x1fe   : > { %14454 = vmatmul.mubr.msk.f32.vlgmr.msra.gmra.mxu1 %vm4468_vm4, %v16645_v63  ;;  %6493 = vmatprep.subr.mxu0 %v4374_v33  ;;  %v17134_v56 = vpop.f32.mrf.mxu1  ;;  %v17136_v1 = vpop.f32.mrf.mxu0  ;;  %v4255_v46 = vmax.f32 %v3997_v53, 0.0  ;;  %v3738_v33 = vadd.f32 %v17025_v36, %v15927_v54  ;;  %v3732_v36 = vadd.f32 %v17003_v45, %v15960_v16  ;;  %v4177_v53 = vadd.f32 %v17048_v3, %v15960_v16 }
 0x1ff   : > { %6377 = vmatprep.mubr.f32.mxu0 %v19841_v0  ;;  %6494 = vmatpush1.msra.mxu0 %v4373_v37  ;;  %v4324_v49 = vmax.f32 %v4183_v47, 0.0 }
 0x200   : > { %6786 = vmatprep.mubr.f32.mxu1 %v19841_v0  ;;  %14441 = vmatmul.mubr.msk.f32.gmra.mxu0 %vm4468_vm4, %v16707_v31  ;;  %v17146_v28 = vpop.f32.mrf.mxu1  ;;  %v17148_v30 = vpop.f32.mrf.mxu0  ;;  %v4250_v12 = vmax.f32 %v3732_v36, 0.0 }
 0x201   : > { %6495 = vmatprep.subr.mxu0 %v4310_v35  ;;  %6531 = vmatprep.mubr.f32.mxu0 %v19841_v0 }
 0x202   : > { %14455 = vmatmul.mubr.msk.f32.gmra.mxu1 %vm4468_vm4, %v16684_v15  ;;  %6496 = vmatpush1.msra.mxu0 %v4309_v14  ;;  %v17157_v40 = vpop.f32.mrf.mxu1  ;;  %v3927_v41 = vpop.f32.mrf.mxu0  ;;  %v4314_v14 = vmax.f32 %v3738_v33, 0.0 }
 0x203   : > { %6497 = vmatprep.subr.mxu0 %v4246_v9  ;;  %6906 = vmatprep.subr.mxu1 %v4448_v61  ;;  %v4189_v9 = vadd.f32 %v17101_v6, %v15937_v59  ;;  %v17264_v33 = vpop.permute.xlu0 %4460 }
 0x204   : > { %6498 = vmatpush1.msra.mxu0 %v4245_v29  ;;  %6907 = vmatpush1.msra.mxu1 %v4447_v32  ;;  %v17163_v48 = vpop.f32.mrf.mxu1  ;;  %v17165_v50 = vpop.f32.mrf.mxu0  ;;  %v4313_v29 = vmax.f32 %v3736_v23, 0.0  ;;  %v3914_v23 = vadd.f32 %v17103_v4, %v15927_v54 }
 0x205   : > { %14445 = vmatmul.mubr.msk.f32.vlgmr.msra.gmra.mxu0 %vm4468_vm4, %v16645_v63  ;;  %6908 = vmatprep.subr.mxu1 %v4384_v52  ;;  %v3742_v63 = vadd.f32 %v17033_v10, %v15937_v59  ;;  %v4195_v10 = vadd.f32 %v17122_v27, %v15864_v62  ;;  %v3730_v27 = vadd.f32 %v16992_v7, %v15960_v16  ;;  %v4388_v34 = vmax.f32 %v4189_v9, 0.0 }
 0x206   : > { %6537 = vmatprep.mubr.f32.mxu0 %v19841_v0  ;;  %6792 = vmatprep.mubr.f32.mxu1 %v19841_v0  ;;  %v17177_v38 = vpop.f32.mrf.mxu1  ;;  %v17179_v60 = vpop.f32.mrf.mxu0  ;;  %v3928_v7 = vadd.f32 %v3927_v41, %v15864_v62  ;;  %v4451_v41 = vmax.f32 %v4193_v51, 0.0 }
 0x207   : > { %6909 = vmatpush1.msra.mxu1 %v4383_v55  ;;  %6657 = vmatprep.subr.mxu0 %v4442_v39  ;;  %v4377_v2 = vmax.f32 %v3742_v63, 0.0  ;;  %v4452_v25 = vmax.f32 %v4195_v10, 0.0  ;;  %v4249_v32 = vmax.f32 %v3730_v27, 0.0  ;;  %v4387_v55 = vmax.f32 %v4187_v18, 0.0 }
 0x208   : > { %14456 = vmatmul.mubr.msk.f32.gmra.mxu1 %vm4468_vm4, %v16707_v31  ;;  %6910 = vmatprep.subr.mxu1 %v4320_v5  ;;  %v17185_v21 = vpop.f32.mrf.mxu1  ;;  %v4446_v39 = vmax.f32 %v3928_v7, 0.0  ;;  %v3926_v5 = vadd.f32 %v17148_v30, %v15864_v62  ;;  %v4260_v63 = vmax.f32 %v4177_v53, 0.0  ;;  %v17258_v30 = vld [vmem:[%s19828_s2 + $0x30] sm:$0x1]  ;;  %v4317_v7 = vmax.f32 %v3914_v23, 0.0 }
 0x209   : > { %14446 = vmatmul.mubr.msk.f32.gmra.mxu0 %vm4468_vm4, %v16684_v15  ;;  %6911 = vmatpush1.msra.mxu1 %v4319_v24  ;;  %v17193_v37 = vpop.f32.mrf.mxu0 }
 0x20a   : > { %6912 = vmatprep.subr.mxu1 %v4256_v57  ;;  %6946 = vmatprep.mubr.f32.mxu1 %v19841_v0  ;;  %v17198_v35 = vpop.f32.mrf.mxu1  ;;  %v3920_v57 = vadd.f32 %v17124_v13, %v15937_v59  ;;  %v17271_v13 = vld [vmem:[%s19828_s2 + $0x28] sm:$0xff] }
 0x20b   : > { %6913 = vmatpush1.msra.mxu1 %v4255_v46  ;;  %6658 = vmatpush1.msra.mxu0 %v4441_v19  ;;  %v17202_v61 = vpop.f32.mrf.mxu0  ;;  %v3916_v19 = vadd.f32 %v17111_v58, %v15927_v54  ;;  %v3910_v58 = vadd.f32 %v17089_v42, %v15960_v16 }
 0x20c   : > { %14460 = vmatmul.mubr.msk.f32.vlgmr.msra.gmra.mxu1 %vm4468_vm4, %v17209_v17  ;;  %6659 = vmatprep.subr.mxu0 %v4378_v20  ;;  %v17215_v45 = vpop.f32.mrf.mxu1  ;;  %v4445_v20 = vmax.f32 %v3926_v5, 0.0  ;;  %v4381_v4 = vmax.f32 %v3920_v57, 0.0 }
 0x20d   : > { %6543 = vmatprep.mubr.f32.mxu0 %v19841_v0  ;;  %6660 = vmatpush1.msra.mxu0 %v4377_v2  ;;  %v4318_v42 = vmax.f32 %v3916_v19, 0.0 }
 0x20e   : > { %6952 = vmatprep.mubr.f32.mxu1 %v19841_v0  ;;  %14447 = vmatmul.mubr.msk.f32.gmra.mxu0 %vm4468_vm4, %v16707_v31  ;;  %v4181_v31 = vadd.f32 %v17065_v11, %v15927_v54 }
 0x20f   : > { %6661 = vmatprep.subr.mxu0 %v4314_v14  ;;  %6697 = vmatprep.mubr.f32.mxu0 %v19841_v0  ;;  %v17227_v6 = vpop.f32.mrf.mxu0  ;;  %v3908_v14 = vadd.f32 %v17081_v44, %v15960_v16 }
 0x210   : > { %14461 = vmatmul.mubr.msk.f32.gmra.mxu1 %vm4468_vm4, %v16684_v15  ;;  %6662 = vmatpush1.msra.mxu0 %v4313_v29  ;;  %v17233_v52 = vpop.f32.mrf.mxu1  ;;  %v4175_v15 = vadd.f32 %v17035_v43, %v15960_v16  ;;  %v4323_v8 = vmax.f32 %v4181_v31, 0.0  ;;  %v3922_v43 = vadd.f32 %v17136_v1, %v15937_v59  ;;  %v4254_v29 = vmax.f32 %v3910_v58, 0.0 }
 0x211   : > { %6663 = vmatprep.subr.mxu0 %v4250_v12  ;;  %7072 = vmatprep.subr.mxu1 %v4452_v25  ;;  %v4099_v26 = vpop.f32.mrf.mxu0  ;;  %v17292_v25 = vpop.permute.xlu0 %7389  ;;  %v4253_v47 = vmax.f32 %v3908_v14, 0.0  ;;  %v17357_v14 = vld [vmem:[%s19828_s2 + $0x58] sm:$0xff] }
 0x212   : > { %6664 = vmatpush1.msra.mxu0 %v4249_v32  ;;  %7073 = vmatpush1.msra.mxu1 %v4451_v41  ;;  %v17239_v22 = vpop.f32.mrf.mxu1  ;;  %v4259_v1 = vmax.f32 %v4175_v15, 0.0  ;;  %v4382_v2 = vmax.f32 %v3922_v43, 0.0  ;;  %v4100_v12 = vadd.f32 %v4099_v26, %v15937_v59  ;;  %v4098_v41 = vadd.f32 %v17227_v6, %v15937_v59 }
 0x213   : > { %14451 = vmatmul.mubr.msk.f32.vlgmr.msra.gmra.mxu0 %vm4468_vm4, %v17209_v17  ;;  %7074 = vmatprep.subr.mxu1 %v4388_v34  ;;  %v4103_v11 = vpop.f32.mrf.mxu0  ;;  %v4092_v26 = vadd.f32 %v17193_v37, %v15927_v54 }
 0x214   : > { %6703 = vmatprep.mubr.f32.mxu0 %v19841_v0  ;;  %6958 = vmatprep.mubr.f32.mxu1 %v19841_v0  ;;  %v17249_v3 = vpop.f32.mrf.mxu1  ;;  %v4104_v44 = vadd.f32 %v4103_v11, %v15864_v62  ;;  %v17326_v11 = vpop.permute.xlu1 %4455  ;;  %v4385_v37 = vmax.f32 %v4098_v41, 0.0 }
 0x215   : > { %7075 = vmatpush1.msra.mxu1 %v4387_v55  ;;  %6823 = vmatprep.subr.mxu0 %v4446_v39  ;;  %v4105_v24 = vpop.f32.mrf.mxu0  ;;  %v17312_v39 = vld [vmem:[%s19828_s2 + $0x50] sm:$0xff]  ;;  %v17319_v15 = vpop.permute.xlu0 %4465  ;;  %v4386_v55 = vmax.f32 %v4100_v12, 0.0  ;;  %v4321_v43 = vmax.f32 %v4092_v26, 0.0  ;;  %v17401_v26 = vld [vmem:[%s19828_s2 + $0x68] sm:$0xff] }
 0x216   : > { %14462 = vmatmul.mubr.msk.f32.gmra.mxu1 %vm4468_vm4, %v17258_v30  ;;  %7076 = vmatprep.subr.mxu1 %v4324_v49  ;;  %v17262_v46 = vpop.f32.mrf.mxu1  ;;  %v4106_v27 = vadd.f32 %v4105_v24, %v15864_v62  ;;  %v4094_v62 = vadd.f32 %v17202_v61, %v15927_v54  ;;  %v4449_v59 = vmax.f32 %v4104_v44, 0.0  ;;  %19857 = vst [vmem:[#allocation6_spill] sm:$0xff] %v17319_v15 }
 0x217   : > { %19856 = vst [vmem:[#allocation5_spill] sm:$0xff] %v17262_v46  ;;  %14452 = vmatmul.mubr.msk.f32.gmra.mxu0 %vm4468_vm4, %v17271_v13  ;;  %7077 = vmatpush1.msra.mxu1 %v4323_v8  ;;  %v17275_v10 = vpop.f32.mrf.mxu0  ;;  %v4088_v61 = vadd.f32 %v17179_v60, %v15960_v16  ;;  %v4086_v54 = vadd.f32 %v17165_v50, %v15960_v16 }
 0x218   : > { %7078 = vmatprep.subr.mxu1 %v4260_v63  ;;  %6709 = vmatprep.mubr.f32.mxu0 %v19841_v0  ;;  %v17280_v36 = vpop.f32.mrf.mxu1  ;;  %v4450_v18 = vmax.f32 %v4106_v27, 0.0  ;;  %v4322_v49 = vmax.f32 %v4094_v62, 0.0  ;;  %v4637_v60 = vadd.f32 %v17177_v38, %v17319_v15  ;;  %v4542_v27 = vadd.f32 %v17275_v10, %v17326_v11  ;;  %v193_v10 = vld [vmem:[%s19828_s2 + $0x40] sm:$0xff] }
 0x219   : > { %7079 = vmatpush1.msra.mxu1 %v4259_v1  ;;  %7112 = vmatprep.mubr.f32.mxu1 %v19841_v0  ;;  %v4543_v51 = vpop.f32.mrf.mxu0  ;;  %v4258_v50 = vmax.f32 %v4088_v61, 0.0  ;;  %v4257_v57 = vmax.f32 %v4086_v54, 0.0  ;;  %v4803_v61 = vadd.f32 %v17249_v3, %v17319_v15  ;;  %v17420_v3 = vld [vmem:[%s19828_s2 + $0x70] sm:$0xff] }
 0x21a   : > { %14466 = vmatmul.mubr.msk.f32.vlgmr.msra.gmra.mxu1 %vm4468_vm4, %v17209_v17  ;;  %6824 = vmatpush1.msra.mxu0 %v4445_v20  ;;  %v17290_v9 = vpop.f32.mrf.mxu1  ;;  %v4544_v16 = vadd.f32 %v4543_v51, %v17326_v11  ;;  %v7135_v23 = vrot.slane %v4637_v60, 6  ;;  %v14941_v51 = vld [vmem:[%s15013_s21] sm:$0x7] }
 0x21b   : > { %14453 = vmatmul.mubr.msk.f32.gmra.mxu0 %vm4468_vm4, %v17258_v30  ;;  %6825 = vmatprep.subr.mxu0 %v4382_v2 }
 0x21c   : > { %6826 = vmatpush1.msra.mxu0 %v4381_v4  ;;  %7118 = vmatprep.mubr.f32.mxu1 %v19841_v0 }
 0x21d   : > { %6827 = vmatprep.subr.mxu0 %v4318_v42  ;;  %6863 = vmatprep.mubr.f32.mxu0 %v19841_v0  ;;  %v4547_v32 = vpop.f32.mrf.mxu0 }
 0x21e   : > { %14467 = vmatmul.mubr.msk.f32.gmra.mxu1 %vm4468_vm4, %v17271_v13  ;;  %6828 = vmatpush1.msra.mxu0 %v4317_v7  ;;  %v17304_v31 = vpop.f32.mrf.mxu1  ;;  %v4548_v5 = vadd.f32 %v4547_v32, %v17264_v33  ;;  %v4639_v32 = vadd.f32 %v17185_v21, %v17319_v15 }
 0x21f   : > { %6829 = vmatprep.subr.mxu0 %v4254_v29  ;;  %v4549_v34 = vpop.f32.mrf.mxu0  ;;  %7124 = vmatprep.mubr.f32.mxu1 %v19841_v0  ;;  %v4633_v29 = vadd.f32 %v17163_v48, %v17264_v33 }
 0x220   : > { %6830 = vmatpush1.msra.mxu0 %v4253_v47  ;;  %v4550_v6 = vadd.f32 %v4549_v34, %v17264_v33  ;;  %v17317_v53 = vpop.f32.mrf.mxu1  ;;  %7394 = vperm.xlu1 %14759, %v17312_v39   ;;  %v7138_v34 = vrot.slane %v4639_v32, 5 }
 0x221   : > { %14457 = vmatmul.mubr.msk.f32.vlgmr.msra.gmra.mxu0 %vm4468_vm4, %v17209_v17  ;;  %6989 = vmatprep.subr.mxu0 %v4450_v18  ;;  %v17378_v18 = vld [vmem:[%s19828_s2 + $0x60] sm:$0xff] }
 0x222   : > { %6869 = vmatprep.mubr.f32.mxu0 %v19841_v0  ;;  %6990 = vmatpush1.msra.mxu0 %v4449_v59 }
 0x223   : > { %6991 = vmatprep.subr.mxu0 %v4386_v55  ;;  %v4553_v8 = vpop.f32.mrf.mxu0  ;;  %14468 = vmatmul.mubr.msk.f32.gmra.mxu1 %vm4468_vm4, %v17258_v30 }
 0x224   : > { %6992 = vmatpush1.msra.mxu0 %v4385_v37  ;;  %v17336_v24 = vpop.f32.mrf.mxu1  ;;  %7534 = vmatprep.subr.mxu1 %v4550_v6  ;;  %v4554_v38 = vadd.f32 %v4553_v8, %v17319_v15 }
 0x225   : > { %14458 = vmatmul.mubr.msk.f32.gmra.mxu0 %vm4468_vm4, %v17271_v13  ;;  %6993 = vmatprep.subr.mxu0 %v4322_v49  ;;  %v4555_v63 = vpop.f32.mrf.mxu0  ;;  %v4969_v32 = vadd.f32 %v17336_v24, %v17319_v15 }
 0x226   : > { %6875 = vmatprep.mubr.f32.mxu0 %v19841_v0  ;;  %6994 = vmatpush1.msra.mxu0 %v4321_v43  ;;  %v4556_v1 = vadd.f32 %v4555_v63, %v17319_v15  ;;  %v17344_v19 = vpop.f32.mrf.mxu1  ;;  %v4631_v63 = vadd.f32 %v17157_v40, %v17264_v33 }
 0x227   : > { %6995 = vmatprep.subr.mxu0 %v4258_v50  ;;  %7535 = vmatpush1.msra.mxu1 %v4548_v5  ;;  %v4707_v20 = vpop.f32.mrf.mxu0 }
 0x228   : > { %v7132_v58 = vrot.slane %v4556_v1, 7  ;;  %6996 = vmatpush1.msra.mxu0 %v4257_v57  ;;  %7536 = vmatprep.subr.mxu1 %v4544_v16  ;;  %v17346_v2 = vpop.f32.mrf.mxu1 }
 0x229   : > { %14459 = vmatmul.mubr.msk.f32.gmra.mxu0 %vm4468_vm4, %v17258_v30  ;;  %14697 = vmatprep.subr.msk.mxu0 %vm213_vm2, %v14941_v51  ;;  %v4709_v4 = vpop.f32.mrf.mxu0 }
 0x22a   : > { %v7174_v42 = vsel %vm7173_vm5, %v4554_v38, %v7132_v58  ;;  %7029 = vmatprep.mubr.f32.mxu0 %v19841_v0  ;;  %7537 = vmatpush1.msra.mxu1 %v4542_v27  ;;  %v17361_v7 = vpop.f32.mrf.mxu1  ;;  %v4710_v59 = vadd.f32 %v4709_v4, %v17326_v11  ;;  %v4627_v38 = vadd.f32 %v17146_v28, %v17326_v11  ;;  %v14942_v58 = vld [vmem:[%s19828_s2 + $0x48] sm:$0xff] }
 0x22b   : > { %v7176_v44 = vsel %vm7175_vm6, %v7174_v42, %v7135_v23  ;;  %7570 = vmatprep.mubr.f32.mxu1 %v19841_v0  ;;  %7384 = vperm.xlu1 %14759, %v193_v10   ;;  %v4799_v28 = vadd.f32 %v17239_v22, %v17264_v33  ;;  %v4797_v22 = vadd.f32 %v17233_v52, %v17264_v33 }
 0x22c   : > { %14474 = vmatmul.mubr.msk.f32.vlgmr.msra.gmra.mxu1 %vm7493_vm7, %v17357_v14  ;;  %v7177_v37 = vsel %vm213_vm2, %v7176_v44, %v7138_v34  ;;  %v4965_v52 = vadd.f32 %v17317_v53, %v17264_v33 }
 0x22d   : > { %14463 = vmatmul.mubr.msk.f32.vlgmr.msra.gmra.mxu0 %vm4468_vm4, %v17209_v17  ;;  %v4713_v12 = vpop.f32.mrf.mxu0  ;;  %7576 = vmatprep.mubr.f32.mxu1 %v19841_v0  ;;  %v192_v17 = vld [vmem:[%s19828_s2 + $0x38] sm:$0xff] }
 0x22e   : > { %14698 = vmatpush3.msk.msra.mxu0 %vm213_vm2, %v14941_v51  ;;  %7035 = vmatprep.mubr.f32.mxu0 %v19841_v0  ;;  %v17384_v48 = vpop.f32.mrf.mxu1  ;;  %v4714_v21 = vadd.f32 %v4713_v12, %v17264_v33 }
 0x22f   : > { %7623 = vmatprep.subr.mxu0 %v4633_v29  ;;  %v4715_v47 = vpop.f32.mrf.mxu0  ;;  %7379 = vperm.xlu1 %14759, %v192_v17   ;;  %v4791_v29 = vadd.f32 %v17198_v35, %v17326_v11 }
 0x230   : > { %14475 = vmatmul.mubr.msk.f32.gmra.mxu1 %vm7493_vm7, %v17378_v18  ;;  %v4716_v41 = vadd.f32 %v4715_v47, %v17264_v33  ;;  %v17392_v62 = vpop.f32.mrf.mxu1 }
 0x231   : > { %14464 = vmatmul.mubr.msk.f32.gmra.mxu0 %vm4468_vm4, %v17271_v13  ;;  %7582 = vmatprep.mubr.f32.mxu1 %v19841_v0  ;;  %v4708_v13 = vadd.f32 %v4707_v20, %v17326_v11  ;;  %v4625_v20 = vadd.f32 %v17134_v56, %v17326_v11 }
 0x232   : > { %7041 = vmatprep.mubr.f32.mxu0 %v19841_v0  ;;  %7712 = vmatprep.subr.mxu1 %v4716_v41 }
 0x233   : > { %v4719_v6 = vpop.f32.mrf.mxu0  ;;  %7713 = vmatpush1.msra.mxu1 %v4714_v21  ;;  %v7156_v21 = vrot.slane %v4969_v32, 6 }
 0x234   : > { %v4720_v55 = vadd.f32 %v4719_v6, %v17319_v15  ;;  %v17409_v54 = vpop.f32.mrf.mxu1  ;;  %14476 = vmatmul.mubr.msk.f32.gmra.mxu1 %vm7493_vm7, %v17401_v26  ;;  %7714 = vmatprep.subr.mxu1 %v4710_v59 }
 0x235   : > { %14465 = vmatmul.mubr.msk.f32.gmra.mxu0 %vm4468_vm4, %v17258_v30  ;;  %v4721_v49 = vpop.f32.mrf.mxu0  ;;  %7588 = vmatprep.mubr.f32.mxu1 %v19841_v0  ;;  %v7147_v30 = vrot.slane %v4803_v61, 2 }
 0x236   : > { %v7141_v5 = vrot.slane %v4720_v55, 4  ;;  %v4722_v8 = vadd.f32 %v4721_v49, %v17319_v15  ;;  %v17423_v60 = vpop.f32.mrf.mxu1  ;;  %14699 = vmatprep.mubr.msk.f32.mxu0 %vm1148_vm3, %v192_v17  ;;  %7715 = vmatpush1.msra.mxu1 %v4708_v13  ;;  %v4971_v49 = vadd.f32 %v17344_v19, %v17319_v15 }
 0x237   : > { %19858 = vst [vmem:[#allocation7_spill] sm:$0xff] %v17423_v60  ;;  %v4873_v43 = vpop.f32.mrf.mxu0 }
 0x238   : > { %v7179_v16 = vsel %vm7178_vm8, %v7177_v37, %v7141_v5  ;;  %v7144_v50 = vrot.slane %v4722_v8, 3  ;;  %v17429_v57 = vpop.f32.mrf.mxu1  ;;  %14477 = vmatmul.mubr.msk.f32.gmra.mxu1 %vm7493_vm7, %v17420_v3  ;;  %v4874_v47 = vadd.f32 %v4873_v43, %v17326_v11  ;;  %v4963_v43 = vadd.f32 %v17304_v31, %v17264_v33 }
 0x239   : > { %14700 = vmatmul.mubr.msk.f32.vlgmr.msra.gmra.mxu0 %vm1148_vm3, %v193_v10  ;;  %v4875_v1 = vpop.f32.mrf.mxu0  ;;  %7748 = vmatprep.mubr.f32.mxu1 %v19841_v0  ;;  %v5135_v31 = vadd.f32 %v17409_v54, %v17319_v15 }
 0x23a   : > { %v7181_v23 = vsel %vm7180_vm9, %v7179_v16, %v7144_v50  ;;  %7624 = vmatpush1.msra.mxu0 %v4631_v63  ;;  %v17440_v40 = vpop.f32.mrf.mxu1  ;;  %14702 = vmatprep.mubr.msk.f32.mxu0 %vm1148_vm3, %v14942_v58  ;;  %v7159_v50 = vrot.slane %v4971_v49, 5  ;;  %v4957_v58 = vadd.f32 %v17280_v36, %v17326_v11 }
 0x23b   : > { %v17447_v27 = vsel %vm7182_vm10, %v7181_v23, %v7147_v30  ;;  %7625 = vmatprep.subr.mxu0 %v4627_v38  ;;  %v4959_v38 = vadd.f32 %v17290_v9, %v17326_v11 }
 0x23c   : > { %19859 = vst [vmem:[#allocation8_spill] sm:$0xff] %v17447_v27  ;;  %7626 = vmatpush1.msra.mxu0 %v4625_v20  ;;  %14482 = vmatmul.mubr.msk.f32.vlgmr.msra.gmra.mxu1 %vm7493_vm7, %v17357_v14 }
 0x23d   : > { %7801 = vmatprep.subr.mxu0 %v4799_v28  ;;  %14703 = vmatmul.mubr.msk.f32.gmra.mxu0 %vm1148_vm3, %v17312_v39  ;;  %v4879_v56 = vpop.f32.mrf.mxu0  ;;  %v4793_v39 = vadd.f32 %v17215_v45, %v17326_v11  ;;  %v4876_v45 = vadd.f32 %v4875_v1, %v17326_v11  ;;  %v5131_v28 = vadd.f32 %v17392_v62, %v17264_v33  ;;  %v7168_v62 = vrot.slane %v5135_v31, 2 }
 0x23e   : > { %v17455_v51 = vpop.f32.mrf.mxu1  ;;  %7659 = vmatprep.mubr.f32.mxu0 %v19841_v0  ;;  %7754 = vmatprep.mubr.f32.mxu1 %v19841_v0  ;;  %v4880_v44 = vadd.f32 %v4879_v56, %v17264_v33 }
 0x23f   : > { %v4881_v4 = vpop.f32.mrf.mxu0 }
 0x240   : > { %v4882_v42 = vadd.f32 %v4881_v4, %v17264_v33  ;;  %v17460_v10 = vpop.f32.mrf.mxu1  ;;  %14483 = vmatmul.mubr.msk.f32.gmra.mxu1 %vm7493_vm7, %v17378_v18 }
 0x241   : > { %14478 = vmatmul.mubr.msk.f32.vlgmr.msra.gmra.mxu0 %vm7493_vm7, %v17357_v14  ;;  %7760 = vmatprep.mubr.f32.mxu1 %v19841_v0 }
 0x242   : > { %7802 = vmatpush1.msra.mxu0 %v4797_v22  ;;  %7890 = vmatprep.subr.mxu1 %v4882_v42 }
 0x243   : > { %v4885_v12 = vpop.f32.mrf.mxu0  ;;  %7803 = vmatprep.subr.mxu0 %v4793_v39  ;;  %7665 = vmatprep.mubr.f32.mxu0 %v19841_v0 }
 0x244   : > { %v17480_v17 = vpop.f32.mrf.mxu1  ;;  %7804 = vmatpush1.msra.mxu0 %v4791_v29  ;;  %7891 = vmatpush1.msra.mxu1 %v4880_v44  ;;  %v4886_v53 = vadd.f32 %v4885_v12, %v17319_v15 }
 0x245   : > { %v4887_v35 = vpop.f32.mrf.mxu0  ;;  %7979 = vmatprep.subr.mxu0 %v4965_v52  ;;  %14479 = vmatmul.mubr.msk.f32.gmra.mxu0 %vm7493_vm7, %v17378_v18  ;;  %v5301_v49 = vadd.f32 %v17480_v17, %v17319_v15 }
 0x246   : > { %v4888_v41 = vadd.f32 %v4887_v35, %v17319_v15  ;;  %v17487_v24 = vpop.f32.mrf.mxu1  ;;  %7892 = vmatprep.subr.mxu1 %v4876_v45  ;;  %14484 = vmatmul.mubr.msk.f32.gmra.mxu1 %vm7493_vm7, %v17401_v26 }
 0x247   : > { %v5039_v34 = vpop.f32.mrf.mxu0  ;;  %7893 = vmatpush1.msra.mxu1 %v4874_v47  ;;  %7671 = vmatprep.mubr.f32.mxu0 %v19841_v0 }
 0x248   : > { %v7153_v59 = vrot.slane %v4888_v41, 7  ;;  %v17492_v6 = vpop.f32.mrf.mxu1  ;;  %7766 = vmatprep.mubr.f32.mxu1 %v19841_v0  ;;  %v5040_v23 = vadd.f32 %v5039_v34, %v17326_v11 }
 0x249   : > { %v5041_v61 = vpop.f32.mrf.mxu0  ;;  %14480 = vmatmul.mubr.msk.f32.gmra.mxu0 %vm7493_vm7, %v17401_v26 }
 0x24a   : > { %v7186_v13 = vsel %vm7173_vm5, %v4886_v53, %v7153_v59  ;;  %v17498_v55 = vpop.f32.mrf.mxu1  ;;  %14485 = vmatmul.mubr.msk.f32.gmra.mxu1 %vm7493_vm7, %v17420_v3  ;;  %7677 = vmatprep.mubr.f32.mxu0 %v19841_v0  ;;  %v5042_v1 = vadd.f32 %v5041_v61, %v17326_v11  ;;  %v5129_v61 = vadd.f32 %v17384_v48, %v17264_v33 }
 0x24b   : > { %v7187_v37 = vsel %vm7175_vm6, %v7186_v13, %v7156_v21  ;;  %7926 = vmatprep.mubr.f32.mxu1 %v19841_v0  ;;  %v5123_v48 = vadd.f32 %v17346_v2, %v17326_v11 }
 0x24c   : > { %v7188_v54 = vsel %vm213_vm2, %v7187_v37, %v7159_v50  ;;  %v5125_v37 = vadd.f32 %v17361_v7, %v17326_v11  ;;  %v5297_v7 = vadd.f32 %v17460_v10, %v17264_v33 }
 0x24d   : > { %v5045_v5 = vpop.f32.mrf.mxu0  ;;  %14481 = vmatmul.mubr.msk.f32.gmra.mxu0 %vm7493_vm7, %v17420_v3 }
 0x24e   : > { %v17509_v8 = vpop.f32.mrf.mxu1  ;;  %14490 = vmatmul.mubr.msk.f32.vlgmr.msra.gmra.mxu1 %vm7493_vm7, %v17357_v14  ;;  %7837 = vmatprep.mubr.f32.mxu0 %v19841_v0  ;;  %v5046_v63 = vadd.f32 %v5045_v5, %v17264_v33 }
 0x24f   : > { %v5047_v30 = vpop.f32.mrf.mxu0  ;;  %7932 = vmatprep.mubr.f32.mxu1 %v19841_v0 }
 0x250   : > { %v5048_v16 = vadd.f32 %v5047_v30, %v17264_v33  ;;  %v17518_v19 = vpop.f32.mrf.mxu1 }
 0x251   : > { %14486 = vmatmul.mubr.msk.f32.vlgmr.msra.gmra.mxu0 %vm7493_vm7, %v17357_v14 }
 0x252   : > { %8068 = vmatprep.subr.mxu1 %v5048_v16  ;;  %7980 = vmatpush1.msra.mxu0 %v4963_v43 }
 0x253   : > { %v5051_v20 = vpop.f32.mrf.mxu0  ;;  %8069 = vmatpush1.msra.mxu1 %v5046_v63  ;;  %7981 = vmatprep.subr.mxu0 %v4959_v38  ;;  %v7197_v38 = vrot.slane %v5301_v49, 6 }
 0x254   : > { %v5052_v9 = vadd.f32 %v5051_v20, %v17319_v15  ;;  %v17534_v56 = vpop.f32.mrf.mxu1  ;;  %8070 = vmatprep.subr.mxu1 %v5042_v1  ;;  %14491 = vmatmul.mubr.msk.f32.gmra.mxu1 %vm7493_vm7, %v17378_v18 }
 0x255   : > { %v5053_v4 = vpop.f32.mrf.mxu0  ;;  %8071 = vmatpush1.msra.mxu1 %v5040_v23  ;;  %7982 = vmatpush1.msra.mxu0 %v4957_v58 }
 0x256   : > { %v7162_v42 = vrot.slane %v5052_v9, 4  ;;  %v5054_v22 = vadd.f32 %v5053_v4, %v17319_v15  ;;  %v17540_v36 = vpop.f32.mrf.mxu1  ;;  %7843 = vmatprep.mubr.f32.mxu0 %v19841_v0  ;;  %8157 = vmatprep.subr.mxu0 %v5131_v28  ;;  %v5303_v28 = vadd.f32 %v17487_v24, %v17319_v15 }
 0x257   : > { %v5205_v39 = vpop.f32.mrf.mxu0  ;;  %14487 = vmatmul.mubr.msk.f32.gmra.mxu0 %vm7493_vm7, %v17378_v18  ;;  %7938 = vmatprep.mubr.f32.mxu1 %v19841_v0 }
 0x258   : > { %v7189_v44 = vsel %vm7178_vm8, %v7188_v54, %v7162_v42  ;;  %v7165_v29 = vrot.slane %v5054_v22, 3  ;;  %v17547_v52 = vpop.f32.mrf.mxu1  ;;  %14492 = vmatmul.mubr.msk.f32.gmra.mxu1 %vm7493_vm7, %v17401_v26  ;;  %7849 = vmatprep.mubr.f32.mxu0 %v19841_v0  ;;  %v5206_v5 = vadd.f32 %v5205_v39, %v17326_v11  ;;  %v7200_v22 = vrot.slane %v5303_v28, 5 }
 0x259   : > { %v5207_v12 = vpop.f32.mrf.mxu0  ;;  %7944 = vmatprep.mubr.f32.mxu1 %v19841_v0  ;;  %v5295_v39 = vadd.f32 %v17455_v51, %v17264_v33  ;;  %v5291_v51 = vadd.f32 %v17440_v40, %v17326_v11  ;;  %v5463_v40 = vadd.f32 %v17518_v19, %v17264_v33 }
 0x25a   : > { %v7190_v32 = vsel %vm7180_vm9, %v7189_v44, %v7165_v29  ;;  %v17554_v45 = vpop.f32.mrf.mxu1  ;;  %v5208_v13 = vadd.f32 %v5207_v12, %v17326_v11  ;;  %v5467_v44 = vadd.f32 %v17534_v56, %v17319_v15 }
 0x25b   : > { %v17557_v47 = vsel %vm7182_vm10, %v7190_v32, %v7168_v62  ;;  %14488 = vmatmul.mubr.msk.f32.gmra.mxu0 %vm7493_vm7, %v17401_v26  ;;  %v5469_v32 = vadd.f32 %v17540_v36, %v17319_v15  ;;  %v5289_v36 = vadd.f32 %v17429_v57, %v17326_v11 }
 0x25c   : > { %19860 = vst [vmem:[#allocation9_spill] sm:$0xff] %v17557_v47  ;;  %14493 = vmatmul.mubr.msk.f32.gmra.mxu1 %vm7493_vm7, %v17420_v3  ;;  %7855 = vmatprep.mubr.f32.mxu0 %v19841_v0  ;;  %v7209_v49 = vrot.slane %v5467_v44, 2 }
 0x25d   : > { %v5211_v35 = vpop.f32.mrf.mxu0  ;;  %8104 = vmatprep.mubr.f32.mxu1 %v19841_v0 }
 0x25e   : > { %v17565_v53 = vpop.f32.mrf.mxu1  ;;  %v5212_v59 = vadd.f32 %v5211_v35, %v17264_v33 }
 0x25f   : > { %v5213_v41 = vpop.f32.mrf.mxu0  ;;  %14489 = vmatmul.mubr.msk.f32.gmra.mxu0 %vm7493_vm7, %v17420_v3 }
 0x260   : > { %v5214_v21 = vadd.f32 %v5213_v41, %v17264_v33  ;;  %v17570_v34 = vpop.f32.mrf.mxu1  ;;  %14498 = vmatmul.mubr.msk.f32.vlgmr.msra.gmra.mxu1 %vm7493_vm7, %v17357_v14  ;;  %8015 = vmatprep.mubr.f32.mxu0 %v19841_v0 }
 0x261   : > { %8110 = vmatprep.mubr.f32.mxu1 %v19841_v0 }
 0x262   : > { %8246 = vmatprep.subr.mxu1 %v5214_v21 }
 0x263   : > { %v5217_v30 = vpop.f32.mrf.mxu0  ;;  %v17585_v43 = vpop.f32.mrf.mxu1  ;;  %8247 = vmatpush1.msra.mxu1 %v5212_v59  ;;  %14494 = vmatmul.mubr.msk.f32.vlgmr.msra.gmra.mxu0 %vm7493_vm7, %v17357_v14 }
 0x264   : > { %8248 = vmatprep.subr.mxu1 %v5208_v13  ;;  %8158 = vmatpush1.msra.mxu0 %v5129_v61  ;;  %v5218_v17 = vadd.f32 %v5217_v30, %v17319_v15  ;;  %v7212_v30 = vrot.slane %v5469_v32, 1  ;;  %v5633_v28 = vadd.f32 %v17585_v43, %v17319_v15 }
 0x265   : > { %v5219_v16 = vpop.f32.mrf.mxu0  ;;  %v17593_v50 = vpop.f32.mrf.mxu1  ;;  %8249 = vmatpush1.msra.mxu1 %v5206_v5  ;;  %8159 = vmatprep.subr.mxu0 %v5125_v37 }
 0x266   : > { %v5220_v63 = vadd.f32 %v5219_v16, %v17319_v15  ;;  %14499 = vmatmul.mubr.msk.f32.gmra.mxu1 %vm7493_vm7, %v17378_v18  ;;  %8160 = vmatpush1.msra.mxu0 %v5123_v48  ;;  %v7218_v32 = vrot.slane %v5633_v28, 6 }
 0x267   : > { %v5371_v2 = vpop.f32.mrf.mxu0  ;;  %v17599_v1 = vpop.f32.mrf.mxu1  ;;  %8021 = vmatprep.mubr.f32.mxu0 %v19841_v0  ;;  %8335 = vmatprep.subr.mxu0 %v5297_v7 }
 0x268   : > { %v7194_v10 = vrot.slane %v5220_v63, 7  ;;  %14495 = vmatmul.mubr.msk.f32.gmra.mxu0 %vm7493_vm7, %v17378_v18  ;;  %8116 = vmatprep.mubr.f32.mxu1 %v19841_v0  ;;  %v5372_v35 = vadd.f32 %v5371_v2, %v17326_v11 }
 0x269   : > { %v5373_v31 = vpop.f32.mrf.mxu0  ;;  %v17605_v23 = vpop.f32.mrf.mxu1  ;;  %8027 = vmatprep.mubr.f32.mxu0 %v19841_v0 }
 0x26a   : > { %v7235_v20 = vsel %vm7173_vm5, %v5218_v17, %v7194_v10  ;;  %14500 = vmatmul.mubr.msk.f32.gmra.mxu1 %vm7493_vm7, %v17401_v26  ;;  %v5374_v29 = vadd.f32 %v5373_v31, %v17326_v11 }
 0x26b   : > { %v7236_v58 = vsel %vm7175_vm6, %v7235_v20, %v7197_v38  ;;  %8122 = vmatprep.mubr.f32.mxu1 %v19841_v0 }
 0x26c   : > { %14496 = vmatmul.mubr.msk.f32.gmra.mxu0 %vm7493_vm7, %v17401_v26  ;;  %v7237_v56 = vsel %vm213_vm2, %v7236_v58, %v7200_v22  ;;  %v5635_v22 = vadd.f32 %v17593_v50, %v17319_v15 }
 0x26d   : > { %v5377_v9 = vpop.f32.mrf.mxu0  ;;  %v17617_v54 = vpop.f32.mrf.mxu1  ;;  %8033 = vmatprep.mubr.f32.mxu0 %v19841_v0 }
 0x26e   : > { %14501 = vmatmul.mubr.msk.f32.gmra.mxu1 %vm7493_vm7, %v17420_v3  ;;  %v5378_v24 = vadd.f32 %v5377_v9, %v17264_v33 }
 0x26f   : > { %v5379_v4 = vpop.f32.mrf.mxu0  ;;  %v17622_v42 = vpop.f32.mrf.mxu1  ;;  %8282 = vmatprep.mubr.f32.mxu1 %v19841_v0 }
 0x270   : > { %v5380_v62 = vadd.f32 %v5379_v4, %v17264_v33  ;;  %14497 = vmatmul.mubr.msk.f32.gmra.mxu0 %vm7493_vm7, %v17420_v3 }
 0x271   : > { %8193 = vmatprep.mubr.f32.mxu0 %v19841_v0 }
 0x272   : > { %v5383_v12 = vpop.f32.mrf.mxu0  ;;  %8424 = vmatprep.subr.mxu1 %v5380_v62  ;;  %14506 = vmatmul.mubr.msk.f32.vlgmr.msra.gmra.mxu1 %vm7493_vm7, %v17357_v14 }
 0x273   : > { %v5384_v41 = vadd.f32 %v5383_v12, %v17319_v15  ;;  %v17641_v21 = vpop.f32.mrf.mxu1  ;;  %8425 = vmatpush1.msra.mxu1 %v5378_v24  ;;  %8288 = vmatprep.mubr.f32.mxu1 %v19841_v0  ;;  %v5461_v24 = vadd.f32 %v17509_v8, %v17264_v33  ;;  %v5457_v8 = vadd.f32 %v17498_v55, %v17326_v11 }
 0x274   : > { %v5385_v59 = vpop.f32.mrf.mxu0  ;;  %8426 = vmatprep.subr.mxu1 %v5374_v29  ;;  %14502 = vmatmul.mubr.msk.f32.vlgmr.msra.gmra.mxu0 %vm7493_vm7, %v17357_v14 }
 0x275   : > { %v7203_v61 = vrot.slane %v5384_v41, 4  ;;  %v5386_v13 = vadd.f32 %v5385_v59, %v17319_v15  ;;  %v17652_v37 = vpop.f32.mrf.mxu1  ;;  %8336 = vmatpush1.msra.mxu0 %v5295_v39  ;;  %8427 = vmatpush1.msra.mxu1 %v5372_v35 }
 0x276   : > { %v5537_v5 = vpop.f32.mrf.mxu0  ;;  %8337 = vmatprep.subr.mxu0 %v5291_v51  ;;  %14507 = vmatmul.mubr.msk.f32.gmra.mxu1 %vm7493_vm7, %v17378_v18  ;;  %v5455_v51 = vadd.f32 %v17492_v6, %v17326_v11 }
 0x277   : > { %v7238_v48 = vsel %vm7178_vm8, %v7237_v56, %v7203_v61  ;;  %v7206_v57 = vrot.slane %v5386_v13, 3  ;;  %v17659_v7 = vpop.f32.mrf.mxu1  ;;  %8338 = vmatpush1.msra.mxu0 %v5289_v36  ;;  %8199 = vmatprep.mubr.f32.mxu0 %v19841_v0  ;;  %v5538_v29 = vadd.f32 %v5537_v5, %v17326_v11  ;;  %v7221_v56 = vrot.slane %v5635_v22, 5 }
 0x278   : > { %v5539_v16 = vpop.f32.mrf.mxu0  ;;  %8513 = vmatprep.subr.mxu0 %v5463_v40  ;;  %14503 = vmatmul.mubr.msk.f32.gmra.mxu0 %vm7493_vm7, %v17378_v18  ;;  %v5629_v36 = vadd.f32 %v17570_v34, %v17264_v33 }
 0x279   : > { %v7239_v19 = vsel %vm7180_vm9, %v7238_v48, %v7206_v57  ;;  %v17665_v17 = vpop.f32.mrf.mxu1  ;;  %8294 = vmatprep.mubr.f32.mxu1 %v19841_v0  ;;  %8205 = vmatprep.mubr.f32.mxu0 %v19841_v0  ;;  %v5540_v39 = vadd.f32 %v5539_v16, %v17326_v11  ;;  %v5799_v48 = vadd.f32 %v17641_v21, %v17319_v15 }
 0x27a   : > { %v7240_v63 = vsel %vm7182_vm10, %v7239_v19, %v7209_v49  ;;  %v5543_v38 = vpop.f32.mrf.mxu0  ;;  %14508 = vmatmul.mubr.msk.f32.gmra.mxu1 %vm7493_vm7, %v17401_v26  ;;  %v5801_v19 = vadd.f32 %v17652_v37, %v17319_v15 }
 0x27b   : > { %v17673_v2 = vsel %vm7184_vm11, %v7240_v63, %v7212_v30  ;;  %v17675_v10 = vpop.f32.mrf.mxu1  ;;  %8300 = vmatprep.mubr.f32.mxu1 %v19841_v0  ;;  %v5544_v62 = vadd.f32 %v5543_v38, %v17264_v33  ;;  %v7230_v28 = vrot.slane %v5799_v48, 2 }
 0x27c   : > { %19861 = vst [vmem:[#allocation10_spill] sm:$0xff] %v17673_v2  ;;  %v5545_v31 = vpop.f32.mrf.mxu0  ;;  %14504 = vmatmul.mubr.msk.f32.gmra.mxu0 %vm7493_vm7, %v17401_v26  ;;  %v7233_v22 = vrot.slane %v5801_v19, 1 }
 0x27d   : > { %v5546_v20 = vadd.f32 %v5545_v31, %v17264_v33  ;;  %v17681_v58 = vpop.f32.mrf.mxu1  ;;  %8211 = vmatprep.mubr.f32.mxu0 %v19841_v0 }
 0x27e   : > { %14509 = vmatmul.mubr.msk.f32.gmra.mxu1 %vm7493_vm7, %v17420_v3 }
 0x27f   : > { %8602 = vmatprep.subr.mxu1 %v5546_v20  ;;  %8460 = vmatprep.mubr.f32.mxu1 %v19841_v0 }
 0x280   : > { %v5549_v9 = vpop.f32.mrf.mxu0  ;;  %v17689_v4 = vpop.f32.mrf.mxu1  ;;  %14505 = vmatmul.mubr.msk.f32.gmra.mxu0 %vm7493_vm7, %v17420_v3 }
 0x281   : > { %8371 = vmatprep.mubr.f32.mxu0 %v19841_v0  ;;  %v5550_v12 = vadd.f32 %v5549_v9, %v17319_v15 }
 0x282   : > { %v5551_v44 = vpop.f32.mrf.mxu0  ;;  %v17700_v43 = vpop.f32.mrf.mxu1  ;;  %14514 = vmatmul.mubr.msk.f32.vlgmr.msra.gmra.mxu1 %vm7493_vm7, %v17357_v14 }
 0x283   : > { %v5552_v50 = vadd.f32 %v5551_v44, %v17319_v15  ;;  %8603 = vmatpush1.msra.mxu1 %v5544_v62  ;;  %8466 = vmatprep.mubr.f32.mxu1 %v19841_v0 }
 0x284   : > { %v5703_v35 = vpop.f32.mrf.mxu0  ;;  %v17710_v41 = vpop.f32.mrf.mxu1  ;;  %8604 = vmatprep.subr.mxu1 %v5540_v39  ;;  %14510 = vmatmul.mubr.msk.f32.vlgmr.msra.gmra.mxu0 %vm7493_vm7, %v17357_v14 }
 0x285   : > { %v7215_v59 = vrot.slane %v5552_v50, 7  ;;  %8514 = vmatpush1.msra.mxu0 %v5461_v24  ;;  %8605 = vmatpush1.msra.mxu1 %v5538_v29  ;;  %v5704_v50 = vadd.f32 %v5703_v35, %v17326_v11 }
 0x286   : > { %v5705_v61 = vpop.f32.mrf.mxu0  ;;  %v17718_v55 = vpop.f32.mrf.mxu1  ;;  %8515 = vmatprep.subr.mxu0 %v5457_v8  ;;  %14515 = vmatmul.mubr.msk.f32.gmra.mxu1 %vm7493_vm7, %v17378_v18 }
 0x287   : > { %v7242_v13 = vsel %vm7173_vm5, %v5550_v12, %v7215_v59  ;;  %8516 = vmatpush1.msra.mxu0 %v5455_v51  ;;  %8377 = vmatprep.mubr.f32.mxu0 %v19841_v0  ;;  %v5706_v44 = vadd.f32 %v5705_v61, %v17326_v11  ;;  %v5627_v12 = vadd.f32 %v17565_v53, %v17264_v33 }
 0x288   : > { %v7243_v6 = vsel %vm7175_vm6, %v7242_v13, %v7218_v32  ;;  %v5709_v40 = vpop.f32.mrf.mxu0  ;;  %8691 = vmatprep.subr.mxu0 %v5629_v36  ;;  %14511 = vmatmul.mubr.msk.f32.gmra.mxu0 %vm7493_vm7, %v17378_v18  ;;  %v5623_v51 = vadd.f32 %v17554_v45, %v17326_v11  ;;  %v5621_v53 = vadd.f32 %v17547_v52, %v17326_v11 }
 0x289   : > { %v17727_v34 = vpop.f32.mrf.mxu1  ;;  %v7244_v49 = vsel %vm213_vm2, %v7243_v6, %v7221_v56  ;;  %8472 = vmatprep.mubr.f32.mxu1 %v19841_v0  ;;  %8383 = vmatprep.mubr.f32.mxu0 %v19841_v0  ;;  %v5710_v62 = vadd.f32 %v5709_v40, %v17264_v33  ;;  %v5795_v45 = vadd.f32 %v17622_v42, %v17264_v33 }
 0x28a   : > { %v5711_v5 = vpop.f32.mrf.mxu0  ;;  %14516 = vmatmul.mubr.msk.f32.gmra.mxu1 %vm7493_vm7, %v17401_v26  ;;  %v5965_v52 = vadd.f32 %v17689_v4, %v17319_v15  ;;  %v5967_v42 = vadd.f32 %v17700_v43, %v17319_v15 }
 0x28b   : > { %v5712_v30 = vadd.f32 %v5711_v5, %v17264_v33  ;;  %8478 = vmatprep.mubr.f32.mxu1 %v19841_v0  ;;  %v17738_v57 = vpop.f32.mrf.mxu1 }
 0x28c   : > { %v5715_v16 = vpop.f32.mrf.mxu0  ;;  %14512 = vmatmul.mubr.msk.f32.gmra.mxu0 %vm7493_vm7, %v17401_v26  ;;  %v7256_v43 = vrot.slane %v5967_v42, 5 }
 0x28d   : > { %v5716_v63 = vadd.f32 %v5715_v16, %v17319_v15  ;;  %8780 = vmatprep.subr.mxu1 %v5712_v30  ;;  %8389 = vmatprep.mubr.f32.mxu0 %v19841_v0  ;;  %v7253_v30 = vrot.slane %v5965_v52, 6 }
 0x28e   : > { %v5717_v38 = vpop.f32.mrf.mxu0  ;;  %v17746_v31 = vpop.f32.mrf.mxu1  ;;  %14517 = vmatmul.mubr.msk.f32.gmra.mxu1 %vm7493_vm7, %v17420_v3 }
 0x28f   : > { %v7224_v21 = vrot.slane %v5716_v63, 4  ;;  %v5718_v20 = vadd.f32 %v5717_v38, %v17319_v15  ;;  %8638 = vmatprep.mubr.f32.mxu1 %v19841_v0 }
 0x290   : > { %v17752_v9 = vpop.f32.mrf.mxu0  ;;  %v17754_v37 = vpop.f32.mrf.mxu1  ;;  %14513 = vmatmul.mubr.msk.f32.gmra.mxu0 %vm7493_vm7, %v17420_v3 }
 0x291   : > { %v7245_v24 = vsel %vm7178_vm8, %v7244_v49, %v7224_v21  ;;  %v7227_v39 = vrot.slane %v5718_v20, 3  ;;  %8549 = vmatprep.mubr.f32.mxu0 %v19841_v0 }
 0x292   : > { %v5871_v29 = vpop.f32.mrf.mxu0  ;;  %14522 = vmatmul.mubr.msk.f32.vlgmr.msra.gmra.mxu1 %vm7493_vm7, %v17357_v14 }
 0x293   : > { %v7246_v8 = vsel %vm7180_vm9, %v7245_v24, %v7227_v39  ;;  %v17768_v32 = vpop.f32.mrf.mxu1  ;;  %8781 = vmatpush1.msra.mxu1 %v5710_v62  ;;  %8644 = vmatprep.mubr.f32.mxu1 %v19841_v0  ;;  %v5872_v39 = vadd.f32 %v5871_v29, %v17326_v11  ;;  %v6131_v29 = vadd.f32 %v17746_v31, %v17319_v15 }
 0x294   : > { %v7247_v56 = vsel %vm7182_vm10, %v7246_v8, %v7230_v28  ;;  %v5875_v59 = vpop.f32.mrf.mxu0  ;;  %8782 = vmatprep.subr.mxu1 %v5706_v44  ;;  %14518 = vmatmul.mubr.msk.f32.vlgmr.msra.gmra.mxu0 %vm7493_vm7, %v17357_v14  ;;  %v5870_v8 = vadd.f32 %v17752_v9, %v17326_v11  ;;  %v6133_v9 = vadd.f32 %v17754_v37, %v17319_v15 }
 0x295   : > { %v17779_v35 = vsel %vm7184_vm11, %v7247_v56, %v7233_v22  ;;  %v17781_v36 = vpop.f32.mrf.mxu1  ;;  %8692 = vmatpush1.msra.mxu0 %v5627_v12  ;;  %8783 = vmatpush1.msra.mxu1 %v5704_v50  ;;  %v5876_v62 = vadd.f32 %v5875_v59, %v17264_v33  ;;  %v5793_v50 = vadd.f32 %v17617_v54, %v17264_v33 }
 0x296   : > { %19862 = vst [vmem:[#allocation11_spill] sm:$0xff] %v17779_v35  ;;  %v5877_v61 = vpop.f32.mrf.mxu0  ;;  %8693 = vmatprep.subr.mxu0 %v5623_v51  ;;  %14523 = vmatmul.mubr.msk.f32.gmra.mxu1 %vm7493_vm7, %v17378_v18  ;;  %v5789_v51 = vadd.f32 %v17605_v23, %v17326_v11  ;;  %v5787_v54 = vadd.f32 %v17599_v1, %v17326_v11  ;;  %v7265_v1 = vrot.slane %v6131_v29, 2  ;;  %v7268_v37 = vrot.slane %v6133_v9, 1 }
 0x297   : > { %v5878_v13 = vadd.f32 %v5877_v61, %v17264_v33  ;;  %8694 = vmatpush1.msra.mxu0 %v5621_v53  ;;  %8555 = vmatprep.mubr.f32.mxu0 %v19841_v0  ;;  %v17791_v6 = vpop.f32.mrf.mxu1  ;;  %v5961_v31 = vadd.f32 %v17681_v58, %v17264_v33 }
 0x298   : > { %v5881_v40 = vpop.f32.mrf.mxu0  ;;  %8869 = vmatprep.subr.mxu0 %v5795_v45  ;;  %14519 = vmatmul.mubr.msk.f32.gmra.mxu0 %vm7493_vm7, %v17378_v18 }
 0x299   : > { %8958 = vmatprep.subr.mxu1 %v5878_v13  ;;  %8650 = vmatprep.mubr.f32.mxu1 %v19841_v0  ;;  %v5882_v4 = vadd.f32 %v5881_v40, %v17319_v15  ;;  %v17804_v48 = vpop.f32.mrf.mxu1 }
 0x29a   : > { %v5883_v49 = vpop.f32.mrf.mxu0  ;;  %14524 = vmatmul.mubr.msk.f32.gmra.mxu1 %vm7493_vm7, %v17401_v26  ;;  %8561 = vmatprep.mubr.f32.mxu0 %v19841_v0 }
 0x29b   : > { %v5884_v5 = vadd.f32 %v5883_v49, %v17319_v15  ;;  %8656 = vmatprep.mubr.f32.mxu1 %v19841_v0 }
 0x29c   : > { %v17806_v16 = vpop.f32.mrf.mxu0  ;;  %14520 = vmatmul.mubr.msk.f32.gmra.mxu0 %vm7493_vm7, %v17401_v26 }
 0x29d   : > { %v7250_v19 = vrot.slane %v5884_v5, 7  ;;  %8567 = vmatprep.mubr.f32.mxu0 %v19841_v0 }
 0x29e   : > { %v17811_v63 = vpop.f32.mrf.mxu0  ;;  %v17813_v38 = vpop.f32.mrf.mxu1  ;;  %14525 = vmatmul.mubr.msk.f32.gmra.mxu1 %vm7493_vm7, %v17420_v3 }
 0x29f   : > { %v7291_v21 = vsel %vm7173_vm5, %v5882_v4, %v7250_v19  ;;  %8816 = vmatprep.mubr.f32.mxu1 %v19841_v0 }
 0x2a0   : > { %v7292_v20 = vsel %vm7175_vm6, %v7291_v21, %v7253_v30  ;;  %v17820_v28 = vpop.f32.mrf.mxu0  ;;  %v17822_v22 = vpop.f32.mrf.mxu1  ;;  %14521 = vmatmul.mubr.msk.f32.gmra.mxu0 %vm7493_vm7, %v17420_v3 }
 0x2a1   : > { %v7293_v24 = vsel %vm213_vm2, %v7292_v20, %v7256_v43  ;;  %8727 = vmatprep.mubr.f32.mxu0 %v19841_v0  ;;  %v6299_v29 = vadd.f32 %v17822_v22, %v17319_v15 }
 0x2a2   : > { %v6043_v44 = vpop.f32.mrf.mxu0  ;;  %v17830_v12 = vpop.f32.mrf.mxu1  ;;  %14530 = vmatmul.mubr.msk.f32.vlgmr.msra.gmra.mxu1 %vm7493_vm7, %v17357_v14 }
 0x2a3   : > { %8959 = vmatpush1.msra.mxu1 %v5876_v62  ;;  %8822 = vmatprep.mubr.f32.mxu1 %v19841_v0  ;;  %v6044_v56 = vadd.f32 %v6043_v44, %v17264_v33  ;;  %v6042_v44 = vadd.f32 %v17820_v28, %v17264_v33  ;;  %v5959_v28 = vadd.f32 %v17675_v10, %v17264_v33 }
 0x2a4   : > { %v17844_v59 = vpop.f32.mrf.mxu1  ;;  %v6047_v53 = vpop.f32.mrf.mxu0  ;;  %8960 = vmatprep.subr.mxu1 %v5872_v39  ;;  %14526 = vmatmul.mubr.msk.f32.vlgmr.msra.gmra.mxu0 %vm7493_vm7, %v17357_v14  ;;  %v6297_v39 = vadd.f32 %v17813_v38, %v17319_v15  ;;  %v5955_v38 = vadd.f32 %v17665_v17, %v17326_v11  ;;  %v5953_v17 = vadd.f32 %v17659_v7, %v17326_v11 }
 0x2a5   : > { %v6048_v23 = vadd.f32 %v6047_v53, %v17319_v15  ;;  %8870 = vmatpush1.msra.mxu0 %v5793_v50  ;;  %8961 = vmatpush1.msra.mxu1 %v5870_v8 }
 0x2a6   : > { %v17855_v45 = vpop.f32.mrf.mxu1  ;;  %v6049_v61 = vpop.f32.mrf.mxu0  ;;  %8871 = vmatprep.subr.mxu0 %v5789_v51  ;;  %9136 = vmatprep.subr.mxu1 %v6044_v56  ;;  %v6038_v51 = vadd.f32 %v17811_v63, %v17326_v11  ;;  %v6036_v56 = vadd.f32 %v17806_v16, %v17326_v11  ;;  %v7274_v10 = vrot.slane %v6297_v39, 6  ;;  %v6127_v16 = vadd.f32 %v17738_v57, %v17264_v33 }
 0x2a7   : > { %v7259_v13 = vrot.slane %v6048_v23, 4  ;;  %v6050_v52 = vadd.f32 %v6049_v61, %v17319_v15  ;;  %14531 = vmatmul.mubr.msk.f32.gmra.mxu1 %vm7493_vm7, %v17378_v18  ;;  %8872 = vmatpush1.msra.mxu0 %v5787_v54  ;;  %v7277_v23 = vrot.slane %v6299_v29, 5 }
 0x2a8   : > { %8733 = vmatprep.mubr.f32.mxu0 %v19841_v0  ;;  %9047 = vmatprep.subr.mxu0 %v5961_v31  ;;  %v17867_v49 = vpop.f32.mrf.mxu1 }
 0x2a9   : > { %v7294_v40 = vsel %vm7178_vm8, %v7293_v24, %v7259_v13  ;;  %v7262_v58 = vrot.slane %v6050_v52, 3  ;;  %v17862_v42 = vpop.f32.mrf.mxu0  ;;  %14527 = vmatmul.mubr.msk.f32.gmra.mxu0 %vm7493_vm7, %v17378_v18  ;;  %8828 = vmatprep.mubr.f32.mxu1 %v19841_v0 }
 0x2aa   : > { %8739 = vmatprep.mubr.f32.mxu0 %v19841_v0 }
 0x2ab   : > { %v7295_v4 = vsel %vm7180_vm9, %v7294_v40, %v7262_v58  ;;  %v17871_v5 = vpop.f32.mrf.mxu0  ;;  %14532 = vmatmul.mubr.msk.f32.gmra.mxu1 %vm7493_vm7, %v17401_v26 }
 0x2ac   : > { %v7296_v30 = vsel %vm7182_vm10, %v7295_v4, %v7265_v1  ;;  %v17876_v43 = vpop.f32.mrf.mxu1  ;;  %8834 = vmatprep.mubr.f32.mxu1 %v19841_v0 }
 0x2ad   : > { %v17880_v19 = vsel %vm7184_vm11, %v7296_v30, %v7268_v37  ;;  %v17882_v21 = vpop.f32.mrf.mxu0  ;;  %14528 = vmatmul.mubr.msk.f32.gmra.mxu0 %vm7493_vm7, %v17401_v26 }
 0x2ae   : > { %19863 = vst [vmem:[#allocation12_spill] sm:$0xff] %v17880_v19  ;;  %v6464_v20 = vpop.f32.mrf.mxu1  ;;  %8745 = vmatprep.mubr.f32.mxu0 %v19841_v0 }
 0x2af   : > { %14533 = vmatmul.mubr.msk.f32.gmra.mxu1 %vm7493_vm7, %v17420_v3  ;;  %v6209_v62 = vpop.f32.mrf.mxu0  ;;  %v6465_v39 = vadd.f32 %v6464_v20, %v17319_v15  ;;  %v6125_v20 = vadd.f32 %v17727_v34, %v17264_v33 }
 0x2b0   : > { %v17889_v24 = vpop.f32.mrf.mxu1  ;;  %8994 = vmatprep.mubr.f32.mxu1 %v19841_v0  ;;  %v6210_v63 = vadd.f32 %v6209_v62, %v17264_v33 }
 0x2b1   : > { %14529 = vmatmul.mubr.msk.f32.gmra.mxu0 %vm7493_vm7, %v17420_v3 }
 0x2b2   : > { %v17898_v50 = vpop.f32.mrf.mxu1  ;;  %v6213_v8 = vpop.f32.mrf.mxu0  ;;  %8905 = vmatprep.mubr.f32.mxu0 %v19841_v0 }
 0x2b3   : > { %14538 = vmatmul.mubr.msk.f32.vlgmr.msra.gmra.mxu1 %vm7493_vm7, %v17357_v14  ;;  %v6214_v22 = vadd.f32 %v6213_v8, %v17319_v15 }
 0x2b4   : > { %v17913_v53 = vpop.f32.mrf.mxu1  ;;  %v6215_v54 = vpop.f32.mrf.mxu0  ;;  %9137 = vmatpush1.msra.mxu1 %v6042_v44  ;;  %9000 = vmatprep.mubr.f32.mxu1 %v19841_v0 }
 0x2b5   : > { %v6216_v9 = vadd.f32 %v6215_v54, %v17319_v15  ;;  %9138 = vmatprep.subr.mxu1 %v6038_v51  ;;  %14534 = vmatmul.mubr.msk.f32.vlgmr.msra.gmra.mxu0 %vm7493_vm7, %v17357_v14 }
 0x2b6   : > { %9048 = vmatpush1.msra.mxu0 %v5959_v28  ;;  %9139 = vmatpush1.msra.mxu1 %v6036_v56  ;;  %v17927_v13 = vpop.f32.mrf.mxu1  ;;  %v17979_v56 = vld [vmem:[%s19828_s2 + $0x58] sm:$0xff] }
 0x2b7   : > { %v7271_v31 = vrot.slane %v6216_v9, 7  ;;  %v17925_v61 = vpop.f32.mrf.mxu0  ;;  %9049 = vmatprep.subr.mxu0 %v5955_v38  ;;  %9314 = vmatprep.subr.mxu1 %v6210_v63  ;;  %v6204_v38 = vadd.f32 %v17871_v5, %v17326_v11  ;;  %v6121_v5 = vadd.f32 %v17718_v55, %v17326_v11  ;;  %v6293_v55 = vadd.f32 %v17804_v48, %v17264_v33 }
 0x2b8   : > { %14539 = vmatmul.mubr.msk.f32.gmra.mxu1 %vm7493_vm7, %v17378_v18  ;;  %9050 = vmatpush1.msra.mxu0 %v5953_v17 }
 0x2b9   : > { %v7298_v14 = vsel %vm7173_vm5, %v6214_v22, %v7271_v31  ;;  %v17932_v7 = vpop.f32.mrf.mxu0  ;;  %8911 = vmatprep.mubr.f32.mxu0 %v19841_v0  ;;  %9225 = vmatprep.subr.mxu0 %v6127_v16 }
 0x2ba   : > { %v7299_v57 = vsel %vm7175_vm6, %v7298_v14, %v7274_v10  ;;  %v17936_v52 = vpop.f32.mrf.mxu1  ;;  %14535 = vmatmul.mubr.msk.f32.gmra.mxu0 %vm7493_vm7, %v17378_v18  ;;  %9006 = vmatprep.mubr.f32.mxu1 %v19841_v0  ;;  %v6463_v18 = vadd.f32 %v17876_v43, %v17319_v15  ;;  %v6208_v43 = vadd.f32 %v17882_v21, %v17264_v33  ;;  %v7289_v21 = vrot.slane %v6465_v39, 1 }
 0x2bb   : > { %v17941_v1 = vpop.f32.mrf.mxu0  ;;  %8917 = vmatprep.mubr.f32.mxu0 %v19841_v0  ;;  %v7300_v37 = vsel %vm213_vm2, %v7299_v57, %v7277_v23 }
 0x2bc   : > { %v17945_v40 = vpop.f32.mrf.mxu1  ;;  %14540 = vmatmul.mubr.msk.f32.gmra.mxu1 %vm7493_vm7, %v17401_v26  ;;  %v7286_v28 = vrot.slane %v6463_v18, 2  ;;  %v6629_v18 = vadd.f32 %v17936_v52, %v17319_v15 }
 0x2bd   : > { %v6375_v58 = vpop.f32.mrf.mxu0  ;;  %9012 = vmatprep.mubr.f32.mxu1 %v19841_v0 }
 0x2be   : > { %v17950_v4 = vpop.f32.mrf.mxu1  ;;  %14536 = vmatmul.mubr.msk.f32.gmra.mxu0 %vm7493_vm7, %v17401_v26  ;;  %v6376_v22 = vadd.f32 %v6375_v58, %v17264_v33  ;;  %v18030_v58 = vld [vmem:[%s19828_s2 + $0x68] sm:$0xff] }
 0x2bf   : > { %8923 = vmatprep.mubr.f32.mxu0 %v19841_v0 }
 0x2c0   : > { %v17957_v30 = vpop.f32.mrf.mxu1  ;;  %v6379_v62 = vpop.f32.mrf.mxu0  ;;  %14541 = vmatmul.mubr.msk.f32.gmra.mxu1 %vm7493_vm7, %v17420_v3 }
 0x2c1   : > { %v6380_v44 = vadd.f32 %v6379_v62, %v17319_v15  ;;  %9172 = vmatprep.mubr.f32.mxu1 %v19841_v0 }
 0x2c2   : > { %v17964_v8 = vpop.f32.mrf.mxu1  ;;  %v6381_v26 = vpop.f32.mrf.mxu0  ;;  %14537 = vmatmul.mubr.msk.f32.gmra.mxu0 %vm7493_vm7, %v17420_v3  ;;  %v6202_v3 = vadd.f32 %v17862_v42, %v17326_v11  ;;  %v6119_v42 = vadd.f32 %v17710_v41, %v17326_v11  ;;  %v18014_v41 = vld [vmem:[%s19828_s2 + $0x60] sm:$0xff] }
 0x2c3   : > { %v7280_v51 = vrot.slane %v6380_v44, 4  ;;  %v6382_v29 = vadd.f32 %v6381_v26, %v17319_v15  ;;  %9083 = vmatprep.mubr.f32.mxu0 %v19841_v0  ;;  %v6631_v44 = vadd.f32 %v17945_v40, %v17319_v15  ;;  %v7309_v40 = vrot.slane %v6629_v18, 6 }
 0x2c4   : > { %14546 = vmatmul.mubr.msk.f32.vlgmr.msra.gmra.mxu1 %vm7493_vm7, %v17979_v56  ;;  %v17992_v9 = vpop.f32.mrf.mxu1 }
 0x2c5   : > { %v7301_v54 = vsel %vm7178_vm8, %v7300_v37, %v7280_v51  ;;  %v7283_v63 = vrot.slane %v6382_v29, 3  ;;  %v17986_v34 = vpop.f32.mrf.mxu0  ;;  %9315 = vmatpush1.msra.mxu1 %v6208_v43  ;;  %9178 = vmatprep.mubr.f32.mxu1 %v19841_v0  ;;  %v18051_v29 = vld [vmem:[%s19828_s2 + $0x70] sm:$0xff] }
 0x2c6   : > { %9316 = vmatprep.subr.mxu1 %v6204_v38  ;;  %14542 = vmatmul.mubr.msk.f32.vlgmr.msra.gmra.mxu0 %vm7493_vm7, %v17979_v56 }
 0x2c7   : > { %v7302_v17 = vsel %vm7180_vm9, %v7301_v54, %v7283_v63  ;;  %v17999_v10 = vpop.f32.mrf.mxu0  ;;  %9226 = vmatpush1.msra.mxu0 %v6125_v20  ;;  %9317 = vmatpush1.msra.mxu1 %v6202_v3  ;;  %v7312_v20 = vrot.slane %v6631_v44, 5  ;;  %v6374_v3 = vadd.f32 %v17941_v1, %v17264_v33  ;;  %v6370_v54 = vadd.f32 %v17932_v7, %v17326_v11 }
 0x2c8   : > { %v7303_v16 = vsel %vm7182_vm10, %v7302_v17, %v7286_v28  ;;  %v18004_v23 = vpop.f32.mrf.mxu1  ;;  %9227 = vmatprep.subr.mxu0 %v6121_v5  ;;  %9492 = vmatprep.subr.mxu1 %v6376_v22  ;;  %v6291_v22 = vadd.f32 %v17791_v6, %v17264_v33  ;;  %v6368_v1 = vadd.f32 %v17925_v61, %v17326_v11 }
 0x2c9   : > { %v18007_v31 = vsel %vm7184_vm11, %v7303_v16, %v7289_v21  ;;  %v18009_v14 = vpop.f32.mrf.mxu0  ;;  %14547 = vmatmul.mubr.msk.f32.gmra.mxu1 %vm7493_vm7, %v18014_v41  ;;  %9228 = vmatpush1.msra.mxu0 %v6119_v42  ;;  %v6287_v7 = vadd.f32 %v17781_v36, %v17326_v11  ;;  %v6285_v61 = vadd.f32 %v17768_v32, %v17326_v11 }
 0x2ca   : > { %19864 = vst [vmem:[#allocation13_spill] sm:$0xff] %v18007_v31  ;;  %v18018_v48 = vpop.f32.mrf.mxu1  ;;  %9089 = vmatprep.mubr.f32.mxu0 %v19841_v0  ;;  %9403 = vmatprep.subr.mxu0 %v6293_v55  ;;  %v6459_v36 = vadd.f32 %v17867_v49, %v17264_v33  ;;  %v6795_v44 = vadd.f32 %v18004_v23, %v17319_v15 }
 0x2cb   : > { %14543 = vmatmul.mubr.msk.f32.gmra.mxu0 %vm7493_vm7, %v18014_v41  ;;  %9184 = vmatprep.mubr.f32.mxu1 %v19841_v0  ;;  %v6541_v57 = vpop.f32.mrf.mxu0 }
 0x2cc   : > { %v18024_v37 = vpop.f32.mrf.mxu1  ;;  %9095 = vmatprep.mubr.f32.mxu0 %v19841_v0  ;;  %v6542_v55 = vadd.f32 %v6541_v57, %v17264_v33 }
 0x2cd   : > { %14548 = vmatmul.mubr.msk.f32.gmra.mxu1 %vm7493_vm7, %v18030_v58 }
 0x2ce   : > { %v18036_v62 = vpop.f32.mrf.mxu1  ;;  %v6545_v39 = vpop.f32.mrf.mxu0  ;;  %9190 = vmatprep.mubr.f32.mxu1 %v19841_v0 }
 0x2cf   : > { %14544 = vmatmul.mubr.msk.f32.gmra.mxu0 %vm7493_vm7, %v18030_v58  ;;  %v6546_v51 = vadd.f32 %v6545_v39, %v17319_v15  ;;  %v6951_v2 = vadd.f32 %v18036_v62, %v17326_v11 }
 0x2d0   : > { %v18043_v26 = vpop.f32.mrf.mxu1  ;;  %v6547_v43 = vpop.f32.mrf.mxu0  ;;  %9101 = vmatprep.mubr.f32.mxu0 %v19841_v0 }
 0x2d1   : > { %v6548_v52 = vadd.f32 %v6547_v43, %v17319_v15  ;;  %14549 = vmatmul.mubr.msk.f32.gmra.mxu1 %vm7493_vm7, %v18051_v29  ;;  %v6797_v43 = vadd.f32 %v18018_v48, %v17319_v15  ;;  %v7321_v48 = vrot.slane %v6795_v44, 2  ;;  %v6536_v44 = vadd.f32 %v17999_v10, %v17326_v11 }
 0x2d2   : > { %9350 = vmatprep.mubr.f32.mxu1 %v19841_v0  ;;  %v18062_v21 = vpop.f32.mrf.mxu1 }
 0x2d3   : > { %v7306_v38 = vrot.slane %v6548_v52, 7  ;;  %v18056_v28 = vpop.f32.mrf.mxu0  ;;  %14545 = vmatmul.mubr.msk.f32.gmra.mxu0 %vm7493_vm7, %v18051_v29 }
 0x2d4   : > { %9261 = vmatprep.mubr.f32.mxu0 %v19841_v0 }
 0x2d5   : > { %v7347_v63 = vsel %vm7173_vm5, %v6546_v51, %v7306_v38  ;;  %v18068_v5 = vpop.f32.mrf.mxu0  ;;  %14554 = vmatmul.mubr.msk.f32.vlgmr.msra.gmra.mxu1 %vm7493_vm7, %v17979_v56  ;;  %v7324_v38 = vrot.slane %v6797_v43, 1  ;;  %v6534_v43 = vadd.f32 %v17986_v34, %v17326_v11 }
 0x2d6   : > { %v7348_v42 = vsel %vm7175_vm6, %v7347_v63, %v7309_v40  ;;  %9493 = vmatpush1.msra.mxu1 %v6374_v3  ;;  %v18077_v17 = vpop.f32.mrf.mxu1  ;;  %9356 = vmatprep.mubr.f32.mxu1 %v19841_v0 }
 0x2d7   : > { %9494 = vmatprep.subr.mxu1 %v6370_v54  ;;  %v18083_v16 = vpop.f32.mrf.mxu0  ;;  %14550 = vmatmul.mubr.msk.f32.vlgmr.msra.gmra.mxu0 %vm7493_vm7, %v17979_v56  ;;  %v7349_v6 = vsel %vm213_vm2, %v7348_v42, %v7312_v20 }
 0x2d8   : > { %9404 = vmatpush1.msra.mxu0 %v6291_v22  ;;  %9495 = vmatpush1.msra.mxu1 %v6368_v1  ;;  %v18090_v18 = vpop.f32.mrf.mxu1 }
 0x2d9   : > { %9405 = vmatprep.subr.mxu0 %v6287_v7  ;;  %9670 = vmatprep.subr.mxu1 %v6542_v55  ;;  %v6707_v57 = vpop.f32.mrf.mxu0 }
 0x2da   : > { %14555 = vmatmul.mubr.msk.f32.gmra.mxu1 %vm7493_vm7, %v18014_v41  ;;  %9406 = vmatpush1.msra.mxu0 %v6285_v61  ;;  %v18096_v39 = vpop.f32.mrf.mxu1  ;;  %v6540_v61 = vadd.f32 %v18009_v14, %v17264_v33 }
 0x2db   : > { %9267 = vmatprep.mubr.f32.mxu0 %v19841_v0  ;;  %9581 = vmatprep.subr.mxu0 %v6459_v36  ;;  %v6711_v32 = vpop.f32.mrf.mxu0 }
 0x2dc   : > { %v6712_v49 = vadd.f32 %v6711_v32, %v17319_v15  ;;  %14551 = vmatmul.mubr.msk.f32.gmra.mxu0 %vm7493_vm7, %v18014_v41  ;;  %9362 = vmatprep.mubr.f32.mxu1 %v19841_v0  ;;  %v18107_v51 = vpop.f32.mrf.mxu1  ;;  %v6457_v32 = vadd.f32 %v17855_v45, %v17264_v33  ;;  %v6451_v45 = vadd.f32 %v17830_v12, %v17326_v11 }
 0x2dd   : > { %v6713_v52 = vpop.f32.mrf.mxu0  ;;  %9273 = vmatprep.mubr.f32.mxu0 %v19841_v0 }
 0x2de   : > { %v7315_v23 = vrot.slane %v6712_v49, 4  ;;  %v6714_v40 = vadd.f32 %v6713_v52, %v17319_v15  ;;  %14556 = vmatmul.mubr.msk.f32.gmra.mxu1 %vm7493_vm7, %v18030_v58  ;;  %v18113_v20 = vpop.f32.mrf.mxu1  ;;  %v6453_v49 = vadd.f32 %v17844_v59, %v17326_v11  ;;  %v6708_v52 = vadd.f32 %v6707_v57, %v17264_v33 }
 0x2df   : > { %9368 = vmatprep.mubr.f32.mxu1 %v19841_v0  ;;  %v6961_v59 = vadd.f32 %v18077_v17, %v17319_v15 }
 0x2e0   : > { %v7350_v3 = vsel %vm7178_vm8, %v7349_v6, %v7315_v23  ;;  %v7318_v54 = vrot.slane %v6714_v40, 3  ;;  %14552 = vmatmul.mubr.msk.f32.gmra.mxu0 %vm7493_vm7, %v18030_v58  ;;  %v18123_v1 = vpop.f32.mrf.mxu1  ;;  %v6625_v23 = vadd.f32 %v17927_v13, %v17264_v33  ;;  %v6963_v40 = vadd.f32 %v18090_v18, %v17319_v15 }
 0x2e1   : > { %9279 = vmatprep.mubr.f32.mxu0 %v19841_v0  ;;  %v18120_v63 = vpop.f32.mrf.mxu0 }
 0x2e2   : > { %v7351_v22 = vsel %vm7180_vm9, %v7350_v3, %v7318_v54  ;;  %14557 = vmatmul.mubr.msk.f32.gmra.mxu1 %vm7493_vm7, %v18051_v29  ;;  %v7330_v3 = vrot.slane %v6961_v59, 6 }
 0x2e3   : > { %v7352_v42 = vsel %vm7182_vm10, %v7351_v22, %v7321_v48  ;;  %9528 = vmatprep.mubr.f32.mxu1 %v19841_v0  ;;  %v18129_v7 = vpop.f32.mrf.mxu0  ;;  %v18136_v6 = vpop.f32.mrf.mxu1  ;;  %v7333_v22 = vrot.slane %v6963_v40, 5  ;;  %v6623_v40 = vadd.f32 %v17913_v53, %v17264_v33 }
 0x2e4   : > { %v18132_v55 = vsel %vm7184_vm11, %v7352_v42, %v7324_v38  ;;  %14553 = vmatmul.mubr.msk.f32.gmra.mxu0 %vm7493_vm7, %v18051_v29 }
 0x2e5   : > { %19865 = vst [vmem:[#allocation14_spill] sm:$0xff] %v18132_v55  ;;  %9439 = vmatprep.mubr.f32.mxu0 %v19841_v0  ;;  %v18141_v36 = vpop.f32.mrf.mxu0  ;;  %v7128_v10 = vpop.f32.mrf.mxu1 }
 0x2e6   : > { %14562 = vmatmul.mubr.msk.f32.vlgmr.msra.gmra.mxu1 %vm7493_vm7, %v17979_v56 }
 0x2e7   : > { %9671 = vmatpush1.msra.mxu1 %v6540_v61  ;;  %9534 = vmatprep.mubr.f32.mxu1 %v19841_v0  ;;  %v18152_v14 = vpop.f32.mrf.mxu0 }
 0x2e8   : > { %9672 = vmatprep.subr.mxu1 %v6536_v44  ;;  %14558 = vmatmul.mubr.msk.f32.vlgmr.msra.gmra.mxu0 %vm7493_vm7, %v17979_v56 }
 0x2e9   : > { %9582 = vmatpush1.msra.mxu0 %v6457_v32  ;;  %9673 = vmatpush1.msra.mxu1 %v6534_v43  ;;  %v6877_v34 = vpop.f32.mrf.mxu0 }
 0x2ea   : > { %9583 = vmatprep.subr.mxu0 %v6453_v49  ;;  %9848 = vmatprep.subr.mxu1 %v6708_v52  ;;  %v6878_v12 = vadd.f32 %v6877_v34, %v17319_v15 }
 0x2eb   : > { %14563 = vmatmul.mubr.msk.f32.gmra.mxu1 %vm7493_vm7, %v18014_v41  ;;  %9584 = vmatpush1.msra.mxu0 %v6451_v45  ;;  %v6879_v57 = vpop.f32.mrf.mxu0 }
 0x2ec   : > { %9445 = vmatprep.mubr.f32.mxu0 %v19841_v0  ;;  %9759 = vmatprep.subr.mxu0 %v6625_v23  ;;  %v6880_v13 = vadd.f32 %v6879_v57, %v17319_v15  ;;  %v18172_v48 = vpop.f32.mrf.mxu1  ;;  %v6706_v23 = vadd.f32 %v18083_v16, %v17264_v33  ;;  %v6700_v16 = vadd.f32 %v18056_v28, %v17326_v11 }
 0x2ed   : > { %14559 = vmatmul.mubr.msk.f32.gmra.mxu0 %vm7493_vm7, %v18014_v41  ;;  %9540 = vmatprep.mubr.f32.mxu1 %v19841_v0  ;;  %v18177_v17 = vpop.f32.mrf.mxu0 }
 0x2ee   : > { %9451 = vmatprep.mubr.f32.mxu0 %v19841_v0  ;;  %v7327_v38 = vrot.slane %v6880_v13, 7  ;;  %v18180_v18 = vpop.f32.mrf.mxu1  ;;  %v7127_v13 = vadd.f32 %v18136_v6, %v17319_v15  ;;  %v6874_v6 = vadd.f32 %v18152_v14, %v17264_v33  ;;  %v7032_v31 = vadd.f32 %v18177_v17, %v17326_v11 }
 0x2ef   : > { %14564 = vmatmul.mubr.msk.f32.gmra.mxu1 %vm7493_vm7, %v18030_v58  ;;  %v18184_v54 = vpop.f32.mrf.mxu0  ;;  %v7123_v17 = vadd.f32 %v18123_v1, %v17264_v33 }
 0x2f0   : > { %v7354_v42 = vsel %vm7173_vm5, %v6878_v12, %v7327_v38  ;;  %9546 = vmatprep.mubr.f32.mxu1 %v19841_v0  ;;  %v18188_v61 = vpop.f32.mrf.mxu1  ;;  %v6702_v12 = vadd.f32 %v18068_v5, %v17326_v11  ;;  %v6619_v5 = vadd.f32 %v17898_v50, %v17326_v11  ;;  %v6791_v50 = vadd.f32 %v17992_v9, %v17264_v33 }
 0x2f1   : > { %v7355_v44 = vsel %vm7175_vm6, %v7354_v42, %v7330_v3  ;;  %14560 = vmatmul.mubr.msk.f32.gmra.mxu0 %vm7493_vm7, %v18030_v58  ;;  %v18193_v32 = vpop.f32.mrf.mxu0  ;;  %v7129_v3 = vadd.f32 %v7128_v10, %v17319_v15  ;;  %v6617_v10 = vadd.f32 %v17889_v24, %v17326_v11  ;;  %v7342_v14 = vrot.slane %v7127_v13, 2 }
 0x2f2   : > { %9457 = vmatprep.mubr.f32.mxu0 %v19841_v0  ;;  %v7356_v43 = vsel %vm213_vm2, %v7355_v44, %v7333_v22  ;;  %v18197_v49 = vpop.f32.mrf.mxu1  ;;  %v7038_v19 = vadd.f32 %v18193_v32, %v17264_v33  ;;  %v7034_v55 = vadd.f32 %v18184_v54, %v17326_v11 }
 0x2f3   : > { %14565 = vmatmul.mubr.msk.f32.gmra.mxu1 %vm7493_vm7, %v18051_v29  ;;  %v18201_v52 = vpop.f32.mrf.mxu0 }
 0x2f4   : > { %9706 = vmatprep.mubr.f32.mxu1 %v19841_v0  ;;  %v18204_v45 = vpop.f32.mrf.mxu1 }
 0x2f5   : > { %14561 = vmatmul.mubr.msk.f32.gmra.mxu0 %vm7493_vm7, %v18051_v29  ;;  %v7043_v34 = vpop.f32.mrf.mxu0 }
 0x2f6   : > { %9617 = vmatprep.mubr.f32.mxu0 %v19841_v0  ;;  %v7044_v59 = vadd.f32 %v7043_v34, %v17319_v15  ;;  %v18212_v57 = vpop.f32.mrf.mxu1 }
 0x2f7   : > { %14570 = vmatmul.mubr.msk.f32.vlgmr.msra.gmra.mxu1 %vm7493_vm7, %v17979_v56  ;;  %v7045_v38 = vpop.f32.mrf.mxu0 }
 0x2f8   : > { %9849 = vmatpush1.msra.mxu1 %v6706_v23  ;;  %9712 = vmatprep.mubr.f32.mxu1 %v19841_v0  ;;  %v7336_v22 = vrot.slane %v7044_v59, 4  ;;  %v7046_v53 = vadd.f32 %v7045_v38, %v17319_v15  ;;  %v18227_v42 = vpop.f32.mrf.mxu1 }
 0x2f9   : > { %9850 = vmatprep.subr.mxu1 %v6702_v12  ;;  %14566 = vmatmul.mubr.msk.f32.vlgmr.msra.gmra.mxu0 %vm7493_vm7, %v17979_v56  ;;  %v18235_v28 = vpop.f32.mrf.mxu0  ;;  %v7345_v12 = vrot.slane %v7129_v3, 1 }
 0x2fa   : > { %9760 = vmatpush1.msra.mxu0 %v6623_v40  ;;  %9851 = vmatpush1.msra.mxu1 %v6700_v16  ;;  %v7357_v44 = vsel %vm7178_vm8, %v7356_v43, %v7336_v22  ;;  %v7339_v34 = vrot.slane %v7046_v53, 3  ;;  %v18240_v23 = vpop.f32.mrf.mxu1 }
 0x2fb   : > { %9761 = vmatprep.subr.mxu0 %v6619_v5  ;;  %10026 = vmatprep.subr.mxu1 %v6874_v6  ;;  %v18244_v59 = vpop.f32.mrf.mxu0 }
 0x2fc   : > { %14571 = vmatmul.mubr.msk.f32.gmra.mxu1 %vm7493_vm7, %v18014_v41  ;;  %9762 = vmatpush1.msra.mxu0 %v6617_v10  ;;  %v7358_v24 = vsel %vm7180_vm9, %v7357_v44, %v7339_v34  ;;  %v18249_v40 = vpop.f32.mrf.mxu1  ;;  %v6872_v44 = vadd.f32 %v18141_v36, %v17264_v33 }
 0x2fd   : > { %9623 = vmatprep.mubr.f32.mxu0 %v19841_v0  ;;  %9937 = vmatprep.subr.mxu0 %v6791_v50  ;;  %v7359_v43 = vsel %vm7182_vm10, %v7358_v24, %v7342_v14  ;;  %v14704_v9 = vpop.f32.mrf.mxu0  ;;  %v6868_v50 = vadd.f32 %v18129_v7, %v17326_v11  ;;  %v6866_v24 = vadd.f32 %v18120_v63, %v17326_v11 }
 0x2fe   : > { %14567 = vmatmul.mubr.msk.f32.gmra.mxu0 %vm7493_vm7, %v18014_v41  ;;  %9718 = vmatprep.mubr.f32.mxu1 %v19841_v0  ;;  %v18257_v13 = vsel %vm7184_vm11, %v7359_v43, %v7345_v12  ;;  %v18259_v38 = vpop.f32.mrf.mxu1  ;;  %v6789_v12 = vadd.f32 %v17964_v8, %v17264_v33  ;;  %v6785_v43 = vadd.f32 %v17957_v30, %v17326_v11 }
 0x2ff   : > { %19866 = vst [vmem:[#allocation15_spill] sm:$0xff] %v18257_v13  ;;  %9629 = vmatprep.mubr.f32.mxu0 %v19841_v0  ;;  %v18262_v16 = vpop.f32.mrf.mxu0  ;;  %v7040_v7 = vadd.f32 %v18201_v52, %v17264_v33  ;;  %v6783_v8 = vadd.f32 %v17950_v4, %v17326_v11 }
 0x300   : > { %14572 = vmatmul.mubr.msk.f32.gmra.mxu1 %vm7493_vm7, %v18030_v58  ;;  %v18266_v3 = vpop.f32.mrf.mxu1  ;;  %v18410_v1 = vadd.f32 %v18262_v16, %v17292_v25 }
 0x301   : > { %9724 = vmatprep.mubr.f32.mxu1 %v19841_v0  ;;  %v18269_v22 = vpop.f32.mrf.mxu0 }
 0x302   : > { %14568 = vmatmul.mubr.msk.f32.gmra.mxu0 %vm7493_vm7, %v18030_v58  ;;  %v18273_v53 = vpop.f32.mrf.mxu1  ;;  %v7587_v60 = vadd.f32 %v18212_v57, %v18410_v1 }
 0x303   : > { %9635 = vmatprep.mubr.f32.mxu0 %v19841_v0  ;;  %v18276_v5 = vpop.f32.mrf.mxu0 }
 0x304   : > { %14573 = vmatmul.mubr.msk.f32.gmra.mxu1 %vm7493_vm7, %v18051_v29 }
 0x305   : > { %9884 = vmatprep.mubr.f32.mxu1 %v19841_v0  ;;  %v18281_v6 = vpop.f32.mrf.mxu0 }
 0x306   : > { %14569 = vmatmul.mubr.msk.f32.gmra.mxu0 %vm7493_vm7, %v18051_v29  ;;  %v18285_v10 = vpop.f32.mrf.mxu1 }
 0x307   : > { %9795 = vmatprep.mubr.f32.mxu0 %v19841_v0  ;;  %v18290_v34 = vpop.f32.mrf.mxu0 }
 0x308   : > { %14578 = vmatmul.mubr.msk.f32.vlgmr.msra.gmra.mxu1 %vm7493_vm7, %v17979_v56  ;;  %v18296_v14 = vpop.f32.mrf.mxu1 }
 0x309   : > { %10027 = vmatpush1.msra.mxu1 %v6872_v44  ;;  %9890 = vmatprep.mubr.f32.mxu1 %v19841_v0  ;;  %v18303_v36 = vpop.f32.mrf.mxu0  ;;  %v6957_v44 = vadd.f32 %v18062_v21, %v17264_v33 }
 0x30a   : > { %10028 = vmatprep.subr.mxu1 %v6868_v50  ;;  %14574 = vmatmul.mubr.msk.f32.vlgmr.msra.gmra.mxu0 %vm7493_vm7, %v17979_v56  ;;  %v18311_v35 = vpop.f32.mrf.mxu1 }
 0x30b   : > { %9938 = vmatpush1.msra.mxu0 %v6789_v12  ;;  %10029 = vmatpush1.msra.mxu1 %v6866_v24  ;;  %v18315_v63 = vpop.f32.mrf.mxu0  ;;  %v7395_v24 = vpop.permute.xlu1 %7394 }
 0x30c   : > { %9939 = vmatprep.subr.mxu0 %v6785_v43  ;;  %10204 = vmatprep.subr.mxu1 %v7040_v7  ;;  %v18319_v30 = vpop.f32.mrf.mxu1  ;;  %v18341_v43 = vadd.f32 %v14704_v9, %v7395_v24 }
 0x30d   : > { %14579 = vmatmul.mubr.msk.f32.gmra.mxu1 %vm7493_vm7, %v18014_v41  ;;  %9940 = vmatpush1.msra.mxu0 %v6783_v8  ;;  %v18323_v52 = vpop.f32.mrf.mxu0 }
 0x30e   : > { %9801 = vmatprep.mubr.f32.mxu0 %v19841_v0  ;;  %10115 = vmatprep.subr.mxu0 %v6957_v44  ;;  %v18326_v4 = vpop.f32.mrf.mxu1  ;;  %v7593_v9 = vadd.f32 %v18240_v23, %v18341_v43  ;;  %v6955_v23 = vadd.f32 %v18043_v26, %v17264_v33  ;;  %v6949_v26 = vadd.f32 %v18024_v37, %v17326_v11 }
 0x30f   : > { %14575 = vmatmul.mubr.msk.f32.gmra.mxu0 %vm7493_vm7, %v18014_v41  ;;  %9896 = vmatprep.mubr.f32.mxu1 %v19841_v0  ;;  %v18331_v21 = vpop.f32.mrf.mxu0  ;;  %v7591_v25 = vadd.f32 %v18227_v42, %v18341_v43 }
 0x310   : > { %9807 = vmatprep.mubr.f32.mxu0 %v19841_v0  ;;  %v18334_v50 = vpop.f32.mrf.mxu1  ;;  %v10547_v54 = vmax.f32 %v7593_v9, 0.0 }
 0x311   : > { %14580 = vmatmul.mubr.msk.f32.gmra.mxu1 %vm7493_vm7, %v18030_v58  ;;  %v18338_v12 = vpop.f32.mrf.mxu0 }
 0x312   : > { %19867 = vst [vmem:[#allocation16_spill] sm:$0xff] %v18338_v12  ;;  %9902 = vmatprep.mubr.f32.mxu1 %v19841_v0 }
 0x313   : > { %14576 = vmatmul.mubr.msk.f32.gmra.mxu0 %vm7493_vm7, %v18030_v58  ;;  %v18345_v7 = vpop.f32.mrf.mxu0 }
 0x314   : > { %9813 = vmatprep.mubr.f32.mxu0 %v19841_v0  ;;  %v18348_v8 = vpop.f32.mrf.mxu1 }
 0x315   : > { %14581 = vmatmul.mubr.msk.f32.gmra.mxu1 %vm7493_vm7, %v18051_v29 }
 0x316   : > { %10062 = vmatprep.mubr.f32.mxu1 %v19841_v0  ;;  %v18353_v44 = vpop.f32.mrf.mxu1 }
 0x317   : > { %14577 = vmatmul.mubr.msk.f32.gmra.mxu0 %vm7493_vm7, %v18051_v29  ;;  %v18359_v24 = vpop.f32.mrf.mxu0 }
 0x318   : > { %9973 = vmatprep.mubr.f32.mxu0 %v19841_v0  ;;  %v18364_v47 = vpop.f32.mrf.mxu1 }
 0x319   : > { %14586 = vmatmul.mubr.msk.f32.vlgmr.msra.gmra.mxu1 %vm7493_vm7, %v17979_v56  ;;  %v18370_v13 = vpop.f32.mrf.mxu0 }
 0x31a   : > { %10205 = vmatpush1.msra.mxu1 %v7038_v19  ;;  %10068 = vmatprep.mubr.f32.mxu1 %v19841_v0  ;;  %v18377_v32 = vpop.f32.mrf.mxu1 }
 0x31b   : > { %10206 = vmatprep.subr.mxu1 %v7034_v55  ;;  %14582 = vmatmul.mubr.msk.f32.vlgmr.msra.gmra.mxu0 %vm7493_vm7, %v17979_v56  ;;  %v18383_v27 = vpop.f32.mrf.mxu0  ;;  %v7385_v55 = vpop.permute.xlu1 %7384 }
 0x31c   : > { %10116 = vmatpush1.msra.mxu0 %v6955_v23  ;;  %10207 = vmatpush1.msra.mxu1 %v7032_v31  ;;  %v18387_v19 = vpop.f32.mrf.mxu1 }
 0x31d   : > { %10117 = vmatprep.subr.mxu0 %v6951_v2  ;;  %10637 = vmatprep.subr.mxu1 %v10547_v54  ;;  %v18391_v62 = vpop.f32.mrf.mxu0 }
 0x31e   : > { %14587 = vmatmul.mubr.msk.f32.gmra.mxu1 %vm7493_vm7, %v18014_v41  ;;  %10118 = vmatpush1.msra.mxu0 %v6949_v26  ;;  %v18395_v9 = vpop.f32.mrf.mxu1  ;;  %v18420_v26 = vadd.f32 %v18235_v28, %v7385_v55  ;;  %v7585_v55 = vadd.f32 %v18204_v45, %v18410_v1 }
 0x31f   : > { %9979 = vmatprep.mubr.f32.mxu0 %v19841_v0  ;;  %10293 = vmatprep.subr.mxu0 %v7123_v17  ;;  %v18398_v31 = vpop.f32.mrf.mxu0  ;;  %v7380_v17 = vpop.permute.xlu1 %7379 }
 0x320   : > { %14583 = vmatmul.mubr.msk.f32.gmra.mxu0 %vm7493_vm7, %v18014_v41  ;;  %10074 = vmatprep.mubr.f32.mxu1 %v19841_v0  ;;  %v18403_v2 = vpop.f32.mrf.mxu1  ;;  %v18436_v28 = vadd.f32 %v18244_v59, %v7380_v17  ;;  %v7581_v42 = vadd.f32 %v18197_v49, %v18420_v26  ;;  %v7579_v59 = vadd.f32 %v18188_v61, %v18420_v26  ;;  %v10483_v17 = vmax.f32 %v7587_v60, 0.0 }
 0x321   : > { %9985 = vmatprep.mubr.f32.mxu0 %v19841_v0  ;;  %v18406_v37 = vpop.f32.mrf.mxu0  ;;  %v19872_v61 = vmov 0.0   ;;  %v7117_v60 = vadd.f32 %v18107_v51, %v17326_v11 }
 0x322   : > { %14588 = vmatmul.mubr.msk.f32.gmra.mxu1 %vm7493_vm7, %v18030_v58  ;;  %v18414_v23 = vpop.f32.mrf.mxu1  ;;  %v10419_v12 = vmax.f32 %v7581_v42, 0.0  ;;  %v10418_v51 = vmax.f32 %v7579_v59, 0.0  ;;  %v18510_v59 = vld [vmem:[%s19828_s2 + $0x78] sm:$0x7] }
 0x323   : > { %10080 = vmatprep.mubr.f32.mxu1 %v19841_v0  ;;  %v18417_v54 = vpop.f32.mrf.mxu0  ;;  %13109 = vrot.lane.b32.xlu1 %v18510_v59, %s14961_s17 }
 0x324   : > { %19868 = vst [vmem:[#allocation17_spill] sm:$0xff] %v18417_v54  ;;  %14584 = vmatmul.mubr.msk.f32.gmra.mxu0 %vm7493_vm7, %v18030_v58  ;;  %v10546_v54 = vmax.f32 %v7591_v25, 0.0  ;;  %v10482_v25 = vmax.f32 %v7585_v55, 0.0 }
 0x325   : > { %9991 = vmatprep.mubr.f32.mxu0 %v19841_v0  ;;  %v18427_v16 = vpop.f32.mrf.mxu0 }
 0x326   : > { %19869 = vst [vmem:[#allocation18_spill] sm:$0xff] %v18427_v16  ;;  %14589 = vmatmul.mubr.msk.f32.gmra.mxu1 %vm7493_vm7, %v18051_v29  ;;  %v18433_v46 = vpop.f32.mrf.mxu1  ;;  %v7121_v16 = vadd.f32 %v18113_v20, %v17264_v33 }
 0x327   : > { %10240 = vmatprep.mubr.f32.mxu1 %v19841_v0 }
 0x328   : > { %14585 = vmatmul.mubr.msk.f32.gmra.mxu0 %vm7493_vm7, %v18051_v29  ;;  %v18445_v57 = vpop.f32.mrf.mxu0  ;;  %v18447_v15 = vpop.f32.mrf.mxu1 }
 0x329   : > { %19870 = vst [vmem:[#allocation19_spill] sm:$0xff] %v18445_v57  ;;  %10151 = vmatprep.mubr.f32.mxu0 %v19841_v0  ;;  %v7575_v57 = vadd.f32 %v18180_v18, %v18436_v28  ;;  %v7682_v0 = vadd.f32 %v18331_v21, %v18341_v43  ;;  %v7115_v18 = vadd.f32 %v18096_v39, %v17326_v11 }
 0x32a   : > { %14594 = vmatmul.mubr.msk.f32.vlgmr.msra.gmra.mxu1 %vm7493_vm7, %v17979_v56  ;;  %v18454_v45 = vpop.f32.mrf.mxu0  ;;  %v18456_v49 = vpop.f32.mrf.mxu1  ;;  %v7771_v21 = vadd.f32 %v18319_v30, %v18341_v43 }
 0x32b   : > { %19871 = vst [vmem:[#allocation20_spill] sm:$0xff] %v18454_v45  ;;  %10638 = vmatpush1.msra.mxu1 %v10546_v54  ;;  %10246 = vmatprep.mubr.f32.mxu1 %v19872_v61  ;;  %v7573_v45 = vadd.f32 %v18172_v48, %v18436_v28  ;;  %v10355_v55 = vmax.f32 %v7575_v57, 0.0  ;;  %v10549_v42 = vmax.f32 %v7682_v0, 0.0 }
 0x32c   : > { %10639 = vmatprep.subr.mxu1 %v10483_v17  ;;  %14590 = vmatmul.mubr.msk.f32.vlgmr.msra.gmra.mxu0 %vm7493_vm7, %v17979_v56  ;;  %v18471_v33 = vpop.f32.mrf.mxu0  ;;  %v18473_v20 = vpop.f32.mrf.mxu1  ;;  %v10551_v30 = vmax.f32 %v7771_v21, 0.0 }
 0x32d   : > { %10294 = vmatpush1.msra.mxu0 %v7121_v16  ;;  %10640 = vmatpush1.msra.mxu1 %v10482_v25  ;;  %v10354_v17 = vmax.f32 %v7573_v45, 0.0 }
 0x32e   : > { %10295 = vmatprep.subr.mxu0 %v7117_v60  ;;  %10641 = vmatprep.subr.mxu1 %v10419_v12  ;;  %v18479_v48 = vpop.f32.mrf.mxu0  ;;  %v18481_v54 = vpop.f32.mrf.mxu1  ;;  %v7769_v60 = vadd.f32 %v18311_v35, %v18341_v43  ;;  %v7680_v35 = vadd.f32 %v18323_v52, %v18341_v43  ;;  %v7757_v52 = vadd.f32 %v18266_v3, %v18420_v26 }
 0x32f   : > { %14595 = vmatmul.mubr.msk.f32.gmra.mxu1 %vm7493_vm7, %v18014_v41  ;;  %10296 = vmatpush1.msra.mxu0 %v7115_v18  ;;  %v7765_v18 = vadd.f32 %v18296_v14, %v18410_v1  ;;  %v7676_v14 = vadd.f32 %v18315_v63, %v18410_v1  ;;  %v7753_v3 = vadd.f32 %v18259_v38, %v18436_v28 }
 0x330   : > { %10642 = vmatpush1.msra.mxu1 %v10418_v51  ;;  %10157 = vmatprep.mubr.f32.mxu0 %v19872_v61  ;;  %v18486_v11 = vpop.f32.mrf.mxu0  ;;  %v18488_v39 = vpop.f32.mrf.mxu1 }
 0x331   : > { %10643 = vmatprep.subr.mxu1 %v10355_v55  ;;  %10708 = vmatprep.subr.mxu0 %v10549_v42  ;;  %v7763_v55 = vadd.f32 %v18285_v10, %v18410_v1  ;;  %v7759_v42 = vadd.f32 %v18273_v53, %v18420_v26  ;;  %v13346_v10 = vrot.slane %v18510_v59, 1  ;;  %v7670_v53 = vadd.f32 %v18290_v34, %v18420_v26 }
 0x332   : > { %14591 = vmatmul.mubr.msk.f32.gmra.mxu0 %vm7493_vm7, %v18014_v41  ;;  %10644 = vmatpush1.msra.mxu1 %v10354_v17  ;;  %v18492_v0 = vpop.f32.mrf.mxu0  ;;  %v18494_v12 = vpop.f32.mrf.mxu1  ;;  %v10487_v63 = vmax.f32 %v7765_v18, 0.0  ;;  %v7751_v34 = vadd.f32 %v18249_v40, %v18436_v28  ;;  %v7668_v18 = vadd.f32 %v18281_v6, %v18420_v26  ;;  %v7949_v40 = vadd.f32 %v18395_v9, %v18341_v43 }
 0x333   : > { %19873 = vst [vmem:[#allocation21_spill] sm:$0xff] %v18494_v12  ;;  %10252 = vmatprep.mubr.f32.mxu1 %v19872_v61  ;;  %10779 = vmatprep.subr.mxu1 %v10551_v30  ;;  %v10423_v12 = vmax.f32 %v7759_v42, 0.0  ;;  %v7662_v6 = vadd.f32 %v18269_v22, %v18436_v28  ;;  %v10421_v42 = vmax.f32 %v7670_v53, 0.0  ;;  %v7860_v22 = vadd.f32 %v18406_v37, %v18341_v43 }
 0x334   : > { %14596 = vmatmul.mubr.msk.f32.gmra.mxu1 %vm7493_vm7, %v18030_v58  ;;  %10163 = vmatprep.mubr.f32.mxu0 %v19872_v61  ;;  %v18500_v16 = vpop.f32.mrf.mxu0  ;;  %v18502_v57 = vpop.f32.mrf.mxu1  ;;  %v10420_v9 = vmax.f32 %v7668_v18, 0.0  ;;  %v7937_v37 = vadd.f32 %v18353_v44, %v18420_v26 }
 0x335   : > { %19874 = vst [vmem:[#allocation22_spill] sm:$0xff] %v18500_v16  ;;  %10258 = vmatprep.mubr.f32.mxu1 %v19872_v61  ;;  %v7674_v16 = vadd.f32 %v18303_v36, %v18410_v1  ;;  %13347 = vrot.lane.b32.xlu1 %v13346_v10, %s14961_s17  ;;  %v10486_v36 = vmax.f32 %v7763_v55, 0.0  ;;  %v10422_v55 = vmax.f32 %v7757_v52, 0.0  ;;  %v7943_v52 = vadd.f32 %v18377_v32, %v18410_v1 }
 0x336   : > { %14592 = vmatmul.mubr.msk.f32.gmra.mxu0 %vm7493_vm7, %v18030_v58  ;;  %v18512_v45 = vpop.f32.mrf.mxu0  ;;  %v18514_v25 = vpop.f32.mrf.mxu1  ;;  %v10356_v32 = vmax.f32 %v7662_v6, 0.0 }
 0x337   : > { %19875 = vst [vmem:[#allocation23_spill] sm:$0xff] %v18512_v45  ;;  %10169 = vmatprep.mubr.f32.mxu0 %v19872_v61  ;;  %v10550_v45 = vmax.f32 %v7769_v60, 0.0  ;;  %v10548_v60 = vmax.f32 %v7680_v35, 0.0  ;;  %v10484_v35 = vmax.f32 %v7674_v16, 0.0  ;;  %v10358_v16 = vmax.f32 %v7751_v34, 0.0 }
 0x338   : > { %14597 = vmatmul.mubr.msk.f32.gmra.mxu1 %vm7493_vm7, %v18051_v29  ;;  %v18525_v21 = vpop.f32.mrf.mxu0  ;;  %v18527_v51 = vpop.f32.mrf.mxu1  ;;  %v7935_v34 = vadd.f32 %v18348_v8, %v18420_v26 }
 0x339   : > { %19876 = vst [vmem:[#allocation24_spill] sm:$0xff] %v18525_v21  ;;  %10677 = vmatprep.mubr.f32.mxu1 %v19872_v61 }
 0x33a   : > { %14593 = vmatmul.mubr.msk.f32.gmra.mxu0 %vm7493_vm7, %v18051_v29  ;;  %v18540_v17 = vpop.f32.mrf.mxu0  ;;  %v18542_v30 = vpop.f32.mrf.mxu1 }
 0x33b   : > { %19877 = vst [vmem:[#allocation25_spill] sm:$0xff] %v18540_v17  ;;  %10329 = vmatprep.mubr.f32.mxu0 %v19872_v61 }
 0x33c   : > { %14602 = vmatmul.mubr.msk.f32.vlgmr.msra.gmra.mxu1 %vm4468_vm4, %v18510_v59  ;;  %v18554_v21 = vpop.f32.mrf.mxu0  ;;  %v18556_v17 = vpop.f32.mrf.mxu1 }
 0x33d   : > { %19878 = vst [vmem:[#allocation26_spill] sm:$0xff] %v18554_v21  ;;  %10780 = vmatpush1.msra.mxu1 %v10550_v45  ;;  %10819 = vmatprep.mubr.f32.mxu1 %v19872_v61  ;;  %v10485_v21 = vmax.f32 %v7676_v14, 0.0  ;;  %v7664_v45 = vadd.f32 %v18276_v5, %v18436_v28  ;;  %v7947_v5 = vadd.f32 %v18387_v19, %v18341_v43 }
 0x33e   : > { %10781 = vmatprep.subr.mxu1 %v10487_v63  ;;  %14598 = vmatmul.mubr.msk.f32.vlgmr.msra.gmra.mxu0 %vm7493_vm7, %v17979_v56  ;;  %v18568_v10 = vpop.f32.mrf.mxu0  ;;  %v18570_v38 = vpop.f32.mrf.mxu1  ;;  %v10359_v63 = vmax.f32 %v7753_v3, 0.0  ;;  %v7941_v19 = vadd.f32 %v18364_v47, %v18410_v1  ;;  %v10555_v3 = vmax.f32 %v7949_v40, 0.0  ;;  %v7931_v47 = vadd.f32 %v18334_v50, %v18436_v28 }
 0x33f   : > { %10709 = vmatpush1.msra.mxu0 %v10548_v60  ;;  %10782 = vmatpush1.msra.mxu1 %v10486_v36  ;;  %v10357_v53 = vmax.f32 %v7664_v45, 0.0  ;;  %v10554_v18 = vmax.f32 %v7947_v5, 0.0  ;;  %v10553_v45 = vmax.f32 %v7860_v22, 0.0  ;;  %v10427_v40 = vmax.f32 %v7937_v37, 0.0 }
 0x340   : > { %10710 = vmatprep.subr.mxu0 %v10485_v21  ;;  %10783 = vmatprep.subr.mxu1 %v10423_v12  ;;  %v18578_v56 = vpop.f32.mrf.mxu0  ;;  %v18580_v14 = vpop.f32.mrf.mxu1  ;;  %v10490_v8 = vmax.f32 %v7941_v19, 0.0  ;;  %v8127_v50 = vadd.f32 %v18488_v39, %v18341_v43  ;;  %v10426_v5 = vmax.f32 %v7935_v34, 0.0  ;;  %v8121_v39 = vadd.f32 %v18473_v20, %v18410_v1 }
 0x341   : > { %10711 = vmatpush1.msra.mxu0 %v10484_v35  ;;  %10784 = vmatpush1.msra.mxu1 %v10422_v55  ;;  %v7929_v35 = vadd.f32 %v18326_v4, %v18436_v28  ;;  %v8125_v4 = vadd.f32 %v18481_v54, %v18341_v43  ;;  %v8115_v20 = vadd.f32 %v18447_v15, %v18420_v26 }
 0x342   : > { %10335 = vmatprep.mubr.f32.mxu0 %v19872_v61  ;;  %10712 = vmatprep.subr.mxu0 %v10421_v42  ;;  %v18589_v12 = vpop.f32.mrf.mxu0  ;;  %v18591_v21 = vpop.f32.mrf.mxu1  ;;  %v10559_v54 = vmax.f32 %v8127_v50, 0.0  ;;  %v7852_v15 = vadd.f32 %v18383_v27, %v18410_v1  ;;  %v10495_v34 = vmax.f32 %v8121_v39, 0.0  ;;  %v7846_v27 = vadd.f32 %v18359_v24, %v18420_v26  ;;  %v19879_v24 = vld [vmem:[#allocation16_spill] sm:$0xff] }
 0x343   : > { %10785 = vmatprep.subr.mxu1 %v10359_v63  ;;  %14599 = vmatmul.mubr.msk.f32.gmra.mxu0 %vm7493_vm7, %v18014_v41  ;;  %v10491_v41 = vmax.f32 %v7943_v52, 0.0  ;;  %v13576_v63 = vrot.slane %v18510_v59, 2  ;;  %v10362_v22 = vmax.f32 %v7929_v35, 0.0  ;;  %v10558_v37 = vmax.f32 %v8125_v4, 0.0 }
 0x344   : > { %10713 = vmatpush1.msra.mxu0 %v10420_v9  ;;  %10786 = vmatpush1.msra.mxu1 %v10358_v16  ;;  %v18599_v36 = vpop.f32.mrf.mxu0  ;;  %v18601_v60 = vpop.f32.mrf.mxu1  ;;  %v10363_v16 = vmax.f32 %v7931_v47, 0.0  ;;  %v7840_v50 = vadd.f32 %v19879_v24, %v18436_v28 }
 0x345   : > { %10714 = vmatprep.subr.mxu0 %v10357_v53  ;;  %10921 = vmatprep.subr.mxu1 %v10555_v3  ;;  %v8119_v53 = vadd.f32 %v18456_v49, %v18410_v1  ;;  %v7854_v49 = vadd.f32 %v18391_v62, %v18410_v1 }
 0x346   : > { %10715 = vmatpush1.msra.mxu0 %v10356_v32  ;;  %14604 = vmatmul.mubr.msk.f32.vlgmr.msra.gmra.mxu1 %vm4468_vm4, %v18510_v59  ;;  %v18609_v44 = vpop.f32.mrf.mxu0  ;;  %v18611_v55 = vpop.f32.mrf.mxu1  ;;  %v8113_v32 = vadd.f32 %v18433_v46, %v18420_v26  ;;  %v7848_v46 = vadd.f32 %v18370_v13, %v18420_v26 }
 0x347   : > { %10922 = vmatpush1.msra.mxu1 %v10554_v18  ;;  %10341 = vmatprep.mubr.f32.mxu0 %v19872_v61  ;;  %v10494_v47 = vmax.f32 %v8119_v53, 0.0  ;;  %v10424_v53 = vmax.f32 %v7846_v27, 0.0 }
 0x348   : > { %10850 = vmatprep.subr.mxu0 %v10553_v45  ;;  %10923 = vmatprep.subr.mxu1 %v10491_v41  ;;  %v18618_v6 = vpop.f32.mrf.mxu0  ;;  %v18620_v42 = vpop.f32.mrf.mxu1  ;;  %v10431_v41 = vmax.f32 %v8115_v20, 0.0  ;;  %v8305_v45 = vadd.f32 %v18580_v14, %v18341_v43  ;;  %v10488_v14 = vmax.f32 %v7852_v15, 0.0  ;;  %v8293_v15 = vadd.f32 %v18527_v51, %v18420_v26 }
 0x349   : > { %14600 = vmatmul.mubr.msk.f32.gmra.mxu0 %vm7493_vm7, %v18030_v58  ;;  %10924 = vmatpush1.msra.mxu1 %v10490_v8  ;;  %v7858_v58 = vadd.f32 %v18398_v31, %v18341_v43  ;;  %v8109_v31 = vadd.f32 %v18414_v23, %v18436_v28  ;;  %v10489_v8 = vmax.f32 %v7854_v49, 0.0 }
 0x34a   : > { %10925 = vmatprep.subr.mxu1 %v10427_v40  ;;  %10347 = vmatprep.mubr.f32.mxu0 %v19872_v61  ;;  %v18630_v9 = vpop.f32.mrf.mxu0  ;;  %v18632_v52 = vpop.f32.mrf.mxu1  ;;  %v10430_v40 = vmax.f32 %v8113_v32, 0.0  ;;  %v10563_v20 = vmax.f32 %v8305_v45, 0.0  ;;  %v8036_v32 = vadd.f32 %v18486_v11, %v18341_v43  ;;  %v8030_v11 = vadd.f32 %v18471_v33, %v18410_v1 }
 0x34b   : > { %10926 = vmatpush1.msra.mxu1 %v10426_v5  ;;  %10961 = vmatprep.mubr.f32.mxu1 %v19872_v61  ;;  %v10552_v23 = vmax.f32 %v7858_v58, 0.0  ;;  %v8303_v5 = vadd.f32 %v18570_v38, %v18341_v43  ;;  %v8299_v58 = vadd.f32 %v18556_v17, %v18410_v1  ;;  %v8032_v17 = vadd.f32 %v18479_v48, %v18410_v1  ;;  %v19880_v48 = vld [vmem:[#allocation20_spill] sm:$0xff] }
 0x34c   : > { %10927 = vmatprep.subr.mxu1 %v10363_v16  ;;  %v18641_v19 = vpop.f32.mrf.mxu0  ;;  %v18643_v3 = vpop.f32.mrf.mxu1  ;;  %13577 = vrot.lane.b32.xlu0 %v13576_v63, %s14961_s17  ;;  %v10367_v63 = vmax.f32 %v8109_v31, 0.0  ;;  %v8026_v51 = vadd.f32 %v19880_v48, %v18420_v26  ;;  %v10556_v45 = vmax.f32 %v8036_v32, 0.0  ;;  %v8216_v32 = vadd.f32 %v18589_v12, %v18341_v43  ;;  %v19885_v48 = vld [vmem:[#allocation26_spill] sm:$0xff] }
 0x34d   : > { %14601 = vmatmul.mubr.msk.f32.gmra.mxu0 %vm7493_vm7, %v18051_v29  ;;  %10928 = vmatpush1.msra.mxu1 %v10362_v22  ;;  %v8107_v29 = vadd.f32 %v18403_v2, %v18436_v28  ;;  %v7842_v2 = vadd.f32 %v18345_v7, %v18436_v28  ;;  %v10425_v7 = vmax.f32 %v7848_v46, 0.0  ;;  %v8038_v22 = vadd.f32 %v18492_v0, %v18341_v43 }
 0x34e   : > { %11063 = vmatprep.subr.mxu1 %v10559_v54  ;;  %14606 = vmatmul.mubr.msk.f32.vlgmr.msra.gmra.mxu1 %vm4468_vm4, %v18510_v59  ;;  %v18658_v62 = vpop.f32.mrf.mxu0  ;;  %v18660_v18 = vpop.f32.mrf.mxu1  ;;  %v8297_v0 = vadd.f32 %v18542_v30, %v18410_v1  ;;  %v10562_v31 = vmax.f32 %v8303_v5, 0.0  ;;  %v10499_v27 = vmax.f32 %v8299_v58, 0.0 }
 0x34f   : > { %11064 = vmatpush1.msra.mxu1 %v10558_v37  ;;  %10748 = vmatprep.mubr.f32.mxu0 %v19872_v61  ;;  %v10366_v39 = vmax.f32 %v8107_v29, 0.0  ;;  %v10361_v49 = vmax.f32 %v7842_v2, 0.0  ;;  %v10360_v37 = vmax.f32 %v7840_v50, 0.0  ;;  %v10557_v30 = vmax.f32 %v8038_v22, 0.0  ;;  %v19882_v2 = vld [vmem:[#allocation21_spill] sm:$0xff] }
 0x350   : > { %11065 = vmatprep.subr.mxu1 %v10495_v34  ;;  %11103 = vmatprep.mubr.f32.mxu1 %v19872_v61  ;;  %v18672_v35 = vpop.f32.mrf.mxu0  ;;  %v18674_v13 = vpop.f32.mrf.mxu1  ;;  %v8291_v29 = vadd.f32 %v18514_v25, %v18420_v26  ;;  %v10493_v50 = vmax.f32 %v8032_v17, 0.0  ;;  %v10492_v22 = vmax.f32 %v8030_v11, 0.0 }
 0x351   : > { %14603 = vmatmul.mubr.msk.f32.vlgmr.msra.gmra.mxu0 %vm4468_vm4, %v18510_v59  ;;  %11066 = vmatpush1.msra.mxu1 %v10494_v47  ;;  %v8287_v47 = vadd.f32 %v18502_v57, %v18436_v28  ;;  %v19883_v57 = vld [vmem:[#allocation18_spill] sm:$0xff]  ;;  %v8483_v58 = vadd.f32 %v18674_v13, %v18341_v43  ;;  %v8210_v13 = vadd.f32 %v18568_v10, %v18410_v1  ;;  %v10561_v10 = vmax.f32 %v8216_v32, 0.0 }
 0x352   : > { %10851 = vmatpush1.msra.mxu0 %v10552_v23  ;;  %11067 = vmatprep.subr.mxu1 %v10431_v41  ;;  %v18684_v4 = vpop.f32.mrf.mxu0  ;;  %v18686_v16 = vpop.f32.mrf.mxu1  ;;  %v19881_v41 = vld [vmem:[#allocation19_spill] sm:$0xff]  ;;  %v8020_v24 = vadd.f32 %v19883_v57, %v18436_v28  ;;  %v8475_v57 = vadd.f32 %v18632_v52, %v18410_v1 }
 0x353   : > { %10852 = vmatprep.subr.mxu0 %v10489_v8  ;;  %11068 = vmatpush1.msra.mxu1 %v10430_v40  ;;  %v8024_v25 = vadd.f32 %v19881_v41, %v18420_v26  ;;  %v8285_v8 = vadd.f32 %v19882_v2, %v18436_v28  ;;  %v10498_v40 = vmax.f32 %v8297_v0, 0.0 }
 0x354   : > { %10853 = vmatpush1.msra.mxu0 %v10488_v14  ;;  %11069 = vmatprep.subr.mxu1 %v10367_v63  ;;  %v18692_v38 = vpop.f32.mrf.mxu0  ;;  %v18694_v54 = vpop.f32.mrf.mxu1  ;;  %v10435_v14 = vmax.f32 %v8293_v15, 0.0  ;;  %v10365_v11 = vmax.f32 %v8020_v24, 0.0  ;;  %v19888_v24 = vld [vmem:[#allocation23_spill] sm:$0xff] }
 0x355   : > { %10854 = vmatprep.subr.mxu0 %v10425_v7  ;;  %11070 = vmatpush1.msra.mxu1 %v10366_v39  ;;  %v19884_v7 = vld [vmem:[#allocation17_spill] sm:$0xff]  ;;  %v10428_v17 = vmax.f32 %v8024_v25, 0.0  ;;  %v10370_v15 = vmax.f32 %v8285_v8, 0.0  ;;  %v8477_v25 = vadd.f32 %v18643_v3, %v18410_v1  ;;  %v19887_v8 = vld [vmem:[#allocation24_spill] sm:$0xff]  ;;  %v10497_v3 = vmax.f32 %v8210_v13, 0.0 }
 0x356   : > { %10855 = vmatpush1.msra.mxu0 %v10424_v53  ;;  %11205 = vmatprep.subr.mxu1 %v10563_v20  ;;  %v18704_v34 = vpop.f32.mrf.mxu0  ;;  %v18706_v46 = vpop.f32.mrf.mxu1  ;;  %v8018_v39 = vadd.f32 %v19884_v7, %v18436_v28  ;;  %v10434_v53 = vmax.f32 %v8291_v29, 0.0  ;;  %v10429_v20 = vmax.f32 %v8026_v51, 0.0  ;;  %v8208_v51 = vadd.f32 %v19885_v48, %v18410_v1 }
 0x357   : > { %10856 = vmatprep.subr.mxu0 %v10361_v49  ;;  %14608 = vmatmul.mubr.msk.f32.vlgmr.msra.gmra.mxu1 %vm4468_vm4, %v18510_v59  ;;  %v10371_v49 = vmax.f32 %v8287_v47, 0.0  ;;  %v8481_v47 = vadd.f32 %v18660_v18, %v18341_v43  ;;  %v10503_v32 = vmax.f32 %v8477_v25, 0.0  ;;  %v10502_v13 = vmax.f32 %v8475_v57, 0.0 }
 0x358   : > { %10857 = vmatpush1.msra.mxu0 %v10360_v37  ;;  %11206 = vmatpush1.msra.mxu1 %v10562_v31  ;;  %v18718_v23 = vpop.f32.mrf.mxu0  ;;  %v18720_v33 = vpop.f32.mrf.mxu1  ;;  %v8214_v31 = vadd.f32 %v18578_v56, %v18341_v43  ;;  %v10364_v29 = vmax.f32 %v8018_v39, 0.0  ;;  %v10567_v56 = vmax.f32 %v8483_v58, 0.0  ;;  %v8469_v58 = vadd.f32 %v18611_v55, %v18420_v26 }
 0x359   : > { %10890 = vmatprep.mubr.f32.mxu0 %v19872_v61  ;;  %10992 = vmatprep.subr.mxu0 %v10557_v30  ;;  %v8463_v55 = vadd.f32 %v18591_v21, %v18436_v28  ;;  %v8392_v48 = vadd.f32 %v18672_v35, %v18341_v43  ;;  %v8388_v21 = vadd.f32 %v18658_v62, %v18410_v1 }
 0x35a   : > { %11207 = vmatprep.subr.mxu1 %v10499_v27  ;;  %14605 = vmatmul.mubr.msk.f32.vlgmr.msra.gmra.mxu0 %vm4468_vm4, %v18510_v59  ;;  %v18731_v63 = vpop.f32.mrf.mxu0  ;;  %v18733_v5 = vpop.f32.mrf.mxu1  ;;  %v19886_v27 = vld [vmem:[#allocation25_spill] sm:$0xff]  ;;  %v10560_v18 = vmax.f32 %v8214_v31, 0.0 }
 0x35b   : > { %10993 = vmatpush1.msra.mxu0 %v10556_v45  ;;  %11208 = vmatpush1.msra.mxu1 %v10498_v40  ;;  %v8204_v41 = vadd.f32 %v19886_v27, %v18420_v26  ;;  %v8202_v40 = vadd.f32 %v19887_v8, %v18420_v26  ;;  %v10438_v27 = vmax.f32 %v8469_v58, 0.0  ;;  %v10374_v35 = vmax.f32 %v8463_v55, 0.0 }
 0x35c   : > { %10994 = vmatprep.subr.mxu0 %v10493_v50  ;;  %11209 = vmatprep.subr.mxu1 %v10435_v14  ;;  %v18741_v0 = vpop.f32.mrf.mxu0  ;;  %v18743_v37 = vpop.f32.mrf.mxu1  ;;  %v8198_v50 = vadd.f32 %v19888_v24, %v18436_v28  ;;  %v8471_v14 = vadd.f32 %v18620_v42, %v18420_v26  ;;  %v8394_v42 = vadd.f32 %v18684_v4, %v18341_v43  ;;  %v10501_v24 = vmax.f32 %v8388_v21, 0.0 }
 0x35d   : > { %10995 = vmatpush1.msra.mxu0 %v10492_v22  ;;  %11210 = vmatpush1.msra.mxu1 %v10434_v53  ;;  %v19889_v22 = vld [vmem:[#allocation22_spill] sm:$0xff]  ;;  %v10496_v53 = vmax.f32 %v8208_v51, 0.0  ;;  %v10432_v31 = vmax.f32 %v8202_v40, 0.0  ;;  %v8380_v40 = vadd.f32 %v18618_v6, %v18420_v26  ;;  %v8653_v58 = vadd.f32 %v18733_v5, %v18410_v1 }
 0x35e   : > { %10996 = vmatprep.subr.mxu0 %v10429_v20  ;;  %11211 = vmatprep.subr.mxu1 %v10371_v49  ;;  %v18749_v12 = vpop.f32.mrf.mxu0  ;;  %v18751_v30 = vpop.f32.mrf.mxu1  ;;  %v8196_v52 = vadd.f32 %v19889_v22, %v18436_v28  ;;  %v10566_v20 = vmax.f32 %v8481_v47, 0.0  ;;  %v10433_v49 = vmax.f32 %v8204_v41, 0.0  ;;  %v10439_v4 = vmax.f32 %v8471_v14, 0.0 }
 0x35f   : > { %10997 = vmatpush1.msra.mxu0 %v10428_v17  ;;  %11212 = vmatpush1.msra.mxu1 %v10370_v15  ;;  %v8386_v41 = vadd.f32 %v18641_v19, %v18410_v1  ;;  %v8659_v19 = vadd.f32 %v18751_v30, %v18341_v43  ;;  %v8374_v14 = vadd.f32 %v18599_v36, %v18436_v28 }
 0x360   : > { %10998 = vmatprep.subr.mxu0 %v10365_v11  ;;  %11032 = vmatprep.mubr.f32.mxu0 %v19872_v61  ;;  %v18762_v45 = vpop.f32.mrf.mxu0  ;;  %v8660_v2 = vpop.f32.mrf.mxu1  ;;  %v8465_v11 = vadd.f32 %v18601_v60, %v18436_v28  ;;  %v8655_v30 = vadd.f32 %v18743_v37, %v18410_v1 }
 0x361   : > { %10999 = vmatpush1.msra.mxu0 %v10364_v29  ;;  %11245 = vmatprep.mubr.f32.mxu1 %v19872_v61  ;;  %v10369_v29 = vmax.f32 %v8198_v50, 0.0  ;;  %v8661_v51 = vadd.f32 %v8660_v2, %v18341_v43  ;;  %v8382_v2 = vadd.f32 %v18630_v9, %v18420_v26  ;;  %v8376_v9 = vadd.f32 %v18609_v44, %v18436_v28 }
 0x362   : > { %11134 = vmatprep.subr.mxu0 %v10561_v10  ;;  %14607 = vmatmul.mubr.msk.f32.vlgmr.msra.gmra.mxu0 %vm4468_vm4, %v18510_v59  ;;  %v8571_v7 = vpop.f32.mrf.mxu0  ;;  %v18775_v39 = vpop.f32.mrf.mxu1  ;;  %v10565_v10 = vmax.f32 %v8394_v42, 0.0  ;;  %v10375_v25 = vmax.f32 %v8465_v11, 0.0  ;;  %v10500_v22 = vmax.f32 %v8386_v41, 0.0  ;;  %v8570_v36 = vadd.f32 %v18762_v45, %v18341_v43 }
 0x363   : > { %11135 = vmatpush1.msra.mxu0 %v10560_v18  ;;  %11347 = vmatprep.subr.mxu1 %v10567_v56  ;;  %v10368_v56 = vmax.f32 %v8196_v52, 0.0  ;;  %v10564_v18 = vmax.f32 %v8392_v48, 0.0  ;;  %v10571_v57 = vmax.f32 %v8661_v51, 0.0  ;;  %v8572_v50 = vadd.f32 %v8571_v7, %v18341_v43 }
 0x364   : > { %11136 = vmatprep.subr.mxu0 %v10497_v3  ;;  %14610 = vmatmul.mubr.msk.f32.vlgmr.msra.gmra.mxu1 %vm4468_vm4, %v18510_v59  ;;  %v18785_v17 = vpop.f32.mrf.mxu0  ;;  %v18787_v15 = vpop.f32.mrf.mxu1  ;;  %v10437_v44 = vmax.f32 %v8382_v2, 0.0  ;;  %v10373_v37 = vmax.f32 %v8376_v9, 0.0  ;;  %v10372_v55 = vmax.f32 %v8374_v14, 0.0  ;;  %v8647_v11 = vadd.f32 %v18706_v46, %v18420_v26 }
 0x365   : > { %11137 = vmatpush1.msra.mxu0 %v10496_v53  ;;  %11348 = vmatpush1.msra.mxu1 %v10566_v20  ;;  %v10436_v53 = vmax.f32 %v8380_v40, 0.0  ;;  %v10570_v20 = vmax.f32 %v8659_v19, 0.0  ;;  %v10569_v42 = vmax.f32 %v8572_v50, 0.0  ;;  %v8564_v45 = vadd.f32 %v18741_v0, %v18410_v1 }
 0x366   : > { %11138 = vmatprep.subr.mxu0 %v10433_v49  ;;  %11349 = vmatprep.subr.mxu1 %v10503_v32  ;;  %v18796_v47 = vpop.f32.mrf.mxu0  ;;  %v8649_v49 = vadd.f32 %v18720_v33, %v18420_v26  ;;  %v8566_v32 = vadd.f32 %v18749_v12, %v18410_v1  ;;  %v8641_v33 = vadd.f32 %v18686_v16, %v18436_v28  ;;  %v10506_v48 = vmax.f32 %v8653_v58, 0.0 }
 0x367   : > { %11139 = vmatpush1.msra.mxu0 %v10432_v31  ;;  %11350 = vmatpush1.msra.mxu1 %v10502_v13  ;;  %v18800_v60 = vpop.f32.mrf.mxu1  ;;  %v10507_v13 = vmax.f32 %v8655_v30, 0.0  ;;  %v8643_v12 = vadd.f32 %v18694_v54, %v18436_v28  ;;  %v8558_v0 = vadd.f32 %v18718_v23, %v18420_v26  ;;  %v10568_v51 = vmax.f32 %v8570_v36, 0.0 }
 0x368   : > { %11140 = vmatprep.subr.mxu0 %v10369_v29  ;;  %11351 = vmatprep.subr.mxu1 %v10439_v4  ;;  %v8560_v29 = vadd.f32 %v18731_v63, %v18420_v26  ;;  %v8554_v54 = vadd.f32 %v18704_v34, %v18436_v28  ;;  %v8552_v23 = vadd.f32 %v18692_v38, %v18436_v28  ;;  %v10442_v41 = vmax.f32 %v8647_v11, 0.0 }
 0x369   : > { %11141 = vmatpush1.msra.mxu0 %v10368_v56  ;;  %11352 = vmatpush1.msra.mxu1 %v10438_v27  ;;  %v18806_v8 = vpop.f32.mrf.mxu0  ;;  %v18808_v62 = vpop.f32.mrf.mxu1  ;;  %v10443_v56 = vmax.f32 %v8649_v49, 0.0  ;;  %v10505_v27 = vmax.f32 %v8566_v32, 0.0  ;;  %v10440_v19 = vmax.f32 %v8558_v0, 0.0 }
 0x36a   : > { %11174 = vmatprep.mubr.f32.mxu0 %v19872_v61  ;;  %11276 = vmatprep.subr.mxu0 %v10565_v10  ;;  %v10504_v10 = vmax.f32 %v8564_v45, 0.0  ;;  %v10441_v34 = vmax.f32 %v8560_v29, 0.0  ;;  %v10377_v9 = vmax.f32 %v8554_v54, 0.0  ;;  %v10376_v14 = vmax.f32 %v8552_v23, 0.0 }
 0x36b   : > { %11353 = vmatprep.subr.mxu1 %v10375_v25  ;;  %14609 = vmatmul.mubr.msk.f32.vlgmr.msra.gmra.mxu0 %vm4468_vm4, %v18510_v59  ;;  %v18820_v3 = vpop.f32.mrf.mxu0  ;;  %v18822_v6 = vpop.f32.mrf.mxu1  ;;  %v10379_v25 = vmax.f32 %v8643_v12, 0.0  ;;  %v8827_v58 = vadd.f32 %v18808_v62, %v18420_v26  ;;  %v8821_v62 = vadd.f32 %v18787_v15, %v18436_v28 }
 0x36c   : > { %11277 = vmatpush1.msra.mxu0 %v10564_v18  ;;  %11354 = vmatpush1.msra.mxu1 %v10374_v35  ;;  %v10378_v18 = vmax.f32 %v8641_v33, 0.0  ;;  %v8738_v32 = vadd.f32 %v18820_v3, %v18420_v26  ;;  %v8732_v3 = vadd.f32 %v18796_v47, %v18436_v28 }
 0x36d   : > { %11278 = vmatprep.subr.mxu0 %v10501_v24  ;;  %11387 = vmatprep.mubr.f32.mxu1 %v19872_v61  ;;  %v18829_v52 = vpop.f32.mrf.mxu0  ;;  %v8832_v7 = vpop.f32.mrf.mxu1  ;;  %v10447_v11 = vmax.f32 %v8827_v58, 0.0  ;;  %v10383_v29 = vmax.f32 %v8821_v62, 0.0 }
 0x36e   : > { %11279 = vmatpush1.msra.mxu0 %v10500_v22  ;;  %11489 = vmatprep.subr.mxu1 %v10571_v57  ;;  %v8833_v24 = vadd.f32 %v8832_v7, %v18410_v1  ;;  %v8831_v22 = vadd.f32 %v18822_v6, %v18410_v1  ;;  %v8825_v7 = vadd.f32 %v18800_v60, %v18420_v26 }
 0x36f   : > { %11280 = vmatprep.subr.mxu0 %v10437_v44  ;;  %14612 = vmatmul.mubr.msk.f32.vlgmr.msra.gmra.mxu1 %vm4468_vm4, %v18510_v59  ;;  %v8743_v31 = vpop.f32.mrf.mxu0  ;;  %v8836_v5 = vpop.f32.mrf.mxu1  ;;  %v8742_v6 = vadd.f32 %v18829_v52, %v18410_v1  ;;  %v8819_v60 = vadd.f32 %v18775_v39, %v18436_v28  ;;  %v8736_v52 = vadd.f32 %v18806_v8, %v18420_v26 }
 0x370   : > { %11281 = vmatpush1.msra.mxu0 %v10436_v53  ;;  %11490 = vmatpush1.msra.mxu1 %v10570_v20  ;;  %v8837_v38 = vadd.f32 %v8836_v5, %v18341_v43  ;;  %v8744_v20 = vadd.f32 %v8743_v31, %v18410_v1  ;;  %v10510_v31 = vmax.f32 %v8831_v22, 0.0  ;;  %v8730_v39 = vadd.f32 %v18785_v17, %v18436_v28 }
 0x371   : > { %11282 = vmatprep.subr.mxu0 %v10373_v37  ;;  %11316 = vmatprep.mubr.f32.mxu0 %v19872_v61  ;;  %v8747_v4 = vpop.f32.mrf.mxu0  ;;  %v8838_v46 = vpop.f32.mrf.mxu1  ;;  %v10508_v8 = vmax.f32 %v8742_v6, 0.0  ;;  %v10382_v47 = vmax.f32 %v8819_v60, 0.0 }
 0x372   : > { %11283 = vmatpush1.msra.mxu0 %v10372_v55  ;;  %11491 = vmatprep.subr.mxu1 %v10507_v13  ;;  %v8839_v16 = vadd.f32 %v8838_v46, %v18341_v43  ;;  %v8748_v30 = vadd.f32 %v8747_v4, %v18341_v43  ;;  %v10574_v36 = vmax.f32 %v8837_v38, 0.0  ;;  %v10509_v45 = vmax.f32 %v8744_v20, 0.0 }
 0x373   : > { %11418 = vmatprep.subr.mxu0 %v10569_v42  ;;  %14611 = vmatmul.mubr.msk.f32.vlgmr.msra.gmra.mxu0 %vm4468_vm4, %v18510_v59  ;;  %v8749_v63 = vpop.f32.mrf.mxu0  ;;  %v18859_v21 = vpop.f32.mrf.mxu1  ;;  %v10511_v42 = vmax.f32 %v8833_v24, 0.0  ;;  %v10446_v13 = vmax.f32 %v8825_v7, 0.0  ;;  %v10445_v4 = vmax.f32 %v8738_v32, 0.0  ;;  %v10444_v46 = vmax.f32 %v8736_v52, 0.0 }
 0x374   : > { %11419 = vmatpush1.msra.mxu0 %v10568_v51  ;;  %11492 = vmatpush1.msra.mxu1 %v10506_v48  ;;  %v8750_v35 = vadd.f32 %v8749_v63, %v18341_v43  ;;  %v10575_v57 = vmax.f32 %v8839_v16, 0.0  ;;  %v10572_v5 = vmax.f32 %v8748_v30, 0.0  ;;  %v10381_v51 = vmax.f32 %v8732_v3, 0.0 }
 0x375   : > { %11420 = vmatprep.subr.mxu0 %v10505_v27  ;;  %11493 = vmatprep.subr.mxu1 %v10443_v56  ;;  %v18864_v2 = vpop.f32.mrf.mxu0  ;;  %v18866_v40 = vpop.f32.mrf.mxu1  ;;  %v10380_v17 = vmax.f32 %v8730_v39, 0.0  ;;  %v18945_v39 = vld [vmem:[%s19828_s2 + $0x78] sm:$0x7] }
 0x376   : > { %11421 = vmatpush1.msra.mxu0 %v10504_v10  ;;  %11494 = vmatpush1.msra.mxu1 %v10442_v41  ;;  %v10573_v44 = vmax.f32 %v8750_v35, 0.0  ;;  %v8999_v22 = vadd.f32 %v18866_v40, %v18436_v28  ;;  %v8908_v32 = vadd.f32 %v18864_v2, %v18436_v28 }
 0x377   : > { %11422 = vmatprep.subr.mxu0 %v10441_v34  ;;  %11495 = vmatprep.subr.mxu1 %v10379_v25  ;;  %v18870_v50 = vpop.f32.mrf.mxu0 }
 0x378   : > { %11423 = vmatpush1.msra.mxu0 %v10440_v19  ;;  %11496 = vmatpush1.msra.mxu1 %v10378_v18  ;;  %v18875_v53 = vpop.f32.mrf.mxu1  ;;  %v10384_v2 = vmax.f32 %v8908_v32, 0.0 }
 0x379   : > { %11424 = vmatprep.subr.mxu0 %v10377_v9  ;;  %11529 = vmatprep.mubr.f32.mxu1 %v19872_v61  ;;  %v9003_v38 = vadd.f32 %v18875_v53, %v18420_v26  ;;  %v8997_v53 = vadd.f32 %v18859_v21, %v18436_v28 }
 0x37a   : > { %11425 = vmatpush1.msra.mxu0 %v10376_v14  ;;  %11631 = vmatprep.subr.mxu1 %v10575_v57  ;;  %v18885_v37 = vpop.f32.mrf.mxu0  ;;  %v9004_v49 = vpop.f32.mrf.mxu1 }
 0x37b   : > { %14614 = vmatmul.mubr.msk.f32.vlgmr.msra.gmra.mxu1 %vm4468_vm4, %v18510_v59  ;;  %11458 = vmatprep.mubr.f32.mxu0 %v19872_v61  ;;  %v9005_v25 = vadd.f32 %v9004_v49, %v18420_v26  ;;  %v8914_v20 = vadd.f32 %v18885_v37, %v18420_v26  ;;  %v10450_v21 = vmax.f32 %v9003_v38, 0.0  ;;  %v10387_v37 = vmax.f32 %v8999_v22, 0.0 }
 0x37c   : > { %11632 = vmatpush1.msra.mxu1 %v10574_v36  ;;  %11560 = vmatprep.subr.mxu0 %v10573_v44  ;;  %v8915_v15 = vpop.f32.mrf.mxu0  ;;  %v9008_v55 = vpop.f32.mrf.mxu1 }
 0x37d   : > { %11633 = vmatprep.subr.mxu1 %v10511_v42  ;;  %14613 = vmatmul.mubr.msk.f32.vlgmr.msra.gmra.mxu0 %vm4468_vm4, %v18510_v59  ;;  %v9009_v23 = vadd.f32 %v9008_v55, %v18410_v1  ;;  %v8916_v30 = vadd.f32 %v8915_v15, %v18420_v26  ;;  %v10451_v40 = vmax.f32 %v9005_v25, 0.0 }
 0x37e   : > { %11561 = vmatpush1.msra.mxu0 %v10572_v5  ;;  %11634 = vmatpush1.msra.mxu1 %v10510_v31  ;;  %v8919_v33 = vpop.f32.mrf.mxu0  ;;  %v9010_v12 = vpop.f32.mrf.mxu1  ;;  %v10386_v5 = vmax.f32 %v8997_v53, 0.0 }
 0x37f   : > { %11562 = vmatprep.subr.mxu0 %v10509_v45  ;;  %11635 = vmatprep.subr.mxu1 %v10447_v11  ;;  %v9011_v27 = vadd.f32 %v9010_v12, %v18410_v1  ;;  %v8920_v57 = vadd.f32 %v8919_v33, %v18410_v1  ;;  %v10514_v7 = vmax.f32 %v9009_v23, 0.0  ;;  %v10449_v60 = vmax.f32 %v8916_v30, 0.0 }
 0x380   : > { %11563 = vmatpush1.msra.mxu0 %v10508_v8  ;;  %11636 = vmatpush1.msra.mxu1 %v10446_v13  ;;  %v8921_v0 = vpop.f32.mrf.mxu0  ;;  %v9014_v48 = vpop.f32.mrf.mxu1 }
 0x381   : > { %11564 = vmatprep.subr.mxu0 %v10445_v4  ;;  %11637 = vmatprep.subr.mxu1 %v10383_v29  ;;  %v9015_v16 = vadd.f32 %v9014_v48, %v18341_v43  ;;  %v8922_v34 = vadd.f32 %v8921_v0, %v18410_v1  ;;  %v10515_v44 = vmax.f32 %v9011_v27, 0.0  ;;  %v10512_v42 = vmax.f32 %v8920_v57, 0.0 }
 0x382   : > { %11565 = vmatpush1.msra.mxu0 %v10444_v46  ;;  %11638 = vmatpush1.msra.mxu1 %v10382_v47  ;;  %v8925_v54 = vpop.f32.mrf.mxu0  ;;  %v9016_v56 = vpop.f32.mrf.mxu1 }
 0x383   : > { %11566 = vmatprep.subr.mxu0 %v10381_v51  ;;  %v9017_v63 = vadd.f32 %v9016_v56, %v18341_v43  ;;  %11671 = vmatprep.mubr.f32.mxu1 %v19872_v61  ;;  %v8926_v41 = vadd.f32 %v8925_v54, %v18341_v43  ;;  %v10578_v9 = vmax.f32 %v9015_v16, 0.0  ;;  %v10513_v49 = vmax.f32 %v8922_v34, 0.0 }
 0x384   : > { %11567 = vmatpush1.msra.mxu0 %v10380_v17  ;;  %v8927_v10 = vpop.f32.mrf.mxu0  ;;  %v18910_v35 = vpop.f32.mrf.mxu1  ;;  %14616 = vmatmul.mubr.msk.f32.vlgmr.msra.gmra.mxu1 %vm4468_vm4, %v18510_v59 }
 0x385   : > { %v10579_v18 = vmax.f32 %v9017_v63, 0.0  ;;  %v8928_v19 = vadd.f32 %v8927_v10, %v18341_v43  ;;  %11600 = vmatprep.mubr.f32.mxu0 %v19872_v61  ;;  %11813 = vmatprep.mubr.f32.mxu1 %v19872_v61  ;;  %v10576_v6 = vmax.f32 %v8926_v41, 0.0  ;;  %v9175_v38 = vadd.f32 %v18910_v35, %v18436_v28 }
 0x386   : > { %v18922_v24 = vpop.f32.mrf.mxu0  ;;  %v18924_v14 = vpop.f32.mrf.mxu1  ;;  %14615 = vmatmul.mubr.msk.f32.vlgmr.msra.gmra.mxu0 %vm4468_vm4, %v18510_v59  ;;  %v8910_v59 = vadd.f32 %v18870_v50, %v18436_v28  ;;  %v10448_v50 = vmax.f32 %v8914_v20, 0.0 }
 0x387   : > { %v10577_v58 = vmax.f32 %v8928_v19, 0.0  ;;  %11773 = vmatprep.subr.mxu1 %v10579_v18  ;;  %11742 = vmatprep.mubr.f32.mxu0 %v19872_v61  ;;  %v9177_v25 = vadd.f32 %v18924_v14, %v18436_v28  ;;  %v9086_v20 = vadd.f32 %v18922_v24, %v18436_v28 }
 0x388   : > { %v18936_v36 = vpop.f32.mrf.mxu0  ;;  %11774 = vmatpush1.msra.mxu1 %v10578_v9  ;;  %v10385_v15 = vmax.f32 %v8910_v59, 0.0 }
 0x389   : > { %v9180_v62 = vpop.f32.mrf.mxu1  ;;  %11702 = vmatprep.subr.mxu0 %v10577_v58  ;;  %11775 = vmatprep.subr.mxu1 %v10515_v44  ;;  %v9088_v44 = vadd.f32 %v18936_v36, %v18436_v28  ;;  %v10388_v24 = vmax.f32 %v9086_v20, 0.0  ;;  %v19890_v20 = vld [vmem:[#allocation6_spill] sm:$0xff] }
 0x38a   : > { %11703 = vmatpush1.msra.mxu0 %v10576_v6  ;;  %11776 = vmatpush1.msra.mxu1 %v10514_v7  ;;  %v9181_v27 = vadd.f32 %v9180_v62, %v18420_v26  ;;  %v10391_v6 = vmax.f32 %v9177_v25, 0.0  ;;  %v10390_v62 = vmax.f32 %v9175_v38, 0.0 }
 0x38b   : > { %v9091_v52 = vpop.f32.mrf.mxu0  ;;  %v9182_v31 = vpop.f32.mrf.mxu1  ;;  %11704 = vmatprep.subr.mxu0 %v10513_v49  ;;  %11777 = vmatprep.subr.mxu1 %v10451_v40  ;;  %v10389_v32 = vmax.f32 %v9088_v44, 0.0 }
 0x38c   : > { %11705 = vmatpush1.msra.mxu0 %v10512_v42  ;;  %11778 = vmatpush1.msra.mxu1 %v10450_v21  ;;  %v9183_v17 = vadd.f32 %v9182_v31, %v18420_v26  ;;  %v9092_v57 = vadd.f32 %v9091_v52, %v18420_v26  ;;  %v10454_v7 = vmax.f32 %v9181_v27, 0.0 }
 0x38d   : > { %v9093_v55 = vpop.f32.mrf.mxu0  ;;  %v9186_v3 = vpop.f32.mrf.mxu1  ;;  %11706 = vmatprep.subr.mxu0 %v10449_v60  ;;  %11779 = vmatprep.subr.mxu1 %v10387_v37 }
 0x38e   : > { %11707 = vmatpush1.msra.mxu0 %v10448_v50  ;;  %11780 = vmatpush1.msra.mxu1 %v10386_v5  ;;  %v9187_v46 = vadd.f32 %v9186_v3, %v18410_v1  ;;  %v9094_v34 = vadd.f32 %v9093_v55, %v18420_v26  ;;  %v10455_v58 = vmax.f32 %v9183_v17, 0.0  ;;  %v10452_v36 = vmax.f32 %v9092_v57, 0.0 }
 0x38f   : > { %v9097_v11 = vpop.f32.mrf.mxu0  ;;  %v9188_v45 = vpop.f32.mrf.mxu1  ;;  %11708 = vmatprep.subr.mxu0 %v10385_v15  ;;  %14618 = vmatmul.mubr.msk.f32.vlgmr.msra.gmra.mxu1 %vm4468_vm4, %v18945_v39 }
 0x390   : > { %11709 = vmatpush1.msra.mxu0 %v10384_v2  ;;  %11955 = vmatprep.mubr.f32.mxu1 %v19872_v61  ;;  %v9189_v4 = vadd.f32 %v9188_v45, %v18410_v1  ;;  %v9098_v63 = vadd.f32 %v9097_v11, %v18410_v1  ;;  %v10518_v9 = vmax.f32 %v9187_v46, 0.0  ;;  %v10453_v59 = vmax.f32 %v9094_v34, 0.0 }
 0x391   : > { %v9099_v13 = vpop.f32.mrf.mxu0  ;;  %v9192_v8 = vpop.f32.mrf.mxu1  ;;  %14617 = vmatmul.mubr.msk.f32.vlgmr.msra.gmra.mxu0 %vm4468_vm4, %v18945_v39 }
 0x392   : > { %11884 = vmatprep.mubr.f32.mxu0 %v19872_v61  ;;  %v9193_v33 = vadd.f32 %v9192_v8, %v18341_v43  ;;  %v9100_v16 = vadd.f32 %v9099_v13, %v18410_v1  ;;  %v10519_v18 = vmax.f32 %v9189_v4, 0.0  ;;  %v10516_v35 = vmax.f32 %v9098_v63, 0.0 }
 0x393   : > { %v9103_v12 = vpop.f32.mrf.mxu0  ;;  %v9194_v29 = vpop.f32.mrf.mxu1 }
 0x394   : > { %v9195_v47 = vadd.f32 %v9194_v29, %v18341_v43  ;;  %v9104_v0 = vadd.f32 %v9103_v12, %v18341_v43  ;;  %v10582_v23 = vmax.f32 %v9193_v33, 0.0  ;;  %v10517_v14 = vmax.f32 %v9100_v16, 0.0 }
 0x395   : > { %v9105_v48 = vpop.f32.mrf.mxu0  ;;  %v18958_v51 = vpop.f32.mrf.mxu1 }
 0x396   : > { %v10583_v54 = vmax.f32 %v9195_v47, 0.0  ;;  %v9106_v56 = vadd.f32 %v9105_v48, %v18341_v43  ;;  %v10580_v22 = vmax.f32 %v9104_v0, 0.0  ;;  %v13110_v27 = vpop.permute.xlu1 %13109  ;;  %v9353_v63 = vadd.f32 %v18958_v51, %v18436_v28 }
 0x397   : > { %v18965_v41 = vpop.f32.mrf.mxu0  ;;  %v18967_v10 = vpop.f32.mrf.mxu1  ;;  %14735 = vpush %v13110_v27 }
 0x398   : > { %v10581_v19 = vmax.f32 %v9106_v56, 0.0  ;;  %11915 = vmatprep.subr.mxu1 %v10583_v54  ;;  %v9355_v17 = vadd.f32 %v18967_v10, %v18436_v28 }
 0x399   : > { %v18975_v30 = vpop.f32.mrf.mxu0  ;;  %11916 = vmatpush1.msra.mxu1 %v10582_v23 }
 0x39a   : > { %v9358_v53 = vpop.f32.mrf.mxu1  ;;  %11844 = vmatprep.subr.mxu0 %v10581_v19  ;;  %11917 = vmatprep.subr.mxu1 %v10519_v18  ;;  %v9266_v10 = vadd.f32 %v18975_v30, %v18436_v28  ;;  %v10395_v44 = vmax.f32 %v9355_v17, 0.0  ;;  %v19891_v30 = vld [vmem:[#allocation5_spill] sm:$0xff] }
 0x39b   : > { %11845 = vmatpush1.msra.mxu0 %v10580_v22  ;;  %11918 = vmatpush1.msra.mxu1 %v10518_v9  ;;  %v9359_v4 = vadd.f32 %v9358_v53, %v18420_v26  ;;  %v9264_v9 = vadd.f32 %v18965_v41, %v18436_v28 }
 0x39c   : > { %v9269_v40 = vpop.f32.mrf.mxu0  ;;  %v9360_v49 = vpop.f32.mrf.mxu1  ;;  %11846 = vmatprep.subr.mxu0 %v10517_v14  ;;  %11919 = vmatprep.subr.mxu1 %v10455_v58 }
 0x39d   : > { %11847 = vmatpush1.msra.mxu0 %v10516_v35  ;;  %11920 = vmatpush1.msra.mxu1 %v10454_v7  ;;  %v9361_v8 = vadd.f32 %v9360_v49, %v18420_v26  ;;  %v9270_v23 = vadd.f32 %v9269_v40, %v18420_v26  ;;  %v10458_v51 = vmax.f32 %v9359_v4, 0.0  ;;  %v4805_v7 = vadd.f32 %v19891_v30, %v19890_v20  ;;  %v19895_v4 = vld [vmem:[#allocation3_spill] sm:$0xff] }
 0x39e   : > { %v9271_v21 = vpop.f32.mrf.mxu0  ;;  %v9364_v42 = vpop.f32.mrf.mxu1  ;;  %11848 = vmatprep.subr.mxu0 %v10453_v59  ;;  %11921 = vmatprep.subr.mxu1 %v10391_v6  ;;  %v10394_v35 = vmax.f32 %v9353_v63, 0.0  ;;  %v10393_v40 = vmax.f32 %v9266_v10, 0.0 }
 0x39f   : > { %11849 = vmatpush1.msra.mxu0 %v10452_v36  ;;  %11922 = vmatpush1.msra.mxu1 %v10390_v62  ;;  %v9365_v2 = vadd.f32 %v9364_v42, %v18410_v1  ;;  %v9272_v16 = vadd.f32 %v9271_v21, %v18420_v26  ;;  %v10459_v19 = vmax.f32 %v9361_v8, 0.0  ;;  %v10456_v6 = vmax.f32 %v9270_v23, 0.0  ;;  %v19892_v42 = vld [vmem:[#allocation7_spill] sm:$0xff] }
 0x3a0   : > { %v9275_v37 = vpop.f32.mrf.mxu0  ;;  %v9366_v60 = vpop.f32.mrf.mxu1  ;;  %11850 = vmatprep.subr.mxu0 %v10389_v32  ;;  %14620 = vmatmul.mubr.msk.f32.vlgmr.msra.gmra.mxu1 %vm4468_vm4, %v18945_v39  ;;  %v10392_v62 = vmax.f32 %v9264_v9, 0.0  ;;  %v7150_v21 = vrot.slane %v4805_v7, 1 }
 0x3a1   : > { %11851 = vmatpush1.msra.mxu0 %v10388_v24  ;;  %12097 = vmatprep.mubr.f32.mxu1 %v19872_v61  ;;  %v9367_v55 = vadd.f32 %v9366_v60, %v18410_v1  ;;  %v9276_v47 = vadd.f32 %v9275_v37, %v18410_v1  ;;  %v10522_v25 = vmax.f32 %v9365_v2, 0.0  ;;  %v10457_v58 = vmax.f32 %v9272_v16, 0.0 }
 0x3a2   : > { %v9277_v52 = vpop.f32.mrf.mxu0  ;;  %v9370_v31 = vpop.f32.mrf.mxu1  ;;  %14619 = vmatmul.mubr.msk.f32.vlgmr.msra.gmra.mxu0 %vm4468_vm4, %v18945_v39  ;;  %v19021_v24 = vadd.f32 %v19892_v42, %v19890_v20  ;;  %v19897_v20 = vld [vmem:[#allocation15_spill] sm:$0xff] }
 0x3a3   : > { %12026 = vmatprep.mubr.f32.mxu0 %v19872_v61  ;;  %v9371_v5 = vadd.f32 %v9370_v31, %v18341_v43  ;;  %v9278_v33 = vadd.f32 %v9277_v52, %v18410_v1  ;;  %v10523_v54 = vmax.f32 %v9367_v55, 0.0  ;;  %v10520_v22 = vmax.f32 %v9276_v47, 0.0 }
 0x3a4   : > { %v9281_v50 = vpop.f32.mrf.mxu0  ;;  %v9372_v15 = vpop.f32.mrf.mxu1  ;;  %v7171_v55 = vrot.slane %v19021_v24, 1  ;;  %v19039_v47 = vadd.s32 56, %v19895_v4  ;;  %v7375_v30 = vmul.f32 1.442695, %v19897_v20 }
 0x3a5   : > { %v9373_v3 = vadd.f32 %v9372_v15, %v18341_v43  ;;  %v9282_v11 = vadd.f32 %v9281_v50, %v18341_v43  ;;  %v10586_v46 = vmax.f32 %v9371_v5, 0.0  ;;  %v10521_v38 = vmax.f32 %v9278_v33, 0.0  ;;  %v19893_v50 = vld [vmem:[#allocation8_spill] sm:$0xff] }
 0x3a6   : > { %v9283_v45 = vpop.f32.mrf.mxu0  ;;  %v18992_v13 = vpop.f32.mrf.mxu1  ;;  %v7185_v15 = vsel %vm7184_vm11, %v19893_v50, %v7150_v21  ;;  %v19899_v21 = vld [vmem:[#allocation9_spill] sm:$0xff]  ;;  %vm13654_vm12 = vcmp.lt.s32.totalorder %v19039_v47, 63 }
 0x3a7   : > { %v10587_v12 = vmax.f32 %v9373_v3, 0.0  ;;  %v9284_v29 = vadd.f32 %v9283_v45, %v18341_v43  ;;  %v10584_v34 = vmax.f32 %v9282_v11, 0.0  ;;  %v13348_v59 = vpop.permute.xlu1 %13347  ;;  %v19894_v11 = vld [vmem:[#allocation10_spill] sm:$0xff]  ;;  %v7192_v42 = vsel %vm7184_vm11, %v19899_v21, %v7171_v55 }
 0x3a8   : > { %v18999_v0 = vpop.f32.mrf.mxu0  ;;  %v19001_v48 = vpop.f32.mrf.mxu1  ;;  %14737 = vpush %v13348_v59  ;;  %v7365_v45 = vmul.f32 1.442695, %v19894_v11  ;;  %v19898_v59 = vld [vmem:[#allocation14_spill] sm:$0xff]  ;;  %v7363_v50 = vmul.f32 1.442695, %v7192_v42  ;;  %v14962_v11 = vmov 0.015625  }
 0x3a9   : > { %v10585_v56 = vmax.f32 %v9284_v29, 0.0  ;;  %12057 = vmatprep.subr.mxu1 %v10587_v12 }
 0x3aa   : > { %v19009_v18 = vpop.f32.mrf.mxu0  ;;  %12058 = vmatpush1.msra.mxu1 %v10586_v46  ;;  %14765 = vpow2.f32 %v7365_v45  ;;  %v13662_v45 = vsel %vm13654_vm12, 0.015873017, %v14962_v11 }
 0x3ab   : > { %v9536_v57 = vpop.f32.mrf.mxu1  ;;  %11986 = vmatprep.subr.mxu0 %v10585_v56  ;;  %12059 = vmatprep.subr.mxu1 %v10523_v54  ;;  %v19896_v56 = vld [vmem:[#allocation13_spill] sm:$0xff] }
 0x3ac   : > { %11987 = vmatpush1.msra.mxu0 %v10584_v34  ;;  %12060 = vmatpush1.msra.mxu1 %v10522_v25  ;;  %v7371_v27 = vmul.f32 1.442695, %v19896_v56  ;;  %v9537_v63 = vadd.f32 %v9536_v57, %v18420_v26 }
 0x3ad   : > { %v9447_v14 = vpop.f32.mrf.mxu0  ;;  %v9538_v53 = vpop.f32.mrf.mxu1  ;;  %11988 = vmatprep.subr.mxu0 %v10521_v38  ;;  %12061 = vmatprep.subr.mxu1 %v10459_v19  ;;  %v9533_v19 = vadd.f32 %v19001_v48, %v18436_v28  ;;  %v9444_v48 = vadd.f32 %v19009_v18, %v18436_v28 }
 0x3ae   : > { %11989 = vmatpush1.msra.mxu0 %v10520_v22  ;;  %12062 = vmatpush1.msra.mxu1 %v10458_v51  ;;  %v9539_v46 = vadd.f32 %v9538_v53, %v18420_v26  ;;  %v9531_v22 = vadd.f32 %v18992_v13, %v18436_v28  ;;  %v9448_v57 = vadd.f32 %v9447_v14, %v18420_v26  ;;  %v7373_v13 = vmul.f32 1.442695, %v19898_v59 }
 0x3af   : > { %v9449_v41 = vpop.f32.mrf.mxu0  ;;  %v9542_v49 = vpop.f32.mrf.mxu1  ;;  %11990 = vmatprep.subr.mxu0 %v10457_v58  ;;  %12063 = vmatprep.subr.mxu1 %v10395_v44  ;;  %v9442_v14 = vadd.f32 %v18999_v0, %v18436_v28  ;;  %14767 = vpow2.f32 %v7371_v27 }
 0x3b0   : > { %11991 = vmatpush1.msra.mxu0 %v10456_v6  ;;  %12064 = vmatpush1.msra.mxu1 %v10394_v35  ;;  %v9543_v8 = vadd.f32 %v9542_v49, %v18410_v1  ;;  %v9450_v38 = vadd.f32 %v9449_v41, %v18420_v26  ;;  %v10463_v7 = vmax.f32 %v9539_v46, 0.0  ;;  %v7361_v49 = vmul.f32 1.442695, %v7185_v15 }
 0x3b1   : > { %v9453_v36 = vpop.f32.mrf.mxu0  ;;  %v9544_v32 = vpop.f32.mrf.mxu1  ;;  %11992 = vmatprep.subr.mxu0 %v10393_v40  ;;  %14622 = vmatmul.mubr.msk.f32.vlgmr.msra.gmra.mxu1 %vm4468_vm4, %v18945_v39  ;;  %v10462_v40 = vmax.f32 %v9537_v63, 0.0  ;;  %v10398_v24 = vmax.f32 %v9531_v22, 0.0  ;;  %14769 = vpow2.f32 %v7375_v30 }
 0x3b2   : > { %11993 = vmatpush1.msra.mxu0 %v10392_v62  ;;  %12239 = vmatprep.mubr.f32.mxu1 %v19872_v61  ;;  %v9545_v3 = vadd.f32 %v9544_v32, %v18410_v1  ;;  %v9454_v23 = vadd.f32 %v9453_v36, %v18410_v1  ;;  %v10526_v44 = vmax.f32 %v9543_v8, 0.0  ;;  %v10399_v62 = vmax.f32 %v9533_v19, 0.0  ;;  %v19901_v8 = vld [vmem:[#allocation11_spill] sm:$0xff] }
 0x3b3   : > { %v9455_v37 = vpop.f32.mrf.mxu0  ;;  %v9548_v60 = vpop.f32.mrf.mxu1  ;;  %14621 = vmatmul.mubr.msk.f32.vlgmr.msra.gmra.mxu0 %vm4468_vm4, %v18945_v39  ;;  %v10461_v36 = vmax.f32 %v9450_v38, 0.0  ;;  %14771 = vpow2.f32 %v7373_v13 }
 0x3b4   : > { %12168 = vmatprep.mubr.f32.mxu0 %v19872_v61  ;;  %v9549_v52 = vadd.f32 %v9548_v60, %v18341_v43  ;;  %v9456_v17 = vadd.f32 %v9455_v37, %v18410_v1  ;;  %v10527_v9 = vmax.f32 %v9545_v3, 0.0  ;;  %v10524_v41 = vmax.f32 %v9454_v23, 0.0  ;;  %v19900_v3 = vld [vmem:[#allocation12_spill] sm:$0xff] }
 0x3b5   : > { %v9459_v31 = vpop.f32.mrf.mxu0  ;;  %v9550_v5 = vpop.f32.mrf.mxu1  ;;  %v10460_v37 = vmax.f32 %v9448_v57, 0.0  ;;  %v10397_v60 = vmax.f32 %v9444_v48, 0.0  ;;  %14773 = vpow2.f32 %v7361_v49 }
 0x3b6   : > { %v9551_v2 = vadd.f32 %v9550_v5, %v18341_v43  ;;  %v9460_v33 = vadd.f32 %v9459_v31, %v18341_v43  ;;  %v10590_v25 = vmax.f32 %v9549_v52, 0.0  ;;  %v10525_v35 = vmax.f32 %v9456_v17, 0.0  ;;  %v19902_v17 = vld [vmem:[#allocation4_spill] sm:$0xff] }
 0x3b7   : > { %v9461_v12 = vpop.f32.mrf.mxu0  ;;  %v19036_v29 = vpop.f32.mrf.mxu1  ;;  %v10396_v5 = vmax.f32 %v9442_v14, 0.0  ;;  %14775 = vpow2.f32 %v7363_v50  ;;  %v13670_v63 = vmul.f32 %v13662_v45, %v19902_v17 }
 0x3b8   : > { %v10591_v16 = vmax.f32 %v9551_v2, 0.0  ;;  %v9462_v54 = vadd.f32 %v9461_v12, %v18341_v43  ;;  %v10588_v58 = vmax.f32 %v9460_v33, 0.0  ;;  %v7369_v2 = vmul.f32 1.442695, %v19900_v3  ;;  %v14766_v14 = vpop.eup %14765 }
 0x3b9   : > { %v19047_v34 = vpop.f32.mrf.mxu0  ;;  %v19049_v10 = vpop.f32.mrf.mxu1  ;;  %v7367_v33 = vmul.f32 1.442695, %v19901_v8  ;;  %v13678_v13 = vsub.f32 0.0, %v13670_v63 }
 0x3ba   : > { %v10589_v51 = vmax.f32 %v9462_v54, 0.0  ;;  %12199 = vmatprep.subr.mxu1 %v10591_v16  ;;  %v13663_v16 = vmul.f32 0.015873017, %v19902_v17  ;;  %14777 = vpow2.f32 %v7369_v2 }
 0x3bb   : > { %v19057_v53 = vpop.f32.mrf.mxu0  ;;  %12200 = vmatpush1.msra.mxu1 %v10590_v25  ;;  %14779 = vpow2.f32 %v7367_v33 }
 0x3bc   : > { %v19062_v6 = vpop.f32.mrf.mxu1  ;;  %12128 = vmatprep.subr.mxu0 %v10589_v51  ;;  %12201 = vmatprep.subr.mxu1 %v10527_v9  ;;  %v19091_v22 = vsub.f32 0.0, %v13663_v16 }
 0x3bd   : > { %12129 = vmatpush1.msra.mxu0 %v10588_v58  ;;  %12202 = vmatpush1.msra.mxu1 %v10526_v44  ;;  %v9715_v30 = vadd.f32 %v19062_v6, %v18420_v26  ;;  %v9709_v6 = vadd.f32 %v19036_v29, %v18436_v28  ;;  %v9620_v29 = vadd.f32 %v19047_v34, %v18436_v28 }
 0x3be   : > { %v19067_v18 = vpop.f32.mrf.mxu0  ;;  %v9716_v32 = vpop.f32.mrf.mxu1  ;;  %12130 = vmatprep.subr.mxu0 %v10525_v35  ;;  %12203 = vmatprep.subr.mxu1 %v10463_v7  ;;  %v13681_v50 = vmul.f32 %v14766_v14, %v19091_v22 }
 0x3bf   : > { %12131 = vmatpush1.msra.mxu0 %v10524_v41  ;;  %12204 = vmatpush1.msra.mxu1 %v10462_v40  ;;  %v13578_v0 = vpop.permute.xlu0 %13577  ;;  %v9717_v57 = vadd.f32 %v9716_v32, %v18420_v26  ;;  %v9711_v40 = vadd.f32 %v19049_v10, %v18436_v28  ;;  %v9626_v32 = vadd.f32 %v19067_v18, %v18420_v26  ;;  %v10466_v18 = vmax.f32 %v9715_v30, 0.0 }
 0x3c0   : > { %v9627_v52 = vpop.f32.mrf.mxu0  ;;  %v9720_v31 = vpop.f32.mrf.mxu1  ;;  %12132 = vmatprep.subr.mxu0 %v10461_v36  ;;  %12205 = vmatprep.subr.mxu1 %v10399_v62  ;;  %14739 = vpush %v13578_v0  ;;  %v9622_v10 = vadd.f32 %v19057_v53, %v18436_v28  ;;  %v10402_v45 = vmax.f32 %v9709_v6, 0.0  ;;  %v10400_v16 = vmax.f32 %v9620_v29, 0.0 }
 0x3c1   : > { %12133 = vmatpush1.msra.mxu0 %v10460_v37  ;;  %12206 = vmatpush1.msra.mxu1 %v10398_v24  ;;  %v9721_v19 = vadd.f32 %v9720_v31, %v18410_v1  ;;  %v9628_v41 = vadd.f32 %v9627_v52, %v18420_v26  ;;  %v14768_v36 = vpop.eup %14767  ;;  %v10467_v0 = vmax.f32 %v9717_v57, 0.0  ;;  %v10464_v8 = vmax.f32 %v9626_v32, 0.0 }
 0x3c2   : > { %v9631_v15 = vpop.f32.mrf.mxu0  ;;  %v9722_v55 = vpop.f32.mrf.mxu1  ;;  %12134 = vmatprep.subr.mxu0 %v10397_v60  ;;  %14624 = vmatmul.mubr.msk.f32.vlgmr.msra.gmra.mxu1 %vm4468_vm4, %v18945_v39  ;;  %v13684_v2 = vmul.f32 %v14768_v36, %v19091_v22  ;;  %v10401_v33 = vmax.f32 %v9622_v10, 0.0 }
 0x3c3   : > { %12135 = vmatpush1.msra.mxu0 %v10396_v5  ;;  %12381 = vmatprep.mubr.f32.mxu1 %v19872_v61  ;;  %v9723_v23 = vadd.f32 %v9722_v55, %v18410_v1  ;;  %v9632_v48 = vadd.f32 %v9631_v15, %v18410_v1  ;;  %v10530_v21 = vmax.f32 %v9721_v19, 0.0  ;;  %v14770_v37 = vpop.eup %14769  ;;  %v10403_v15 = vmax.f32 %v9711_v40, 0.0 }
 0x3c4   : > { %v9633_v12 = vpop.f32.mrf.mxu0  ;;  %v9726_v46 = vpop.f32.mrf.mxu1  ;;  %14623 = vmatmul.mubr.msk.f32.vlgmr.msra.gmra.mxu0 %vm4468_vm4, %v18945_v39  ;;  %v10465_v55 = vmax.f32 %v9628_v41, 0.0  ;;  %v13686_v34 = vmul.f32 %v14770_v37, %v13678_v13 }
 0x3c5   : > { %12310 = vmatprep.mubr.f32.mxu0 %v19872_v61  ;;  %v9727_v54 = vadd.f32 %v9726_v46, %v18341_v43  ;;  %v9634_v44 = vadd.f32 %v9633_v12, %v18410_v1  ;;  %v10531_v49 = vmax.f32 %v9723_v23, 0.0  ;;  %v14772_v31 = vpop.eup %14771  ;;  %v10528_v5 = vmax.f32 %v9632_v48, 0.0 }
 0x3c6   : > { %v9637_v56 = vpop.f32.mrf.mxu0  ;;  %v9728_v27 = vpop.f32.mrf.mxu1  ;;  %v13685_v17 = vmul.f32 %v14772_v31, %v19091_v22  ;;  %v13697_v23 = vmul.f32 1.442695, %v13684_v2 }
 0x3c7   : > { %v9729_v25 = vadd.f32 %v9728_v27, %v18341_v43  ;;  %v9638_v38 = vadd.f32 %v9637_v56, %v18341_v43  ;;  %v10594_v7 = vmax.f32 %v9727_v54, 0.0  ;;  %v10529_v60 = vmax.f32 %v9634_v44, 0.0  ;;  %v14774_v11 = vpop.eup %14773 }
 0x3c8   : > { %v9639_v9 = vpop.f32.mrf.mxu0  ;;  %v19089_v51 = vpop.f32.mrf.mxu1  ;;  %v13691_v54 = vmul.f32 1.442695, %v13681_v50  ;;  %s14736_s21 = spop %14735 }
 0x3c9   : > { %v10595_v58 = vmax.f32 %v9729_v25, 0.0  ;;  %v9640_v20 = vadd.f32 %v9639_v9, %v18341_v43  ;;  %v10592_v42 = vmax.f32 %v9638_v38, 0.0  ;;  %v14776_v56 = vpop.eup %14775  ;;  %v13679_v25 = vmul.f32 %v14774_v11, %v19091_v22 }
 0x3ca   : > { %v19099_v35 = vpop.f32.mrf.mxu0  ;;  %v19101_v59 = vpop.f32.mrf.mxu1  ;;  %v13701_v38 = vmul.f32 1.442695, %v13686_v34  ;;  %14781 = vpow2.f32 %v13691_v54  ;;  %v13680_v41 = vmul.f32 %v14776_v56, %v19091_v22 }
 0x3cb   : > { %v10593_v62 = vmax.f32 %v9640_v20, 0.0  ;;  %12341 = vmatprep.subr.mxu1 %v10595_v58  ;;  %v14778_v19 = vpop.eup %14777  ;;  %v13699_v58 = vmul.f32 1.442695, %v13685_v17  ;;  %14783 = vpow2.f32 %v13697_v23  ;;  %v19132_v13 = vmul.f32 1.442695, %v13679_v25 }
 0x3cc   : > { %v19110_v24 = vpop.f32.mrf.mxu0  ;;  %12342 = vmatpush1.msra.mxu1 %v10594_v7  ;;  %v14780_v9 = vpop.eup %14779  ;;  %v13683_v7 = vmul.f32 %v14778_v19, %v19091_v22  ;;  %14785 = vpow2.f32 %v13701_v38  ;;  %v13689_v56 = vmul.f32 1.442695, %v13680_v41 }
 0x3cd   : > { %v19114_v52 = vpop.f32.mrf.mxu1  ;;  %12270 = vmatprep.subr.mxu0 %v10593_v62  ;;  %12343 = vmatprep.subr.mxu1 %v10531_v49  ;;  %14787 = vpow2.f32 %v13699_v58  ;;  %v13682_v32 = vmul.f32 %v14780_v9, %v19091_v22  ;;  %v9889_v22 = vadd.f32 %v19101_v59, %v18436_v28 }
 0x3ce   : > { %12271 = vmatpush1.msra.mxu0 %v10592_v42  ;;  %12344 = vmatpush1.msra.mxu1 %v10530_v21 }
 0x3cf   : > { %v19119_v3 = vpop.f32.mrf.mxu0  ;;  %v9894_v53 = vpop.f32.mrf.mxu1  ;;  %12272 = vmatprep.subr.mxu0 %v10529_v60  ;;  %12345 = vmatprep.subr.mxu1 %v10467_v0  ;;  %v9893_v0 = vadd.f32 %v19114_v52, %v18420_v26  ;;  %v10407_v17 = vmax.f32 %v9889_v22, 0.0 }
 0x3d0   : > { %12273 = vmatpush1.msra.mxu0 %v10528_v5  ;;  %12346 = vmatpush1.msra.mxu1 %v10466_v18  ;;  %v9895_v21 = vadd.f32 %v9894_v53, %v18420_v26  ;;  %v13695_v5 = vmul.f32 1.442695, %v13683_v7  ;;  %v9887_v53 = vadd.f32 %v19089_v51, %v18436_v28  ;;  %v9804_v52 = vadd.f32 %v19119_v3, %v18420_v26 }
 0x3d1   : > { %v9805_v12 = vpop.f32.mrf.mxu0  ;;  %v9898_v46 = vpop.f32.mrf.mxu1  ;;  %12274 = vmatprep.subr.mxu0 %v10465_v55  ;;  %12347 = vmatprep.subr.mxu1 %v10403_v15  ;;  %v9798_v51 = vadd.f32 %v19099_v35, %v18436_v28 }
 0x3d2   : > { %12275 = vmatpush1.msra.mxu0 %v10464_v8  ;;  %12348 = vmatpush1.msra.mxu1 %v10402_v45  ;;  %v9899_v49 = vadd.f32 %v9898_v46, %v18410_v1  ;;  %v9806_v50 = vadd.f32 %v9805_v12, %v18420_v26  ;;  %v9800_v8 = vadd.f32 %v19110_v24, %v18436_v28  ;;  %v10471_v59 = vmax.f32 %v9895_v21, 0.0 }
 0x3d3   : > { %v9809_v27 = vpop.f32.mrf.mxu0  ;;  %v9900_v63 = vpop.f32.mrf.mxu1  ;;  %12276 = vmatprep.subr.mxu0 %v10401_v33  ;;  %14626 = vmatmul.mubr.msk.f32.vlgmr.msra.gmra.mxu1 %vm4468_vm4, %v18945_v39  ;;  %v13693_v12 = vmul.f32 1.442695, %v13682_v32  ;;  %v10470_v46 = vmax.f32 %v9893_v0, 0.0  ;;  %14789 = vpow2.f32 %v13695_v5  ;;  %v10404_v38 = vmax.f32 %v9798_v51, 0.0 }
 0x3d4   : > { %12277 = vmatpush1.msra.mxu0 %v10400_v16  ;;  %12523 = vmatprep.mubr.f32.mxu1 %v19872_v61  ;;  %v9901_v14 = vadd.f32 %v9900_v63, %v18410_v1  ;;  %v9810_v60 = vadd.f32 %v9809_v27, %v18410_v1  ;;  %v10534_v2 = vmax.f32 %v9899_v49, 0.0  ;;  %v10469_v16 = vmax.f32 %v9806_v50, 0.0 }
 0x3d5   : > { %v9811_v57 = vpop.f32.mrf.mxu0  ;;  %v9904_v44 = vpop.f32.mrf.mxu1  ;;  %14625 = vmatmul.mubr.msk.f32.vlgmr.msra.gmra.mxu0 %vm4468_vm4, %v18945_v39  ;;  %v10406_v27 = vmax.f32 %v9887_v53, 0.0  ;;  %v10468_v63 = vmax.f32 %v9804_v52, 0.0  ;;  %v10405_v23 = vmax.f32 %v9800_v8, 0.0  ;;  %14791 = vpow2.f32 %v13693_v12 }
 0x3d6   : > { %12452 = vmatprep.mubr.f32.mxu0 %v19872_v61  ;;  %v9905_v20 = vadd.f32 %v9904_v44, %v18341_v43  ;;  %v9812_v42 = vadd.f32 %v9811_v57, %v18410_v1  ;;  %v10535_v15 = vmax.f32 %v9901_v14, 0.0  ;;  %v10532_v3 = vmax.f32 %v9810_v60, 0.0 }
 0x3d7   : > { %v9815_v30 = vpop.f32.mrf.mxu0  ;;  %v9906_v48 = vpop.f32.mrf.mxu1  ;;  %14793 = vpow2.f32 %v19132_v13 }
 0x3d8   : > { %v9907_v40 = vadd.f32 %v9906_v48, %v18341_v43  ;;  %v9816_v62 = vadd.f32 %v9815_v30, %v18341_v43  ;;  %v10598_v31 = vmax.f32 %v9905_v20, 0.0  ;;  %v10533_v34 = vmax.f32 %v9812_v42, 0.0  ;;  %v19169_v19 = vpop.eup %14781 }
 0x3d9   : > { %v9817_v36 = vpop.f32.mrf.mxu0  ;;  %v19139_v6 = vpop.f32.mrf.mxu1  ;;  %14795 = vpow2.f32 %v13689_v56  ;;  %s14738_s23 = spop %14737 }
 0x3da   : > { %v10599_v37 = vmax.f32 %v9907_v40, 0.0  ;;  %v9818_v10 = vadd.f32 %v9817_v36, %v18341_v43  ;;  %v10596_v11 = vmax.f32 %v9816_v62, 0.0  ;;  %v19172_v9 = vpop.eup %14783  ;;  %v19847_v62 = vsub.f32 1.0, %v19169_v19 }
 0x3db   : > { %v19148_v29 = vpop.f32.mrf.mxu0  ;;  %v19150_v18 = vpop.f32.mrf.mxu1 }
 0x3dc   : > { %v10597_v55 = vmax.f32 %v9818_v10, 0.0  ;;  %12483 = vmatprep.subr.mxu1 %v10599_v37  ;;  %v19176_v58 = vpop.eup %14785  ;;  %v19845_v10 = vsub.f32 1.0, %v19172_v9 }
 0x3dd   : > { %v19159_v45 = vpop.f32.mrf.mxu0  ;;  %12484 = vmatpush1.msra.mxu1 %v10598_v31  ;;  %v19179_v20 = vpop.eup %14787  ;;  %v19844_v40 = vsub.f32 1.0, %v19176_v58 }
 0x3de   : > { %v19163_v33 = vpop.f32.mrf.mxu1  ;;  %12412 = vmatprep.subr.mxu0 %v10597_v55  ;;  %12485 = vmatprep.subr.mxu1 %v10535_v15  ;;  %v19843_v37 = vsub.f32 1.0, %v19179_v20 }
 0x3df   : > { %12413 = vmatpush1.msra.mxu0 %v10596_v11  ;;  %12486 = vmatpush1.msra.mxu1 %v10534_v2  ;;  %v10071_v50 = vadd.f32 %v19163_v33, %v18420_v26  ;;  %v13718_v2 = vsub.f32 1.0, %v19844_v40  ;;  %v10067_v11 = vadd.f32 %v19150_v18, %v18436_v28  ;;  %v10065_v33 = vadd.f32 %v19139_v6, %v18436_v28 }
 0x3e0   : > { %v19167_v54 = vpop.f32.mrf.mxu0  ;;  %v10072_v24 = vpop.f32.mrf.mxu1  ;;  %12414 = vmatprep.subr.mxu0 %v10533_v34  ;;  %12487 = vmatprep.subr.mxu1 %v10471_v59  ;;  %v9978_v18 = vadd.f32 %v19159_v45, %v18436_v28  ;;  %v13717_v45 = vsub.f32 1.0, %v19843_v37 }
 0x3e1   : > { %12415 = vmatpush1.msra.mxu0 %v10532_v3  ;;  %12488 = vmatpush1.msra.mxu1 %v10470_v46  ;;  %v10073_v0 = vadd.f32 %v10072_v24, %v18420_v26  ;;  %v19198_v22 = vpop.eup %14789  ;;  %v9982_v12 = vadd.f32 %v19167_v54, %v18420_v26  ;;  %v9976_v54 = vadd.f32 %v19148_v29, %v18436_v28  ;;  %v13716_v29 = vsub.f32 1.0, %v19845_v10 }
 0x3e2   : > { %v9983_v25 = vpop.f32.mrf.mxu0  ;;  %v10076_v35 = vpop.f32.mrf.mxu1  ;;  %12416 = vmatprep.subr.mxu0 %v10469_v16  ;;  %12489 = vmatprep.subr.mxu1 %v10407_v17  ;;  %v19846_v6 = vsub.f32 1.0, %v19198_v22 }
 0x3e3   : > { %12417 = vmatpush1.msra.mxu0 %v10468_v63  ;;  %12490 = vmatpush1.msra.mxu1 %v10406_v27  ;;  %v10077_v36 = vadd.f32 %v10076_v35, %v18410_v1  ;;  %v9984_v8 = vadd.f32 %v9983_v25, %v18420_v26  ;;  %v19218_v17 = vpop.eup %14791  ;;  %v10475_v16 = vmax.f32 %v10073_v0, 0.0  ;;  %v10474_v63 = vmax.f32 %v10071_v50, 0.0 }
 0x3e4   : > { %v9987_v57 = vpop.f32.mrf.mxu0  ;;  %v10078_v44 = vpop.f32.mrf.mxu1  ;;  %12418 = vmatprep.subr.mxu0 %v10405_v23  ;;  %14628 = vmatmul.mubr.msk.f32.vlgmr.msra.gmra.mxu1 %vm4468_vm4, %v18945_v39  ;;  %v10411_v35 = vmax.f32 %v10067_v11, 0.0  ;;  %v13725_v0 = vadd.f32 1e-15, %v13717_v45 }
 0x3e5   : > { %12419 = vmatpush1.msra.mxu0 %v10404_v38  ;;  %12665 = vmatprep.mubr.f32.mxu1 %v19872_v61  ;;  %v10079_v41 = vadd.f32 %v10078_v44, %v18410_v1  ;;  %v9988_v15 = vadd.f32 %v9987_v57, %v18410_v1  ;;  %v10538_v51 = vmax.f32 %v10077_v36, 0.0  ;;  %v19225_v27 = vpop.eup %14793  ;;  %v10473_v38 = vmax.f32 %v9984_v8, 0.0 }
 0x3e6   : > { %v9989_v30 = vpop.f32.mrf.mxu0  ;;  %v10082_v48 = vpop.f32.mrf.mxu1  ;;  %14627 = vmatmul.mubr.msk.f32.vlgmr.msra.gmra.mxu0 %vm4468_vm4, %v18945_v39  ;;  %v13726_v44 = vadd.f32 1e-15, %v13718_v2  ;;  %v10408_v36 = vmax.f32 %v9976_v54, 0.0 }
 0x3e7   : > { %12594 = vmatprep.mubr.f32.mxu0 %v19872_v61  ;;  %v10083_v7 = vadd.f32 %v10082_v48, %v18341_v43  ;;  %v9990_v60 = vadd.f32 %v9989_v30, %v18410_v1  ;;  %v10539_v59 = vmax.f32 %v10079_v41, 0.0  ;;  %v10536_v23 = vmax.f32 %v9988_v15, 0.0  ;;  %v19231_v25 = vpop.eup %14795 }
 0x3e8   : > { %v9993_v13 = vpop.f32.mrf.mxu0  ;;  %v10084_v14 = vpop.f32.mrf.mxu1  ;;  %v10410_v30 = vmax.f32 %v10065_v33, 0.0  ;;  %v10472_v48 = vmax.f32 %v9982_v12, 0.0  ;;  %v13713_v41 = vsub.f32 1.0, %v19847_v62  ;;  %14797 = vlog2.f32 %v13726_v44 }
 0x3e9   : > { %v10085_v49 = vadd.f32 %v10084_v14, %v18341_v43  ;;  %v9994_v32 = vadd.f32 %v9993_v13, %v18341_v43  ;;  %v10602_v55 = vmax.f32 %v10083_v7, 0.0  ;;  %v10537_v24 = vmax.f32 %v9990_v60, 0.0 }
 0x3ea   : > { %v9995_v21 = vpop.f32.mrf.mxu0  ;;  %v19191_v42 = vpop.f32.mrf.mxu1  ;;  %v19848_v13 = vsub.f32 1.0, %v19218_v17  ;;  %v10409_v14 = vmax.f32 %v9978_v18, 0.0  ;;  %v13715_v60 = vsub.f32 1.0, %v19846_v6  ;;  %v13724_v15 = vadd.f32 1e-15, %v13716_v29 }
 0x3eb   : > { %v10603_v31 = vmax.f32 %v10085_v49, 0.0  ;;  %v9996_v5 = vadd.f32 %v9995_v21, %v18341_v43  ;;  %v10600_v46 = vmax.f32 %v9994_v32, 0.0  ;;  %v13703_v49 = vsub.f32 1.0, %v19225_v27 }
 0x3ec   : > { %v19203_v53 = vpop.f32.mrf.mxu0  ;;  %v19205_v52 = vpop.f32.mrf.mxu1  ;;  %v13721_v2 = vadd.f32 1e-15, %v13713_v41  ;;  %14799 = vlog2.f32 %v13725_v0 }
 0x3ed   : > { %v10601_v34 = vmax.f32 %v9996_v5, 0.0  ;;  %12625 = vmatprep.subr.mxu1 %v10603_v31  ;;  %v13704_v31 = vsub.f32 1.0, %v19231_v25  ;;  %v13711_v11 = vsub.f32 1.0, %v13703_v49  ;;  %14801 = vlog2.f32 %v13724_v15 }
 0x3ee   : > { %v19216_v3 = vpop.f32.mrf.mxu0  ;;  %12626 = vmatpush1.msra.mxu1 %v10602_v55  ;;  %v13714_v55 = vsub.f32 1.0, %v19848_v13  ;;  %14803 = vlog2.f32 %v13721_v2 }
 0x3ef   : > { %v19222_v56 = vpop.f32.mrf.mxu1  ;;  %12554 = vmatprep.subr.mxu0 %v10601_v34  ;;  %12627 = vmatprep.subr.mxu1 %v10539_v59  ;;  %v13723_v34 = vadd.f32 1e-15, %v13715_v60  ;;  %v13712_v33 = vsub.f32 1.0, %v13704_v31  ;;  %v10243_v60 = vadd.f32 %v19191_v42, %v18436_v28  ;;  %v10154_v42 = vadd.f32 %v19203_v53, %v18436_v28 }
 0x3f0   : > { %12555 = vmatpush1.msra.mxu0 %v10600_v46  ;;  %12628 = vmatpush1.msra.mxu1 %v10538_v51  ;;  %v13722_v18 = vadd.f32 1e-15, %v13714_v55  ;;  %v10156_v55 = vadd.f32 %v19216_v3, %v18436_v28 }
 0x3f1   : > { %v10250_v57 = vpop.f32.mrf.mxu1  ;;  %12556 = vmatprep.subr.mxu0 %v10537_v24  ;;  %12629 = vmatprep.subr.mxu1 %v10475_v16  ;;  %v13719_v24 = vadd.f32 1e-15, %v13711_v11  ;;  %14805 = vlog2.f32 %v13723_v34  ;;  %v13720_v45 = vadd.f32 1e-15, %v13712_v33  ;;  %v10414_v3 = vmax.f32 %v10243_v60, 0.0  ;;  %s14740_s24 = spop %14739 }
 0x3f2   : > { %v19233_v7 = vpop.f32.mrf.mxu0  ;;  %12557 = vmatpush1.msra.mxu0 %v10536_v23  ;;  %12630 = vmatpush1.msra.mxu1 %v10474_v63  ;;  %14807 = vlog2.f32 %v13722_v18  ;;  %v10413_v53 = vmax.f32 %v10156_v55, 0.0  ;;  %v19303_v60 = vadd.s32 16, %v19895_v4 }
 0x3f3   : > { %12558 = vmatprep.subr.mxu0 %v10473_v38  ;;  %12631 = vmatprep.subr.mxu1 %v10411_v35  ;;  %v10251_v35 = vadd.f32 %v10250_v57, %v18420_v26  ;;  %14809 = vlog2.f32 %v13720_v45 }
 0x3f4   : > { %v10161_v32 = vpop.f32.mrf.mxu0  ;;  %v10254_v21 = vpop.f32.mrf.mxu1  ;;  %12559 = vmatpush1.msra.mxu0 %v10472_v48  ;;  %12632 = vmatpush1.msra.mxu1 %v10410_v30  ;;  %v10249_v48 = vadd.f32 %v19222_v56, %v18420_v26  ;;  %v10160_v56 = vadd.f32 %v19233_v7, %v18420_v26  ;;  %14811 = vlog2.f32 %v13719_v24  ;;  %v19290_v24 = vld [vmem:[%s19828_s2 + $0x78] sm:$0x7] }
 0x3f5   : > { %12560 = vmatprep.subr.mxu0 %v10409_v14  ;;  %14630 = vmatmul.mubr.msk.f32.vlgmr.msra.gmra.mxu1 %vm4468_vm4, %v18945_v39  ;;  %v10255_v54 = vadd.f32 %v10254_v21, %v18410_v1  ;;  %v10162_v21 = vadd.f32 %v10161_v32, %v18420_v26  ;;  %v14798_v32 = vpop.eup %14797 }
 0x3f6   : > { %v10165_v5 = vpop.f32.mrf.mxu0  ;;  %v10256_v50 = vpop.f32.mrf.mxu1  ;;  %12561 = vmatpush1.msra.mxu0 %v10408_v36  ;;  %12807 = vmatprep.mubr.f32.mxu1 %v19872_v61  ;;  %v10245_v36 = vadd.f32 %v19205_v52, %v18436_v28  ;;  %v10479_v52 = vmax.f32 %v10251_v35, 0.0  ;;  %v10478_v11 = vmax.f32 %v10249_v48, 0.0  ;;  %v10476_v33 = vmax.f32 %v10160_v56, 0.0 }
 0x3f7   : > { %14629 = vmatmul.mubr.msk.f32.vlgmr.msra.gmra.mxu0 %vm4468_vm4, %v18945_v39  ;;  %v10257_v39 = vadd.f32 %v10256_v50, %v18410_v1  ;;  %v10166_v29 = vadd.f32 %v10165_v5, %v18410_v1  ;;  %v10542_v50 = vmax.f32 %v10255_v54, 0.0  ;;  %v13742_v18 = vmul.f32 0.6931472, %v14798_v32 }
 0x3f8   : > { %v10167_v8 = vpop.f32.mrf.mxu0  ;;  %v10260_v59 = vpop.f32.mrf.mxu1  ;;  %12736 = vmatprep.mubr.f32.mxu0 %v19872_v61  ;;  %v10415_v7 = vmax.f32 %v10245_v36, 0.0 }
 0x3f9   : > { %v10261_v12 = vadd.f32 %v10260_v59, %v18341_v43  ;;  %v10168_v38 = vadd.f32 %v10167_v8, %v18410_v1  ;;  %v10543_v57 = vmax.f32 %v10257_v39, 0.0  ;;  %v10540_v8 = vmax.f32 %v10166_v29, 0.0 }
 0x3fa   : > { %v10171_v51 = vpop.f32.mrf.mxu0  ;;  %v10262_v46 = vpop.f32.mrf.mxu1  ;;  %v10477_v59 = vmax.f32 %v10162_v21, 0.0  ;;  %v10412_v39 = vmax.f32 %v10154_v42, 0.0  ;;  %v19299_v21 = vadd.s32 8, %v19895_v4 }
 0x3fb   : > { %v10263_v16 = vadd.f32 %v10262_v46, %v18341_v43  ;;  %v10172_v63 = vadd.f32 %v10171_v51, %v18341_v43  ;;  %v10606_v14 = vmax.f32 %v10261_v12, 0.0  ;;  %v10541_v2 = vmax.f32 %v10168_v38, 0.0  ;;  %v19903_v12 = vld [vmem:[#allocation2_spill] sm:$0xff]  ;;  %v14800_v51 = vpop.eup %14799 }
 0x3fc   : > { %v10173_v23 = vpop.f32.mrf.mxu0  ;;  %vm13743_vm13 = vcmp.lt.s32.totalorder %v19903_v12, %v19895_v4  ;;  %vm13744_vm15 = vcmp.lt.s32.totalorder %v19903_v12, %v19299_v21  ;;  %vm13745_vm0 = vcmp.lt.s32.totalorder %v19903_v12, %v19303_v60 }
 0x3fd   : > { %v10607_v44 = vmax.f32 %v10263_v16, 0.0  ;;  %v10174_v30 = vadd.f32 %v10173_v23, %v18341_v43  ;;  %v10604_v5 = vmax.f32 %v10172_v63, 0.0  ;;  %v14802_v16 = vpop.eup %14801  ;;  %v14658_v54 = vsel %vm13743_vm13, 1.0, %v19872_v61 }
 0x3fe   : > { %v19267_v41 = vpop.f32.mrf.mxu0  ;;  %v14804_v63 = vpop.eup %14803  ;;  %v13740_v23 = vmul.f32 0.6931472, %v14800_v51  ;;  %v13738_v38 = vmul.f32 0.6931472, %v14802_v16  ;;  %vm13750_vm13 = vcmp.lt.s32.totalorder %v19903_v12, %v19039_v47 }
 0x3ff   : > { %v10605_v0 = vmax.f32 %v10174_v30, 0.0  ;;  %12767 = vmatprep.subr.mxu1 %v10607_v44  ;;  %v14806_v45 = vpop.eup %14805 }
 0x400   : > { %v19276_v15 = vpop.f32.mrf.mxu0  ;;  %12768 = vmatpush1.msra.mxu1 %v10606_v14  ;;  %v14808_v44 = vpop.eup %14807  ;;  %v13736_v48 = vmul.f32 0.6931472, %v14806_v45 }
 0x401   : > { %12696 = vmatprep.subr.mxu0 %v10605_v0  ;;  %12769 = vmatprep.subr.mxu1 %v10543_v57  ;;  %v14810_v14 = vpop.eup %14809  ;;  %v13734_v36 = vmul.f32 0.6931472, %v14808_v44 }
 0x402   : > { %12697 = vmatpush1.msra.mxu0 %v10604_v5  ;;  %12770 = vmatpush1.msra.mxu1 %v10542_v50  ;;  %v13732_v5 = vmul.f32 0.6931472, %v14804_v63  ;;  %v14812_v55 = vpop.eup %14811 }
 0x403   : > { %v19282_v34 = vpop.f32.mrf.mxu0  ;;  %12698 = vmatprep.subr.mxu0 %v10541_v2  ;;  %12771 = vmatprep.subr.mxu1 %v10479_v52  ;;  %v13730_v2 = vmul.f32 0.6931472, %v14810_v14 }
 0x404   : > { %12699 = vmatpush1.msra.mxu0 %v10540_v8  ;;  %12772 = vmatpush1.msra.mxu1 %v10478_v11  ;;  %v19312_v11 = vadd.s32 24, %v19895_v4 }
 0x405   : > { %v10339_v46 = vpop.f32.mrf.mxu0  ;;  %12700 = vmatprep.subr.mxu0 %v10477_v59  ;;  %12773 = vmatprep.subr.mxu1 %v10415_v7  ;;  %v10334_v7 = vadd.f32 %v19276_v15, %v18436_v28  ;;  %v14660_v15 = vsel %vm13745_vm0, 1.0, %v19872_v61 }
 0x406   : > { %12701 = vmatpush1.msra.mxu0 %v10476_v33  ;;  %12774 = vmatpush1.msra.mxu1 %v10414_v3  ;;  %v10340_v32 = vadd.f32 %v10339_v46, %v18420_v26  ;;  %v13728_v3 = vmul.f32 0.6931472, %v14812_v55  ;;  %v10332_v33 = vadd.f32 %v19267_v41, %v18436_v28  ;;  %vm13746_vm1 = vcmp.lt.s32.totalorder %v19903_v12, %v19312_v11 }
 0x407   : > { %12702 = vmatprep.subr.mxu0 %v10413_v53  ;;  %14705 = vmatprep.subr.mxu1 %v13742_v18  ;;  %v19333_v53 = vadd.s32 40, %v19895_v4  ;;  %v19338_v41 = vadd.s32 48, %v19895_v4  ;;  %v10417_v46 = vmax.f32 %v10334_v7, 0.0 }
 0x408   : > { %12703 = vmatpush1.msra.mxu0 %v10412_v39  ;;  %14632 = vmatmul.mubr.msk.f32.vlgmr.msra.gmra.mxu1 %vm4468_vm4, %v19290_v24  ;;  %v14661_v39 = vsel %vm13746_vm1, 1.0, %v19872_v61 }
 0x409   : > { %v10343_v35 = vpop.f32.mrf.mxu0  ;;  %14706 = vmatpush3.msra.mxu1 %v13742_v18  ;;  %14631 = vmatmul.mubr.msk.f32.vlgmr.msra.gmra.mxu0 %vm4468_vm4, %v19290_v24  ;;  %v10416_v18 = vmax.f32 %v10332_v33, 0.0  ;;  %vm13748_vm7 = vcmp.lt.s32.totalorder %v19903_v12, %v19333_v53  ;;  %vm13749_vm12 = vcmp.lt.s32.totalorder %v19903_v12, %v19338_v41 }
 0x40a   : > { %14707 = vmatprep.subr.mxu1 %v13740_v23  ;;  %14721 = vmatprep.mubr.msk.f32.mxu1 %vm13767_vm14, %v14658_v54  ;;  %v10344_v52 = vadd.f32 %v10343_v35, %v18410_v1  ;;  %v14663_v54 = vsel %vm13748_vm7, 1.0, %v19872_v61  ;;  %v14664_v63 = vsel %vm13749_vm12, 1.0, %v19872_v61 }
 0x40b   : > { %v10345_v30 = vpop.f32.mrf.mxu0  ;;  %14708 = vmatpush3.msra.mxu1 %v13740_v23  ;;  %12878 = vmatprep.mubr.f32.mxu0 %v19872_v61  ;;  %v14665_v23 = vsel %vm13750_vm13, 1.0, %v19872_v61 }
 0x40c   : > { %14709 = vmatprep.subr.mxu1 %v13738_v38  ;;  %v10346_v56 = vadd.f32 %v10345_v30, %v18410_v1  ;;  %v19319_v1 = vadd.s32 32, %v19895_v4  ;;  %v10544_v51 = vmax.f32 %v10344_v52, 0.0 }
 0x40d   : > { %v10349_v29 = vpop.f32.mrf.mxu0  ;;  %14710 = vmatpush3.msra.mxu1 %v13738_v38 }
 0x40e   : > { %14711 = vmatprep.subr.mxu1 %v13736_v48  ;;  %v10350_v57 = vadd.f32 %v10349_v29, %v18341_v43  ;;  %v10545_v59 = vmax.f32 %v10346_v56, 0.0  ;;  %vm13747_vm3 = vcmp.lt.s32.totalorder %v19903_v12, %v19319_v1 }
 0x40f   : > { %v10351_v0 = vpop.f32.mrf.mxu0  ;;  %14712 = vmatpush3.msra.mxu1 %v13736_v48  ;;  %v14662_v16 = vsel %vm13747_vm3, 1.0, %v19872_v61 }
 0x410   : > { %v10352_v50 = vadd.f32 %v10351_v0, %v18341_v43  ;;  %14713 = vmatprep.subr.mxu1 %v13734_v36  ;;  %v10338_v43 = vadd.f32 %v19282_v34, %v18420_v26  ;;  %v10608_v8 = vmax.f32 %v10350_v57, 0.0  ;;  %v14659_v26 = vsel %vm13744_vm15, 1.0, %v19872_v61 }
 0x411   : > { %14714 = vmatpush3.msra.mxu1 %v13734_v36  ;;  %v10481_v34 = vmax.f32 %v10340_v32, 0.0  ;;  %v10750_v35 = vpop.f32.mrf.mxu0 }
 0x412   : > { %v10609_v42 = vmax.f32 %v10352_v50, 0.0  ;;  %14715 = vmatprep.subr.mxu1 %v13732_v5  ;;  %v10480_v28 = vmax.f32 %v10338_v43, 0.0  ;;  %v12889_v48 = vrot.slane %v10750_v35, 6  ;;  %v13173_v57 = vrot.slane %v10750_v35, 7 }
 0x413   : > { %14716 = vmatpush3.msra.mxu1 %v13732_v5  ;;  %v10752_v29 = vpop.f32.mrf.mxu0 }
 0x414   : > { %12838 = vmatprep.subr.mxu0 %v10609_v42  ;;  %14717 = vmatprep.subr.mxu1 %v13730_v2  ;;  %v12892_v50 = vrot.slane %v10752_v29, 5  ;;  %v13175_v5 = vrot.slane %v10752_v29, 6 }
 0x415   : > { %12839 = vmatpush1.msra.mxu0 %v10608_v8  ;;  %14718 = vmatpush3.msra.mxu1 %v13730_v2  ;;  %v13412_v8 = vrot.slane %v10752_v29, 7 }
 0x416   : > { %12840 = vmatprep.subr.mxu0 %v10545_v59  ;;  %14719 = vmatprep.subr.mxu1 %v13728_v3 }
 0x417   : > { %12841 = vmatpush1.msra.mxu0 %v10544_v51  ;;  %14720 = vmatpush3.msra.mxu1 %v13728_v3 }
 0x418   : > { %12842 = vmatprep.subr.mxu0 %v10481_v34  ;;  %14722 = vmatmul.mubr.msk.f32.vlgmr.msra.gmra.mxu1 %vm13767_vm14, %v14659_v26 }
 0x419   : > { %12843 = vmatpush1.msra.mxu0 %v10480_v28  ;;  %14724 = vmatprep.mubr.msk.f32.mxu1 %vm13767_vm14, %v14660_v15 }
 0x41a   : > { %12844 = vmatprep.subr.mxu0 %v10417_v46  ;;  %v10892_v55 = vpop.f32.mrf.mxu0 }
 0x41b   : > { %12845 = vmatpush1.msra.mxu0 %v10416_v18 }
 0x41c   : > { %14633 = vmatmul.mubr.msk.f32.vlgmr.msra.gmra.mxu0 %vm4468_vm4, %v19290_v24  ;;  %14725 = vmatmul.mubr.msk.f32.gmra.mxu1 %vm13767_vm14, %v14661_v39  ;;  %v10679_v24 = vpop.f32.mrf.mxu1  ;;  %v10894_v33 = vpop.f32.mrf.mxu0 }
 0x41d   : > { %14727 = vmatprep.mubr.msk.f32.mxu1 %vm13767_vm14, %v14662_v16  ;;  %v13171_v44 = vrot.slane %v10679_v24, 1  ;;  %v13408_v14 = vrot.slane %v10679_v24, 2  ;;  %v12901_v16 = vrot.slane %v10892_v55, 2  ;;  %v13183_v29 = vrot.slane %v10894_v33, 2 }
 0x41e   : > { %v10681_v45 = vpop.f32.mrf.mxu1 }
 0x41f   : > { %v12886_v38 = vrot.slane %v10681_v45, 7  ;;  %v13410_v12 = vrot.slane %v10681_v45, 1  ;;  %v13200_v0 = vsel %vm7173_vm5, %v13171_v44, %v10681_v45  ;;  %v12904_v44 = vrot.slane %v10894_v33, 1 }
 0x420   : > { %14728 = vmatmul.mubr.msk.f32.gmra.mxu1 %vm13767_vm14, %v14663_v54  ;;  %v10821_v30 = vpop.f32.mrf.mxu1  ;;  %v13201_v2 = vsel %vm7175_vm6, %v13200_v0, %v13173_v57  ;;  %v19381_v57 = vstv %s14736_s21 }
 0x421   : > { %14730 = vmatprep.mubr.msk.f32.mxu1 %vm13767_vm14, %v14664_v63  ;;  %v12927_v36 = vsel %vm7173_vm5, %v10679_v24, %v12886_v38  ;;  %v13436_v32 = vsel %vm7173_vm5, %v13408_v14, %v13410_v12  ;;  %v12895_v42 = vrot.slane %v10821_v30, 4  ;;  %v13177_v7 = vrot.slane %v10821_v30, 5 }
 0x422   : > { %v10823_v56 = vpop.f32.mrf.mxu1  ;;  %v12928_v61 = vsel %vm7175_vm6, %v12927_v36, %v12889_v48  ;;  %v13437_v59 = vsel %vm7175_vm6, %v13436_v32, %v10750_v35  ;;  %v13202_v3 = vsel %vm213_vm2, %v13201_v2, %v13175_v5  ;;  %v13414_v15 = vrot.slane %v10821_v30, 6  ;;  %v11034_v46 = vpop.f32.mrf.mxu0 }
 0x423   : > { %v12929_v43 = vsel %vm213_vm2, %v12928_v61, %v12892_v50  ;;  %v12898_v26 = vrot.slane %v10823_v56, 3  ;;  %v13179_v28 = vrot.slane %v10823_v56, 4  ;;  %v13438_v18 = vsel %vm213_vm2, %v13437_v59, %v13412_v8 }
 0x424   : > { %14731 = vmatmul.mubr.msk.f32.gmra.mxu1 %vm13767_vm14, %v14665_v23  ;;  %v10963_v52 = vpop.f32.mrf.mxu1  ;;  %v12930_v34 = vsel %vm7178_vm8, %v12929_v43, %v12895_v42  ;;  %v13203_v39 = vsel %vm7178_vm8, %v13202_v3, %v13177_v7  ;;  %v13416_v23 = vrot.slane %v10823_v56, 5  ;;  %v13181_v24 = vrot.slane %v10892_v55, 3  ;;  %v11036_v38 = vpop.f32.mrf.mxu0 }
 0x425   : > { %v12931_v63 = vsel %vm7180_vm9, %v12930_v34, %v12898_v26  ;;  %v13439_v45 = vsel %vm7178_vm8, %v13438_v18, %v13414_v15  ;;  %v13204_v35 = vsel %vm7180_vm9, %v13203_v39, %v13179_v28  ;;  %v13418_v48 = vrot.slane %v10892_v55, 4 }
 0x426   : > { %v10965_v51 = vpop.f32.mrf.mxu1  ;;  %v12932_v30 = vsel %vm7182_vm10, %v12931_v63, %v12901_v16  ;;  %v13440_v36 = vsel %vm7180_vm9, %v13439_v45, %v13416_v23  ;;  %v13205_v12 = vsel %vm7182_vm10, %v13204_v35, %v13181_v24  ;;  %v13420_v5 = vrot.slane %v10894_v33, 3 }
 0x427   : > { %v12907_v0 = vrot.slane %v10965_v51, 7  ;;  %v12933_v61 = vsel %vm7184_vm11, %v12932_v30, %v12904_v44  ;;  %v19388_v2 = vstv %s14738_s23  ;;  %v13186_v55 = vrot.slane %v10963_v52, 1 }
 0x428   : > { %v19371_v54 = vpop.f32.mrf.mxu1  ;;  %v13441_v32 = vsel %vm7182_vm10, %v13440_v36, %v13418_v48  ;;  %v13206_v42 = vsel %vm7184_vm11, %v13205_v12, %v13183_v29  ;;  %v13422_v43 = vrot.slane %v10963_v52, 2  ;;  %v13424_v8 = vrot.slane %v10965_v51, 1 }
 0x429   : > { %v12910_v7 = vrot.slane %v11034_v46, 6  ;;  %v13114_v59 = vadd.f32 %v19381_v57, %v12933_v61  ;;  %v12934_v3 = vsel %vm7173_vm5, %v10963_v52, %v12907_v0  ;;  %v13188_v26 = vrot.slane %v11034_v46, 7 }
 0x42a   : > { %v19377_v14 = vpop.f32.mrf.mxu1  ;;  %v13442_v33 = vsel %vm7184_vm11, %v13441_v32, %v13420_v5  ;;  %v13352_v28 = vadd.f32 %v19388_v2, %v13206_v42  ;;  %v19398_v18 = vstv %s14740_s24  ;;  %v13207_v39 = vsel %vm7173_vm5, %v13186_v55, %v10965_v51 }
 0x42b   : > { %v19383_v56 = vpop.f32.mrf.mxu0  ;;  %v13443_v16 = vsel %vm7173_vm5, %v13422_v43, %v13424_v8  ;;  %v12913_v63 = vrot.slane %v11036_v38, 5  ;;  %v12935_v24 = vsel %vm7175_vm6, %v12934_v3, %v12910_v7  ;;  %v13190_v52 = vrot.slane %v11036_v38, 6 }
 0x42c   : > { %v19385_v50 = vpop.f32.mrf.mxu1  ;;  %v14634_v35 = vmul.f32 -1.442695, %v13114_v59  ;;  %v13582_v44 = vadd.f32 %v19398_v18, %v13442_v33  ;;  %v13208_v30 = vsel %vm7175_vm6, %v13207_v39, %v13188_v26  ;;  %v13426_v48 = vrot.slane %v11036_v38, 7 }
 0x42d   : > { %v19394_v34 = vpop.f32.mrf.mxu0  ;;  %v14642_v36 = vmul.f32 -1.442695, %v13352_v28  ;;  %v13444_v51 = vsel %vm7175_vm6, %v13443_v16, %v11034_v46  ;;  %v12916_v12 = vrot.slane %v19371_v54, 4  ;;  %v12936_v0 = vsel %vm213_vm2, %v12935_v24, %v12913_v63 }
 0x42e   : > { %v11249_v15 = vpop.f32.mrf.mxu1  ;;  %v13192_v61 = vrot.slane %v19371_v54, 5  ;;  %v13428_v5 = vrot.slane %v19371_v54, 6  ;;  %v13209_v42 = vsel %vm213_vm2, %v13208_v30, %v13190_v52  ;;  %v12919_v38 = vrot.slane %v19377_v14, 3 }
 0x42f   : > { %v12942_v45 = vrot.slane %v11249_v15, 7  ;;  %v13194_v43 = vrot.slane %v19377_v14, 4  ;;  %14813 = vpow2.f32 %v14634_v35  ;;  %v14650_v8 = vmul.f32 -1.442695, %v13582_v44 }
 0x430   : > { %v19407_v29 = vpop.f32.mrf.mxu1  ;;  %v13445_v7 = vsel %vm213_vm2, %v13444_v51, %v13426_v48  ;;  %v13215_v59 = vrot.slane %v19385_v50, 1  ;;  %14815 = vpow2.f32 %v14642_v36  ;;  %v12937_v54 = vsel %vm7178_vm8, %v12936_v0, %v12916_v12 }
 0x431   : > { %v12983_v46 = vsel %vm7173_vm5, %v19385_v50, %v12942_v45  ;;  %v13430_v26 = vrot.slane %v19377_v14, 5  ;;  %v13210_v28 = vsel %vm7178_vm8, %v13209_v42, %v13192_v61  ;;  %v13450_v39 = vrot.slane %v19385_v50, 2 }
 0x432   : > { %v19422_v3 = vpop.f32.mrf.mxu1  ;;  %v13452_v16 = vrot.slane %v11249_v15, 1  ;;  %v13446_v45 = vsel %vm7178_vm8, %v13445_v7, %v13428_v5  ;;  %v12922_v35 = vrot.slane %v19383_v56, 2  ;;  %14817 = vpow2.f32 %v14650_v8 }
 0x433   : > { %v19402_v23 = vpop.f32.mrf.mxu0  ;;  %v12938_v14 = vsel %vm7180_vm9, %v12937_v54, %v12919_v38  ;;  %v13244_v30 = vsel %vm7173_vm5, %v13215_v59, %v11249_v15  ;;  %v12951_v50 = vrot.slane %v19407_v29, 4  ;;  %v13211_v48 = vsel %vm7180_vm9, %v13210_v28, %v13194_v43 }
 0x434   : > { %v12945_v55 = vrot.slane %v19402_v23, 6  ;;  %v13217_v44 = vrot.slane %v19402_v23, 7  ;;  %v13196_v36 = vrot.slane %v19383_v56, 3  ;;  %v13432_v51 = vrot.slane %v19383_v56, 4 }
 0x435   : > { %v11320_v32 = vpop.f32.mrf.mxu0  ;;  %v13447_v0 = vsel %vm7180_vm9, %v13446_v45, %v13430_v26  ;;  %v12925_v61 = vrot.slane %v19394_v34, 1  ;;  %v13478_v5 = vsel %vm7173_vm5, %v13450_v39, %v13452_v16  ;;  %v12939_v38 = vsel %vm7182_vm10, %v12938_v14, %v12922_v35 }
 0x436   : > { %v12948_v33 = vrot.slane %v11320_v32, 5  ;;  %v12984_v63 = vsel %vm7175_vm6, %v12983_v46, %v12945_v55  ;;  %v13219_v55 = vrot.slane %v11320_v32, 6  ;;  %v13245_v43 = vsel %vm7175_vm6, %v13244_v30, %v13217_v44 }
 0x437   : > { %v12954_v46 = vrot.slane %v19422_v3, 3  ;;  %v13198_v56 = vrot.slane %v19394_v34, 2  ;;  %v13434_v8 = vrot.slane %v19394_v34, 3  ;;  %v13454_v7 = vrot.slane %v11320_v32, 7 }
 0x438   : > { %v12985_v12 = vsel %vm213_vm2, %v12984_v63, %v12948_v33  ;;  %v13212_v26 = vsel %vm7182_vm10, %v13211_v48, %v13196_v36  ;;  %v13448_v33 = vsel %vm7182_vm10, %v13447_v0, %v13432_v51  ;;  %v13479_v28 = vsel %vm7175_vm6, %v13478_v5, %v19402_v23 }
 0x439   : > { %v12986_v59 = vsel %vm7178_vm8, %v12985_v12, %v12951_v50  ;;  %v13221_v39 = vrot.slane %v19407_v29, 5  ;;  %v12940_v16 = vsel %vm7184_vm11, %v12939_v38, %v12925_v61  ;;  %v13246_v63 = vsel %vm213_vm2, %v13245_v43, %v13219_v55 }
 0x43a   : > { %v13456_v45 = vrot.slane %v19407_v29, 6  ;;  %v12987_v35 = vsel %vm7180_vm9, %v12986_v59, %v12954_v46  ;;  %v13213_v44 = vsel %vm7184_vm11, %v13212_v26, %v13198_v56  ;;  %v13449_v14 = vsel %vm7184_vm11, %v13448_v33, %v13434_v8 }
 0x43b   : > { %v19431_v52 = vpop.f32.mrf.mxu1  ;;  %v13480_v23 = vsel %vm213_vm2, %v13479_v28, %v13454_v7  ;;  %v13223_v30 = vrot.slane %v19422_v3, 4  ;;  %v13115_v36 = vadd.f32 %v19381_v57, %v12940_v16  ;;  %v13247_v51 = vsel %vm7178_vm8, %v13246_v63, %v13221_v39 }
 0x43c   : > { %v14814_v48 = vpop.eup %14813  ;;  %v13458_v0 = vrot.slane %v19422_v3, 5  ;;  %v13353_v55 = vadd.f32 %v19388_v2, %v13213_v44  ;;  %v13583_v38 = vadd.f32 %v19398_v18, %v13449_v14  ;;  %v13481_v43 = vsel %vm7178_vm8, %v13480_v23, %v13456_v45 }
 0x43d   : > { %v19429_v24 = vpop.f32.mrf.mxu0  ;;  %v19448_v15 = vpop.f32.mrf.mxu1  ;;  %v13248_v56 = vsel %vm7180_vm9, %v13247_v51, %v13223_v30  ;;  %v14635_v26 = vmul.f32 -1.442695, %v13115_v36  ;;  %v13146_v39 = vadd.f32 1.0, %v14814_v48 }
 0x43e   : > { %v12957_v34 = vrot.slane %v19429_v24, 2  ;;  %v14816_v29 = vpop.eup %14815  ;;  %v13225_v46 = vrot.slane %v19429_v24, 3  ;;  %v12963_v8 = vrot.slane %v19448_v15, 7  ;;  %v13460_v33 = vrot.slane %v19429_v24, 4 }
 0x43f   : > { %v19446_v42 = vpop.f32.mrf.mxu0  ;;  %v14818_v3 = vpop.eup %14817  ;;  %v13384_v16 = vadd.f32 1.0, %v14816_v29  ;;  %v13482_v63 = vsel %vm7180_vm9, %v13481_v43, %v13458_v0  ;;  %v14643_v45 = vmul.f32 -1.442695, %v13353_v55  ;;  %v13230_v24 = vrot.slane %v19431_v52, 1 }
 0x440   : > { %v12960_v12 = vrot.slane %v19446_v42, 1  ;;  %v12988_v61 = vsel %vm7182_vm10, %v12987_v35, %v12957_v34  ;;  %v13227_v34 = vrot.slane %v19446_v42, 2  ;;  %v14651_v35 = vmul.f32 -1.442695, %v13583_v38 }
 0x441   : > { %v13249_v44 = vsel %vm7182_vm10, %v13248_v56, %v13225_v46  ;;  %v13462_v30 = vrot.slane %v19446_v42, 3  ;;  %v12990_v48 = vsel %vm7173_vm5, %v19431_v52, %v12963_v8  ;;  %14819 = vpow2.f32 %v14635_v26 }
 0x442   : > { %v12989_v28 = vsel %vm7184_vm11, %v12988_v61, %v12960_v12  ;;  %v13483_v12 = vsel %vm7182_vm10, %v13482_v63, %v13460_v33  ;;  %v13464_v29 = vrot.slane %v19431_v52, 2  ;;  %v13466_v0 = vrot.slane %v19448_v15, 1 }
 0x443   : > { %v13116_v23 = vadd.f32 %v19381_v57, %v12989_v28  ;;  %14821 = vrcp.f32 %v13146_v39  ;;  %v19511_v61 = vadd.f32 1.0, %v14818_v3  ;;  %v13250_v42 = vsel %vm7184_vm11, %v13249_v44, %v13227_v34 }
 0x444   : > { %v19466_v32 = vpop.f32.mrf.mxu1  ;;  %14823 = vrcp.f32 %v13384_v16  ;;  %v13484_v8 = vsel %vm7184_vm11, %v13483_v12, %v13462_v30  ;;  %v13251_v3 = vsel %vm7173_vm5, %v13230_v24, %v19448_v15  ;;  %v13354_v26 = vadd.f32 %v19388_v2, %v13250_v42 }
 0x445   : > { %14825 = vpow2.f32 %v14643_v45  ;;  %v14636_v52 = vmul.f32 -1.442695, %v13116_v23  ;;  %v13485_v33 = vsel %vm7173_vm5, %v13464_v29, %v13466_v0  ;;  %v12972_v28 = vrot.slane %v19466_v32, 4 }
 0x446   : > { %v19456_v54 = vpop.f32.mrf.mxu0  ;;  %v19481_v5 = vpop.f32.mrf.mxu1  ;;  %14827 = vpow2.f32 %v14651_v35  ;;  %v13584_v44 = vadd.f32 %v19398_v18, %v13484_v8  ;;  %v13236_v24 = vrot.slane %v19466_v32, 5  ;;  %v14644_v12 = vmul.f32 -1.442695, %v13354_v26 }
 0x447   : > { %v12966_v14 = vrot.slane %v19456_v54, 6  ;;  %v13232_v46 = vrot.slane %v19456_v54, 7  ;;  %14829 = vpow2.f32 %v14636_v52  ;;  %v13486_v30 = vsel %vm7175_vm6, %v13485_v33, %v19456_v54 }
 0x448   : > { %v19474_v50 = vpop.f32.mrf.mxu0  ;;  %v13238_v52 = vrot.slane %v19481_v5, 4  ;;  %v13472_v33 = vrot.slane %v19481_v5, 5  ;;  %14831 = vpow2.f32 %v14644_v12 }
 0x449   : > { %v12969_v55 = vrot.slane %v19474_v50, 5  ;;  %v12991_v43 = vsel %vm7175_vm6, %v12990_v48, %v12966_v14  ;;  %v13234_v16 = vrot.slane %v19474_v50, 6  ;;  %v13252_v15 = vsel %vm7175_vm6, %v13251_v3, %v13232_v46 }
 0x44a   : > { %v13468_v35 = vrot.slane %v19474_v50, 7  ;;  %v12975_v48 = vrot.slane %v19481_v5, 3  ;;  %v14652_v46 = vmul.f32 -1.442695, %v13584_v44 }
 0x44b   : > { %v12992_v39 = vsel %vm213_vm2, %v12991_v43, %v12969_v55  ;;  %v13253_v42 = vsel %vm213_vm2, %v13252_v15, %v13234_v16  ;;  %v13470_v55 = vrot.slane %v19466_v32, 6 }
 0x44c   : > { %v12993_v29 = vsel %vm7178_vm8, %v12992_v39, %v12972_v28  ;;  %v13254_v39 = vsel %vm7178_vm8, %v13253_v42, %v13236_v24  ;;  %14833 = vpow2.f32 %v14652_v46 }
 0x44d   : > { %v12994_v26 = vsel %vm7180_vm9, %v12993_v29, %v12975_v48  ;;  %v13255_v42 = vsel %vm7180_vm9, %v13254_v39, %v13238_v52  ;;  %14835 = vrcp.f32 %v19511_v61 }
 0x44e   : > { %v14820_v15 = vpop.eup %14819 }
 0x44f   : > { %v19491_v59 = vpop.f32.mrf.mxu1 }
 0x450   : > { %v13259_v63 = vrot.slane %v19491_v59, 1  ;;  %v19571_v48 = vpop.eup %14821 }
 0x451   : > { %v19489_v7 = vpop.f32.mrf.mxu0  ;;  %v19506_v51 = vpop.f32.mrf.mxu1 }
 0x452   : > { %v12998_v56 = vrot.slane %v19506_v51, 7  ;;  %v13288_v43 = vsel %vm7173_vm5, %v13259_v63, %v19506_v51  ;;  %v12978_v8 = vrot.slane %v19489_v7, 2  ;;  %v13240_v12 = vrot.slane %v19489_v7, 3 }
 0x453   : > { %v19504_v36 = vpop.f32.mrf.mxu0 }
 0x454   : > { %v13039_v14 = vsel %vm7173_vm5, %v19491_v59, %v12998_v56  ;;  %v13487_v56 = vsel %vm213_vm2, %v13486_v30, %v13468_v35  ;;  %v12981_v5 = vrot.slane %v19504_v36, 1  ;;  %v13494_v30 = vrot.slane %v19506_v51, 1 }
 0x455   : > { %v13488_v35 = vsel %vm7178_vm8, %v13487_v56, %v13470_v55  ;;  %v12995_v24 = vsel %vm7182_vm10, %v12994_v26, %v12978_v8  ;;  %v13474_v55 = vrot.slane %v19489_v7, 4  ;;  %v13242_v8 = vrot.slane %v19504_v36, 2 }
 0x456   : > { %v13489_v56 = vsel %vm7180_vm9, %v13488_v35, %v13472_v33  ;;  %v12996_v52 = vsel %vm7184_vm11, %v12995_v24, %v12981_v5  ;;  %v13256_v39 = vsel %vm7182_vm10, %v13255_v42, %v13240_v12  ;;  %v13476_v46 = vrot.slane %v19504_v36, 3 }
 0x457   : > { %v13490_v35 = vsel %vm7182_vm10, %v13489_v56, %v13474_v55 }
 0x460   : > { %v19537_v23 = vpop.f32.mrf.mxu1 }
 0x461   : > { %v13007_v28 = vrot.slane %v19537_v23, 4  ;;  %v13265_v29 = vrot.slane %v19537_v23, 5 }
 0x462   : > { %v19515_v38 = vpop.f32.mrf.mxu0  ;;  %v19554_v3 = vpop.f32.mrf.mxu1 }
 0x463   : > { %v13001_v34 = vrot.slane %v19515_v38, 6  ;;  %v13261_v0 = vrot.slane %v19515_v38, 7 }
 0x464   : > { %v19530_v45 = vpop.f32.mrf.mxu0 }
 0x465   : > { %v13004_v50 = vrot.slane %v19530_v45, 5  ;;  %v13040_v54 = vsel %vm7175_vm6, %v13039_v14, %v13001_v34  ;;  %v13263_v32 = vrot.slane %v19530_v45, 6  ;;  %v13289_v16 = vsel %vm7175_vm6, %v13288_v43, %v13261_v0 }
 0x466   : > { %v13492_v14 = vrot.slane %v19491_v59, 2  ;;  %v13010_v0 = vrot.slane %v19554_v3, 3  ;;  %v13496_v5 = vrot.slane %v19530_v45, 7 }
 0x467   : > { %v13041_v63 = vsel %vm213_vm2, %v13040_v54, %v13004_v50  ;;  %v19577_v50 = vpop.eup %14823  ;;  %v13290_v59 = vsel %vm213_vm2, %v13289_v16, %v13263_v32  ;;  %v13147_v54 = vadd.f32 1.0, %v14820_v15  ;;  %v13267_v32 = vrot.slane %v19554_v3, 4 }
 0x468   : > { %v13042_v51 = vsel %vm7178_vm8, %v13041_v63, %v13007_v28  ;;  %v14826_v43 = vpop.eup %14825  ;;  %v13520_v7 = vsel %vm7173_vm5, %v13492_v14, %v13494_v30  ;;  %v13291_v33 = vsel %vm7178_vm8, %v13290_v59, %v13265_v29  ;;  %v13117_v30 = vadd.f32 %v19381_v57, %v12996_v52 }
 0x469   : > { %v14828_v40 = vpop.eup %14827  ;;  %v13043_v16 = vsel %vm7180_vm9, %v13042_v51, %v13010_v0  ;;  %v13385_v15 = vadd.f32 1.0, %v14826_v43  ;;  %v13521_v24 = vsel %vm7175_vm6, %v13520_v7, %v19515_v38  ;;  %v13257_v0 = vsel %vm7184_vm11, %v13256_v39, %v13242_v8 }
 0x46a   : > { %v14830_v14 = vpop.eup %14829  ;;  %v13292_v61 = vsel %vm7180_vm9, %v13291_v33, %v13267_v32  ;;  %14837 = vrcp.f32 %v13147_v54  ;;  %v13615_v55 = vadd.f32 1.0, %v14828_v40  ;;  %v13491_v59 = vsel %vm7184_vm11, %v13490_v35, %v13476_v46 }
 0x46b   : > { %v13498_v38 = vrot.slane %v19537_v23, 6  ;;  %14839 = vrcp.f32 %v13385_v15  ;;  %v13148_v43 = vadd.f32 1.0, %v14830_v14  ;;  %v13522_v56 = vsel %vm213_vm2, %v13521_v24, %v13496_v5 }
 0x46c   : > { %v13355_v52 = vadd.f32 %v19388_v2, %v13257_v0  ;;  %v14637_v23 = vmul.f32 -1.442695, %v13117_v30  ;;  %v13585_v39 = vadd.f32 %v19398_v18, %v13491_v59  ;;  %v13500_v46 = vrot.slane %v19554_v3, 5 }
 0x46d   : > { %14841 = vrcp.f32 %v13615_v55 }
 0x46e   : > { %14843 = vrcp.f32 %v13148_v43  ;;  %v14645_v24 = vmul.f32 -1.442695, %v13355_v52 }
 0x46f   : > { %14845 = vpow2.f32 %v14637_v23 }
 0x470   : > { %14847 = vpow2.f32 %v14645_v24 }
 0x471   : > { %v19565_v44 = vpop.f32.mrf.mxu1 }
 0x472   : > { %v13506_v55 = vrot.slane %v19565_v44, 2 }
 0x473   : > { %v19563_v34 = vpop.f32.mrf.mxu0  ;;  %v19587_v37 = vpop.f32.mrf.mxu1 }
 0x474   : > { %v13013_v28 = vrot.slane %v19563_v34, 2  ;;  %v13269_v36 = vrot.slane %v19563_v34, 3  ;;  %v13019_v45 = vrot.slane %v19587_v37, 7  ;;  %v13502_v3 = vrot.slane %v19563_v34, 4 }
 0x475   : > { %v19585_v26 = vpop.f32.mrf.mxu0  ;;  %v13508_v59 = vrot.slane %v19587_v37, 1 }
 0x476   : > { %v13016_v12 = vrot.slane %v19585_v26, 1  ;;  %v13044_v42 = vsel %vm7182_vm10, %v13043_v16, %v13013_v28  ;;  %v13271_v8 = vrot.slane %v19585_v26, 2  ;;  %v13293_v7 = vsel %vm7182_vm10, %v13292_v61, %v13269_v36  ;;  %v14832_v28 = vpop.eup %14831 }
 0x477   : > { %v13046_v33 = vsel %vm7173_vm5, %v19565_v44, %v13019_v45  ;;  %v13523_v16 = vsel %vm7178_vm8, %v13522_v56, %v13498_v38  ;;  %v13274_v36 = vrot.slane %v19565_v44, 1  ;;  %v14834_v0 = vpop.eup %14833  ;;  %v14653_v61 = vmul.f32 -1.442695, %v13585_v39 }
 0x478   : > { %v13045_v32 = vsel %vm7184_vm11, %v13044_v42, %v13016_v12  ;;  %v13294_v14 = vsel %vm7184_vm11, %v13293_v7, %v13271_v8  ;;  %v13524_v42 = vsel %vm7180_vm9, %v13523_v16, %v13500_v46  ;;  %v13504_v8 = vrot.slane %v19585_v26, 3 }
 0x479   : > { %v13118_v5 = vadd.f32 %v19381_v57, %v13045_v32  ;;  %v13356_v45 = vadd.f32 %v19388_v2, %v13294_v14  ;;  %v19650_v32 = vpop.eup %14835  ;;  %v13525_v44 = vsel %vm7182_vm10, %v13524_v42, %v13502_v3  ;;  %v13295_v23 = vsel %vm7173_vm5, %v13274_v36, %v19587_v37 }
 0x47a   : > { %v19655_v46 = vadd.f32 1.0, %v14834_v0  ;;  %14849 = vpow2.f32 %v14653_v61  ;;  %v13526_v24 = vsel %vm7184_vm11, %v13525_v44, %v13504_v8 }
 0x47b   : > { %v14638_v56 = vmul.f32 -1.442695, %v13118_v5  ;;  %v14646_v16 = vmul.f32 -1.442695, %v13356_v45  ;;  %v13527_v5 = vsel %vm7173_vm5, %v13506_v55, %v13508_v59 }
 0x47d   : > { %14851 = vpow2.f32 %v14638_v56 }
 0x47e   : > { %14853 = vpow2.f32 %v14646_v16 }
 0x482   : > { %v19607_v29 = vpop.f32.mrf.mxu1 }
 0x483   : > { %v13028_v38 = vrot.slane %v19607_v29, 4 }
 0x484   : > { %v19597_v63 = vpop.f32.mrf.mxu0  ;;  %v19623_v54 = vpop.f32.mrf.mxu1 }
 0x485   : > { %v13022_v40 = vrot.slane %v19597_v63, 6  ;;  %v13276_v52 = vrot.slane %v19597_v63, 7  ;;  %v13528_v8 = vsel %vm7175_vm6, %v13527_v5, %v19597_v63  ;;  %v13514_v62 = vrot.slane %v19623_v54, 5 }
 0x486   : > { %v19615_v51 = vpop.f32.mrf.mxu0 }
 0x487   : > { %v13025_v30 = vrot.slane %v19615_v51, 5  ;;  %v13047_v12 = vsel %vm7175_vm6, %v13046_v33, %v13022_v40  ;;  %v13386_v40 = vadd.f32 1.0, %v14832_v28  ;;  %v13031_v33 = vrot.slane %v19623_v54, 3 }
 0x488   : > { %v13296_v37 = vsel %vm7175_vm6, %v13295_v23, %v13276_v52  ;;  %v13278_v3 = vrot.slane %v19615_v51, 6  ;;  %v13510_v55 = vrot.slane %v19615_v51, 7  ;;  %v13280_v52 = vrot.slane %v19607_v29, 5 }
 0x489   : > { %v13048_v7 = vsel %vm213_vm2, %v13047_v12, %v13025_v30  ;;  %v19661_v30 = vpop.eup %14837  ;;  %v13512_v51 = vrot.slane %v19607_v29, 6  ;;  %14855 = vrcp.f32 %v13386_v40 }
 0x48a   : > { %v13049_v14 = vsel %vm7178_vm8, %v13048_v7, %v13028_v38  ;;  %v19666_v36 = vpop.eup %14839  ;;  %v13297_v10 = vsel %vm213_vm2, %v13296_v37, %v13278_v3  ;;  %v13282_v37 = vrot.slane %v19623_v54, 4  ;;  %14857 = vrcp.f32 %v19655_v46 }
 0x48b   : > { %v13050_v59 = vsel %vm7180_vm9, %v13049_v14, %v13031_v33  ;;  %v19678_v23 = vpop.eup %14841  ;;  %v13298_v6 = vsel %vm7178_vm8, %v13297_v10, %v13280_v52 }
 0x48c   : > { %v13299_v54 = vsel %vm7180_vm9, %v13298_v6, %v13282_v37 }
 0x493   : > { %v19632_v35 = vpop.f32.mrf.mxu1 }
 0x494   : > { %v13303_v28 = vrot.slane %v19632_v35, 1  ;;  %v13534_v0 = vrot.slane %v19632_v35, 2 }
 0x495   : > { %v19630_v15 = vpop.f32.mrf.mxu0  ;;  %v12385_v34 = vpop.f32.mrf.mxu1 }
 0x496   : > { %v13054_v26 = vrot.slane %v12385_v34, 7  ;;  %v13034_v12 = vrot.slane %v19630_v15, 2  ;;  %v13536_v61 = vrot.slane %v12385_v34, 1  ;;  %v13332_v7 = vsel %vm7173_vm5, %v13303_v28, %v12385_v34 }
 0x497   : > { %v19645_v43 = vpop.f32.mrf.mxu0  ;;  %v13586_v34 = vadd.f32 %v19398_v18, %v13526_v24  ;;  %v13529_v28 = vsel %vm213_vm2, %v13528_v8, %v13510_v55 }
 0x498   : > { %v13095_v38 = vsel %vm7173_vm5, %v19632_v35, %v13054_v26  ;;  %v13037_v33 = vrot.slane %v19645_v43, 1  ;;  %v19683_v35 = vpop.eup %14843  ;;  %v13051_v26 = vsel %vm7182_vm10, %v13050_v59, %v13034_v12  ;;  %v13562_v16 = vsel %vm7173_vm5, %v13534_v0, %v13536_v61 }
 0x499   : > { %v14846_v3 = vpop.eup %14845  ;;  %v13530_v55 = vsel %vm7178_vm8, %v13529_v28, %v13512_v51 }
 0x49a   : > { %v14848_v8 = vpop.eup %14847 }
 0x4a4   : > { %v12525_v44 = vpop.f32.mrf.mxu1 }
 0x4a5   : > { %v13063_v12 = vrot.slane %v12525_v44, 4  ;;  %v13309_v61 = vrot.slane %v12525_v44, 5  ;;  %v13540_v52 = vrot.slane %v12525_v44, 6 }
 0x4a6   : > { %v12454_v39 = vpop.f32.mrf.mxu0  ;;  %v12527_v59 = vpop.f32.mrf.mxu1 }
 0x4a7   : > { %v13057_v42 = vrot.slane %v12454_v39, 6  ;;  %v13305_v56 = vrot.slane %v12454_v39, 7  ;;  %v13563_v0 = vsel %vm7175_vm6, %v13562_v16, %v12454_v39  ;;  %v13311_v51 = vrot.slane %v12527_v59, 4 }
 0x4a8   : > { %v12456_v45 = vpop.f32.mrf.mxu0  ;;  %v13531_v16 = vsel %vm7180_vm9, %v13530_v55, %v13514_v62  ;;  %v13542_v44 = vrot.slane %v12527_v59, 5 }
 0x4a9   : > { %v13060_v14 = vrot.slane %v12456_v45, 5  ;;  %v13096_v63 = vsel %vm7175_vm6, %v13095_v38, %v13057_v42  ;;  %v13307_v5 = vrot.slane %v12456_v45, 6  ;;  %v13333_v29 = vsel %vm7175_vm6, %v13332_v7, %v13305_v56 }
 0x4aa   : > { %v13538_v13 = vrot.slane %v12456_v45, 7  ;;  %v13052_v42 = vsel %vm7184_vm11, %v13051_v26, %v13037_v33  ;;  %v13284_v38 = vrot.slane %v19630_v15, 3  ;;  %v13516_v45 = vrot.slane %v19630_v15, 4  ;;  %v14850_v33 = vpop.eup %14849 }
 0x4ab   : > { %v13097_v24 = vsel %vm213_vm2, %v13096_v63, %v13060_v14  ;;  %v13334_v56 = vsel %vm213_vm2, %v13333_v29, %v13307_v5  ;;  %v13066_v7 = vrot.slane %v12527_v59, 3  ;;  %v13119_v39 = vadd.f32 %v19381_v57, %v13052_v42  ;;  %v14852_v28 = vpop.eup %14851 }
 0x4ac   : > { %v13564_v14 = vsel %vm213_vm2, %v13563_v0, %v13538_v13  ;;  %v13098_v40 = vsel %vm7178_vm8, %v13097_v24, %v13063_v12  ;;  %v13149_v26 = vadd.f32 1.0, %v14846_v3  ;;  %v14654_v63 = vmul.f32 -1.442695, %v13586_v34 }
 0x4ad   : > { %v13335_v5 = vsel %vm7178_vm8, %v13334_v56, %v13309_v61  ;;  %v13300_v6 = vsel %vm7182_vm10, %v13299_v54, %v13284_v38  ;;  %v13286_v15 = vrot.slane %v19645_v43, 2  ;;  %v13518_v42 = vrot.slane %v19645_v43, 3  ;;  %v14854_v61 = vpop.eup %14853 }
 0x4ae   : > { %v13565_v13 = vsel %vm7178_vm8, %v13564_v14, %v13540_v52  ;;  %v13099_v12 = vsel %vm7180_vm9, %v13098_v40, %v13066_v7  ;;  %v13532_v62 = vsel %vm7182_vm10, %v13531_v16, %v13516_v45  ;;  %v14639_v34 = vmul.f32 -1.442695, %v13119_v39 }
 0x4af   : > { %v13336_v0 = vsel %vm7180_vm9, %v13335_v5, %v13311_v51  ;;  %14859 = vrcp.f32 %v13149_v26  ;;  %v13301_v38 = vsel %vm7184_vm11, %v13300_v6, %v13286_v15  ;;  %v13566_v43 = vsel %vm7180_vm9, %v13565_v13, %v13542_v44  ;;  %v19725_v15 = vpop.eup %14855 }
 0x4b0   : > { %v13387_v52 = vadd.f32 1.0, %v14848_v8  ;;  %14861 = vpow2.f32 %v14654_v63  ;;  %v13533_v46 = vsel %vm7184_vm11, %v13532_v62, %v13518_v42  ;;  %v13617_v7 = vadd.f32 1.0, %v14850_v33 }
 0x4b1   : > { %14863 = vpow2.f32 %v14639_v34  ;;  %v13357_v51 = vadd.f32 %v19388_v2, %v13301_v38  ;;  %v13388_v5 = vadd.f32 1.0, %v14854_v61  ;;  %v13587_v8 = vadd.f32 %v19398_v18, %v13533_v46 }
 0x4b2   : > { %14865 = vrcp.f32 %v13387_v52 }
 0x4b3   : > { %14867 = vrcp.f32 %v13617_v7  ;;  %v14655_v34 = vmul.f32 -1.442695, %v13587_v8 }
 0x4b5   : > { %v12667_v24 = vpop.f32.mrf.mxu1 }
 0x4b6   : > { %v13318_v6 = vrot.slane %v12667_v24, 1  ;;  %v13548_v33 = vrot.slane %v12667_v24, 2 }
 0x4b7   : > { %v12596_v10 = vpop.f32.mrf.mxu0  ;;  %v12669_v14 = vpop.f32.mrf.mxu1 }
 0x4b8   : > { %v13069_v37 = vrot.slane %v12596_v10, 2  ;;  %v13313_v3 = vrot.slane %v12596_v10, 3  ;;  %v13544_v59 = vrot.slane %v12596_v10, 4  ;;  %v13150_v10 = vadd.f32 1.0, %v14852_v28 }
 0x4b9   : > { %v12598_v29 = vpop.f32.mrf.mxu0  ;;  %v13075_v44 = vrot.slane %v12669_v14, 7 }
 0x4ba   : > { %v13072_v55 = vrot.slane %v12598_v29, 1  ;;  %v13100_v56 = vsel %vm7182_vm10, %v13099_v12, %v13069_v37  ;;  %v13315_v54 = vrot.slane %v12598_v29, 2  ;;  %v13337_v45 = vsel %vm7182_vm10, %v13336_v0, %v13313_v3 }
 0x4bb   : > { %v13546_v39 = vrot.slane %v12598_v29, 3  ;;  %v13567_v26 = vsel %vm7182_vm10, %v13566_v43, %v13544_v59  ;;  %v13550_v37 = vrot.slane %v12669_v14, 1  ;;  %14869 = vrcp.f32 %v13150_v10 }
 0x4bc   : > { %v13101_v16 = vsel %vm7184_vm11, %v13100_v56, %v13072_v55  ;;  %v13338_v63 = vsel %vm7184_vm11, %v13337_v45, %v13315_v54  ;;  %v14647_v12 = vmul.f32 -1.442695, %v13357_v51  ;;  %14871 = vrcp.f32 %v13388_v5  ;;  %v19735_v45 = vpop.eup %14857 }
 0x4bd   : > { %v13120_v28 = vadd.f32 %v19381_v57, %v13101_v16  ;;  %v13568_v29 = vsel %vm7184_vm11, %v13567_v26, %v13546_v39  ;;  %v13358_v3 = vadd.f32 %v19388_v2, %v13338_v63  ;;  %v13339_v0 = vsel %vm7173_vm5, %v13318_v6, %v12669_v14  ;;  %v19738_v14 = vpop.eup %14859 }
 0x4be   : > { %v13588_v59 = vadd.f32 %v19398_v18, %v13568_v29  ;;  %v13102_v55 = vsel %vm7173_vm5, %v12667_v24, %v13075_v44  ;;  %v13569_v38 = vsel %vm7173_vm5, %v13548_v33, %v13550_v37  ;;  %14873 = vpow2.f32 %v14647_v12  ;;  %v14862_v8 = vpop.eup %14861 }
 0x4bf   : > { %v14640_v56 = vmul.f32 -1.442695, %v13120_v28  ;;  %v14648_v7 = vmul.f32 -1.442695, %v13358_v3  ;;  %14875 = vpow2.f32 %v14655_v34  ;;  %v14864_v37 = vpop.eup %14863 }
 0x4c0   : > { %v14656_v63 = vmul.f32 -1.442695, %v13588_v59  ;;  %v13151_v59 = vadd.f32 1.0, %v14864_v37 }
 0x4c1   : > { %14877 = vpow2.f32 %v14640_v56 }
 0x4c2   : > { %14879 = vpow2.f32 %v14648_v7 }
 0x4c8   : > { %v12809_v61 = vpop.f32.mrf.mxu1 }
 0x4c9   : > { %v12738_v40 = vpop.f32.mrf.mxu0  ;;  %v13084_v10 = vrot.slane %v12809_v61, 4  ;;  %v13324_v16 = vrot.slane %v12809_v61, 5  ;;  %v13554_v5 = vrot.slane %v12809_v61, 6  ;;  %v13618_v61 = vadd.f32 1.0, %v14862_v8 }
 0x4ca   : > { %v13078_v42 = vrot.slane %v12738_v40, 6  ;;  %v13320_v62 = vrot.slane %v12738_v40, 7  ;;  %v12811_v51 = vpop.f32.mrf.mxu1  ;;  %v13570_v24 = vsel %vm7175_vm6, %v13569_v38, %v12738_v40 }
 0x4cb   : > { %v12740_v13 = vpop.f32.mrf.mxu0  ;;  %v13556_v40 = vrot.slane %v12811_v51, 5 }
 0x4cc   : > { %v13081_v43 = vrot.slane %v12740_v13, 5  ;;  %v13103_v54 = vsel %vm7175_vm6, %v13102_v55, %v13078_v42  ;;  %v13322_v52 = vrot.slane %v12740_v13, 6  ;;  %v13552_v46 = vrot.slane %v12740_v13, 7 }
 0x4cd   : > { %v13340_v39 = vsel %vm7175_vm6, %v13339_v0, %v13320_v62  ;;  %v13087_v42 = vrot.slane %v12811_v51, 3  ;;  %v13326_v13 = vrot.slane %v12811_v51, 4  ;;  %v19747_v0 = vpop.eup %14865 }
 0x4ce   : > { %v13104_v26 = vsel %vm213_vm2, %v13103_v54, %v13081_v43  ;;  %v13341_v6 = vsel %vm213_vm2, %v13340_v39, %v13322_v52  ;;  %v13571_v33 = vsel %vm213_vm2, %v13570_v24, %v13552_v46  ;;  %v19749_v43 = vpop.eup %14867 }
 0x4cf   : > { %v13105_v29 = vsel %vm7178_vm8, %v13104_v26, %v13084_v10  ;;  %v13342_v3 = vsel %vm7178_vm8, %v13341_v6, %v13324_v16  ;;  %v13572_v62 = vsel %vm7178_vm8, %v13571_v33, %v13554_v5  ;;  %v19751_v46 = vpop.eup %14869 }
 0x4d0   : > { %v13106_v7 = vsel %vm7180_vm9, %v13105_v29, %v13087_v42  ;;  %v13343_v39 = vsel %vm7180_vm9, %v13342_v3, %v13326_v13  ;;  %v13573_v10 = vsel %vm7180_vm9, %v13572_v62, %v13556_v40  ;;  %v19756_v16 = vpop.eup %14871 }
 0x4d1   : > { %v14874_v13 = vpop.eup %14873 }
 0x4d8   : > { %v14723_v44 = vpop.f32.mrf.mxu1 }
 0x4d9   : > { %v13899_v28 = vmul.f32 1.442695, %v14723_v44 }
 0x4da   : > { %v13858_v12 = vpop.f32.mrf.mxu1 }
 0x4db   : > { %14881 = vpow2.f32 %v13899_v28  ;;  %v13897_v34 = vmul.f32 1.442695, %v13858_v12 }
 0x4dc   : > { %14883 = vpow2.f32 %v14656_v63  ;;  %v12880_v55 = vpop.f32.mrf.mxu0  ;;  %v14726_v38 = vpop.f32.mrf.mxu1 }
 0x4dd   : > { %v13090_v56 = vrot.slane %v12880_v55, 2  ;;  %v13328_v54 = vrot.slane %v12880_v55, 3  ;;  %v13558_v52 = vrot.slane %v12880_v55, 4  ;;  %14885 = vpow2.f32 %v13897_v34  ;;  %v14876_v34 = vpop.eup %14875 }
 0x4de   : > { %v12882_v51 = vpop.f32.mrf.mxu0  ;;  %v13903_v24 = vmul.f32 1.442695, %v14726_v38  ;;  %v13868_v26 = vpop.f32.mrf.mxu1 }
 0x4df   : > { %v13107_v5 = vsel %vm7182_vm10, %v13106_v7, %v13090_v56  ;;  %v13344_v8 = vsel %vm7182_vm10, %v13343_v39, %v13328_v54  ;;  %v13574_v63 = vsel %vm7182_vm10, %v13573_v10, %v13558_v52  ;;  %v13093_v6 = vrot.slane %v12882_v51, 1  ;;  %v14878_v7 = vpop.eup %14877 }
 0x4e0   : > { %v13330_v33 = vrot.slane %v12882_v51, 2  ;;  %v13560_v44 = vrot.slane %v12882_v51, 3  ;;  %14887 = vpow2.f32 %v13903_v24  ;;  %v13901_v37 = vmul.f32 1.442695, %v13868_v26  ;;  %v14729_v28 = vpop.f32.mrf.mxu1  ;;  %v14880_v51 = vpop.eup %14879 }
 0x4e1   : > { %14889 = vrcp.f32 %v13618_v61  ;;  %v13108_v29 = vsel %vm7184_vm11, %v13107_v5, %v13093_v6  ;;  %v13907_v42 = vmul.f32 1.442695, %v14729_v28  ;;  %v13928_v61 = vcvt.s32.f32 %v19039_v47 }
 0x4e2   : > { %v13121_v40 = vadd.f32 %v19381_v57, %v13108_v29  ;;  %v13345_v12 = vsel %vm7184_vm11, %v13344_v8, %v13330_v33  ;;  %v13575_v3 = vsel %vm7184_vm11, %v13574_v63, %v13560_v44  ;;  %14891 = vpow2.f32 %v13901_v37  ;;  %v13878_v62 = vpop.f32.mrf.mxu1 }
 0x4e3   : > { %14893 = vrcp.f32 %v13151_v59  ;;  %v13359_v55 = vadd.f32 %v19388_v2, %v13345_v12  ;;  %v13589_v38 = vadd.f32 %v19398_v18, %v13575_v3  ;;  %v13905_v56 = vmul.f32 1.442695, %v13878_v62 }
 0x4e4   : > { %v14641_v54 = vmul.f32 -1.442695, %v13121_v40  ;;  %14895 = vpow2.f32 %v13907_v42  ;;  %v14732_v52 = vpop.f32.mrf.mxu1  ;;  %v13922_v24 = vcvt.s32.f32 %v19299_v21  ;;  %v13923_v59 = vcvt.s32.f32 %v19303_v60 }
 0x4e5   : > { %v14649_v57 = vmul.f32 -1.442695, %v13359_v55  ;;  %v14657_v39 = vmul.f32 -1.442695, %v13589_v38  ;;  %14897 = vpow2.f32 %v13905_v56  ;;  %v13911_v10 = vmul.f32 1.442695, %v14732_v52 }
 0x4e6   : > { %v13921_v2 = vcvt.s32.f32 %v19895_v4  ;;  %14899 = vpow2.f32 %v14641_v54  ;;  %v13888_v18 = vpop.f32.mrf.mxu1  ;;  %v13924_v26 = vcvt.s32.f32 %v19312_v11  ;;  %v13389_v47 = vadd.f32 1.0, %v14874_v13 }
 0x4e7   : > { %14901 = vpow2.f32 %v14649_v57  ;;  %v13909_v5 = vmul.f32 1.442695, %v13888_v18  ;;  %v13925_v63 = vcvt.s32.f32 %v19319_v1  ;;  %v13619_v6 = vadd.f32 1.0, %v14876_v34 }
 0x4e8   : > { %v14882_v8 = vpop.eup %14881  ;;  %14903 = vpow2.f32 %v14657_v39  ;;  %v13926_v44 = vcvt.s32.f32 %v19333_v53  ;;  %v13927_v21 = vcvt.s32.f32 %v19338_v41  ;;  %v13152_v60 = vadd.f32 1.0, %v14878_v7 }
 0x4e9   : > { %v14884_v33 = vpop.eup %14883  ;;  %14905 = vpow2.f32 %v13911_v10  ;;  %v13930_v37 = vmul.f32 0.015873017, %v13922_v24  ;;  %v13914_v11 = vmul.f32 %v14882_v8, %v13704_v31  ;;  %v13929_v28 = vmul.f32 0.015873017, %v13921_v2 }
 0x4ea   : > { %v14886_v4 = vpop.eup %14885  ;;  %14907 = vpow2.f32 %v13909_v5  ;;  %v19777_v29 = vmul.f32 0.015873017, %v13928_v61  ;;  %v13931_v42 = vmul.f32 0.015873017, %v13923_v59  ;;  %v13932_v1 = vmul.f32 0.015873017, %v13924_v26 }
 0x4eb   : > { %14909 = vrcp.f32 %v13389_v47  ;;  %v13933_v13 = vmul.f32 0.015873017, %v13925_v63  ;;  %v13390_v40 = vadd.f32 1.0, %v14880_v51  ;;  %v13913_v53 = vmul.f32 %v14886_v4, %v13703_v49 }
 0x4ec   : > { %14911 = vrcp.f32 %v13619_v6  ;;  %v13934_v12 = vmul.f32 0.015873017, %v13926_v44  ;;  %v19781_v3 = vmul.f32 0.015873017, %v13927_v21  ;;  %v13620_v25 = vadd.f32 1.0, %v14884_v33 }
 0x4ed   : > { %v14888_v41 = vpop.eup %14887  ;;  %14913 = vrcp.f32 %v13152_v60  ;;  %v13951_v62 = vmul.f32 %v13930_v37, %v13914_v11  ;;  %v13950_v34 = vmul.f32 %v13929_v28, %v13913_v53  ;;  %v13972_v55 = vmul.f32 %v19571_v48, %v13913_v53 }
 0x4ee   : > { %v14890_v31 = vpop.eup %14889  ;;  %v13994_v38 = vmul.f32 %v19577_v50, %v13913_v53  ;;  %v13973_v61 = vmul.f32 %v19661_v30, %v13914_v11  ;;  %v13995_v54 = vmul.f32 %v19666_v36, %v13914_v11  ;;  %v14016_v27 = vmul.f32 %v19650_v32, %v13913_v53 }
 0x4ef   : > { %v14892_v56 = vpop.eup %14891  ;;  %v19904_v49 = vsub.f32 1.0, %v19218_v17  ;;  %14915 = vrcp.f32 %v13390_v40  ;;  %v14017_v57 = vmul.f32 %v19678_v23, %v13914_v11  ;;  %v13937_v39 = vadd.f32 %v13914_v11, %v13913_v53 }
 0x4f0   : > { %v19790_v7 = vpop.eup %14893  ;;  %v19905_v48 = vsub.f32 1.0, %v19169_v19  ;;  %14917 = vrcp.f32 %v13620_v25  ;;  %v13958_v51 = vadd.f32 %v13951_v62, %v13950_v34  ;;  %v13980_v30 = vadd.f32 %v13973_v61, %v13972_v55 }
 0x4f1   : > { %v13916_v52 = vmul.f32 %v14888_v41, %v19904_v49  ;;  %v14896_v50 = vpop.eup %14895  ;;  %v14002_v24 = vadd.f32 %v13995_v54, %v13994_v38  ;;  %v14024_v59 = vadd.f32 %v14017_v57, %v14016_v27  ;;  %v19906_v19 = vsub.f32 1.0, %v19198_v22 }
 0x4f2   : > { %v13915_v10 = vmul.f32 %v14892_v56, %v19905_v48  ;;  %v14898_v36 = vpop.eup %14897  ;;  %v19908_v27 = vsub.f32 1.0, %v19176_v58 }
 0x4f3   : > { %v14900_v18 = vpop.eup %14899  ;;  %v13953_v26 = vmul.f32 %v13932_v1, %v13916_v52  ;;  %v13917_v5 = vmul.f32 %v14898_v36, %v19906_v19  ;;  %v13975_v4 = vmul.f32 %v19738_v14, %v13916_v52  ;;  %v14019_v1 = vmul.f32 %v19749_v43, %v13916_v52 }
 0x4f4   : > { %v13938_v32 = vadd.f32 %v13937_v39, %v13915_v10  ;;  %v13952_v2 = vmul.f32 %v13931_v42, %v13915_v10  ;;  %v13974_v17 = vmul.f32 %v19683_v35, %v13915_v10  ;;  %v13996_v47 = vmul.f32 %v19725_v15, %v13915_v10  ;;  %v14902_v8 = vpop.eup %14901 }
 0x4f5   : > { %v14018_v23 = vmul.f32 %v19735_v45, %v13915_v10  ;;  %v13153_v63 = vadd.f32 1.0, %v14900_v18  ;;  %v14904_v21 = vpop.eup %14903  ;;  %v13391_v60 = vadd.f32 1.0, %v14902_v8  ;;  %v19907_v35 = vsub.f32 1.0, %v19172_v9 }
 0x4f6   : > { %v13959_v6 = vadd.f32 %v13958_v51, %v13952_v2  ;;  %v13981_v33 = vadd.f32 %v13980_v30, %v13974_v17  ;;  %v13939_v44 = vadd.f32 %v13938_v32, %v13916_v52  ;;  %v14003_v37 = vadd.f32 %v14002_v24, %v13996_v47  ;;  %v14906_v28 = vpop.eup %14905 }
 0x4f7   : > { %v13918_v11 = vmul.f32 %v14896_v50, %v19907_v35  ;;  %14919 = vrcp.f32 %v13153_v63  ;;  %v13621_v15 = vadd.f32 1.0, %v14904_v21  ;;  %v13997_v45 = vmul.f32 %v19747_v0, %v13916_v52  ;;  %v14908_v42 = vpop.eup %14907 }
 0x4f8   : > { %v14025_v22 = vadd.f32 %v14024_v59, %v14018_v23  ;;  %14921 = vrcp.f32 %v13391_v60  ;;  %v13940_v40 = vadd.f32 %v13939_v44, %v13917_v5  ;;  %v13954_v53 = vmul.f32 %v13933_v13, %v13917_v5  ;;  %v14910_v41 = vpop.eup %14909 }
 0x4f9   : > { %14923 = vrcp.f32 %v13621_v15  ;;  %v13960_v25 = vadd.f32 %v13959_v6, %v13953_v26  ;;  %v13976_v14 = vmul.f32 %v19751_v46, %v13917_v5  ;;  %v13982_v62 = vadd.f32 %v13981_v33, %v13975_v4  ;;  %v14912_v9 = vpop.eup %14911 }
 0x4fa   : > { %v13955_v34 = vmul.f32 %v13934_v12, %v13918_v11  ;;  %v13998_v55 = vmul.f32 %v19756_v16, %v13917_v5  ;;  %v14004_v38 = vadd.f32 %v14003_v37, %v13997_v45  ;;  %v14020_v56 = vmul.f32 %v14890_v31, %v13917_v5  ;;  %v14914_v0 = vpop.eup %14913 }
 0x4fb   : > { %v13961_v61 = vadd.f32 %v13960_v25, %v13954_v53  ;;  %v14026_v54 = vadd.f32 %v14025_v22, %v14019_v1  ;;  %v13920_v43 = vmul.f32 %v14906_v28, %v19908_v27  ;;  %v19909_v13 = vsub.f32 1.0, %v19179_v20 }
 0x4fc   : > { %v13941_v52 = vadd.f32 %v13940_v40, %v13918_v11  ;;  %v13983_v57 = vadd.f32 %v13982_v62, %v13976_v14  ;;  %v14916_v48 = vpop.eup %14915  ;;  %v14005_v12 = vadd.f32 %v14004_v38, %v13998_v55  ;;  %v13977_v31 = vmul.f32 %v19790_v7, %v13918_v11 }
 0x4fd   : > { %v13919_v49 = vmul.f32 %v14908_v42, %v19909_v13  ;;  %v13962_v39 = vadd.f32 %v13961_v61, %v13955_v34  ;;  %v14918_v16 = vpop.eup %14917  ;;  %v14027_v50 = vadd.f32 %v14026_v54, %v14020_v56  ;;  %v13957_v51 = vmul.f32 %v19777_v29, %v13920_v43 }
 0x4fe   : > { %v13999_v58 = vmul.f32 %v14910_v41, %v13918_v11  ;;  %v14021_v36 = vmul.f32 %v14912_v9, %v13918_v11  ;;  %v13984_v32 = vadd.f32 %v13983_v57, %v13977_v31 }
 0x4ff   : > { %v13956_v46 = vmul.f32 %v19781_v3, %v13919_v49  ;;  %v13942_v10 = vadd.f32 %v13941_v52, %v13919_v49  ;;  %v13978_v59 = vmul.f32 %v14914_v0, %v13919_v49  ;;  %v14000_v17 = vmul.f32 %v14916_v48, %v13919_v49 }
 0x500   : > { %v14006_v3 = vadd.f32 %v14005_v12, %v13999_v58  ;;  %v14022_v26 = vmul.f32 %v14918_v16, %v13919_v49  ;;  %v14028_v47 = vadd.f32 %v14027_v50, %v14021_v36 }
 0x501   : > { %v13963_v30 = vadd.f32 %v13962_v39, %v13956_v46  ;;  %v13943_v24 = vadd.f32 %v13942_v10, %v13920_v43  ;;  %v13985_v63 = vadd.f32 %v13984_v32, %v13978_v59 }
 0x502   : > { %v14007_v44 = vadd.f32 %v14006_v3, %v14000_v17  ;;  %v14029_v37 = vadd.f32 %v14028_v47, %v14022_v26 }
 0x503   : > { %v13964_v20 = vadd.f32 %v13963_v30, %v13957_v51  ;;  %v13944_v2 = vrot.slane %v13943_v24, 4 }
 0x504   : > { %v14920_v23 = vpop.eup %14919 }
 0x505   : > { %v13965_v18 = vrot.slane %v13964_v20, 4  ;;  %v13945_v19 = vadd.f32 %v13944_v2, %v13943_v24  ;;  %v14922_v5 = vpop.eup %14921  ;;  %v13979_v7 = vmul.f32 %v14920_v23, %v13920_v43 }
 0x506   : > { %v14924_v29 = vpop.eup %14923  ;;  %v14001_v6 = vmul.f32 %v14922_v5, %v13920_v43 }
 0x507   : > { %v13966_v8 = vadd.f32 %v13965_v18, %v13964_v20  ;;  %v13946_v33 = vrot.slane %v13945_v19, 2  ;;  %v14023_v21 = vmul.f32 %v14924_v29, %v13920_v43  ;;  %v13986_v4 = vadd.f32 %v13985_v63, %v13979_v7 }
 0x508   : > { %v14008_v11 = vadd.f32 %v14007_v44, %v14001_v6 }
 0x509   : > { %v13967_v60 = vrot.slane %v13966_v8, 2  ;;  %v13947_v35 = vadd.f32 %v13946_v33, %v13945_v19  ;;  %v13987_v28 = vrot.slane %v13986_v4, 4  ;;  %v14030_v15 = vadd.f32 %v14029_v37, %v14023_v21 }
 0x50a   : > { %v14009_v22 = vrot.slane %v14008_v11, 4 }
 0x50b   : > { %v13968_v45 = vadd.f32 %v13967_v60, %v13966_v8  ;;  %v13948_v42 = vrot.slane %v13947_v35, 1  ;;  %v13988_v1 = vadd.f32 %v13987_v28, %v13986_v4  ;;  %v14031_v40 = vrot.slane %v14030_v15, 4 }
 0x50c   : > { %v14010_v53 = vadd.f32 %v14009_v22, %v14008_v11 }
 0x50d   : > { %v13989_v41 = vrot.slane %v13988_v1, 2  ;;  %v14032_v25 = vadd.f32 %v14031_v40, %v14030_v15  ;;  %v13969_v14 = vrot.slane %v13968_v45, 1  ;;  %v13949_v9 = vadd.f32 %v13948_v42, %v13947_v35 }
 0x50e   : > { %v14011_v62 = vrot.slane %v14010_v53, 2 }
 0x50f   : > { %v13990_v34 = vadd.f32 %v13989_v41, %v13988_v1  ;;  %v14033_v55 = vrot.slane %v14032_v25, 2  ;;  %v13970_v61 = vadd.f32 %v13969_v14, %v13968_v45  ;;  %v13971_v27 = vsub.f32 1.0, %v13949_v9 }
 0x510   : > { %v14012_v38 = vadd.f32 %v14011_v62, %v14010_v53 }
 0x511   : > { %v13991_v56 = vrot.slane %v13990_v34, 1  ;;  %v14034_v0 = vadd.f32 %v14033_v55, %v14032_v25  ;;  %v14038_v39 = vsel %vm7173_vm5, %v13970_v61, %v13949_v9 }
 0x512   : > { %v14013_v54 = vrot.slane %v14012_v38, 1 }
 0x513   : > { %v13992_v43 = vadd.f32 %v13991_v56, %v13990_v34  ;;  %v14035_v13 = vrot.slane %v14034_v0, 1 }
 0x514   : > { %v14014_v49 = vadd.f32 %v14013_v54, %v14012_v38 }
 0x515   : > { %v13993_v52 = vadd.f32 %v13992_v43, %v13971_v27  ;;  %v14036_v57 = vadd.f32 %v14035_v13, %v14034_v0 }
 0x516   : > { %v14015_v46 = vadd.f32 %v14014_v49, %v13971_v27 }
 0x517   : > { %v14037_v48 = vadd.f32 %v14036_v57, %v13971_v27  ;;  %v14039_v12 = vsel %vm7175_vm6, %v14038_v39, %v13993_v52 }
 0x518   : > { %v14040_v10 = vsel %vm213_vm2, %v14039_v12, %v14015_v46 }
 0x519   : > { %v14041_v16 = vsel %vm7178_vm8, %v14040_v10, %v14037_v48 }
 0x51a   : > { %v14042_v31 = vsel %vm7180_vm9, %v14041_v16, 0.0 }
 0x51b   : > { %14043 = vst [vmem:[%s182_s28] sm:$0xff] %v14042_v31 }
 0x51c PF: > { %s13_s12 = sadd.s32 1, %s14955_s12  }
 0x51d   : > { %p10_p4 = scmp.ge.s32.totalorder %s13_s12, 4  }
 0x51f   :  { %12 = sbr.rel (!%p10_p4) target bundleno = 1 (0x1), region = 65 }

</bundles_post_ra>
